<compile_context>
chip_gen: v5e
topology: v5e:2x2
jax: 0.10.0
libtpu: 0.0.40
codegen_flags: <defaults>
</compile_context>

<pallas_src>
import functools
import numpy as np
import jax
import jax.numpy as jnp
from jax.experimental import pallas as pl
from jax.experimental.pallas import tpu as pltpu


def _round_up(x, m):
    return ((x + m - 1) // m) * m


# ----------------------------------------------------------------------------
# Kernel 1: conv0 (block-diagonal) + conv1 fused, tiled over (b, hb, wb) rows
# ----------------------------------------------------------------------------
def _conv01_kernel(p0_ref, w0_ref, t0_ref, w1_ref, t1_ref, o_ref):
    # p0: (tm, 3072) bf16 rows=(b,hb,wb), cols=(kh,kw,ci,ph,pw)
    # w0: (3072, 256) bf16 block-diagonal (BN scale folded), t0: (1, 256) f32
    p1 = jnp.dot(p0_ref[...], w0_ref[...], preferred_element_type=jnp.float32)
    p1 = jnp.maximum(p1 + t0_ref[...], 0.0)                 # conv0 + BN + ReLU
    # p1 lanes are (kh, kw, c) == conv1's im2col columns: conv1 is just a second dot.
    h1 = jnp.dot(p1.astype(jnp.bfloat16), w1_ref[...],
                 preferred_element_type=jnp.float32)
    o_ref[...] = jnp.maximum(h1 + t1_ref[...], 0.0).astype(o_ref.dtype)


def conv01_forward(p0, w0bd, t0r, w1m, t1, *, tm):
    Mp, K0 = p0.shape
    N0 = w0bd.shape[1]
    N1 = w1m.shape[1]
    return pl.pallas_call(
        _conv01_kernel,
        out_shape=jax.ShapeDtypeStruct((Mp, N1), jnp.bfloat16),
        grid=(Mp // tm,),
        in_specs=[
            pl.BlockSpec((tm, K0), lambda i: (i, 0)),
            pl.BlockSpec((K0, N0), lambda i: (0, 0)),
            pl.BlockSpec((1, N0), lambda i: (0, 0)),
            pl.BlockSpec((N0, N1), lambda i: (0, 0)),
            pl.BlockSpec((1, N1), lambda i: (0, 0)),
        ],
        out_specs=pl.BlockSpec((tm, N1), lambda i: (i, 0)),
        compiler_params=pltpu.CompilerParams(dimension_semantics=("parallel",)),
    )(p0, w0bd, t0r, w1m, t1)


# ----------------------------------------------------------------------------
# Kernel 2: conv2 (dense im2col matmul) + all action_n heads, per batch chunk
# ----------------------------------------------------------------------------
def _conv2_heads_kernel(p2_ref, w2_ref, t2_ref, w1r_ref, b1_ref, wbd_ref, b2_ref, o_ref):
    bc = o_ref.shape[0]                 # batch-chunk rows (multiple of 8)
    P = w1r_ref.shape[0]                # 18 spatial positions

    # conv2 as one dense im2col matmul for this chunk; rows are (pos, b-within-chunk).
    h2 = jnp.dot(p2_ref[...], w2_ref[...], preferred_element_type=jnp.float32)
    h2 = jnp.maximum(h2 + t2_ref[...], 0.0).astype(jnp.bfloat16)       # (P*bc, 32)

    # Heads layer 1: accumulate sublane-aligned (bc,32)x(32,A*64) dots over positions.
    # Accumulator initialized from pos 0 (no zeros+add); bias applied once after the loop.
    acc = jnp.dot(h2[0:bc, :], w1r_ref[0], preferred_element_type=jnp.float32)
    for pos in range(1, P):
        acc = acc + jnp.dot(h2[pos * bc:(pos + 1) * bc, :], w1r_ref[pos],
                            preferred_element_type=jnp.float32)
    hid = jnp.maximum(acc + b1_ref[...], 0.0)                          # (bc, A*64)

    # Heads layer 2: block-diagonal (A*64, A*2) matmul; the module ReLUs this too.
    out = jnp.dot(hid.astype(jnp.bfloat16), wbd_ref[...],
                  preferred_element_type=jnp.float32)
    o_ref[...] = jnp.maximum(out + b2_ref[...], 0.0)


def conv2_heads_forward(p2, w2m, t2, w1r, b1h, wbd, b2h, *, bc, n_pos):
    R, K2 = p2.shape
    nch = R // (n_pos * bc)
    C2 = w2m.shape[1]
    AH = w1r.shape[2]
    A2 = wbd.shape[1]
    return pl.pallas_call(
        _conv2_heads_kernel,
        out_shape=jax.ShapeDtypeStruct((nch * bc, A2), jnp.float32),
        grid=(nch,),
        in_specs=[
            pl.BlockSpec((n_pos * bc, K2), lambda i: (i, 0)),
            pl.BlockSpec((K2, C2), lambda i: (0, 0)),
            pl.BlockSpec((1, C2), lambda i: (0, 0)),
            pl.BlockSpec((n_pos, C2, AH), lambda i: (0, 0, 0)),
            pl.BlockSpec((1, AH), lambda i: (0, 0)),
            pl.BlockSpec((AH, A2), lambda i: (0, 0)),
            pl.BlockSpec((1, A2), lambda i: (0, 0)),
        ],
        out_specs=pl.BlockSpec((bc, A2), lambda i: (i, 0)),
        compiler_params=pltpu.CompilerParams(dimension_semantics=("parallel",)),
    )(p2, w2m, t2, w1r, b1h, wbd, b2h)


# ----------------------------------------------------------------------------
# Forward pass (glue is tiny, bf16, and fuses under jit; matmuls run in the 2 kernels)
# ----------------------------------------------------------------------------
def dqn_forward_pallas(x_nchw, p):
    B, C0, H0, W0 = x_nchw.shape
    Ha, Wa = H0 // 8, W0 // 8                    # 28, 40 conv0 grid
    Hb, Wb = Ha // 4, Wa // 4                    # 7, 10  conv1 grid
    Hc, Wc = Hb - 4, Wb - 4                      # 3, 6   conv2 grid
    P = Hc * Wc                                  # 18
    M1 = B * Hb * Wb                             # conv1-row space

    # Glue A: 8x8 patchify straight from NCHW *in bf16*; rows = (b, hb, wb), columns =
    # (kh, kw, ci, ph, pw) so the block-diagonal conv0 weights apply and conv1's im2col
    # input is produced directly by the conv0 matmul.
    xb = x_nchw.astype(jnp.bfloat16)
    p0 = (xb.reshape(B, C0, Hb, 4, 8, Wb, 4, 8)
            .transpose(0, 2, 5, 3, 6, 1, 4, 7)
            .reshape(M1, 16 * C0 * 64))
    steps = max(2, pl.cdiv(M1, 512))             # >=2 steps: both v7x cores + pipelining
    tm = _round_up(pl.cdiv(M1, steps), 8)        # ~512-row tiles at larger batch
    Mp = tm * steps
    if Mp != M1:
        p0 = jnp.pad(p0, ((0, Mp - M1), (0, 0)))
    h1 = conv01_forward(p0, p["w0bd"], p["t0r"], p["w1m"], p["t1"], tm=tm)[:M1]

    # Glue B: conv2 5x5 im2col gather (tiny, bf16). Rows ordered (chunk, pos, b-in-chunk)
    # so the kernel's per-chunk block is contiguous and padded rows only ever map to
    # output rows that are sliced off below.
    BPtot = _round_up(B, 8)
    bc = 8
    nch = BPtot // bc
    h1g = h1.reshape(B, Hb, Wb, 32)
    taps = [h1g[:, di:di + Hc, dj:dj + Wc, :] for di in range(5) for dj in range(5)]
    p2 = (jnp.stack(taps, axis=3)                # (B, 3, 6, 25, 32) bf16
             .transpose(1, 2, 0, 3, 4)           # (3, 6, B, 25, 32)
             .reshape(P, B, 25 * 32))
    p2 = jnp.pad(p2, ((0, 0), (0, BPtot - B), (0, 0)))
    p2 = (p2.reshape(P, nch, bc, 25 * 32)
             .transpose(1, 0, 2, 3)
             .reshape(nch * P * bc, 25 * 32))

    out = conv2_heads_forward(p2, p["w2m"], p["t2"], p["w1r"], p["b1h"],
                              p["wbd"], p["b2h"], bc=bc, n_pos=P)[:B]   # (B, A*2)
    A = out.shape[1] // 2
    # torch.cat([head_a(x) for a], dim=0) ordering: row = a*B + b
    return out.reshape(B, A, 2).transpose(1, 0, 2).reshape(A * B, 2)


# ----------------------------------------------------------------------------
# Parameters: PyTorch-like init (original layouts) + kernel-layout preparation
# ----------------------------------------------------------------------------
def init_raw_params(key, action_n):
    def u(k, shape, fan_in):
        b = 1.0 / np.sqrt(fan_in)
        return jax.random.uniform(k, shape, jnp.float32, -b, b)

    ks = jax.random.split(key, 6 + 4 * action_n)
    raw = dict(
        w0=u(ks[0], (16, 3, 8, 8), 3 * 8 * 8),   b0=u(ks[1], (16,), 3 * 8 * 8),
        w1=u(ks[2], (32, 16, 4, 4), 16 * 4 * 4), b1=u(ks[3], (32,), 16 * 4 * 4),
        w2=u(ks[4], (32, 32, 5, 5), 32 * 5 * 5), b2=u(ks[5], (32,), 32 * 5 * 5),
        hw1=[], hb1=[], hw2=[], hb2=[],
    )
    for a in range(action_n):
        k0, k1, k2, k3 = ks[6 + 4 * a:6 + 4 * a + 4]
        raw["hw1"].append(u(k0, (64, 576), 576))
        raw["hb1"].append(u(k1, (64,), 576))
        raw["hw2"].append(u(k2, (2, 64), 64))
        raw["hb2"].append(u(k3, (2,), 64))
    return raw


def prepare_params(raw, action_n, eps=1e-5):
    A = action_n
    s = 1.0 / np.sqrt(1.0 + eps)   # eval-mode BN scale (running_mean=0, running_var=1)

    # conv0 as a block-diagonal (3072, 256) bf16 matrix: block q=(kh*4+kw) maps patch
    # columns (ci, ph, pw) to output lanes (kh, kw, c_out); BN scale folded in.
    w0m = raw["w0"].reshape(16, 3 * 64).T * s                        # (192, 16)
    w0bd = jnp.kron(jnp.eye(16, dtype=jnp.float32), w0m).astype(jnp.bfloat16)
    t0r = jnp.tile((raw["b0"] * s).reshape(1, 16), (1, 16)).astype(jnp.float32)

    # conv1 / conv2: im2col weight matrices with (kh, kw, cin) rows, BN scale folded.
    w1m = (raw["w1"].transpose(2, 3, 1, 0).reshape(256, 32) * s).astype(jnp.bfloat16)
    t1 = (raw["b1"] * s).reshape(1, 32).astype(jnp.float32)
    w2m = (raw["w2"].transpose(2, 3, 1, 0).reshape(800, 32) * s).astype(jnp.bfloat16)
    t2 = (raw["b2"] * s).reshape(1, 32).astype(jnp.float32)

    # Heads layer 1 regrouped for per-position accumulation with lane-dense A*64 outputs:
    # w1r[pos, c, a*64+h] = W1_a[h, c*18 + pos]  (torch x.view flatten order is (C, H, W)).
    W1 = jnp.stack(raw["hw1"])                                       # (A, 64, 576)
    w1r = (W1.reshape(A, 64, 32, 18).transpose(3, 2, 0, 1)
             .reshape(18, 32, A * 64).astype(jnp.bfloat16))
    b1h = jnp.stack(raw["hb1"]).reshape(1, A * 64).astype(jnp.float32)

    # Heads layer 2 packed as one block-diagonal (A*64, A*2) matrix.
    W2 = jnp.stack(raw["hw2"])                                       # (A, 2, 64)
    wbd = (jnp.einsum("ab,aho->ahbo", jnp.eye(A, dtype=jnp.float32),
                      W2.transpose(0, 2, 1))
              .reshape(A * 64, A * 2).astype(jnp.bfloat16))
    b2h = jnp.stack(raw["hb2"]).reshape(1, A * 2).astype(jnp.float32)

    return dict(w0bd=w0bd, t0r=t0r, w1m=w1m, t1=t1, w2m=w2m, t2=t2,
                w1r=w1r, b1h=b1h, wbd=wbd, b2h=b2h)


# ----------------------------------------------------------------------------
# Faithful pure-JAX reference of the PyTorch module (f32, lax.conv, eval-mode BN)
# ----------------------------------------------------------------------------
def dqn_forward_reference(x, raw, action_n, eps=1e-5):
    s = 1.0 / jnp.sqrt(1.0 + eps)

    def conv_bn_relu(h, w, b, stride):
        y = jax.lax.conv_general_dilated(
            h, w, (stride, stride), "VALID",
            dimension_numbers=("NCHW", "OIHW", "NCHW"))
        return jnp.maximum((y + b.reshape(1, -1, 1, 1)) * s, 0.0)

    h = conv_bn_relu(x, raw["w0"], raw["b0"], 8)
    h = conv_bn_relu(h, raw["w1"], raw["b1"], 4)
    h = conv_bn_relu(h, raw["w2"], raw["b2"], 1)
    feat = h.reshape(h.shape[0], -1)                 # x.view(B, -1): (C, H, W)-major
    ys = []
    for a in range(action_n):
        z = jnp.maximum(feat @ raw["hw1"][a].T + raw["hb1"][a], 0.0)
        # NOTE: the PyTorch module applies ReLU after the final Linear(64, 2) as well.
        z = jnp.maximum(z @ raw["hw2"][a].T + raw["hb2"][a], 0.0)
        ys.append(z)
    return jnp.concatenate(ys, axis=0)


if __name__ == "__main__":
    key = jax.random.PRNGKey(0)
    action_n = 3
    batch = 2
    kp, kx = jax.random.split(key)
    raw = init_raw_params(kp, action_n)
    params = prepare_params(raw, action_n)
    # Linear(32*3*6, 64) in the module forces a (3, 224, 320) NCHW input image.
    x = jax.random.normal(kx, (batch, 3, 224, 320), jnp.float32)

    fwd = jax.jit(dqn_forward_pallas)
    out = jax.block_until_ready(fwd(x, params))
    assert out.shape == (action_n * batch, 2), out.shape

    ref = jax.block_until_ready(
        jax.jit(functools.partial(dqn_forward_reference, action_n=action_n))(x, raw))
    # bf16 weights / MXU inputs vs. the f32 reference: relaxed but layout-bug-catching tolerance
    np.testing.assert_allclose(np.asarray(out), np.asarray(ref), rtol=5e-2, atol=2e-2)

    print("KERNEL_OK")
</pallas_src>

<mosaic_0001>
module attributes {stable_mosaic.version = 11 : i64} {
  func.func @_conv01_kernel(%arg0: i32, %arg1: memref<72x3072xbf16, #tpu.memory_space<vmem>>, %arg2: memref<3072x256xbf16, #tpu.memory_space<vmem>>, %arg3: memref<1x256xf32, #tpu.memory_space<vmem>>, %arg4: memref<256x32xbf16, #tpu.memory_space<vmem>>, %arg5: memref<1x32xf32, #tpu.memory_space<vmem>>, %arg6: memref<72x32xbf16, #tpu.memory_space<vmem>>) attributes {dimension_semantics = [#tpu.dimension_semantics<parallel>], iteration_bounds = array<i64: 2>, scalar_prefetch = 0 : i64, scratch_operands = 0 : i64, tpu.core_type = #tpu.core_type<tc>, window_params = [{transform_indices = @transform_0, window_bounds = array<i64: 72, 3072>}, {pipeline_mode = #tpu.pipeline_mode<synchronous>, transform_indices = @transform_1, window_bounds = array<i64: 3072, 256>}, {pipeline_mode = #tpu.pipeline_mode<synchronous>, transform_indices = @transform_2, window_bounds = array<i64: 1, 256>}, {pipeline_mode = #tpu.pipeline_mode<synchronous>, transform_indices = @transform_3, window_bounds = array<i64: 256, 32>}, {pipeline_mode = #tpu.pipeline_mode<synchronous>, transform_indices = @transform_4, window_bounds = array<i64: 1, 32>}, {transform_indices = @transform_5, window_bounds = array<i64: 72, 32>}]} {
    %c0 = arith.constant 0 : index
    %c0_0 = arith.constant 0 : index
    %0 = vector.load %arg1[%c0, %c0_0] : memref<72x3072xbf16, #tpu.memory_space<vmem>>, vector<72x3072xbf16>
    %c0_1 = arith.constant 0 : index
    %c0_2 = arith.constant 0 : index
    %1 = vector.load %arg2[%c0_1, %c0_2] : memref<3072x256xbf16, #tpu.memory_space<vmem>>, vector<3072x256xbf16>
    %cst = arith.constant dense<0.000000e+00> : vector<72x256xf32>
    %2 = tpu.matmul %0, %1, %cst {dimension_numbers = #tpu.dot_dimension_numbers<[1], [0], [0], [1], [0, 0, 1, 1], [], []>} : vector<72x3072xbf16>, vector<3072x256xbf16>, vector<72x256xf32> -> vector<72x256xf32>
    %c0_3 = arith.constant 0 : index
    %c0_4 = arith.constant 0 : index
    %3 = vector.load %arg3[%c0_3, %c0_4] : memref<1x256xf32, #tpu.memory_space<vmem>>, vector<1x256xf32>
    %4 = vector.broadcast %3 : vector<1x256xf32> to vector<72x256xf32>
    %5 = arith.addf %2, %4 : vector<72x256xf32>
    %cst_5 = arith.constant 0.000000e+00 : f32
    %6 = vector.broadcast %cst_5 : f32 to vector<72x256xf32>
    %7 = arith.maximumf %5, %6 : vector<72x256xf32>
    %8 = arith.truncf %7 : vector<72x256xf32> to vector<72x256xbf16>
    %c0_6 = arith.constant 0 : index
    %c0_7 = arith.constant 0 : index
    %9 = vector.load %arg4[%c0_6, %c0_7] : memref<256x32xbf16, #tpu.memory_space<vmem>>, vector<256x32xbf16>
    %cst_8 = arith.constant dense<0.000000e+00> : vector<72x32xf32>
    %10 = tpu.matmul %8, %9, %cst_8 {dimension_numbers = #tpu.dot_dimension_numbers<[1], [0], [0], [1], [0, 0, 1, 1], [], []>} : vector<72x256xbf16>, vector<256x32xbf16>, vector<72x32xf32> -> vector<72x32xf32>
    %c0_9 = arith.constant 0 : index
    %c0_10 = arith.constant 0 : index
    %11 = vector.load %arg5[%c0_9, %c0_10] : memref<1x32xf32, #tpu.memory_space<vmem>>, vector<1x32xf32>
    %12 = vector.broadcast %11 : vector<1x32xf32> to vector<72x32xf32>
    %13 = arith.addf %10, %12 : vector<72x32xf32>
    %cst_11 = arith.constant 0.000000e+00 : f32
    %14 = vector.broadcast %cst_11 : f32 to vector<72x32xf32>
    %15 = arith.maximumf %13, %14 : vector<72x32xf32>
    %16 = arith.truncf %15 : vector<72x32xf32> to vector<72x32xbf16>
    %c0_12 = arith.constant 0 : index
    %c0_13 = arith.constant 0 : index
    %17 = vector.load %arg6[%c0_12, %c0_13] : memref<72x32xbf16, #tpu.memory_space<vmem>>, vector<72x32xbf16>
    tpu.vector_store %arg6[%c0_12, %c0_13], %16 {strides = array<i32>} : memref<72x32xbf16, #tpu.memory_space<vmem>>, vector<72x32xbf16>,
    return
  }
  func.func @transform_0(%arg0: i32) -> (i32, i32) {
    %c0_i32 = arith.constant 0 : i32
    %c0_i32_0 = arith.constant 0 : i32
    return %arg0, %c0_i32 : i32, i32
  }
  func.func @transform_1(%arg0: i32) -> (i32, i32) {
    %c0_i32 = arith.constant 0 : i32
    %c0_i32_0 = arith.constant 0 : i32
    %c0_i32_1 = arith.constant 0 : i32
    return %c0_i32, %c0_i32_0 : i32, i32
  }
  func.func @transform_2(%arg0: i32) -> (i32, i32) {
    %c0_i32 = arith.constant 0 : i32
    %c0_i32_0 = arith.constant 0 : i32
    %c0_i32_1 = arith.constant 0 : i32
    return %c0_i32, %c0_i32_0 : i32, i32
  }
  func.func @transform_3(%arg0: i32) -> (i32, i32) {
    %c0_i32 = arith.constant 0 : i32
    %c0_i32_0 = arith.constant 0 : i32
    %c0_i32_1 = arith.constant 0 : i32
    return %c0_i32, %c0_i32_0 : i32, i32
  }
  func.func @transform_4(%arg0: i32) -> (i32, i32) {
    %c0_i32 = arith.constant 0 : i32
    %c0_i32_0 = arith.constant 0 : i32
    %c0_i32_1 = arith.constant 0 : i32
    return %c0_i32, %c0_i32_0 : i32, i32
  }
  func.func @transform_5(%arg0: i32) -> (i32, i32) {
    %c0_i32 = arith.constant 0 : i32
    %c0_i32_0 = arith.constant 0 : i32
    return %arg0, %c0_i32 : i32, i32
  }
}

module attributes {stable_mosaic.version = 11 : i64} {
  func.func @_conv2_heads_kernel(%arg0: i32, %arg1: memref<144x800xbf16, #tpu.memory_space<vmem>>, %arg2: memref<800x32xbf16, #tpu.memory_space<vmem>>, %arg3: memref<1x32xf32, #tpu.memory_space<vmem>>, %arg4: memref<18x32x192xbf16, #tpu.memory_space<vmem>>, %arg5: memref<1x192xf32, #tpu.memory_space<vmem>>, %arg6: memref<192x6xbf16, #tpu.memory_space<vmem>>, %arg7: memref<1x6xf32, #tpu.memory_space<vmem>>, %arg8: memref<8x6xf32, #tpu.memory_space<vmem>>) attributes {dimension_semantics = [#tpu.dimension_semantics<parallel>], iteration_bounds = array<i64: 1>, scalar_prefetch = 0 : i64, scratch_operands = 0 : i64, tpu.core_type = #tpu.core_type<tc>, window_params = [{transform_indices = @transform_0, window_bounds = array<i64: 144, 800>}, {pipeline_mode = #tpu.pipeline_mode<synchronous>, transform_indices = @transform_1, window_bounds = array<i64: 800, 32>}, {pipeline_mode = #tpu.pipeline_mode<synchronous>, transform_indices = @transform_2, window_bounds = array<i64: 1, 32>}, {pipeline_mode = #tpu.pipeline_mode<synchronous>, transform_indices = @transform_3, window_bounds = array<i64: 18, 32, 192>}, {pipeline_mode = #tpu.pipeline_mode<synchronous>, transform_indices = @transform_4, window_bounds = array<i64: 1, 192>}, {pipeline_mode = #tpu.pipeline_mode<synchronous>, transform_indices = @transform_5, window_bounds = array<i64: 192, 6>}, {pipeline_mode = #tpu.pipeline_mode<synchronous>, transform_indices = @transform_6, window_bounds = array<i64: 1, 6>}, {transform_indices = @transform_7, window_bounds = array<i64: 8, 6>}]} {
    %c0 = arith.constant 0 : index
    %c0_0 = arith.constant 0 : index
    %0 = vector.load %arg1[%c0, %c0_0] : memref<144x800xbf16, #tpu.memory_space<vmem>>, vector<144x800xbf16>
    %c0_1 = arith.constant 0 : index
    %c0_2 = arith.constant 0 : index
    %1 = vector.load %arg2[%c0_1, %c0_2] : memref<800x32xbf16, #tpu.memory_space<vmem>>, vector<800x32xbf16>
    %cst = arith.constant dense<0.000000e+00> : vector<144x32xf32>
    %2 = tpu.matmul %0, %1, %cst {dimension_numbers = #tpu.dot_dimension_numbers<[1], [0], [0], [1], [0, 0, 1, 1], [], []>} : vector<144x800xbf16>, vector<800x32xbf16>, vector<144x32xf32> -> vector<144x32xf32>
    %c0_3 = arith.constant 0 : index
    %c0_4 = arith.constant 0 : index
    %3 = vector.load %arg3[%c0_3, %c0_4] : memref<1x32xf32, #tpu.memory_space<vmem>>, vector<1x32xf32>
    %4 = vector.broadcast %3 : vector<1x32xf32> to vector<144x32xf32>
    %5 = arith.addf %2, %4 : vector<144x32xf32>
    %cst_5 = arith.constant 0.000000e+00 : f32
    %6 = vector.broadcast %cst_5 : f32 to vector<144x32xf32>
    %7 = arith.maximumf %5, %6 : vector<144x32xf32>
    %8 = arith.truncf %7 : vector<144x32xf32> to vector<144x32xbf16>
    %9 = vector.extract_strided_slice %8 {offsets = [0, 0], sizes = [8, 32], strides = [1, 1]} : vector<144x32xbf16> to vector<8x32xbf16>
    %c0_6 = arith.constant 0 : index
    %c0_7 = arith.constant 0 : index
    %c0_8 = arith.constant 0 : index
    %10 = vector.load %arg4[%c0_6, %c0_7, %c0_8] : memref<18x32x192xbf16, #tpu.memory_space<vmem>>, vector<1x32x192xbf16>
    %11 = vector.shape_cast %10 : vector<1x32x192xbf16> to vector<32x192xbf16>
    %cst_9 = arith.constant dense<0.000000e+00> : vector<8x192xf32>
    %12 = tpu.matmul %9, %11, %cst_9 {dimension_numbers = #tpu.dot_dimension_numbers<[1], [0], [0], [1], [0, 0, 1, 1], [], []>} : vector<8x32xbf16>, vector<32x192xbf16>, vector<8x192xf32> -> vector<8x192xf32>
    %13 = vector.extract_strided_slice %8 {offsets = [8, 0], sizes = [8, 32], strides = [1, 1]} : vector<144x32xbf16> to vector<8x32xbf16>
    %c1 = arith.constant 1 : index
    %c0_10 = arith.constant 0 : index
    %c0_11 = arith.constant 0 : index
    %14 = vector.load %arg4[%c1, %c0_10, %c0_11] : memref<18x32x192xbf16, #tpu.memory_space<vmem>>, vector<1x32x192xbf16>
    %15 = vector.shape_cast %14 : vector<1x32x192xbf16> to vector<32x192xbf16>
    %cst_12 = arith.constant dense<0.000000e+00> : vector<8x192xf32>
    %16 = tpu.matmul %13, %15, %cst_12 {dimension_numbers = #tpu.dot_dimension_numbers<[1], [0], [0], [1], [0, 0, 1, 1], [], []>} : vector<8x32xbf16>, vector<32x192xbf16>, vector<8x192xf32> -> vector<8x192xf32>
    %17 = arith.addf %12, %16 : vector<8x192xf32>
    %18 = vector.extract_strided_slice %8 {offsets = [16, 0], sizes = [8, 32], strides = [1, 1]} : vector<144x32xbf16> to vector<8x32xbf16>
    %c2 = arith.constant 2 : index
    %c0_13 = arith.constant 0 : index
    %c0_14 = arith.constant 0 : index
    %19 = vector.load %arg4[%c2, %c0_13, %c0_14] : memref<18x32x192xbf16, #tpu.memory_space<vmem>>, vector<1x32x192xbf16>
    %20 = vector.shape_cast %19 : vector<1x32x192xbf16> to vector<32x192xbf16>
    %cst_15 = arith.constant dense<0.000000e+00> : vector<8x192xf32>
    %21 = tpu.matmul %18, %20, %cst_15 {dimension_numbers = #tpu.dot_dimension_numbers<[1], [0], [0], [1], [0, 0, 1, 1], [], []>} : vector<8x32xbf16>, vector<32x192xbf16>, vector<8x192xf32> -> vector<8x192xf32>
    %22 = arith.addf %17, %21 : vector<8x192xf32>
    %23 = vector.extract_strided_slice %8 {offsets = [24, 0], sizes = [8, 32], strides = [1, 1]} : vector<144x32xbf16> to vector<8x32xbf16>
    %c3 = arith.constant 3 : index
    %c0_16 = arith.constant 0 : index
    %c0_17 = arith.constant 0 : index
    %24 = vector.load %arg4[%c3, %c0_16, %c0_17] : memref<18x32x192xbf16, #tpu.memory_space<vmem>>, vector<1x32x192xbf16>
    %25 = vector.shape_cast %24 : vector<1x32x192xbf16> to vector<32x192xbf16>
    %cst_18 = arith.constant dense<0.000000e+00> : vector<8x192xf32>
    %26 = tpu.matmul %23, %25, %cst_18 {dimension_numbers = #tpu.dot_dimension_numbers<[1], [0], [0], [1], [0, 0, 1, 1], [], []>} : vector<8x32xbf16>, vector<32x192xbf16>, vector<8x192xf32> -> vector<8x192xf32>
    %27 = arith.addf %22, %26 : vector<8x192xf32>
    %28 = vector.extract_strided_slice %8 {offsets = [32, 0], sizes = [8, 32], strides = [1, 1]} : vector<144x32xbf16> to vector<8x32xbf16>
    %c4 = arith.constant 4 : index
    %c0_19 = arith.constant 0 : index
    %c0_20 = arith.constant 0 : index
    %29 = vector.load %arg4[%c4, %c0_19, %c0_20] : memref<18x32x192xbf16, #tpu.memory_space<vmem>>, vector<1x32x192xbf16>
    %30 = vector.shape_cast %29 : vector<1x32x192xbf16> to vector<32x192xbf16>
    %cst_21 = arith.constant dense<0.000000e+00> : vector<8x192xf32>
    %31 = tpu.matmul %28, %30, %cst_21 {dimension_numbers = #tpu.dot_dimension_numbers<[1], [0], [0], [1], [0, 0, 1, 1], [], []>} : vector<8x32xbf16>, vector<32x192xbf16>, vector<8x192xf32> -> vector<8x192xf32>
    %32 = arith.addf %27, %31 : vector<8x192xf32>
    %33 = vector.extract_strided_slice %8 {offsets = [40, 0], sizes = [8, 32], strides = [1, 1]} : vector<144x32xbf16> to vector<8x32xbf16>
    %c5 = arith.constant 5 : index
    %c0_22 = arith.constant 0 : index
    %c0_23 = arith.constant 0 : index
    %34 = vector.load %arg4[%c5, %c0_22, %c0_23] : memref<18x32x192xbf16, #tpu.memory_space<vmem>>, vector<1x32x192xbf16>
    %35 = vector.shape_cast %34 : vector<1x32x192xbf16> to vector<32x192xbf16>
    %cst_24 = arith.constant dense<0.000000e+00> : vector<8x192xf32>
    %36 = tpu.matmul %33, %35, %cst_24 {dimension_numbers = #tpu.dot_dimension_numbers<[1], [0], [0], [1], [0, 0, 1, 1], [], []>} : vector<8x32xbf16>, vector<32x192xbf16>, vector<8x192xf32> -> vector<8x192xf32>
    %37 = arith.addf %32, %36 : vector<8x192xf32>
    %38 = vector.extract_strided_slice %8 {offsets = [48, 0], sizes = [8, 32], strides = [1, 1]} : vector<144x32xbf16> to vector<8x32xbf16>
    %c6 = arith.constant 6 : index
    %c0_25 = arith.constant 0 : index
    %c0_26 = arith.constant 0 : index
    %39 = vector.load %arg4[%c6, %c0_25, %c0_26] : memref<18x32x192xbf16, #tpu.memory_space<vmem>>, vector<1x32x192xbf16>
    %40 = vector.shape_cast %39 : vector<1x32x192xbf16> to vector<32x192xbf16>
    %cst_27 = arith.constant dense<0.000000e+00> : vector<8x192xf32>
    %41 = tpu.matmul %38, %40, %cst_27 {dimension_numbers = #tpu.dot_dimension_numbers<[1], [0], [0], [1], [0, 0, 1, 1], [], []>} : vector<8x32xbf16>, vector<32x192xbf16>, vector<8x192xf32> -> vector<8x192xf32>
    %42 = arith.addf %37, %41 : vector<8x192xf32>
    %43 = vector.extract_strided_slice %8 {offsets = [56, 0], sizes = [8, 32], strides = [1, 1]} : vector<144x32xbf16> to vector<8x32xbf16>
    %c7 = arith.constant 7 : index
    %c0_28 = arith.constant 0 : index
    %c0_29 = arith.constant 0 : index
    %44 = vector.load %arg4[%c7, %c0_28, %c0_29] : memref<18x32x192xbf16, #tpu.memory_space<vmem>>, vector<1x32x192xbf16>
    %45 = vector.shape_cast %44 : vector<1x32x192xbf16> to vector<32x192xbf16>
    %cst_30 = arith.constant dense<0.000000e+00> : vector<8x192xf32>
    %46 = tpu.matmul %43, %45, %cst_30 {dimension_numbers = #tpu.dot_dimension_numbers<[1], [0], [0], [1], [0, 0, 1, 1], [], []>} : vector<8x32xbf16>, vector<32x192xbf16>, vector<8x192xf32> -> vector<8x192xf32>
    %47 = arith.addf %42, %46 : vector<8x192xf32>
    %48 = vector.extract_strided_slice %8 {offsets = [64, 0], sizes = [8, 32], strides = [1, 1]} : vector<144x32xbf16> to vector<8x32xbf16>
    %c8 = arith.constant 8 : index
    %c0_31 = arith.constant 0 : index
    %c0_32 = arith.constant 0 : index
    %49 = vector.load %arg4[%c8, %c0_31, %c0_32] : memref<18x32x192xbf16, #tpu.memory_space<vmem>>, vector<1x32x192xbf16>
    %50 = vector.shape_cast %49 : vector<1x32x192xbf16> to vector<32x192xbf16>
    %cst_33 = arith.constant dense<0.000000e+00> : vector<8x192xf32>
    %51 = tpu.matmul %48, %50, %cst_33 {dimension_numbers = #tpu.dot_dimension_numbers<[1], [0], [0], [1], [0, 0, 1, 1], [], []>} : vector<8x32xbf16>, vector<32x192xbf16>, vector<8x192xf32> -> vector<8x192xf32>
    %52 = arith.addf %47, %51 : vector<8x192xf32>
    %53 = vector.extract_strided_slice %8 {offsets = [72, 0], sizes = [8, 32], strides = [1, 1]} : vector<144x32xbf16> to vector<8x32xbf16>
    %c9 = arith.constant 9 : index
    %c0_34 = arith.constant 0 : index
    %c0_35 = arith.constant 0 : index
    %54 = vector.load %arg4[%c9, %c0_34, %c0_35] : memref<18x32x192xbf16, #tpu.memory_space<vmem>>, vector<1x32x192xbf16>
    %55 = vector.shape_cast %54 : vector<1x32x192xbf16> to vector<32x192xbf16>
    %cst_36 = arith.constant dense<0.000000e+00> : vector<8x192xf32>
    %56 = tpu.matmul %53, %55, %cst_36 {dimension_numbers = #tpu.dot_dimension_numbers<[1], [0], [0], [1], [0, 0, 1, 1], [], []>} : vector<8x32xbf16>, vector<32x192xbf16>, vector<8x192xf32> -> vector<8x192xf32>
    %57 = arith.addf %52, %56 : vector<8x192xf32>
    %58 = vector.extract_strided_slice %8 {offsets = [80, 0], sizes = [8, 32], strides = [1, 1]} : vector<144x32xbf16> to vector<8x32xbf16>
    %c10 = arith.constant 10 : index
    %c0_37 = arith.constant 0 : index
    %c0_38 = arith.constant 0 : index
    %59 = vector.load %arg4[%c10, %c0_37, %c0_38] : memref<18x32x192xbf16, #tpu.memory_space<vmem>>, vector<1x32x192xbf16>
    %60 = vector.shape_cast %59 : vector<1x32x192xbf16> to vector<32x192xbf16>
    %cst_39 = arith.constant dense<0.000000e+00> : vector<8x192xf32>
    %61 = tpu.matmul %58, %60, %cst_39 {dimension_numbers = #tpu.dot_dimension_numbers<[1], [0], [0], [1], [0, 0, 1, 1], [], []>} : vector<8x32xbf16>, vector<32x192xbf16>, vector<8x192xf32> -> vector<8x192xf32>
    %62 = arith.addf %57, %61 : vector<8x192xf32>
    %63 = vector.extract_strided_slice %8 {offsets = [88, 0], sizes = [8, 32], strides = [1, 1]} : vector<144x32xbf16> to vector<8x32xbf16>
    %c11 = arith.constant 11 : index
    %c0_40 = arith.constant 0 : index
    %c0_41 = arith.constant 0 : index
    %64 = vector.load %arg4[%c11, %c0_40, %c0_41] : memref<18x32x192xbf16, #tpu.memory_space<vmem>>, vector<1x32x192xbf16>
    %65 = vector.shape_cast %64 : vector<1x32x192xbf16> to vector<32x192xbf16>
    %cst_42 = arith.constant dense<0.000000e+00> : vector<8x192xf32>
    %66 = tpu.matmul %63, %65, %cst_42 {dimension_numbers = #tpu.dot_dimension_numbers<[1], [0], [0], [1], [0, 0, 1, 1], [], []>} : vector<8x32xbf16>, vector<32x192xbf16>, vector<8x192xf32> -> vector<8x192xf32>
    %67 = arith.addf %62, %66 : vector<8x192xf32>
    %68 = vector.extract_strided_slice %8 {offsets = [96, 0], sizes = [8, 32], strides = [1, 1]} : vector<144x32xbf16> to vector<8x32xbf16>
    %c12 = arith.constant 12 : index
    %c0_43 = arith.constant 0 : index
    %c0_44 = arith.constant 0 : index
    %69 = vector.load %arg4[%c12, %c0_43, %c0_44] : memref<18x32x192xbf16, #tpu.memory_space<vmem>>, vector<1x32x192xbf16>
    %70 = vector.shape_cast %69 : vector<1x32x192xbf16> to vector<32x192xbf16>
    %cst_45 = arith.constant dense<0.000000e+00> : vector<8x192xf32>
    %71 = tpu.matmul %68, %70, %cst_45 {dimension_numbers = #tpu.dot_dimension_numbers<[1], [0], [0], [1], [0, 0, 1, 1], [], []>} : vector<8x32xbf16>, vector<32x192xbf16>, vector<8x192xf32> -> vector<8x192xf32>
    %72 = arith.addf %67, %71 : vector<8x192xf32>
    %73 = vector.extract_strided_slice %8 {offsets = [104, 0], sizes = [8, 32], strides = [1, 1]} : vector<144x32xbf16> to vector<8x32xbf16>
    %c13 = arith.constant 13 : index
    %c0_46 = arith.constant 0 : index
    %c0_47 = arith.constant 0 : index
    %74 = vector.load %arg4[%c13, %c0_46, %c0_47] : memref<18x32x192xbf16, #tpu.memory_space<vmem>>, vector<1x32x192xbf16>
    %75 = vector.shape_cast %74 : vector<1x32x192xbf16> to vector<32x192xbf16>
    %cst_48 = arith.constant dense<0.000000e+00> : vector<8x192xf32>
    %76 = tpu.matmul %73, %75, %cst_48 {dimension_numbers = #tpu.dot_dimension_numbers<[1], [0], [0], [1], [0, 0, 1, 1], [], []>} : vector<8x32xbf16>, vector<32x192xbf16>, vector<8x192xf32> -> vector<8x192xf32>
    %77 = arith.addf %72, %76 : vector<8x192xf32>
    %78 = vector.extract_strided_slice %8 {offsets = [112, 0], sizes = [8, 32], strides = [1, 1]} : vector<144x32xbf16> to vector<8x32xbf16>
    %c14 = arith.constant 14 : index
    %c0_49 = arith.constant 0 : index
    %c0_50 = arith.constant 0 : index
    %79 = vector.load %arg4[%c14, %c0_49, %c0_50] : memref<18x32x192xbf16, #tpu.memory_space<vmem>>, vector<1x32x192xbf16>
    %80 = vector.shape_cast %79 : vector<1x32x192xbf16> to vector<32x192xbf16>
    %cst_51 = arith.constant dense<0.000000e+00> : vector<8x192xf32>
    %81 = tpu.matmul %78, %80, %cst_51 {dimension_numbers = #tpu.dot_dimension_numbers<[1], [0], [0], [1], [0, 0, 1, 1], [], []>} : vector<8x32xbf16>, vector<32x192xbf16>, vector<8x192xf32> -> vector<8x192xf32>
    %82 = arith.addf %77, %81 : vector<8x192xf32>
    %83 = vector.extract_strided_slice %8 {offsets = [120, 0], sizes = [8, 32], strides = [1, 1]} : vector<144x32xbf16> to vector<8x32xbf16>
    %c15 = arith.constant 15 : index
    %c0_52 = arith.constant 0 : index
    %c0_53 = arith.constant 0 : index
    %84 = vector.load %arg4[%c15, %c0_52, %c0_53] : memref<18x32x192xbf16, #tpu.memory_space<vmem>>, vector<1x32x192xbf16>
    %85 = vector.shape_cast %84 : vector<1x32x192xbf16> to vector<32x192xbf16>
    %cst_54 = arith.constant dense<0.000000e+00> : vector<8x192xf32>
    %86 = tpu.matmul %83, %85, %cst_54 {dimension_numbers = #tpu.dot_dimension_numbers<[1], [0], [0], [1], [0, 0, 1, 1], [], []>} : vector<8x32xbf16>, vector<32x192xbf16>, vector<8x192xf32> -> vector<8x192xf32>
    %87 = arith.addf %82, %86 : vector<8x192xf32>
    %88 = vector.extract_strided_slice %8 {offsets = [128, 0], sizes = [8, 32], strides = [1, 1]} : vector<144x32xbf16> to vector<8x32xbf16>
    %c16 = arith.constant 16 : index
    %c0_55 = arith.constant 0 : index
    %c0_56 = arith.constant 0 : index
    %89 = vector.load %arg4[%c16, %c0_55, %c0_56] : memref<18x32x192xbf16, #tpu.memory_space<vmem>>, vector<1x32x192xbf16>
    %90 = vector.shape_cast %89 : vector<1x32x192xbf16> to vector<32x192xbf16>
    %cst_57 = arith.constant dense<0.000000e+00> : vector<8x192xf32>
    %91 = tpu.matmul %88, %90, %cst_57 {dimension_numbers = #tpu.dot_dimension_numbers<[1], [0], [0], [1], [0, 0, 1, 1], [], []>} : vector<8x32xbf16>, vector<32x192xbf16>, vector<8x192xf32> -> vector<8x192xf32>
    %92 = arith.addf %87, %91 : vector<8x192xf32>
    %93 = vector.extract_strided_slice %8 {offsets = [136, 0], sizes = [8, 32], strides = [1, 1]} : vector<144x32xbf16> to vector<8x32xbf16>
    %c17 = arith.constant 17 : index
    %c0_58 = arith.constant 0 : index
    %c0_59 = arith.constant 0 : index
    %94 = vector.load %arg4[%c17, %c0_58, %c0_59] : memref<18x32x192xbf16, #tpu.memory_space<vmem>>, vector<1x32x192xbf16>
    %95 = vector.shape_cast %94 : vector<1x32x192xbf16> to vector<32x192xbf16>
    %cst_60 = arith.constant dense<0.000000e+00> : vector<8x192xf32>
    %96 = tpu.matmul %93, %95, %cst_60 {dimension_numbers = #tpu.dot_dimension_numbers<[1], [0], [0], [1], [0, 0, 1, 1], [], []>} : vector<8x32xbf16>, vector<32x192xbf16>, vector<8x192xf32> -> vector<8x192xf32>
    %97 = arith.addf %92, %96 : vector<8x192xf32>
    %c0_61 = arith.constant 0 : index
    %c0_62 = arith.constant 0 : index
    %98 = vector.load %arg5[%c0_61, %c0_62] : memref<1x192xf32, #tpu.memory_space<vmem>>, vector<1x192xf32>
    %99 = vector.broadcast %98 : vector<1x192xf32> to vector<8x192xf32>
    %100 = arith.addf %97, %99 : vector<8x192xf32>
    %cst_63 = arith.constant 0.000000e+00 : f32
    %101 = vector.broadcast %cst_63 : f32 to vector<8x192xf32>
    %102 = arith.maximumf %100, %101 : vector<8x192xf32>
    %103 = arith.truncf %102 : vector<8x192xf32> to vector<8x192xbf16>
    %c0_64 = arith.constant 0 : index
    %c0_65 = arith.constant 0 : index
    %104 = vector.load %arg6[%c0_64, %c0_65] : memref<192x6xbf16, #tpu.memory_space<vmem>>, vector<192x6xbf16>
    %cst_66 = arith.constant dense<0.000000e+00> : vector<8x6xf32>
    %105 = tpu.matmul %103, %104, %cst_66 {dimension_numbers = #tpu.dot_dimension_numbers<[1], [0], [0], [1], [0, 0, 1, 1], [], []>} : vector<8x192xbf16>, vector<192x6xbf16>, vector<8x6xf32> -> vector<8x6xf32>
    %c0_67 = arith.constant 0 : index
    %c0_68 = arith.constant 0 : index
    %106 = vector.load %arg7[%c0_67, %c0_68] : memref<1x6xf32, #tpu.memory_space<vmem>>, vector<1x6xf32>
    %107 = vector.broadcast %106 : vector<1x6xf32> to vector<8x6xf32>
    %108 = arith.addf %105, %107 : vector<8x6xf32>
    %cst_69 = arith.constant 0.000000e+00 : f32
    %109 = vector.broadcast %cst_69 : f32 to vector<8x6xf32>
    %110 = arith.maximumf %108, %109 : vector<8x6xf32>
    %c0_70 = arith.constant 0 : index
    %c0_71 = arith.constant 0 : index
    %111 = vector.load %arg8[%c0_70, %c0_71] : memref<8x6xf32, #tpu.memory_space<vmem>>, vector<8x6xf32>
    tpu.vector_store %arg8[%c0_70, %c0_71], %110 {strides = array<i32>} : memref<8x6xf32, #tpu.memory_space<vmem>>, vector<8x6xf32>,
    return
  }
  func.func @transform_0(%arg0: i32) -> (i32, i32) {
    %c0_i32 = arith.constant 0 : i32
    %c0_i32_0 = arith.constant 0 : i32
    return %arg0, %c0_i32 : i32, i32
  }
  func.func @transform_1(%arg0: i32) -> (i32, i32) {
    %c0_i32 = arith.constant 0 : i32
    %c0_i32_0 = arith.constant 0 : i32
    %c0_i32_1 = arith.constant 0 : i32
    return %c0_i32, %c0_i32_0 : i32, i32
  }
  func.func @transform_2(%arg0: i32) -> (i32, i32) {
    %c0_i32 = arith.constant 0 : i32
    %c0_i32_0 = arith.constant 0 : i32
    %c0_i32_1 = arith.constant 0 : i32
    return %c0_i32, %c0_i32_0 : i32, i32
  }
  func.func @transform_3(%arg0: i32) -> (i32, i32, i32) {
    %c0_i32 = arith.constant 0 : i32
    %c0_i32_0 = arith.constant 0 : i32
    %c0_i32_1 = arith.constant 0 : i32
    %c0_i32_2 = arith.constant 0 : i32
    return %c0_i32, %c0_i32_0, %c0_i32_1 : i32, i32, i32
  }
  func.func @transform_4(%arg0: i32) -> (i32, i32) {
    %c0_i32 = arith.constant 0 : i32
    %c0_i32_0 = arith.constant 0 : i32
    %c0_i32_1 = arith.constant 0 : i32
    return %c0_i32, %c0_i32_0 : i32, i32
  }
  func.func @transform_5(%arg0: i32) -> (i32, i32) {
    %c0_i32 = arith.constant 0 : i32
    %c0_i32_0 = arith.constant 0 : i32
    %c0_i32_1 = arith.constant 0 : i32
    return %c0_i32, %c0_i32_0 : i32, i32
  }
  func.func @transform_6(%arg0: i32) -> (i32, i32) {
    %c0_i32 = arith.constant 0 : i32
    %c0_i32_0 = arith.constant 0 : i32
    %c0_i32_1 = arith.constant 0 : i32
    return %c0_i32, %c0_i32_0 : i32, i32
  }
  func.func @transform_7(%arg0: i32) -> (i32, i32) {
    %c0_i32 = arith.constant 0 : i32
    %c0_i32_0 = arith.constant 0 : i32
    return %arg0, %c0_i32 : i32, i32
  }
}

</mosaic_0001>

<bundles_post_ra>
// kernel: dqn_forward_pallas.2
= control target key start
LH: loop header
LB: loop body
LE: loop exit
PB: predicated region body
PF: predicated region fallthrough
CT: control target
= control target key end

     0   :  { %s7661_s18 = smov 0   ;;  %s11528_s0 = inlined_call_operand.vmem [shape: bf16[144,3072], index: 0, kind: input, shape index: {}]   ;;  %s11529_s1 = inlined_call_operand.vmem [shape: bf16[3072,256], index: 1, kind: input, shape index: {}]   ;;  %s11530_s2 = inlined_call_operand.vmem [shape: f32[1,256], index: 2, kind: input, shape index: {}]   ;;  %s11531_s3 = inlined_call_operand.vmem [shape: bf16[256,32], index: 3, kind: input, shape index: {}]   ;;  %s11532_s4 = inlined_call_operand.vmem [shape: f32[1,32], index: 4, kind: input, shape index: {}]   ;;  %s11533_s5 = inlined_call_operand.vmem [shape: bf16[144,32], index: 5, kind: output, shape index: {}]  }
   0x1 LB: > { %s5107_s19 = sadd.s32 4294967295, %s7629_s18   ;;  %p5111_p0 = scmp.ge.s32.totalorder %s7629_s18, 1  ;;  %s7629_s18 = sphi %s7661_s18, %s15_s18  }
   0x2   : > { %p189_p1 = scmp.lt.s32.totalorder %s7629_s18, 3 }
   0x4   : > { %p190_p2 = pnand %p5111_p0, %p189_p1 }
   0x6   : > { %193 = sbr.rel (%p190_p2) target bundleno = 1320 (0x528), region = 40 }
   0xb   : > { %v5556_v0 = vld [vmem:[%s11529_s1 + $0x70] sm:$0xf]  ;;  %v7211_v1 = vld [vmem:[%s11529_s1 + $0x74] sm:$0xf0]  ;;  %v5548_v5 = vld [vmem:[%s11529_s1 + $0x60] sm:$0xf] }
   0xc   : > { %v5620_v2 = vld [vmem:[%s11529_s1 + $0xf0] sm:$0xf]  ;;  %v5557_v3 = vor.u32 %v7211_v1, %v5556_v0  ;;  %v7227_v4 = vld [vmem:[%s11529_s1 + $0xf4] sm:$0xf0]  ;;  %v7209_v6 = vld [vmem:[%s11529_s1 + $0x64] sm:$0xf0] }
   0xd   : > { %v5621_v7 = vor.u32 %v7227_v4, %v5620_v2  ;;  %v5612_v8 = vld [vmem:[%s11529_s1 + $0xe0] sm:$0xf]  ;;  %v7225_v9 = vld [vmem:[%s11529_s1 + $0xe4] sm:$0xf0]  ;;  %v5549_v10 = vor.u32 %v7209_v6, %v5548_v5  ;;  %v5540_v12 = vld [vmem:[%s11529_s1 + $0x50] sm:$0xf] }
   0xe   : > { %3213 = vmatpush.bf16.msra.mxu0 %v5557_v3  ;;  %7596 = vmatpush.bf16.msra.mxu2 %v5557_v3  ;;  %v5613_v11 = vor.u32 %v7225_v9, %v5612_v8  ;;  %v7207_v13 = vld [vmem:[%s11529_s1 + $0x54] sm:$0xf0]  ;;  %v5604_v14 = vld [vmem:[%s11529_s1 + $0xd0] sm:$0xf]  ;;  %v5532_v18 = vld [vmem:[%s11529_s1 + $0x40] sm:$0xf] }
   0xf   : > { %7604 = vmatpush.bf16.msra.mxu3 %v5621_v7  ;;  %3246 = vmatpush.bf16.msra.mxu1 %v5621_v7  ;;  %v7223_v15 = vld [vmem:[%s11529_s1 + $0xd4] sm:$0xf0]  ;;  %v5541_v16 = vor.u32 %v7207_v13, %v5540_v12  ;;  %v7205_v19 = vld [vmem:[%s11529_s1 + $0x44] sm:$0xf0]  ;;  %v5596_v20 = vld [vmem:[%s11529_s1 + $0xc0] sm:$0xf] }
  0x10   : > { %v5605_v17 = vor.u32 %v7223_v15, %v5604_v14  ;;  %v7221_v21 = vld [vmem:[%s11529_s1 + $0xc4] sm:$0xf0]  ;;  %s218_s29 = smul.u32 9, %s5107_s19  ;;  %v5533_v22 = vor.u32 %v7205_v19, %v5532_v18  ;;  %v5524_v24 = vld [vmem:[%s11529_s1 + $0x30] sm:$0xf]  ;;  %vm5041_vm0 = vcmask 257024  }
  0x11   : > { %v5597_v23 = vor.u32 %v7221_v21, %v5596_v20  ;;  %v7203_v25 = vld [vmem:[%s11529_s1 + $0x34] sm:$0xf0]  ;;  %v5588_v26 = vld [vmem:[%s11529_s1 + $0xb0] sm:$0xf]  ;;  %v5516_v30 = vld [vmem:[%s11529_s1 + $0x20] sm:$0xf] }
  0x12   : > { %3214 = vmatpush.bf16.msra.mxu0 %v5549_v10  ;;  %7597 = vmatpush.bf16.msra.mxu2 %v5549_v10  ;;  %p219_p3 = scmp.lt.s32.totalorder %s218_s29, 17  ;;  %v7219_v27 = vld [vmem:[%s11529_s1 + $0xb4] sm:$0xf0]  ;;  %v5525_v28 = vor.u32 %v7203_v25, %v5524_v24  ;;  %v7201_v31 = vld [vmem:[%s11529_s1 + $0x24] sm:$0xf0] }
  0x13   : > { %7605 = vmatpush.bf16.msra.mxu3 %v5613_v11  ;;  %3247 = vmatpush.bf16.msra.mxu1 %v5613_v11  ;;  %v5589_v29 = vor.u32 %v7219_v27, %v5588_v26  ;;  %v5580_v32 = vld [vmem:[%s11529_s1 + $0xa0] sm:$0xf]  ;;  %v7217_v33 = vld [vmem:[%s11529_s1 + $0xa4] sm:$0xf0]  ;;  %v5517_v34 = vor.u32 %v7201_v31, %v5516_v30  ;;  %v5508_v36 = vld [vmem:[%s11529_s1 + $0x10] sm:$0xf] }
  0x14   : > { %s11763_s29 = smov (!%p219_p3, %s218_s29), 17  ;;  %v5581_v35 = vor.u32 %v7217_v33, %v5580_v32  ;;  %v7199_v37 = vld [vmem:[%s11529_s1 + $0x14] sm:$0xf0]  ;;  %v5572_v38 = vld [vmem:[%s11529_s1 + $0x90] sm:$0xf] }
  0x15   : > { %s7612_s22 = smul.u32 96, %s11763_s29  ;;  %v7215_v39 = vld [vmem:[%s11529_s1 + $0x94] sm:$0xf0]  ;;  %v5509_v40 = vor.u32 %v7199_v37, %v5508_v36  ;;  %v5500_v41 = vld [vmem:[%s11529_s1] sm:$0xf]  ;;  %s5113_s28 = sshll.u32 %s11763_s29, 2 }
  0x16   : > { %3215 = vmatpush.bf16.msra.mxu0 %v5541_v16  ;;  %7598 = vmatpush.bf16.msra.mxu2 %v5541_v16  ;;  %v7197_v42 = vld [vmem:[%s11529_s1 + $0x4] sm:$0xf0]  ;;  %v5573_v43 = vor.u32 %v7215_v39, %v5572_v38  ;;  %v5564_v44 = vld [vmem:[%s11529_s1 + $0x80] sm:$0xf]  ;;  %v5684_v46 = vld [vmem:[%s11529_s1 + $0x170] sm:$0xf]  ;;  %s11490_s7 = scalar_lea.vmem %s11533_s5, %s5113_s28 }
  0x17   : > { %7606 = vmatpush.bf16.msra.mxu3 %v5605_v17  ;;  %3248 = vmatpush.bf16.msra.mxu1 %v5605_v17  ;;  %s7767_s12 = scalar_lea.vmem %s11528_s0, %s7612_s22  ;;  %v7213_v45 = vld [vmem:[%s11529_s1 + $0x84] sm:$0xf0]  ;;  %v7243_v47 = vld [vmem:[%s11529_s1 + $0x174] sm:$0xf0]  ;;  %v5812_v48 = vld [vmem:[%s11529_s1 + $0x270] sm:$0xf]  ;;  %v5501_v53 = vor.u32 %v7197_v42, %v5500_v41 }
  0x18   : > { %v7275_v49 = vld [vmem:[%s11529_s1 + $0x274] sm:$0xf0]  ;;  %v5116_v50 = vld [vmem:[%s7767_s12] sm:$0xf]  ;;  %v5748_v51 = vld [vmem:[%s11529_s1 + $0x1f0] sm:$0xf]  ;;  %v5565_v58 = vor.u32 %v7213_v45, %v5564_v44  ;;  %v5685_v61 = vor.u32 %v7243_v47, %v5684_v46 }
  0x19   : > { %v7259_v52 = vld [vmem:[%s11529_s1 + $0x1f4] sm:$0xf0]  ;;  %v7112_v54 = vld [vmem:[%s7767_s12 + $0x5c] sm:$0xf0]  ;;  %v7148_v59 = vld [vmem:[%s7767_s12 + $0x184] sm:$0xf]  ;;  %v5813_v63 = vor.u32 %v7275_v49, %v5812_v48 }
  0x1a   : > { %3216 = vmatpush.bf16.msra.mxu0 %v5533_v22  ;;  %7599 = vmatpush.bf16.msra.mxu2 %v5533_v22  ;;  %v5308_v55 = vld [vmem:[%s7767_s12 + $0x180] sm:$0xf]  ;;  %v5310_v60 = vld [vmem:[%s7767_s12 + $0x1e0] sm:$0xf0]  ;;  %v5749_v0 = vor.u32 %v7259_v52, %v5748_v51  ;;  %v7241_v1 = vld [vmem:[%s11529_s1 + $0x164] sm:$0xf0]  ;;  %v7814_v4 = vor.u32 %v7112_v54, %v5116_v50 }
  0x1b   : > { %7607 = vmatpush.bf16.msra.mxu3 %v5597_v23  ;;  %3249 = vmatpush.bf16.msra.mxu1 %v5597_v23  ;;  %v7160_v56 = vld [vmem:[%s7767_s12 + $0x1dc] sm:$0xf0]  ;;  %v5876_v2 = vld [vmem:[%s11529_s1 + $0x2f0] sm:$0xf]  ;;  %v7291_v3 = vld [vmem:[%s11529_s1 + $0x2f4] sm:$0xf0]  ;;  %v7827_v9 = vor.u32 %v7148_v59, %v5310_v60 }
  0x1c   : > { %v5676_v57 = vld [vmem:[%s11529_s1 + $0x160] sm:$0xf]  ;;  %v7816_v5 = vor.u32 %v7160_v56, %v5308_v55  ;;  %v7273_v6 = vld [vmem:[%s11529_s1 + $0x264] sm:$0xf0]  ;;  %v7100_v10 = vld [vmem:[%s7767_s12 + $0x4] sm:$0xf]  ;;  %v5877_v15 = vor.u32 %v7291_v3, %v5876_v2 }
  0x1d   : > { %v5804_v62 = vld [vmem:[%s11529_s1 + $0x260] sm:$0xf]  ;;  %v7257_v8 = vld [vmem:[%s11529_s1 + $0x1e4] sm:$0xf0]  ;;  %v5118_v11 = vld [vmem:[%s7767_s12 + $0x60] sm:$0xf0]  ;;  %v5677_v12 = vor.u32 %v7241_v1, %v5676_v57 }
  0x1e   : > { %3217 = vmatpush.bf16.msra.mxu0 %v5525_v28  ;;  %7600 = vmatpush.bf16.msra.mxu2 %v5525_v28  ;;  %v5740_v7 = vld [vmem:[%s11529_s1 + $0x1e0] sm:$0xf]  ;;  %v5796_v13 = vld [vmem:[%s11529_s1 + $0x250] sm:$0xf]  ;;  %v5805_v16 = vor.u32 %v7273_v6, %v5804_v62  ;;  %v7239_v18 = vld [vmem:[%s11529_s1 + $0x154] sm:$0xf0]  ;;  %v7857_v24 = vor.u32 %v7100_v10, %v5118_v11 }
  0x1f   : > { %7608 = vmatpush.bf16.msra.mxu3 %v5589_v29  ;;  %3250 = vmatpush.bf16.msra.mxu1 %v5589_v29  ;;  %v5668_v14 = vld [vmem:[%s11529_s1 + $0x150] sm:$0xf]  ;;  %v5741_v17 = vor.u32 %v7257_v8, %v5740_v7  ;;  %v5868_v19 = vld [vmem:[%s11529_s1 + $0x2e0] sm:$0xf]  ;;  %v7289_v20 = vld [vmem:[%s11529_s1 + $0x2e4] sm:$0xf0] }
  0x20   : > { %v7271_v21 = vld [vmem:[%s11529_s1 + $0x254] sm:$0xf0]  ;;  %v5732_v22 = vld [vmem:[%s11529_s1 + $0x1d0] sm:$0xf]  ;;  %v5669_v25 = vor.u32 %v7239_v18, %v5668_v14  ;;  %v5788_v26 = vld [vmem:[%s11529_s1 + $0x240] sm:$0xf]  ;;  %v5869_v28 = vor.u32 %v7289_v20, %v5868_v19 }
  0x21   : > { %v7255_v23 = vld [vmem:[%s11529_s1 + $0x1d4] sm:$0xf0]  ;;  %v5660_v27 = vld [vmem:[%s11529_s1 + $0x140] sm:$0xf]  ;;  %v5797_v29 = vor.u32 %v7271_v21, %v5796_v13  ;;  %v7237_v31 = vld [vmem:[%s11529_s1 + $0x144] sm:$0xf0] }
  0x22   : > { %3218 = vmatpush.bf16.msra.mxu0 %v5517_v34  ;;  %7601 = vmatpush.bf16.msra.mxu2 %v5517_v34  ;;  %v5733_v30 = vor.u32 %v7255_v23, %v5732_v22  ;;  %v5860_v32 = vld [vmem:[%s11529_s1 + $0x2d0] sm:$0xf]  ;;  %v7287_v33 = vld [vmem:[%s11529_s1 + $0x2d4] sm:$0xf0]  ;;  %v7269_v34 = vld [vmem:[%s11529_s1 + $0x244] sm:$0xf0]  ;;  %v5661_v38 = vor.u32 %v7237_v31, %v5660_v27 }
  0x23   : > { %7609 = vmatpush.bf16.msra.mxu3 %v5581_v35  ;;  %3251 = vmatpush.bf16.msra.mxu1 %v5581_v35  ;;  %v5724_v35 = vld [vmem:[%s11529_s1 + $0x1c0] sm:$0xf]  ;;  %v7253_v36 = vld [vmem:[%s11529_s1 + $0x1c4] sm:$0xf0]  ;;  %v5780_v37 = vld [vmem:[%s11529_s1 + $0x230] sm:$0xf]  ;;  %v5789_v41 = vor.u32 %v7269_v34, %v5788_v26 }
  0x24   : > { %v5652_v39 = vld [vmem:[%s11529_s1 + $0x130] sm:$0xf]  ;;  %v5212_v42 = vld [vmem:[%s7767_s12 + $0xc0] sm:$0xf]  ;;  %v5725_v44 = vor.u32 %v7253_v36, %v5724_v35  ;;  %v7235_v45 = vld [vmem:[%s11529_s1 + $0x134] sm:$0xf0] }
  0x25   : > { %v5852_v46 = vld [vmem:[%s11529_s1 + $0x2c0] sm:$0xf]  ;;  %v7285_v47 = vld [vmem:[%s11529_s1 + $0x2c4] sm:$0xf0]  ;;  %v7267_v48 = vld [vmem:[%s11529_s1 + $0x234] sm:$0xf0]  ;;  %v5653_v56 = vor.u32 %v7235_v45, %v5652_v39 }
  0x26   : > { %3219 = vmatpush.bf16.msra.mxu0 %v5509_v40  ;;  %7602 = vmatpush.bf16.msra.mxu2 %v5509_v40  ;;  %v5861_v40 = vor.u32 %v7287_v33, %v5860_v32  ;;  %v5716_v49 = vld [vmem:[%s11529_s1 + $0x1b0] sm:$0xf]  ;;  %v7251_v50 = vld [vmem:[%s11529_s1 + $0x1b4] sm:$0xf0]  ;;  %v5404_v51 = vld [vmem:[%s7767_s12 + $0x240] sm:$0xf]  ;;  %v5781_v59 = vor.u32 %v7267_v48, %v5780_v37 }
  0x27   : > { %7610 = vmatpush.bf16.msra.mxu3 %v5573_v43  ;;  %3252 = vmatpush.bf16.msra.mxu1 %v5573_v43  ;;  %v7136_v43 = vld [vmem:[%s7767_s12 + $0x11c] sm:$0xf0]  ;;  %v5406_v54 = vld [vmem:[%s7767_s12 + $0x2a0] sm:$0xf0]  ;;  %v5717_v60 = vor.u32 %v7251_v50, %v5716_v49  ;;  %v5844_v62 = vld [vmem:[%s11529_s1 + $0x2b0] sm:$0xf] }
  0x28   : > { %v7184_v52 = vld [vmem:[%s7767_s12 + $0x29c] sm:$0xf0]  ;;  %v7265_v2 = vld [vmem:[%s11529_s1 + $0x224] sm:$0xf0]  ;;  %v7124_v8 = vld [vmem:[%s7767_s12 + $0xc4] sm:$0xf] }
  0x29   : > { %v5772_v55 = vld [vmem:[%s11529_s1 + $0x220] sm:$0xf]  ;;  %v7932_v1 = vor.u32 %v7184_v52, %v5404_v51  ;;  %v7249_v6 = vld [vmem:[%s11529_s1 + $0x1a4] sm:$0xf0]  ;;  %v5214_v10 = vld [vmem:[%s7767_s12 + $0x120] sm:$0xf0] }
  0x2a   : > { %3220 = vmatpush.bf16.msra.mxu0 %v5501_v53  ;;  %7603 = vmatpush.bf16.msra.mxu2 %v5501_v53  ;;  %v7172_v53 = vld [vmem:[%s7767_s12 + $0x244] sm:$0xf]  ;;  %v5644_v57 = vld [vmem:[%s11529_s1 + $0x120] sm:$0xf]  ;;  %v5764_v11 = vld [vmem:[%s11529_s1 + $0x210] sm:$0xf]  ;;  %v7973_v23 = vor.u32 %v7124_v8, %v5214_v10 }
  0x2b   : > { %7611 = vmatpush.bf16.msra.mxu3 %v5565_v58  ;;  %3253 = vmatpush.bf16.msra.mxu1 %v5565_v58  ;;  %v5853_v58 = vor.u32 %v7285_v47, %v5852_v46  ;;  %v5708_v3 = vld [vmem:[%s11529_s1 + $0x1a0] sm:$0xf]  ;;  %v7943_v7 = vor.u32 %v7172_v53, %v5406_v54  ;;  %v5636_v13 = vld [vmem:[%s11529_s1 + $0x110] sm:$0xf]  ;;  %v7281_v19 = vld [vmem:[%s11529_s1 + $0x2a4] sm:$0xf0] }
  0x2c   : > { %v5836_v18 = vld [vmem:[%s11529_s1 + $0x2a0] sm:$0xf]  ;;  %v7263_v20 = vld [vmem:[%s11529_s1 + $0x214] sm:$0xf0]  ;;  %v5700_v21 = vld [vmem:[%s11529_s1 + $0x190] sm:$0xf] }
  0x2d   : > { %3221 = vmatmul.bf16.vlgmr.msra.gmra.mxu0 %v7814_v4  ;;  %3231 = vmatmul.bf16.vlgmr.msra.gmra.mxu2 %v7816_v5  ;;  %v7247_v22 = vld [vmem:[%s11529_s1 + $0x194] sm:$0xf0]  ;;  %v7261_v26 = vld [vmem:[%s11529_s1 + $0x204] sm:$0xf0]  ;;  %v327_v31 = vld [vmem:[%s7767_s12 + $0x300] sm:$0xff] }
  0x2e   : > { %3279 = vmatpush.bf16.msrb.mxu2 %v5685_v61  ;;  %3345 = vmatpush.bf16.msrb.mxu0 %v5813_v63  ;;  %v7233_v61 = vld [vmem:[%s11529_s1 + $0x124] sm:$0xf0]  ;;  %v7283_v63 = vld [vmem:[%s11529_s1 + $0x2b4] sm:$0xf0]  ;;  %v5701_v32 = vor.u32 %v7247_v22, %v5700_v21  ;;  %v5828_v34 = vld [vmem:[%s11529_s1 + $0x290] sm:$0xf]  ;;  %v1029_v48 = vunpack.c.l.b16 %v327_v31  ;;  %v1030_v51 = vunpack.c.h.b16 %v327_v31 }
  0x2f   : > { %3312 = vmatpush.bf16.msrb.mxu3 %v5749_v0  ;;  %3378 = vmatpush.bf16.msrb.mxu1 %v5877_v15  ;;  %v7930_v0 = vor.u32 %v7136_v43, %v5212_v42  ;;  %v5845_v14 = vor.u32 %v7283_v63, %v5844_v62  ;;  %v5773_v15 = vor.u32 %v7265_v2, %v5772_v55  ;;  %v7229_v33 = vld [vmem:[%s11529_s1 + $0x104] sm:$0xf0]  ;;  %v7279_v35 = vld [vmem:[%s11529_s1 + $0x294] sm:$0xf0]  ;;  %v5692_v36 = vld [vmem:[%s11529_s1 + $0x180] sm:$0xf] }
  0x30   : > { %3264 = vmatmul.bf16.vlgmr.msra.gmra.mxu3 %v7827_v9  ;;  %3254 = vmatmul.bf16.vlgmr.msra.gmra.mxu1 %v7857_v24  ;;  %v7245_v37 = vld [vmem:[%s11529_s1 + $0x184] sm:$0xf0]  ;;  %v7307_v39 = vld [vmem:[%s11529_s1 + $0x374] sm:$0xf0]  ;;  %v5829_v43 = vor.u32 %v7279_v35, %v5828_v34  ;;  %v5820_v46 = vld [vmem:[%s11529_s1 + $0x280] sm:$0xf] }
  0x31   : > { %v5693_v45 = vor.u32 %v7245_v37, %v5692_v36  ;;  %v7277_v47 = vld [vmem:[%s11529_s1 + $0x284] sm:$0xf0]  ;;  %v5132_v52 = vld [vmem:[%s7767_s12 + $0x10] sm:$0xf]  ;;  %v5932_v55 = vld [vmem:[%s11529_s1 + $0x360] sm:$0xf] }
  0x32   : > { %3280 = vmatpush.bf16.msrb.mxu2 %v5677_v12  ;;  %3346 = vmatpush.bf16.msrb.mxu0 %v5805_v16  ;;  %v5645_v12 = vor.u32 %v7233_v61, %v5644_v57  ;;  %v5709_v16 = vor.u32 %v7249_v6, %v5708_v3  ;;  %v7114_v53 = vld [vmem:[%s7767_s12 + $0x6c] sm:$0xf0]  ;;  %v5821_v54 = vor.u32 %v7277_v47, %v5820_v46  ;;  %v5996_v57 = vld [vmem:[%s11529_s1 + $0x3e0] sm:$0xf]  ;;  %v7102_v63 = vld [vmem:[%s7767_s12 + $0x14] sm:$0xf] }
  0x33   : > { %3313 = vmatpush.bf16.msrb.mxu3 %v5741_v17  ;;  %3379 = vmatpush.bf16.msrb.mxu1 %v5869_v28  ;;  %v7231_v17 = vld [vmem:[%s11529_s1 + $0x114] sm:$0xf0]  ;;  %v5628_v28 = vld [vmem:[%s11529_s1 + $0x100] sm:$0xf]  ;;  %v8038_v61 = vpack.c.b16 %v1030_v51, %v1030_v51  ;;  %v5134_v2 = vld [vmem:[%s7767_s12 + $0x70] sm:$0xf0] }
  0x34   : > { %v5637_v27 = vor.u32 %v7231_v17, %v5636_v13  ;;  %v5629_v42 = vor.u32 %v7229_v33, %v5628_v28  ;;  %v8044_v6 = vor.u32 %v7102_v63, %v5134_v2  ;;  %v5924_v8 = vld [vmem:[%s11529_s1 + $0x350] sm:$0xf]  ;;  %v7303_v10 = vld [vmem:[%s11529_s1 + $0x354] sm:$0xf0]  ;;  %v7101_v22 = vld [vmem:[%s7767_s12 + $0xc] sm:$0xf] }
  0x35   : > { %v7319_v13 = vld [vmem:[%s11529_s1 + $0x3d4] sm:$0xf0]  ;;  %v7138_v21 = vld [vmem:[%s7767_s12 + $0x12c] sm:$0xf0]  ;;  %v5980_v35 = vld [vmem:[%s11529_s1 + $0x3c0] sm:$0xf] }
  0x36   : > { %3281 = vmatpush.bf16.msrb.mxu2 %v5669_v25  ;;  %3347 = vmatpush.bf16.msrb.mxu0 %v5797_v29  ;;  %v5756_v25 = vld [vmem:[%s11529_s1 + $0x200] sm:$0xf]  ;;  %v5837_v29 = vor.u32 %v7281_v19, %v5836_v18  ;;  %v5124_v18 = vld [vmem:[%s7767_s12 + $0x8] sm:$0xf]  ;;  %v6068_v31 = vld [vmem:[%s11529_s1 + $0x470] sm:$0xf] }
  0x37   : > { %3314 = vmatpush.bf16.msrb.mxu3 %v5733_v30  ;;  %3380 = vmatpush.bf16.msrb.mxu1 %v5861_v40  ;;  %v5765_v30 = vor.u32 %v7263_v20, %v5764_v11  ;;  %v6004_v40 = vld [vmem:[%s11529_s1 + $0x3f0] sm:$0xf]  ;;  %v7113_v19 = vld [vmem:[%s7767_s12 + $0x64] sm:$0xf0]  ;;  %v6060_v37 = vld [vmem:[%s11529_s1 + $0x460] sm:$0xf] }
  0x38   : > { %v5988_v11 = vld [vmem:[%s11529_s1 + $0x3d0] sm:$0xf]  ;;  %v7317_v36 = vld [vmem:[%s11529_s1 + $0x3c4] sm:$0xf0]  ;;  %v7315_v47 = vld [vmem:[%s11529_s1 + $0x3b4] sm:$0xf0] }
  0x39   : > { %v5228_v20 = vld [vmem:[%s7767_s12 + $0xd0] sm:$0xf]  ;;  %v7333_v51 = vld [vmem:[%s11529_s1 + $0x444] sm:$0xf0] }
  0x3a   : > { %3282 = vmatpush.bf16.msrb.mxu2 %v5661_v38  ;;  %3348 = vmatpush.bf16.msrb.mxu0 %v5789_v41  ;;  %v5940_v38 = vld [vmem:[%s11529_s1 + $0x370] sm:$0xf]  ;;  %v7323_v41 = vld [vmem:[%s11529_s1 + $0x3f4] sm:$0xf0] }
  0x3b   : > { %3315 = vmatpush.bf16.msrb.mxu3 %v5725_v44  ;;  %3381 = vmatpush.bf16.msrb.mxu1 %v5853_v58  ;;  %v5757_v44 = vor.u32 %v7261_v26, %v5756_v25  ;;  %v5941_v49 = vor.u32 %v7307_v39, %v5940_v38  ;;  %v6005_v50 = vor.u32 %v7323_v41, %v6004_v40  ;;  %v7321_v58 = vld [vmem:[%s11529_s1 + $0x3e4] sm:$0xf0]  ;;  %v5126_v25 = vld [vmem:[%s7767_s12 + $0x68] sm:$0xf0]  ;;  %v5908_v40 = vld [vmem:[%s11529_s1 + $0x330] sm:$0xf] }
  0x3c   : > { %v5997_v3 = vor.u32 %v7321_v58, %v5996_v57  ;;  %v8072_v26 = vor.u32 %v7113_v19, %v5124_v18  ;;  %v8076_v28 = vor.u32 %v7101_v22, %v5126_v25  ;;  %v5981_v38 = vor.u32 %v7317_v36, %v5980_v35  ;;  %v7337_v39 = vld [vmem:[%s11529_s1 + $0x464] sm:$0xf0]  ;;  %v7299_v41 = vld [vmem:[%s11529_s1 + $0x334] sm:$0xf0]  ;;  %v5972_v46 = vld [vmem:[%s11529_s1 + $0x3b0] sm:$0xf] }
  0x3d   : > { %3226 = vmatmul.bf16.gmra.mxu0 %v7930_v0  ;;  %3236 = vmatmul.bf16.gmra.mxu2 %v7932_v1  ;;  %v5222_v57 = vld [vmem:[%s7767_s12 + $0x128] sm:$0xf0]  ;;  %v7313_v18 = vld [vmem:[%s11529_s1 + $0x3a4] sm:$0xf0]  ;;  %v6028_v19 = vld [vmem:[%s11529_s1 + $0x420] sm:$0xf] }
  0x3e   : > { %3283 = vmatpush.bf16.msrb.mxu2 %v5653_v56  ;;  %3349 = vmatpush.bf16.msrb.mxu0 %v5781_v59  ;;  %v7305_v56 = vld [vmem:[%s11529_s1 + $0x364] sm:$0xf0]  ;;  %v8034_v59 = vpack.c.b16 %v1029_v48, %v1029_v48  ;;  %v5973_v48 = vor.u32 %v7315_v47, %v5972_v46  ;;  %v6020_v25 = vld [vmem:[%s11529_s1 + $0x410] sm:$0xf]  ;;  %v7355_v36 = vld [vmem:[%s11529_s1 + $0x4f4] sm:$0xf0] }
  0x3f   : > { %3316 = vmatpush.bf16.msrb.mxu3 %v5717_v60  ;;  %3382 = vmatpush.bf16.msrb.mxu1 %v5845_v14  ;;  %v8036_v60 = vor.u32 %v7114_v53, %v5132_v52  ;;  %v5933_v62 = vor.u32 %v7305_v56, %v5932_v55  ;;  %v5989_v14 = vor.u32 %v7319_v13, %v5988_v11  ;;  %v5220_v52 = vld [vmem:[%s7767_s12 + $0xc8] sm:$0xf]  ;;  %v7162_v55 = vld [vmem:[%s7767_s12 + $0x1ec] sm:$0xf0]  ;;  %v7125_v56 = vld [vmem:[%s7767_s12 + $0xcc] sm:$0xf] }
  0x40   : > { %3269 = vmatmul.bf16.gmra.mxu3 %v7943_v7  ;;  %3259 = vmatmul.bf16.gmra.mxu1 %v7973_v23  ;;  %v7137_v53 = vld [vmem:[%s7767_s12 + $0x124] sm:$0xf0]  ;;  %v8138_v2 = vor.u32 %v7125_v56, %v5222_v57  ;;  %v7331_v11 = vld [vmem:[%s11529_s1 + $0x434] sm:$0xf0]  ;;  %v7186_v46 = vld [vmem:[%s7767_s12 + $0x2ac] sm:$0xf0] }
  0x41   : > { %v7149_v47 = vld [vmem:[%s7767_s12 + $0x18c] sm:$0xf]  ;;  %v7353_v56 = vld [vmem:[%s11529_s1 + $0x4e4] sm:$0xf0] }
  0x42   : > { %3284 = vmatpush.bf16.msrb.mxu2 %v5645_v12  ;;  %3350 = vmatpush.bf16.msrb.mxu0 %v5773_v15  ;;  %v5925_v12 = vor.u32 %v7303_v10, %v5924_v8  ;;  %v5916_v15 = vld [vmem:[%s11529_s1 + $0x340] sm:$0xf]  ;;  %v5326_v8 = vld [vmem:[%s7767_s12 + $0x1f0] sm:$0xf0]  ;;  %v6036_v10 = vld [vmem:[%s11529_s1 + $0x430] sm:$0xf] }
  0x43   : > { %3317 = vmatpush.bf16.msrb.mxu3 %v5709_v16  ;;  %3383 = vmatpush.bf16.msrb.mxu1 %v5837_v29  ;;  %v7301_v16 = vld [vmem:[%s11529_s1 + $0x344] sm:$0xf0]  ;;  %v7126_v29 = vld [vmem:[%s7767_s12 + $0xd4] sm:$0xf]  ;;  %v6037_v13 = vor.u32 %v7331_v11, %v6036_v10  ;;  %v5884_v10 = vld [vmem:[%s11529_s1 + $0x300] sm:$0xf] }
  0x44   : > { %v5917_v17 = vor.u32 %v7301_v16, %v5916_v15  ;;  %v7297_v15 = vld [vmem:[%s11529_s1 + $0x324] sm:$0xf0]  ;;  %v5964_v16 = vld [vmem:[%s11529_s1 + $0x3a0] sm:$0xf] }
  0x46   : > { %3285 = vmatpush.bf16.msrb.mxu2 %v5637_v27  ;;  %3351 = vmatpush.bf16.msrb.mxu0 %v5765_v30  ;;  %v8074_v27 = vor.u32 %v7138_v21, %v5228_v20  ;;  %v5230_v30 = vld [vmem:[%s7767_s12 + $0x130] sm:$0xf0]  ;;  %v7329_v20 = vld [vmem:[%s11529_s1 + $0x424] sm:$0xf0]  ;;  %v5965_v21 = vor.u32 %v7313_v18, %v5964_v16  ;;  %v6108_v18 = vld [vmem:[%s11529_s1 + $0x4c0] sm:$0xf] }
  0x47   : > { %3318 = vmatpush.bf16.msrb.mxu3 %v5701_v32  ;;  %3384 = vmatpush.bf16.msrb.mxu1 %v5829_v43  ;;  %v7339_v32 = vld [vmem:[%s11529_s1 + $0x474] sm:$0xf0]  ;;  %v8088_v33 = vor.u32 %v7126_v29, %v5230_v30  ;;  %v5909_v43 = vor.u32 %v7299_v41, %v5908_v40  ;;  %v6029_v22 = vor.u32 %v7329_v20, %v6028_v19  ;;  %v5892_v30 = vld [vmem:[%s11529_s1 + $0x310] sm:$0xf]  ;;  %v7325_v40 = vld [vmem:[%s11529_s1 + $0x404] sm:$0xf0] }
  0x48   : > { %v6069_v34 = vor.u32 %v7339_v32, %v6068_v31  ;;  %v7327_v29 = vld [vmem:[%s11529_s1 + $0x414] sm:$0xf0]  ;;  %v7349_v19 = vld [vmem:[%s11529_s1 + $0x4c4] sm:$0xf0]  ;;  %v329_v20 = vld [vmem:[%s7767_s12 + $0x310] sm:$0xff] }
  0x49   : > { %v7295_v31 = vld [vmem:[%s11529_s1 + $0x314] sm:$0xf0]  ;;  %v6021_v35 = vor.u32 %v7327_v29, %v6020_v25  ;;  %v5412_v25 = vld [vmem:[%s7767_s12 + $0x248] sm:$0xf] }
  0x4a   : > { %3286 = vmatpush.bf16.msrb.mxu2 %v5629_v42  ;;  %3352 = vmatpush.bf16.msrb.mxu0 %v5757_v44  ;;  %v6061_v42 = vor.u32 %v7337_v39, %v6060_v37  ;;  %v6052_v44 = vld [vmem:[%s11529_s1 + $0x450] sm:$0xf]  ;;  %v5893_v32 = vor.u32 %v7295_v31, %v5892_v30  ;;  %v6012_v39 = vld [vmem:[%s11529_s1 + $0x400] sm:$0xf]  ;;  %v7185_v29 = vld [vmem:[%s7767_s12 + $0x2a4] sm:$0xf0] }
  0x4b   : > { %3319 = vmatpush.bf16.msrb.mxu3 %v5693_v45  ;;  %3385 = vmatpush.bf16.msrb.mxu1 %v5821_v54  ;;  %v7335_v45 = vld [vmem:[%s11529_s1 + $0x454] sm:$0xf0]  ;;  %v5324_v54 = vld [vmem:[%s7767_s12 + $0x190] sm:$0xf]  ;;  %v7173_v30 = vld [vmem:[%s7767_s12 + $0x24c] sm:$0xf] }
  0x4c   : > { %v8136_v63 = vor.u32 %v7162_v55, %v5324_v54  ;;  %v5956_v37 = vld [vmem:[%s11529_s1 + $0x390] sm:$0xf]  ;;  %v5422_v54 = vld [vmem:[%s7767_s12 + $0x2b0] sm:$0xf0]  ;;  %v6124_v55 = vld [vmem:[%s11529_s1 + $0x4e0] sm:$0xf] }
  0x4d   : > { %3241 = vmatmul.bf16.gmra.mxu2 %v8034_v59  ;;  %3353 = vmatmul.bf16.vlgmr.msrb.gmra.mxu0 %v8036_v60  ;;  %v5414_v31 = vld [vmem:[%s7767_s12 + $0x2a8] sm:$0xf0] }
  0x4e   : > { %3411 = vmatpush.bf16.msra.mxu2 %v5941_v49  ;;  %3477 = vmatpush.bf16.msra.mxu0 %v6069_v34  ;;  %v6053_v49 = vor.u32 %v7335_v45, %v6052_v44  ;;  %v6132_v34 = vld [vmem:[%s11529_s1 + $0x4f0] sm:$0xf]  ;;  %v7161_v44 = vld [vmem:[%s7767_s12 + $0x1e4] sm:$0xf0] }
  0x4f   : > { %3444 = vmatpush.bf16.msra.mxu3 %v6005_v50  ;;  %v6044_v50 = vld [vmem:[%s11529_s1 + $0x440] sm:$0xf]  ;;  %v6133_v41 = vor.u32 %v7355_v36, %v6132_v34  ;;  %v5420_v45 = vld [vmem:[%s7767_s12 + $0x250] sm:$0xf]  ;;  %v7347_v34 = vld [vmem:[%s11529_s1 + $0x4b4] sm:$0xf0] }
  0x50   : > { %3274 = vmatmul.bf16.gmra.mxu3 %v8038_v61  ;;  %3386 = vmatmul.bf16.vlgmr.msrb.gmra.mxu1 %v8044_v6  ;;  %v6045_v58 = vor.u32 %v7333_v51, %v6044_v50  ;;  %v8210_v51 = vor.u32 %v7186_v46, %v5420_v45  ;;  %v6260_v46 = vld [vmem:[%s11529_s1 + $0x5f0] sm:$0xf] }
  0x51   : > { %3510 = vmatpush.bf16.msra.mxu1 %v6133_v41  ;;  %v6092_v41 = vld [vmem:[%s11529_s1 + $0x4a0] sm:$0xf] }
  0x52   : > { %3412 = vmatpush.bf16.msra.mxu2 %v5933_v62  ;;  %3478 = vmatpush.bf16.msra.mxu0 %v6061_v42  ;;  %v8134_v62 = vor.u32 %v7137_v53, %v5220_v52  ;;  %v7174_v53 = vld [vmem:[%s7767_s12 + $0x254] sm:$0xf] }
  0x53   : > { %3445 = vmatpush.bf16.msra.mxu3 %v5997_v3  ;;  %v7150_v3 = vld [vmem:[%s7767_s12 + $0x194] sm:$0xf]  ;;  %v8224_v57 = vor.u32 %v7174_v53, %v5422_v54  ;;  %v6084_v53 = vld [vmem:[%s11529_s1 + $0x490] sm:$0xf]  ;;  %v7343_v54 = vld [vmem:[%s11529_s1 + $0x494] sm:$0xf0] }
  0x56   : > { %3413 = vmatpush.bf16.msra.mxu2 %v5925_v12  ;;  %3479 = vmatpush.bf16.msra.mxu0 %v6053_v49  ;;  %v8150_v12 = vor.u32 %v7150_v3, %v5326_v8  ;;  %v6013_v49 = vor.u32 %v7325_v40, %v6012_v39  ;;  %v6116_v3 = vld [vmem:[%s11529_s1 + $0x4d0] sm:$0xf]  ;;  %v7351_v8 = vld [vmem:[%s11529_s1 + $0x4d4] sm:$0xf0]  ;;  %v8267_v39 = vor.u32 %v7173_v30, %v5414_v31 }
  0x57   : > { %3446 = vmatpush.bf16.msra.mxu3 %v5989_v14  ;;  %v5900_v14 = vld [vmem:[%s11529_s1 + $0x320] sm:$0xf]  ;;  %v6117_v11 = vor.u32 %v7351_v8, %v6116_v3  ;;  %v7341_v3 = vld [vmem:[%s11529_s1 + $0x484] sm:$0xf0] }
  0x58   : > { %v6188_v8 = vld [vmem:[%s11529_s1 + $0x560] sm:$0xf] }
  0x5a   : > { %3414 = vmatpush.bf16.msra.mxu2 %v5917_v17  ;;  %3480 = vmatpush.bf16.msra.mxu0 %v6045_v58  ;;  %v5901_v17 = vor.u32 %v7297_v15, %v5900_v14  ;;  %v6125_v58 = vor.u32 %v7353_v56, %v6124_v55  ;;  %v5948_v14 = vld [vmem:[%s11529_s1 + $0x380] sm:$0xf]  ;;  %v7309_v15 = vld [vmem:[%s11529_s1 + $0x384] sm:$0xf0]  ;;  %v6085_v55 = vor.u32 %v7343_v54, %v6084_v53 }
  0x5b   : > { %3447 = vmatpush.bf16.msra.mxu3 %v5981_v38  ;;  %v7311_v38 = vld [vmem:[%s11529_s1 + $0x394] sm:$0xf0]  ;;  %v328_v56 = vld [vmem:[%s7767_s12 + $0x308] sm:$0xff] }
  0x5c   : > { %v5957_v42 = vor.u32 %v7311_v38, %v5956_v37  ;;  %3511 = vmatpush.bf16.msra.mxu1 %v6125_v58  ;;  %v1034_v37 = vunpack.c.h.b16 %v329_v20  ;;  %v6076_v58 = vld [vmem:[%s11529_s1 + $0x480] sm:$0xf] }
  0x5d   : > { %3287 = vmatmul.bf16.vlgmr.msrb.gmra.mxu2 %v8072_v26  ;;  %3358 = vmatmul.bf16.gmra.mxu0 %v8074_v27 }
  0x5e   : > { %3415 = vmatpush.bf16.msra.mxu2 %v5909_v43  ;;  %3481 = vmatpush.bf16.msra.mxu0 %v6037_v13  ;;  %v5316_v43 = vld [vmem:[%s7767_s12 + $0x188] sm:$0xf]  ;;  %v8271_v40 = vpack.c.b16 %v1034_v37, %v1034_v37  ;;  %v6244_v37 = vld [vmem:[%s11529_s1 + $0x5d0] sm:$0xf] }
  0x5f   : > { %3448 = vmatpush.bf16.msra.mxu3 %v5973_v48  ;;  %v5318_v48 = vld [vmem:[%s7767_s12 + $0x1e8] sm:$0xf0]  ;;  %v8208_v50 = vor.u32 %v7161_v44, %v5316_v43  ;;  %v7293_v13 = vld [vmem:[%s11529_s1 + $0x304] sm:$0xf0]  ;;  %v6196_v43 = vld [vmem:[%s11529_s1 + $0x570] sm:$0xf] }
  0x60   : > { %3320 = vmatmul.bf16.vlgmr.msrb.gmra.mxu3 %v8076_v28  ;;  %3391 = vmatmul.bf16.gmra.mxu1 %v8088_v33  ;;  %v8212_v52 = vor.u32 %v7149_v47, %v5318_v48  ;;  %v5885_v16 = vor.u32 %v7293_v13, %v5884_v10  ;;  %11610 = vst [vmem:[#allocation2_spill] sm:$0xff] %v8271_v40  ;;  %v7371_v44 = vld [vmem:[%s11529_s1 + $0x574] sm:$0xf0]  ;;  %v1031_v13 = vunpack.c.l.b16 %v328_v56 }
  0x61   : > { %3512 = vmatpush.bf16.msra.mxu1 %v6117_v11  ;;  %v6197_v47 = vor.u32 %v7371_v44, %v6196_v43  ;;  %v7387_v48 = vld [vmem:[%s11529_s1 + $0x5f4] sm:$0xf0]  ;;  %v6077_v10 = vor.u32 %v7341_v3, %v6076_v58  ;;  %v7369_v11 = vld [vmem:[%s11529_s1 + $0x564] sm:$0xf0]  ;;  %v7128_v3 = vld [vmem:[%s7767_s12 + $0xe4] sm:$0xf] }
  0x62   : > { %3416 = vmatpush.bf16.msra.mxu2 %v5901_v17  ;;  %3482 = vmatpush.bf16.msra.mxu0 %v6029_v22  ;;  %v5949_v17 = vor.u32 %v7309_v15, %v5948_v14  ;;  %v1033_v22 = vunpack.c.l.b16 %v329_v20  ;;  %v6189_v14 = vor.u32 %v7369_v11, %v6188_v8  ;;  %v1032_v15 = vunpack.c.h.b16 %v328_v56  ;;  %v5140_v43 = vld [vmem:[%s7767_s12 + $0x18] sm:$0xf]  ;;  %v5246_v8 = vld [vmem:[%s7767_s12 + $0x140] sm:$0xf0]  ;;  %v6172_v11 = vld [vmem:[%s11529_s1 + $0x540] sm:$0xf] }
  0x63   : > { %3449 = vmatpush.bf16.msra.mxu3 %v5965_v21  ;;  %v6109_v21 = vor.u32 %v7349_v19, %v6108_v18  ;;  %v8314_v18 = vpack.c.b16 %v1031_v13, %v1031_v13  ;;  %v7365_v13 = vld [vmem:[%s11529_s1 + $0x544] sm:$0xf0] }
  0x64   : > { %v8265_v36 = vpack.c.b16 %v1033_v22, %v1033_v22  ;;  %v8318_v20 = vpack.c.b16 %v1032_v15, %v1032_v15  ;;  %v5150_v22 = vld [vmem:[%s7767_s12 + $0x80] sm:$0xf0]  ;;  %v8374_v15 = vor.u32 %v7128_v3, %v5246_v8  ;;  %v7399_v3 = vld [vmem:[%s11529_s1 + $0x654] sm:$0xf0]  ;;  %v6228_v8 = vld [vmem:[%s11529_s1 + $0x5b0] sm:$0xf] }
  0x65   : > { %3513 = vmatpush.bf16.msra.mxu1 %v6109_v21  ;;  %11611 = vst [vmem:[#allocation3_spill] sm:$0xff] %v8314_v18  ;;  %v7104_v21 = vld [vmem:[%s7767_s12 + $0x24] sm:$0xf] }
  0x66   : > { %3417 = vmatpush.bf16.msra.mxu2 %v5893_v32  ;;  %3483 = vmatpush.bf16.msra.mxu0 %v6021_v35  ;;  %v6100_v32 = vld [vmem:[%s11529_s1 + $0x4b0] sm:$0xf]  ;;  %v8263_v35 = vor.u32 %v7185_v29, %v5412_v25  ;;  %11613 = vst [vmem:[#allocation5_spill] sm:$0xff] %v8318_v20  ;;  %v6252_v25 = vld [vmem:[%s11529_s1 + $0x5e0] sm:$0xf]  ;;  %v8330_v31 = vor.u32 %v7104_v21, %v5150_v22 }
  0x67   : > { %3450 = vmatpush.bf16.msra.mxu3 %v5957_v42  ;;  %v6101_v38 = vor.u32 %v7347_v34, %v6100_v32  ;;  %v7345_v42 = vld [vmem:[%s11529_s1 + $0x4a4] sm:$0xf0]  ;;  %v6180_v32 = vld [vmem:[%s11529_s1 + $0x550] sm:$0xf]  ;;  %v7367_v34 = vld [vmem:[%s11529_s1 + $0x554] sm:$0xf0] }
  0x68   : > { %v6093_v45 = vor.u32 %v7345_v42, %v6092_v41  ;;  %v7385_v29 = vld [vmem:[%s11529_s1 + $0x5e4] sm:$0xf0]  ;;  %11614 = vst [vmem:[#allocation6_spill] sm:$0xff] %v8330_v31  ;;  %v7383_v41 = vld [vmem:[%s11529_s1 + $0x5d4] sm:$0xf0] }
  0x69   : > { %3514 = vmatpush.bf16.msra.mxu1 %v6101_v38  ;;  %v6253_v30 = vor.u32 %v7385_v29, %v6252_v25  ;;  %v6181_v38 = vor.u32 %v7367_v34, %v6180_v32  ;;  %v723_v42 = vld [vmem:[%s11530_s2] sm:$0x3]  ;;  %v6245_v44 = vor.u32 %v7383_v41, %v6244_v37  ;;  %11618 = vst [vmem:[#allocation10_spill] sm:$0xff] %v8374_v15  ;;  %v7381_v22 = vld [vmem:[%s11529_s1 + $0x5c4] sm:$0xf0] }
  0x6a   : > { %3484 = vmatpush.bf16.msra.mxu0 %v6013_v49  ;;  %3418 = vmatpush.bf16.msra.mxu2 %v5885_v16  ;;  %v6261_v49 = vor.u32 %v7387_v48, %v6260_v46  ;;  %v5148_v16 = vld [vmem:[%s7767_s12 + $0x20] sm:$0xf]  ;;  %v7103_v48 = vld [vmem:[%s7767_s12 + $0x1c] sm:$0xf]  ;;  %v8355_v53 = vperm.slane %v723_v42, 0 }
  0x6b   : > { %3451 = vmatpush.bf16.msra.mxu3 %v5949_v17  ;;  %v7116_v17 = vld [vmem:[%s7767_s12 + $0x7c] sm:$0xf0]  ;;  %v7403_v25 = vld [vmem:[%s11529_s1 + $0x674] sm:$0xf0] }
  0x6c   : > { %v8316_v19 = vor.u32 %v7116_v17, %v5148_v16  ;;  %v5244_v46 = vld [vmem:[%s7767_s12 + $0xe0] sm:$0xf]  ;;  %v6324_v16 = vld [vmem:[%s11529_s1 + $0x670] sm:$0xf] }
  0x6d   : > { %3292 = vmatmul.bf16.gmra.mxu2 %v8134_v62  ;;  %3363 = vmatmul.bf16.gmra.mxu0 %v8136_v63  ;;  %v6236_v21 = vld [vmem:[%s11529_s1 + $0x5c0] sm:$0xf]  ;;  %v6325_v32 = vor.u32 %v7403_v25, %v6324_v16  ;;  %v7127_v25 = vld [vmem:[%s7767_s12 + $0xdc] sm:$0xf] }
  0x6e   : > { %3515 = vmatpush.bf16.msra.mxu1 %v6093_v45  ;;  %3543 = vmatpush.bf16.msrb.mxu2 %v6197_v47  ;;  %11612 = vst [vmem:[#allocation4_spill] sm:$0xff] %v8316_v19  ;;  %v7115_v45 = vld [vmem:[%s7767_s12 + $0x74] sm:$0xf0]  ;;  %v7140_v47 = vld [vmem:[%s7767_s12 + $0x13c] sm:$0xf0] }
  0x6f   : > { %3576 = vmatpush.bf16.msrb.mxu3 %v6261_v49  ;;  %v5142_v49 = vld [vmem:[%s7767_s12 + $0x78] sm:$0xf0]  ;;  %v8357_v54 = vor.u32 %v7115_v45, %v5140_v43  ;;  %v6316_v37 = vld [vmem:[%s11529_s1 + $0x660] sm:$0xf]  ;;  %3609 = vmatpush.bf16.msrb.mxu0 %v6325_v32 }
  0x70   : > { %3325 = vmatmul.bf16.gmra.mxu3 %v8138_v2  ;;  %3396 = vmatmul.bf16.gmra.mxu1 %v8150_v12  ;;  %v8361_v58 = vor.u32 %v7103_v48, %v5142_v49  ;;  %v7363_v48 = vld [vmem:[%s11529_s1 + $0x534] sm:$0xf0]  ;;  %v6308_v49 = vld [vmem:[%s11529_s1 + $0x650] sm:$0xf]  ;;  %v5340_v16 = vld [vmem:[%s7767_s12 + $0x1a0] sm:$0xf] }
  0x71   : > { %11615 = vst [vmem:[#allocation7_spill] sm:$0xff] %v8357_v54 }
  0x72   : > { %3516 = vmatpush.bf16.msra.mxu1 %v6085_v55  ;;  %3544 = vmatpush.bf16.msrb.mxu2 %v6189_v14  ;;  %v8359_v55 = vor.u32 %v7140_v47, %v5244_v46  ;;  %11617 = vst [vmem:[#allocation9_spill] sm:$0xff] %v8361_v58  ;;  %v6173_v14 = vor.u32 %v7365_v13, %v6172_v11  ;;  %v6164_v47 = vld [vmem:[%s11529_s1 + $0x530] sm:$0xf]  ;;  %v5236_v11 = vld [vmem:[%s7767_s12 + $0xd8] sm:$0xf] }
  0x73   : > { %3577 = vmatpush.bf16.msrb.mxu3 %v6253_v30  ;;  %v6237_v30 = vor.u32 %v7381_v22, %v6236_v21  ;;  %v6309_v22 = vor.u32 %v7399_v3, %v6308_v49  ;;  %v5342_v49 = vld [vmem:[%s7767_s12 + $0x200] sm:$0xf0] }
  0x74   : > { %11616 = vst [vmem:[#allocation8_spill] sm:$0xff] %v8359_v55 }
  0x76   : > { %3517 = vmatpush.bf16.msra.mxu1 %v6077_v10  ;;  %3545 = vmatpush.bf16.msrb.mxu2 %v6181_v38  ;;  %v7401_v38 = vld [vmem:[%s11529_s1 + $0x664] sm:$0xf0] }
  0x77   : > { %3578 = vmatpush.bf16.msrb.mxu3 %v6245_v44  ;;  %v6317_v44 = vor.u32 %v7401_v38, %v6316_v37  ;;  %v6300_v37 = vld [vmem:[%s11529_s1 + $0x640] sm:$0xf]  ;;  %v7397_v38 = vld [vmem:[%s11529_s1 + $0x644] sm:$0xf0] }
  0x79   : > { %3610 = vmatpush.bf16.msrb.mxu0 %v6317_v44 }
  0x7a   : > { %3546 = vmatpush.bf16.msrb.mxu2 %v6173_v14  ;;  %v7139_v14 = vld [vmem:[%s7767_s12 + $0x134] sm:$0xf0] }
  0x7b   : > { %3579 = vmatpush.bf16.msrb.mxu3 %v6237_v30  ;;  %v5238_v30 = vld [vmem:[%s7767_s12 + $0x138] sm:$0xf0] }
  0x7d   : > { %3297 = vmatmul.bf16.gmra.mxu2 %v8208_v50  ;;  %3368 = vmatmul.bf16.gmra.mxu0 %v8210_v51 }
  0x7e   : > { %3611 = vmatpush.bf16.msrb.mxu0 %v6309_v22 }
  0x80   : > { %3330 = vmatmul.bf16.gmra.mxu3 %v8212_v52  ;;  %3401 = vmatmul.bf16.gmra.mxu1 %v8224_v57 }
  0x8d   : > { %3302 = vmatmul.bf16.gmra.mxu2 %v8263_v35  ;;  %3373 = vmatmul.bf16.gmra.mxu0 %v8265_v36 }
  0x90   : > { %3335 = vmatmul.bf16.gmra.mxu3 %v8267_v39  ;;  %3406 = vmatmul.bf16.gmra.mxu1 %v8271_v40  ;;  %v6548_v40 = vld [vmem:[%s11529_s1 + $0x830] sm:$0xf] }
  0x9d   : > { %3307 = vmatmul.bf16.gmra.mxu2 %v8314_v18  ;;  %3485 = vmatmul.bf16.vlgmr.msra.gmra.mxu0 %v8316_v19 }
  0xa0   : > { %3340 = vmatmul.bf16.gmra.mxu3 %v8318_v20  ;;  %3518 = vmatmul.bf16.vlgmr.msra.gmra.mxu1 %v8330_v31 }
  0xaa   : > { %v3222_v56 = vpop.f32.mrf.mxu0 }
  0xab   : > { %v3223_v10 = vadd.f32 %v3222_v56, %v8355_v53  ;;  %v6165_v56 = vor.u32 %v7363_v48, %v6164_v47  ;;  %v7152_v48 = vld [vmem:[%s7767_s12 + $0x1a4] sm:$0xf] }
  0xad   : > { %3419 = vmatmul.bf16.vlgmr.msra.gmra.mxu2 %v8357_v54  ;;  %3490 = vmatmul.bf16.gmra.mxu0 %v8359_v55  ;;  %v3255_v17 = vpop.f32.mrf.mxu1  ;;  %v7106_v55 = vld [vmem:[%s7767_s12 + $0x34] sm:$0xf] }
  0xae   : > { %v8389_v29 = vadd.f32 %v3255_v17, %v3223_v10  ;;  %v7379_v10 = vld [vmem:[%s11529_s1 + $0x5b4] sm:$0xf0]  ;;  %v7164_v17 = vld [vmem:[%s7767_s12 + $0x1fc] sm:$0xf0]  ;;  %3547 = vmatpush.bf16.msrb.mxu2 %v6165_v56  ;;  %v6301_v56 = vor.u32 %v7397_v38, %v6300_v37  ;;  %v7393_v37 = vld [vmem:[%s11529_s1 + $0x624] sm:$0xf0] }
  0xaf   : > { %v6229_v13 = vor.u32 %v7379_v10, %v6228_v8  ;;  %v8437_v44 = vor.u32 %v7164_v17, %v5340_v16  ;;  %v6292_v10 = vld [vmem:[%s11529_s1 + $0x630] sm:$0xf]  ;;  %v6156_v17 = vld [vmem:[%s11529_s1 + $0x520] sm:$0xf]  ;;  %v5166_v54 = vld [vmem:[%s7767_s12 + $0x90] sm:$0xf0] }
  0xb0   : > { %3452 = vmatmul.bf16.vlgmr.msra.gmra.mxu3 %v8361_v58  ;;  %v3232_v34 = vpop.f32.mrf.mxu2  ;;  %3523 = vmatmul.bf16.gmra.mxu1 %v8374_v15 }
  0xb1   : > { %v3233_v41 = vadd.f32 %v3232_v34, %v8355_v53  ;;  %3580 = vmatpush.bf16.msrb.mxu3 %v6229_v13  ;;  %11620 = vst [vmem:[#allocation12_spill] sm:$0xff] %v8437_v44  ;;  %v8454_v13 = vor.u32 %v7152_v48, %v5342_v49  ;;  %3612 = vmatpush.bf16.msrb.mxu0 %v6301_v56  ;;  %v6220_v56 = vld [vmem:[%s11529_s1 + $0x5a0] sm:$0xf] }
  0xb2   : > { %v3224_v43 = vpop.f32.mrf.mxu0 }
  0xb3   : > { %v3265_v42 = vpop.f32.mrf.mxu3  ;;  %v3225_v46 = vadd.f32 %v3224_v43, %v8355_v53  ;;  %v8435_v43 = vor.u32 %v7139_v14, %v5236_v11  ;;  %v7395_v11 = vld [vmem:[%s11529_s1 + $0x634] sm:$0xf0]  ;;  %11622 = vst [vmem:[#allocation14_spill] sm:$0xff] %v8454_v13 }
  0xb4   : > { %v8399_v45 = vadd.f32 %v3265_v42, %v3233_v41  ;;  %v6293_v16 = vor.u32 %v7395_v11, %v6292_v10  ;;  %v6276_v11 = vld [vmem:[%s11529_s1 + $0x610] sm:$0xf] }
  0xb5   : > { %v3257_v21 = vpop.f32.mrf.mxu1  ;;  %11619 = vst [vmem:[#allocation11_spill] sm:$0xff] %v8435_v43 }
  0xb6   : > { %v8426_v32 = vadd.f32 %v3257_v21, %v3225_v46  ;;  %v8439_v46 = vor.u32 %v7127_v25, %v5238_v30  ;;  %v7361_v21 = vld [vmem:[%s11529_s1 + $0x524] sm:$0xf0]  ;;  %3613 = vmatpush.bf16.msrb.mxu0 %v6293_v16  ;;  %v5332_v16 = vld [vmem:[%s7767_s12 + $0x198] sm:$0xf] }
  0xb7   : > { %v6157_v25 = vor.u32 %v7361_v21, %v6156_v17  ;;  %v7163_v17 = vld [vmem:[%s7767_s12 + $0x1f4] sm:$0xf0]  ;;  %v5436_v21 = vld [vmem:[%s7767_s12 + $0x260] sm:$0xf] }
  0xb8   : > { %v3234_v34 = vpop.f32.mrf.mxu2  ;;  %11621 = vst [vmem:[#allocation13_spill] sm:$0xff] %v8439_v46 }
  0xb9   : > { %v3235_v41 = vadd.f32 %v3234_v34, %v8355_v53  ;;  %v6284_v34 = vld [vmem:[%s11529_s1 + $0x620] sm:$0xf]  ;;  %3548 = vmatpush.bf16.msrb.mxu2 %v6157_v25 }
  0xba   : > { %v3227_v47 = vpop.f32.mrf.mxu0  ;;  %v7188_v25 = vld [vmem:[%s7767_s12 + $0x2bc] sm:$0xf0] }
  0xbb   : > { %v3267_v42 = vpop.f32.mrf.mxu3  ;;  %v3228_v8 = vadd.f32 %v3227_v47, %v8355_v53  ;;  %v6285_v47 = vor.u32 %v7393_v37, %v6284_v34  ;;  %v7151_v37 = vld [vmem:[%s7767_s12 + $0x19c] sm:$0xf] }
  0xbc   : > { %v8443_v3 = vadd.f32 %v3267_v42, %v3235_v41 }
  0xbd   : > { %3424 = vmatmul.bf16.gmra.mxu2 %v8435_v43  ;;  %3495 = vmatmul.bf16.gmra.mxu0 %v8437_v44  ;;  %v3260_v14 = vpop.f32.mrf.mxu1  ;;  %v7176_v44 = vld [vmem:[%s7767_s12 + $0x264] sm:$0xf] }
  0xbe   : > { %v8463_v22 = vadd.f32 %v3260_v14, %v3228_v8  ;;  %v7377_v8 = vld [vmem:[%s11529_s1 + $0x5a4] sm:$0xf0]  ;;  %v7391_v14 = vld [vmem:[%s11529_s1 + $0x614] sm:$0xf0]  ;;  %3614 = vmatpush.bf16.msrb.mxu0 %v6285_v47  ;;  %v6388_v47 = vld [vmem:[%s11529_s1 + $0x6f0] sm:$0xf] }
  0xbf   : > { %v6221_v10 = vor.u32 %v7377_v8, %v6220_v56  ;;  %v6277_v34 = vor.u32 %v7391_v14, %v6276_v11  ;;  %v6268_v56 = vld [vmem:[%s11529_s1 + $0x600] sm:$0xf]  ;;  %v7389_v8 = vld [vmem:[%s11529_s1 + $0x604] sm:$0xf0]  ;;  %v8506_v14 = vor.u32 %v7163_v17, %v5332_v16  ;;  %v5438_v43 = vld [vmem:[%s7767_s12 + $0x2c0] sm:$0xf0] }
  0xc0   : > { %3457 = vmatmul.bf16.gmra.mxu3 %v8439_v46  ;;  %v3237_v30 = vpop.f32.mrf.mxu2  ;;  %3528 = vmatmul.bf16.gmra.mxu1 %v8454_v13  ;;  %v6148_v16 = vld [vmem:[%s11529_s1 + $0x510] sm:$0xf]  ;;  %v7359_v17 = vld [vmem:[%s11529_s1 + $0x514] sm:$0xf0] }
  0xc1   : > { %v3238_v38 = vadd.f32 %v3237_v30, %v8355_v53  ;;  %3581 = vmatpush.bf16.msrb.mxu3 %v6221_v10  ;;  %11623 = vst [vmem:[#allocation15_spill] sm:$0xff] %v8506_v14 }
  0xc2   : > { %v3229_v42 = vpop.f32.mrf.mxu0  ;;  %3615 = vmatpush.bf16.msrb.mxu0 %v6277_v34  ;;  %v7375_v34 = vld [vmem:[%s11529_s1 + $0x594] sm:$0xf0] }
  0xc3   : > { %v3270_v41 = vpop.f32.mrf.mxu3  ;;  %v3230_v49 = vadd.f32 %v3229_v42, %v8355_v53 }
  0xc4   : > { %v8473_v48 = vadd.f32 %v3270_v41, %v3238_v38  ;;  %v5334_v38 = vld [vmem:[%s7767_s12 + $0x1f8] sm:$0xf0] }
  0xc5   : > { %v3262_v30 = vpop.f32.mrf.mxu1  ;;  %v8515_v46 = vor.u32 %v7151_v37, %v5334_v38  ;;  %v6149_v37 = vor.u32 %v7359_v17, %v6148_v16  ;;  %v8535_v38 = vor.u32 %v7176_v44, %v5438_v43  ;;  %v6372_v44 = vld [vmem:[%s11529_s1 + $0x6d0] sm:$0xf] }
  0xc6   : > { %v8494_v41 = vadd.f32 %v3262_v30, %v3230_v49  ;;  %v8508_v49 = vor.u32 %v7188_v25, %v5436_v21  ;;  %v7419_v30 = vld [vmem:[%s11529_s1 + $0x6f4] sm:$0xf0]  ;;  %v6269_v21 = vor.u32 %v7389_v8, %v6268_v56  ;;  %v6212_v25 = vld [vmem:[%s11529_s1 + $0x590] sm:$0xf]  ;;  %v6380_v56 = vld [vmem:[%s11529_s1 + $0x6e0] sm:$0xf] }
  0xc7   : > { %11625 = vst [vmem:[#allocation17_spill] sm:$0xff] %v8515_v46  ;;  %v6389_v15 = vor.u32 %v7419_v30, %v6388_v47  ;;  %v7417_v8 = vld [vmem:[%s11529_s1 + $0x6e4] sm:$0xf0]  ;;  %3549 = vmatpush.bf16.msrb.mxu2 %v6149_v37  ;;  %v6140_v37 = vld [vmem:[%s11529_s1 + $0x500] sm:$0xf] }
  0xc8   : > { %v3239_v42 = vpop.f32.mrf.mxu2  ;;  %11624 = vst [vmem:[#allocation16_spill] sm:$0xff] %v8508_v49  ;;  %v6381_v47 = vor.u32 %v7417_v8, %v6380_v56  ;;  %3616 = vmatpush.bf16.msrb.mxu0 %v6269_v21  ;;  %v331_v21 = vld [vmem:[%s7767_s12 + $0x320] sm:$0xff]  ;;  %v7373_v56 = vld [vmem:[%s11529_s1 + $0x584] sm:$0xf0] }
  0xc9   : > { %v3240_v10 = vadd.f32 %v3239_v42, %v8355_v53  ;;  %3642 = vmatpush.bf16.msrb.mxu1 %v6389_v15  ;;  %11626 = vst [vmem:[#allocation18_spill] sm:$0xff] %v8535_v38  ;;  %v6213_v42 = vor.u32 %v7375_v34, %v6212_v25  ;;  %v6204_v34 = vld [vmem:[%s11529_s1 + $0x580] sm:$0xf] }
  0xca   : > { %v8513_v13 = vpop.f32.mrf.mxu0  ;;  %v6364_v8 = vld [vmem:[%s11529_s1 + $0x6c0] sm:$0xf] }
  0xcb   : > { %v3272_v11 = vpop.f32.mrf.mxu3  ;;  %3582 = vmatpush.bf16.msrb.mxu3 %v6213_v42 }
  0xcc   : > { %v8519_v58 = vadd.f32 %v3272_v11, %v3240_v10  ;;  %v7415_v10 = vld [vmem:[%s11529_s1 + $0x6d4] sm:$0xf0] }
  0xcd   : > { %3429 = vmatmul.bf16.gmra.mxu2 %v8506_v14  ;;  %3500 = vmatmul.bf16.gmra.mxu0 %v8508_v49  ;;  %v8544_v15 = vpop.f32.mrf.mxu1  ;;  %v6373_v16 = vor.u32 %v7415_v10, %v6372_v44  ;;  %v6205_v44 = vor.u32 %v7373_v56, %v6204_v34  ;;  %v7411_v49 = vld [vmem:[%s11529_s1 + $0x6b4] sm:$0xf0] }
  0xce   : > { %3643 = vmatpush.bf16.msrb.mxu1 %v6381_v47  ;;  %v7413_v47 = vld [vmem:[%s11529_s1 + $0x6c4] sm:$0xf0] }
  0xcf   : > { %v6365_v10 = vor.u32 %v7413_v47, %v6364_v8  ;;  %3583 = vmatpush.bf16.msrb.mxu3 %v6205_v44  ;;  %v1038_v47 = vunpack.c.h.b16 %v331_v21 }
  0xd0   : > { %3462 = vmatmul.bf16.gmra.mxu3 %v8515_v46  ;;  %v3242_v43 = vpop.f32.mrf.mxu2  ;;  %3533 = vmatmul.bf16.gmra.mxu1 %v8535_v38  ;;  %v6356_v46 = vld [vmem:[%s11529_s1 + $0x6b0] sm:$0xf] }
  0xd1   : > { %v3243_v11 = vadd.f32 %v3242_v43, %v8355_v53  ;;  %v7357_v53 = vld [vmem:[%s11529_s1 + $0x504] sm:$0xf0]  ;;  %v1037_v43 = vunpack.c.l.b16 %v331_v21 }
  0xd2   : > { %v8554_v17 = vpop.f32.mrf.mxu0  ;;  %3644 = vmatpush.bf16.msrb.mxu1 %v6373_v16  ;;  %v6141_v42 = vor.u32 %v7357_v53, %v6140_v37  ;;  %v7175_v16 = vld [vmem:[%s7767_s12 + $0x25c] sm:$0xf]  ;;  %v7409_v21 = vld [vmem:[%s11529_s1 + $0x6a4] sm:$0xf0] }
  0xd3   : > { %v3275_v30 = vpop.f32.mrf.mxu3  ;;  %v5430_v37 = vld [vmem:[%s7767_s12 + $0x2b8] sm:$0xf0]  ;;  %v8591_v8 = vpack.c.b16 %v1037_v43, %v1037_v43  ;;  %v7435_v43 = vld [vmem:[%s11529_s1 + $0x774] sm:$0xf0] }
  0xd4   : > { %v8557_v25 = vadd.f32 %v3275_v30, %v3243_v11  ;;  %v5428_v11 = vld [vmem:[%s7767_s12 + $0x258] sm:$0xf]  ;;  %3550 = vmatpush.bf16.msrb.mxu2 %v6141_v42  ;;  %v6357_v42 = vor.u32 %v7411_v49, %v6356_v46  ;;  %v8595_v44 = vor.u32 %v7175_v16, %v5430_v37  ;;  %v6452_v49 = vld [vmem:[%s11529_s1 + $0x770] sm:$0xf] }
  0xd5   : > { %v7187_v30 = vld [vmem:[%s7767_s12 + $0x2b4] sm:$0xf0]  ;;  %v8579_v38 = vpop.f32.mrf.mxu1  ;;  %11628 = vst [vmem:[#allocation20_spill] sm:$0xff] %v8591_v8  ;;  %v6453_v16 = vor.u32 %v7435_v43, %v6452_v49  ;;  %v6516_v37 = vld [vmem:[%s11529_s1 + $0x7f0] sm:$0xf] }
  0xd6   : > { %3645 = vmatpush.bf16.msrb.mxu1 %v6365_v10  ;;  %v8589_v56 = vor.u32 %v7187_v30, %v5428_v11  ;;  %11629 = vst [vmem:[#allocation21_spill] sm:$0xff] %v8595_v44  ;;  %v8599_v10 = vpack.c.b16 %v1038_v47, %v1038_v47  ;;  %v6348_v11 = vld [vmem:[%s11529_s1 + $0x6a0] sm:$0xf] }
  0xd7   : > { %v6349_v30 = vor.u32 %v7409_v21, %v6348_v11  ;;  %v7407_v11 = vld [vmem:[%s11529_s1 + $0x694] sm:$0xf0] }
  0xd8   : > { %v3244_v53 = vpop.f32.mrf.mxu2  ;;  %11627 = vst [vmem:[#allocation19_spill] sm:$0xff] %v8589_v56  ;;  %3675 = vmatpush.bf16.msra.mxu2 %v6453_v16 }
  0xd9   : > { %11630 = vst [vmem:[#allocation22_spill] sm:$0xff] %v8599_v10  ;;  %v7451_v53 = vld [vmem:[%s11529_s1 + $0x7f4] sm:$0xf0] }
  0xda   : > { %v8593_v14 = vpop.f32.mrf.mxu0  ;;  %3646 = vmatpush.bf16.msrb.mxu1 %v6357_v42  ;;  %v6517_v47 = vor.u32 %v7451_v53, %v6516_v37  ;;  %v6340_v42 = vld [vmem:[%s11529_s1 + $0x690] sm:$0xf]  ;;  %v6332_v53 = vld [vmem:[%s11529_s1 + $0x680] sm:$0xf] }
  0xdb   : > { %v3277_v34 = vpop.f32.mrf.mxu3  ;;  %v6341_v43 = vor.u32 %v7407_v11, %v6340_v42  ;;  %v5164_v42 = vld [vmem:[%s7767_s12 + $0x30] sm:$0xf] }
  0xdc   : > { %3708 = vmatpush.bf16.msra.mxu3 %v6517_v47  ;;  %v7118_v11 = vld [vmem:[%s7767_s12 + $0x8c] sm:$0xf0] }
  0xdd   : > { %3434 = vmatmul.bf16.gmra.mxu2 %v8589_v56  ;;  %3505 = vmatmul.bf16.gmra.mxu0 %v8591_v8  ;;  %v8608_v46 = vpop.f32.mrf.mxu1  ;;  %v8656_v56 = vor.u32 %v7118_v11, %v5164_v42  ;;  %v8673_v42 = vor.u32 %v7106_v55, %v5166_v54  ;;  %v6436_v55 = vld [vmem:[%s11529_s1 + $0x750] sm:$0xf] }
  0xde   : > { %3647 = vmatpush.bf16.msrb.mxu1 %v6349_v30  ;;  %v330_v30 = vld [vmem:[%s7767_s12 + $0x318] sm:$0xff] }
  0xdf   : > { %v1035_v8 = vunpack.c.l.b16 %v330_v30  ;;  %v1036_v16 = vunpack.c.h.b16 %v330_v30  ;;  %11632 = vst [vmem:[#allocation24_spill] sm:$0xff] %v8656_v56 }
  0xe0   : > { %3467 = vmatmul.bf16.gmra.mxu3 %v8595_v44  ;;  %v3288_v34 = vpop.f32.mrf.mxu2  ;;  %3538 = vmatmul.bf16.gmra.mxu1 %v8599_v10  ;;  %11634 = vst [vmem:[#allocation26_spill] sm:$0xff] %v8673_v42 }
  0xe1   : > { %v3289_v21 = vadd.f32 %v3288_v34, %v8389_v29  ;;  %v7405_v29 = vld [vmem:[%s11529_s1 + $0x684] sm:$0xf0] }
  0xe2   : > { %v8630_v44 = vpop.f32.mrf.mxu0  ;;  %3648 = vmatpush.bf16.msrb.mxu1 %v6341_v43  ;;  %v6333_v10 = vor.u32 %v7405_v29, %v6332_v53  ;;  %v8654_v29 = vpack.c.b16 %v1035_v8, %v1035_v8 }
  0xe3   : > { %v3321_v49 = vpop.f32.mrf.mxu3 }
  0xe4   : > { %v3322_v37 = vadd.f32 %v3321_v49, %v3289_v21  ;;  %v6444_v49 = vld [vmem:[%s11529_s1 + $0x760] sm:$0xf]  ;;  %11631 = vst [vmem:[#allocation23_spill] sm:$0xff] %v8654_v29 }
  0xe5   : > { %v8642_v47 = vpop.f32.mrf.mxu1 }
  0xe6   : > { %v3355_v34 = vadd.f32 %v8513_v13, %v3322_v37  ;;  %v7433_v13 = vld [vmem:[%s11529_s1 + $0x764] sm:$0xf0]  ;;  %3649 = vmatpush.bf16.msrb.mxu1 %v6333_v10  ;;  %v6508_v10 = vld [vmem:[%s11529_s1 + $0x7e0] sm:$0xf] }
  0xe7   : > { %v6445_v30 = vor.u32 %v7433_v13, %v6444_v49 }
  0xe8   : > { %v8645_v21 = vadd.f32 %v8544_v15, %v3355_v34  ;;  %v3290_v43 = vpop.f32.mrf.mxu2  ;;  %v8660_v34 = vpack.c.b16 %v1036_v16, %v1036_v16 }
  0xe9   : > { %v3291_v37 = vadd.f32 %v3290_v43, %v8426_v32  ;;  %3676 = vmatpush.bf16.msra.mxu2 %v6445_v30  ;;  %v7449_v32 = vld [vmem:[%s11529_s1 + $0x7e4] sm:$0xf0] }
  0xea   : > { %v8658_v15 = vpop.f32.mrf.mxu0  ;;  %11633 = vst [vmem:[#allocation25_spill] sm:$0xff] %v8660_v34  ;;  %v6509_v8 = vor.u32 %v7449_v32, %v6508_v10  ;;  %v5156_v10 = vld [vmem:[%s7767_s12 + $0x28] sm:$0xf] }
  0xeb   : > { %v3323_v53 = vpop.f32.mrf.mxu3 }
  0xec   : > { %v3324_v31 = vadd.f32 %v3323_v53, %v3291_v37  ;;  %3709 = vmatpush.bf16.msra.mxu3 %v6509_v8  ;;  %v7447_v37 = vld [vmem:[%s11529_s1 + $0x7d4] sm:$0xf0]  ;;  %v7117_v8 = vld [vmem:[%s7767_s12 + $0x84] sm:$0xf0] }
  0xed   : > { %3439 = vmatmul.bf16.gmra.mxu2 %v8654_v29  ;;  %3617 = vmatmul.bf16.vlgmr.msrb.gmra.mxu0 %v8656_v56  ;;  %v8676_v11 = vpop.f32.mrf.mxu1  ;;  %v7130_v29 = vld [vmem:[%s7767_s12 + $0xf4] sm:$0xf] }
  0xee   : > { %v3357_v16 = vadd.f32 %v8554_v17, %v3324_v31 }
  0xf0   : > { %3472 = vmatmul.bf16.gmra.mxu3 %v8660_v34  ;;  %v8679_v49 = vadd.f32 %v8579_v38, %v3357_v16  ;;  %v3293_v13 = vpop.f32.mrf.mxu2  ;;  %3650 = vmatmul.bf16.vlgmr.msrb.gmra.mxu1 %v8673_v42  ;;  %v7431_v38 = vld [vmem:[%s11529_s1 + $0x754] sm:$0xf0]  ;;  %v5260_v16 = vld [vmem:[%s7767_s12 + $0xf0] sm:$0xf] }
  0xf1   : > { %v3294_v43 = vadd.f32 %v3293_v13, %v8463_v22  ;;  %v6500_v22 = vld [vmem:[%s11529_s1 + $0x7d0] sm:$0xf]  ;;  %v6437_v17 = vor.u32 %v7431_v38, %v6436_v55  ;;  %v7105_v55 = vld [vmem:[%s7767_s12 + $0x2c] sm:$0xf] }
  0xf2   : > { %v8683_v31 = vpop.f32.mrf.mxu0  ;;  %v6501_v32 = vor.u32 %v7447_v37, %v6500_v22  ;;  %v7142_v13 = vld [vmem:[%s7767_s12 + $0x14c] sm:$0xf0]  ;;  %v5158_v38 = vld [vmem:[%s7767_s12 + $0x88] sm:$0xf0] }
  0xf3   : > { %v3326_v30 = vpop.f32.mrf.mxu3  ;;  %3677 = vmatpush.bf16.msra.mxu2 %v6437_v17  ;;  %v8712_v22 = vor.u32 %v7142_v13, %v5260_v16  ;;  %v8716_v56 = vor.u32 %v7105_v55, %v5158_v38  ;;  %v5262_v17 = vld [vmem:[%s7767_s12 + $0x150] sm:$0xf0]  ;;  %v7445_v16 = vld [vmem:[%s11529_s1 + $0x7c4] sm:$0xf0]  ;;  %v6572_v38 = vld [vmem:[%s11529_s1 + $0x860] sm:$0xf] }
  0xf4   : > { %v3327_v54 = vadd.f32 %v3326_v30, %v3294_v43  ;;  %3710 = vmatpush.bf16.msra.mxu3 %v6501_v32 }
  0xf5   : > { %v8702_v43 = vpop.f32.mrf.mxu1  ;;  %11636 = vst [vmem:[#allocation28_spill] sm:$0xff] %v8712_v22 }
  0xf6   : > { %v3360_v53 = vadd.f32 %v8593_v14, %v3327_v54  ;;  %v8710_v54 = vor.u32 %v7117_v8, %v5156_v10  ;;  %11637 = vst [vmem:[#allocation29_spill] sm:$0xff] %v8716_v56  ;;  %v8729_v10 = vor.u32 %v7130_v29, %v5262_v17  ;;  %v6492_v8 = vld [vmem:[%s11529_s1 + $0x7c0] sm:$0xf] }
  0xf7   : > { %v6493_v29 = vor.u32 %v7445_v16, %v6492_v8  ;;  %v6564_v8 = vld [vmem:[%s11529_s1 + $0x850] sm:$0xf]  ;;  %v7463_v16 = vld [vmem:[%s11529_s1 + $0x854] sm:$0xf0] }
  0xf8   : > { %v8705_v30 = vadd.f32 %v8608_v46, %v3360_v53  ;;  %v3295_v42 = vpop.f32.mrf.mxu2  ;;  %11635 = vst [vmem:[#allocation27_spill] sm:$0xff] %v8710_v54  ;;  %v6428_v46 = vld [vmem:[%s11529_s1 + $0x740] sm:$0xf] }
  0xf9   : > { %v3296_v34 = vadd.f32 %v3295_v42, %v8494_v41  ;;  %v7429_v41 = vld [vmem:[%s11529_s1 + $0x744] sm:$0xf0]  ;;  %11638 = vst [vmem:[#allocation30_spill] sm:$0xff] %v8729_v10  ;;  %3711 = vmatpush.bf16.msra.mxu3 %v6493_v29 }
  0xfa   : > { %v8714_v37 = vpop.f32.mrf.mxu0  ;;  %v6429_v42 = vor.u32 %v7429_v41, %v6428_v46  ;;  %v5252_v29 = vld [vmem:[%s7767_s12 + $0xe8] sm:$0xf] }
  0xfb   : > { %v3328_v14 = vpop.f32.mrf.mxu3 }
  0xfc   : > { %v3329_v20 = vadd.f32 %v3328_v14, %v3296_v34  ;;  %v6580_v34 = vld [vmem:[%s11529_s1 + $0x870] sm:$0xf]  ;;  %3678 = vmatpush.bf16.msra.mxu2 %v6429_v42  ;;  %v7465_v14 = vld [vmem:[%s11529_s1 + $0x864] sm:$0xf0] }
  0xfd   : > { %3551 = vmatmul.bf16.vlgmr.msrb.gmra.mxu2 %v8710_v54  ;;  %3622 = vmatmul.bf16.gmra.mxu0 %v8712_v22  ;;  %v8735_v32 = vpop.f32.mrf.mxu1  ;;  %v6573_v41 = vor.u32 %v7465_v14, %v6572_v38  ;;  %v5356_v38 = vld [vmem:[%s7767_s12 + $0x1b0] sm:$0xf] }
  0xfe   : > { %v3362_v53 = vadd.f32 %v8630_v44, %v3329_v20  ;;  %v7467_v20 = vld [vmem:[%s11529_s1 + $0x874] sm:$0xf0]  ;;  %v7166_v14 = vld [vmem:[%s7767_s12 + $0x20c] sm:$0xf0] }
  0xff   : > { %v6581_v13 = vor.u32 %v7467_v20, %v6580_v34 }
 0x100   : > { %3584 = vmatmul.bf16.vlgmr.msrb.gmra.mxu3 %v8716_v56  ;;  %v8747_v44 = vadd.f32 %v8642_v47, %v3362_v53  ;;  %v3298_v55 = vpop.f32.mrf.mxu2  ;;  %3655 = vmatmul.bf16.gmra.mxu1 %v8729_v10  ;;  %v6420_v53 = vld [vmem:[%s11529_s1 + $0x730] sm:$0xf] }
 0x101   : > { %v3299_v17 = vadd.f32 %v3298_v55, %v8399_v45  ;;  %3741 = vmatpush.bf16.msra.mxu0 %v6581_v13  ;;  %v7427_v45 = vld [vmem:[%s11529_s1 + $0x734] sm:$0xf0]  ;;  %v7141_v13 = vld [vmem:[%s7767_s12 + $0x144] sm:$0xf0]  ;;  %v7129_v55 = vld [vmem:[%s7767_s12 + $0xec] sm:$0xf] }
 0x102   : > { %v8757_v47 = vpop.f32.mrf.mxu0  ;;  %v6421_v34 = vor.u32 %v7427_v45, %v6420_v53  ;;  %v5254_v45 = vld [vmem:[%s7767_s12 + $0x148] sm:$0xf0] }
 0x103   : > { %v3331_v46 = vpop.f32.mrf.mxu3  ;;  %v8802_v54 = vor.u32 %v7129_v55, %v5254_v45  ;;  %v6412_v55 = vld [vmem:[%s11529_s1 + $0x720] sm:$0xf] }
 0x104   : > { %v3332_v42 = vadd.f32 %v3331_v46, %v3299_v17  ;;  %3679 = vmatpush.bf16.msra.mxu2 %v6421_v34  ;;  %v6565_v46 = vor.u32 %v7463_v16, %v6564_v8  ;;  %v8796_v16 = vor.u32 %v7141_v13, %v5252_v29 }
 0x105   : > { %v8777_v17 = vpop.f32.mrf.mxu1  ;;  %3742 = vmatpush.bf16.msra.mxu0 %v6573_v41  ;;  %v6556_v41 = vld [vmem:[%s11529_s1 + $0x840] sm:$0xf]  ;;  %11641 = vst [vmem:[#allocation33_spill] sm:$0xff] %v8802_v54 }
 0x106   : > { %v3365_v20 = vadd.f32 %v8658_v15, %v3332_v42  ;;  %v6484_v15 = vld [vmem:[%s11529_s1 + $0x7b0] sm:$0xf]  ;;  %v7443_v42 = vld [vmem:[%s11529_s1 + $0x7b4] sm:$0xf0]  ;;  %11639 = vst [vmem:[#allocation31_spill] sm:$0xff] %v8796_v16 }
 0x107   : > { %v6485_v56 = vor.u32 %v7443_v42, %v6484_v15  ;;  %v7154_v15 = vld [vmem:[%s7767_s12 + $0x1b4] sm:$0xf] }
 0x108   : > { %v8780_v53 = vadd.f32 %v8676_v11, %v3365_v20  ;;  %v3300_v10 = vpop.f32.mrf.mxu2  ;;  %v7461_v11 = vld [vmem:[%s11529_s1 + $0x844] sm:$0xf0]  ;;  %v8798_v20 = vor.u32 %v7166_v14, %v5356_v38  ;;  %v5358_v42 = vld [vmem:[%s7767_s12 + $0x210] sm:$0xf0] }
 0x109   : > { %v3301_v34 = vadd.f32 %v3300_v10, %v8443_v3  ;;  %3743 = vmatpush.bf16.msra.mxu0 %v6565_v46  ;;  %3712 = vmatpush.bf16.msra.mxu3 %v6485_v56  ;;  %v6557_v19 = vor.u32 %v7461_v11, %v6556_v41  ;;  %v7459_v3 = vld [vmem:[%s11529_s1 + $0x834] sm:$0xf0]  ;;  %v8815_v29 = vor.u32 %v7154_v15, %v5358_v42  ;;  %v7425_v38 = vld [vmem:[%s11529_s1 + $0x724] sm:$0xf0]  ;;  %v6540_v46 = vld [vmem:[%s11529_s1 + $0x820] sm:$0xf] }
 0x10a   : > { %11640 = vst [vmem:[#allocation32_spill] sm:$0xff] %v8798_v20  ;;  %v8800_v22 = vpop.f32.mrf.mxu0  ;;  %v6549_v13 = vor.u32 %v7459_v3, %v6548_v40  ;;  %v7457_v40 = vld [vmem:[%s11529_s1 + $0x824] sm:$0xf0]  ;;  %v6532_v15 = vld [vmem:[%s11529_s1 + $0x810] sm:$0xf] }
 0x10b   : > { %v3333_v8 = vpop.f32.mrf.mxu3  ;;  %11642 = vst [vmem:[#allocation34_spill] sm:$0xff] %v8815_v29  ;;  %v6541_v41 = vor.u32 %v7457_v40, %v6540_v46  ;;  %v7455_v42 = vld [vmem:[%s11529_s1 + $0x814] sm:$0xf0]  ;;  %v7153_v40 = vld [vmem:[%s7767_s12 + $0x1ac] sm:$0xf] }
 0x10c   : > { %v3334_v18 = vadd.f32 %v3333_v8, %v3301_v34  ;;  %v6476_v34 = vld [vmem:[%s11529_s1 + $0x7a0] sm:$0xf] }
 0x10d   : > { %3556 = vmatmul.bf16.gmra.mxu2 %v8796_v16  ;;  %3627 = vmatmul.bf16.gmra.mxu0 %v8798_v20  ;;  %v8818_v56 = vpop.f32.mrf.mxu1  ;;  %v6804_v16 = vld [vmem:[%s11529_s1 + $0xa30] sm:$0xf] }
 0x10e   : > { %v3367_v10 = vadd.f32 %v8683_v31, %v3334_v18  ;;  %3744 = vmatpush.bf16.msra.mxu0 %v6557_v19  ;;  %v6413_v18 = vor.u32 %v7425_v38, %v6412_v55  ;;  %v5452_v55 = vld [vmem:[%s7767_s12 + $0x270] sm:$0xf] }
 0x10f   : > { %v7190_v38 = vld [vmem:[%s7767_s12 + $0x2cc] sm:$0xf0] }
 0x110   : > { %3589 = vmatmul.bf16.gmra.mxu3 %v8802_v54  ;;  %v8827_v14 = vadd.f32 %v8702_v43, %v3367_v10  ;;  %v3303_v31 = vpop.f32.mrf.mxu2  ;;  %3660 = vmatmul.bf16.gmra.mxu1 %v8815_v29  ;;  %v5348_v10 = vld [vmem:[%s7767_s12 + $0x1a8] sm:$0xf] }
 0x111   : > { %v3304_v19 = vadd.f32 %v3303_v31, %v8473_v48  ;;  %3680 = vmatpush.bf16.msra.mxu2 %v6413_v18  ;;  %v7441_v48 = vld [vmem:[%s11529_s1 + $0x7a4] sm:$0xf0]  ;;  %v6533_v31 = vor.u32 %v7455_v42, %v6532_v15 }
 0x112   : > { %v3376_v43 = vpop.f32.mrf.mxu0  ;;  %3745 = vmatpush.bf16.msra.mxu0 %v6549_v13  ;;  %v6477_v8 = vor.u32 %v7441_v48, %v6476_v34  ;;  %v7165_v13 = vld [vmem:[%s7767_s12 + $0x204] sm:$0xf0]  ;;  %v8871_v48 = vor.u32 %v7190_v38, %v5452_v55  ;;  %v6468_v55 = vld [vmem:[%s11529_s1 + $0x790] sm:$0xf] }
 0x113   : > { %v3336_v45 = vpop.f32.mrf.mxu3  ;;  %v7453_v43 = vld [vmem:[%s11529_s1 + $0x804] sm:$0xf0]  ;;  %v8869_v34 = vor.u32 %v7165_v13, %v5348_v10  ;;  %v7423_v10 = vld [vmem:[%s11529_s1 + $0x714] sm:$0xf0] }
 0x114   : > { %v3337_v11 = vadd.f32 %v3336_v45, %v3304_v19  ;;  %3713 = vmatpush.bf16.msra.mxu3 %v6477_v8  ;;  %v5350_v19 = vld [vmem:[%s7767_s12 + $0x208] sm:$0xf0]  ;;  %11644 = vst [vmem:[#allocation36_spill] sm:$0xff] %v8871_v48  ;;  %v7483_v8 = vld [vmem:[%s11529_s1 + $0x8f4] sm:$0xf0] }
 0x115   : > { %v3409_v18 = vpop.f32.mrf.mxu1  ;;  %11643 = vst [vmem:[#allocation35_spill] sm:$0xff] %v8869_v34  ;;  %v8878_v42 = vor.u32 %v7153_v40, %v5350_v19 }
 0x116   : > { %v3370_v3 = vadd.f32 %v8714_v37, %v3337_v11  ;;  %3746 = vmatpush.bf16.msra.mxu0 %v6541_v41  ;;  %v6524_v37 = vld [vmem:[%s11529_s1 + $0x800] sm:$0xf]  ;;  %v6644_v41 = vld [vmem:[%s11529_s1 + $0x8f0] sm:$0xf]  ;;  %v5454_v18 = vld [vmem:[%s7767_s12 + $0x2d0] sm:$0xf0] }
 0x117   : > { %11645 = vst [vmem:[#allocation37_spill] sm:$0xff] %v8878_v42  ;;  %v6645_v29 = vor.u32 %v7483_v8, %v6644_v41  ;;  %v6525_v13 = vor.u32 %v7453_v43, %v6524_v37  ;;  %v6636_v37 = vld [vmem:[%s11529_s1 + $0x8e0] sm:$0xf] }
 0x118   : > { %v8855_v46 = vadd.f32 %v8735_v32, %v3370_v3  ;;  %v3305_v45 = vpop.f32.mrf.mxu2  ;;  %v7178_v3 = vld [vmem:[%s7767_s12 + $0x274] sm:$0xf] }
 0x119   : > { %v3306_v11 = vadd.f32 %v3305_v45, %v8519_v58  ;;  %v6404_v58 = vld [vmem:[%s11529_s1 + $0x710] sm:$0xf]  ;;  %3774 = vmatpush.bf16.msra.mxu1 %v6645_v29  ;;  %v8897_v19 = vor.u32 %v7178_v3, %v5454_v18  ;;  %v7481_v29 = vld [vmem:[%s11529_s1 + $0x8e4] sm:$0xf0] }
 0x11a   : > { %v8876_v15 = vpop.f32.mrf.mxu0  ;;  %3747 = vmatpush.bf16.msra.mxu0 %v6533_v31  ;;  %v6405_v38 = vor.u32 %v7423_v10, %v6404_v58  ;;  %v7439_v31 = vld [vmem:[%s11529_s1 + $0x794] sm:$0xf0]  ;;  %v6637_v41 = vor.u32 %v7481_v29, %v6636_v37  ;;  %v333_v58 = vld [vmem:[%s7767_s12 + $0x330] sm:$0xff] }
 0x11b   : > { %v3338_v32 = vpop.f32.mrf.mxu3  ;;  %11646 = vst [vmem:[#allocation38_spill] sm:$0xff] %v8897_v19  ;;  %v6469_v45 = vor.u32 %v7439_v31, %v6468_v55  ;;  %v7421_v55 = vld [vmem:[%s11529_s1 + $0x704] sm:$0xf0]  ;;  %v1041_v29 = vunpack.c.l.b16 %v333_v58 }
 0x11c   : > { %v3339_v54 = vadd.f32 %v3338_v32, %v3306_v11  ;;  %3681 = vmatpush.bf16.msra.mxu2 %v6405_v38  ;;  %v6628_v11 = vld [vmem:[%s11529_s1 + $0x8d0] sm:$0xf]  ;;  %v7479_v32 = vld [vmem:[%s11529_s1 + $0x8d4] sm:$0xf0]  ;;  %v7437_v31 = vld [vmem:[%s11529_s1 + $0x784] sm:$0xf0] }
 0x11d   : > { %3561 = vmatmul.bf16.gmra.mxu2 %v8869_v34  ;;  %3632 = vmatmul.bf16.gmra.mxu0 %v8871_v48  ;;  %v8906_v43 = vpop.f32.mrf.mxu1  ;;  %v6629_v18 = vor.u32 %v7479_v32, %v6628_v11  ;;  %v5444_v11 = vld [vmem:[%s7767_s12 + $0x268] sm:$0xf] }
 0x11e   : > { %v3372_v40 = vadd.f32 %v8757_v47, %v3339_v54  ;;  %3748 = vmatpush.bf16.msra.mxu0 %v6525_v13  ;;  %3714 = vmatpush.bf16.msra.mxu3 %v6469_v45  ;;  %v6396_v13 = vld [vmem:[%s11529_s1 + $0x700] sm:$0xf]  ;;  %v7477_v45 = vld [vmem:[%s11529_s1 + $0x8c4] sm:$0xf0] }
 0x11f   : > { %3775 = vmatpush.bf16.msra.mxu1 %v6637_v41  ;;  %v6397_v38 = vor.u32 %v7421_v55, %v6396_v13  ;;  %v7189_v32 = vld [vmem:[%s7767_s12 + $0x2c4] sm:$0xf0]  ;;  %v5446_v13 = vld [vmem:[%s7767_s12 + $0x2c8] sm:$0xf0] }
 0x120   : > { %3594 = vmatmul.bf16.gmra.mxu3 %v8878_v42  ;;  %v8909_v54 = vadd.f32 %v8777_v17, %v3372_v40  ;;  %v3308_v47 = vpop.f32.mrf.mxu2  ;;  %3665 = vmatmul.bf16.gmra.mxu1 %v8897_v19  ;;  %v6620_v40 = vld [vmem:[%s11529_s1 + $0x8c0] sm:$0xf]  ;;  %v5182_v19 = vld [vmem:[%s7767_s12 + $0xa0] sm:$0xf0] }
 0x121   : > { %v3309_v8 = vadd.f32 %v3308_v47, %v8557_v25  ;;  %v6460_v25 = vld [vmem:[%s11529_s1 + $0x780] sm:$0xf]  ;;  %v6621_v47 = vor.u32 %v7477_v45, %v6620_v40  ;;  %3682 = vmatpush.bf16.msra.mxu2 %v6397_v38  ;;  %v8958_v38 = vpack.c.b16 %v1041_v29, %v1041_v29 }
 0x122   : > { %v8919_v17 = vpop.f32.mrf.mxu0  ;;  %v6461_v41 = vor.u32 %v7437_v31, %v6460_v25  ;;  %v8956_v31 = vor.u32 %v7189_v32, %v5444_v11  ;;  %v6708_v11 = vld [vmem:[%s11529_s1 + $0x970] sm:$0xf]  ;;  %v7499_v32 = vld [vmem:[%s11529_s1 + $0x974] sm:$0xf0] }
 0x123   : > { %v3341_v3 = vpop.f32.mrf.mxu3  ;;  %3776 = vmatpush.bf16.msra.mxu1 %v6629_v18  ;;  %v7177_v18 = vld [vmem:[%s7767_s12 + $0x26c] sm:$0xf]  ;;  %11648 = vst [vmem:[#allocation40_spill] sm:$0xff] %v8958_v38 }
 0x124   : > { %v3342_v10 = vadd.f32 %v3341_v3, %v3309_v8  ;;  %3715 = vmatpush.bf16.msra.mxu3 %v6461_v41  ;;  %11647 = vst [vmem:[#allocation39_spill] sm:$0xff] %v8956_v31 }
 0x125   : > { %v8943_v8 = vpop.f32.mrf.mxu1 }
 0x126   : > { %v3375_v37 = vadd.f32 %v8800_v22, %v3342_v10  ;;  %v6612_v22 = vld [vmem:[%s11529_s1 + $0x8b0] sm:$0xf]  ;;  %v7475_v10 = vld [vmem:[%s11529_s1 + $0x8b4] sm:$0xf0] }
 0x127   : > { %3777 = vmatpush.bf16.msra.mxu1 %v6621_v47  ;;  %v6613_v40 = vor.u32 %v7475_v10, %v6612_v22  ;;  %v6604_v47 = vld [vmem:[%s11529_s1 + $0x8a0] sm:$0xf]  ;;  %v7515_v22 = vld [vmem:[%s11529_s1 + $0x9f4] sm:$0xf0] }
 0x128   : > { %v8946_v3 = vadd.f32 %v8818_v56, %v3375_v37  ;;  %v3310_v55 = vpop.f32.mrf.mxu2  ;;  %v1042_v56 = vunpack.c.h.b16 %v333_v58  ;;  %v8962_v37 = vor.u32 %v7177_v18, %v5446_v13  ;;  %v7473_v58 = vld [vmem:[%s11529_s1 + $0x8a4] sm:$0xf0]  ;;  %v6709_v13 = vor.u32 %v7499_v32, %v6708_v11 }
 0x129   : > { %v6605_v18 = vor.u32 %v7473_v58, %v6604_v47  ;;  %v6772_v55 = vld [vmem:[%s11529_s1 + $0x9f0] sm:$0xf] }
 0x12a   : > { %v8960_v45 = vpop.f32.mrf.mxu0  ;;  %11649 = vst [vmem:[#allocation41_spill] sm:$0xff] %v8962_v37  ;;  %v8966_v41 = vpack.c.b16 %v1042_v56, %v1042_v56  ;;  %v6596_v56 = vld [vmem:[%s11529_s1 + $0x890] sm:$0xf]  ;;  %3807 = vmatpush.bf16.msrb.mxu2 %v6709_v13 }
 0x12b   : > { %v3343_v25 = vpop.f32.mrf.mxu3  ;;  %3778 = vmatpush.bf16.msra.mxu1 %v6613_v40  ;;  %v7471_v40 = vld [vmem:[%s11529_s1 + $0x894] sm:$0xf0] }
 0x12c   : > { %11650 = vst [vmem:[#allocation42_spill] sm:$0xff] %v8966_v41  ;;  %v6773_v25 = vor.u32 %v7515_v22, %v6772_v55  ;;  %v6597_v11 = vor.u32 %v7471_v40, %v6596_v56  ;;  %v6588_v22 = vld [vmem:[%s11529_s1 + $0x880] sm:$0xf] }
 0x12d   : > { %3566 = vmatmul.bf16.gmra.mxu2 %v8956_v31  ;;  %3637 = vmatmul.bf16.gmra.mxu0 %v8958_v38  ;;  %v8975_v29 = vpop.f32.mrf.mxu1  ;;  %v5180_v56 = vld [vmem:[%s7767_s12 + $0x40] sm:$0xf]  ;;  %v7108_v31 = vld [vmem:[%s7767_s12 + $0x44] sm:$0xf] }
 0x12e   : > { %3840 = vmatpush.bf16.msrb.mxu3 %v6773_v25  ;;  %v7120_v40 = vld [vmem:[%s7767_s12 + $0x9c] sm:$0xf0] }
 0x12f   : > { %3779 = vmatpush.bf16.msra.mxu1 %v6605_v18  ;;  %v332_v18 = vld [vmem:[%s7767_s12 + $0x328] sm:$0xff]  ;;  %v9023_v38 = vor.u32 %v7120_v40, %v5180_v56  ;;  %v9040_v56 = vor.u32 %v7108_v31, %v5182_v19 }
 0x130   : > { %3599 = vmatmul.bf16.gmra.mxu3 %v8962_v37  ;;  %v3420_v10 = vpop.f32.mrf.mxu2  ;;  %3670 = vmatmul.bf16.gmra.mxu1 %v8966_v41  ;;  %v1039_v37 = vunpack.c.l.b16 %v332_v18  ;;  %v1040_v13 = vunpack.c.h.b16 %v332_v18 }
 0x131   : > { %v3421_v47 = vadd.f32 %v3420_v10, %v8645_v21  ;;  %v7469_v21 = vld [vmem:[%s11529_s1 + $0x884] sm:$0xf0]  ;;  %11652 = vst [vmem:[#allocation44_spill] sm:$0xff] %v9023_v38 }
 0x132   : > { %v8997_v32 = vpop.f32.mrf.mxu0  ;;  %v6589_v41 = vor.u32 %v7469_v21, %v6588_v22  ;;  %v9021_v21 = vpack.c.b16 %v1039_v37, %v1039_v37  ;;  %11654 = vst [vmem:[#allocation46_spill] sm:$0xff] %v9040_v56 }
 0x133   : > { %v3453_v58 = vpop.f32.mrf.mxu3  ;;  %3780 = vmatpush.bf16.msra.mxu1 %v6597_v11 }
 0x134   : > { %v3454_v55 = vadd.f32 %v3453_v58, %v3421_v47  ;;  %v6700_v58 = vld [vmem:[%s11529_s1 + $0x960] sm:$0xf]  ;;  %11651 = vst [vmem:[#allocation43_spill] sm:$0xff] %v9021_v21 }
 0x135   : > { %v9009_v25 = vpop.f32.mrf.mxu1 }
 0x136   : > { %v3487_v10 = vadd.f32 %v8876_v15, %v3454_v55  ;;  %v7497_v15 = vld [vmem:[%s11529_s1 + $0x964] sm:$0xf0] }
 0x137   : > { %3781 = vmatpush.bf16.msra.mxu1 %v6589_v41  ;;  %v6701_v18 = vor.u32 %v7497_v15, %v6700_v58  ;;  %v6764_v41 = vld [vmem:[%s11529_s1 + $0x9e0] sm:$0xf] }
 0x138   : > { %v9012_v47 = vadd.f32 %v8906_v43, %v3487_v10  ;;  %v3422_v11 = vpop.f32.mrf.mxu2  ;;  %v9027_v10 = vpack.c.b16 %v1040_v13, %v1040_v13 }
 0x139   : > { %v3423_v55 = vadd.f32 %v3422_v11, %v8679_v49  ;;  %3808 = vmatpush.bf16.msrb.mxu2 %v6701_v18  ;;  %v7513_v49 = vld [vmem:[%s11529_s1 + $0x9e4] sm:$0xf0] }
 0x13a   : > { %v9025_v43 = vpop.f32.mrf.mxu0  ;;  %11653 = vst [vmem:[#allocation45_spill] sm:$0xff] %v9027_v10  ;;  %v6765_v37 = vor.u32 %v7513_v49, %v6764_v41  ;;  %v5172_v41 = vld [vmem:[%s7767_s12 + $0x38] sm:$0xf] }
 0x13b   : > { %v3455_v22 = vpop.f32.mrf.mxu3 }
 0x13c   : > { %v3456_v42 = vadd.f32 %v3455_v22, %v3423_v55  ;;  %3841 = vmatpush.bf16.msrb.mxu3 %v6765_v37  ;;  %v7511_v55 = vld [vmem:[%s11529_s1 + $0x9d4] sm:$0xf0] }
 0x13d   : > { %3571 = vmatmul.bf16.gmra.mxu2 %v9021_v21  ;;  %3749 = vmatmul.bf16.vlgmr.msra.gmra.mxu0 %v9023_v38  ;;  %v9043_v40 = vpop.f32.mrf.mxu1  ;;  %v7119_v37 = vld [vmem:[%s7767_s12 + $0x94] sm:$0xf0]  ;;  %v7132_v21 = vld [vmem:[%s7767_s12 + $0x104] sm:$0xf] }
 0x13e   : > { %v3489_v13 = vadd.f32 %v8919_v17, %v3456_v42  ;;  %v6692_v17 = vld [vmem:[%s11529_s1 + $0x950] sm:$0xf] }
 0x140   : > { %3604 = vmatmul.bf16.gmra.mxu3 %v9027_v10  ;;  %v9046_v58 = vadd.f32 %v8943_v8, %v3489_v13  ;;  %v3425_v15 = vpop.f32.mrf.mxu2  ;;  %3782 = vmatmul.bf16.vlgmr.msra.gmra.mxu1 %v9040_v56  ;;  %v7495_v8 = vld [vmem:[%s11529_s1 + $0x954] sm:$0xf0]  ;;  %v5276_v13 = vld [vmem:[%s7767_s12 + $0x100] sm:$0xf] }
 0x141   : > { %v3426_v11 = vadd.f32 %v3425_v15, %v8705_v30  ;;  %v6756_v30 = vld [vmem:[%s11529_s1 + $0x9d0] sm:$0xf]  ;;  %v6693_v31 = vor.u32 %v7495_v8, %v6692_v17  ;;  %v7144_v15 = vld [vmem:[%s7767_s12 + $0x15c] sm:$0xf0]  ;;  %v7107_v17 = vld [vmem:[%s7767_s12 + $0x3c] sm:$0xf] }
 0x142   : > { %v9050_v42 = vpop.f32.mrf.mxu0  ;;  %v6757_v49 = vor.u32 %v7511_v55, %v6756_v30  ;;  %v5174_v8 = vld [vmem:[%s7767_s12 + $0x98] sm:$0xf0]  ;;  %v9079_v30 = vor.u32 %v7144_v15, %v5276_v13  ;;  %v7509_v13 = vld [vmem:[%s11529_s1 + $0x9c4] sm:$0xf0] }
 0x143   : > { %v3458_v18 = vpop.f32.mrf.mxu3  ;;  %3809 = vmatpush.bf16.msrb.mxu2 %v6693_v31  ;;  %v9083_v38 = vor.u32 %v7107_v17, %v5174_v8  ;;  %v5278_v31 = vld [vmem:[%s7767_s12 + $0x160] sm:$0xf0]  ;;  %v6828_v8 = vld [vmem:[%s11529_s1 + $0xa60] sm:$0xf] }
 0x144   : > { %v3459_v19 = vadd.f32 %v3458_v18, %v3426_v11  ;;  %3842 = vmatpush.bf16.msrb.mxu3 %v6757_v49  ;;  %11656 = vst [vmem:[#allocation48_spill] sm:$0xff] %v9079_v30 }
 0x145   : > { %v9069_v11 = vpop.f32.mrf.mxu1  ;;  %11657 = vst [vmem:[#allocation49_spill] sm:$0xff] %v9083_v38 }
 0x146   : > { %v3492_v22 = vadd.f32 %v8960_v45, %v3459_v19  ;;  %v9077_v19 = vor.u32 %v7119_v37, %v5172_v41  ;;  %v9096_v41 = vor.u32 %v7132_v21, %v5278_v31  ;;  %v6748_v37 = vld [vmem:[%s11529_s1 + $0x9c0] sm:$0xf] }
 0x147   : > { %v6749_v21 = vor.u32 %v7509_v13, %v6748_v37  ;;  %v6820_v37 = vld [vmem:[%s11529_s1 + $0xa50] sm:$0xf]  ;;  %v7527_v13 = vld [vmem:[%s11529_s1 + $0xa54] sm:$0xf0] }
 0x148   : > { %v9072_v18 = vadd.f32 %v8975_v29, %v3492_v22  ;;  %v3427_v56 = vpop.f32.mrf.mxu2  ;;  %11655 = vst [vmem:[#allocation47_spill] sm:$0xff] %v9077_v19  ;;  %v6684_v29 = vld [vmem:[%s11529_s1 + $0x940] sm:$0xf] }
 0x149   : > { %v3428_v10 = vadd.f32 %v3427_v56, %v8747_v44  ;;  %v7493_v44 = vld [vmem:[%s11529_s1 + $0x944] sm:$0xf0]  ;;  %11658 = vst [vmem:[#allocation50_spill] sm:$0xff] %v9096_v41  ;;  %3843 = vmatpush.bf16.msrb.mxu3 %v6749_v21  ;;  %v5268_v21 = vld [vmem:[%s7767_s12 + $0xf8] sm:$0xf] }
 0x14a   : > { %v9081_v55 = vpop.f32.mrf.mxu0  ;;  %v6685_v56 = vor.u32 %v7493_v44, %v6684_v29 }
 0x14b   : > { %v3460_v45 = vpop.f32.mrf.mxu3 }
 0x14c   : > { %v3461_v48 = vadd.f32 %v3460_v45, %v3428_v10  ;;  %v6836_v10 = vld [vmem:[%s11529_s1 + $0xa70] sm:$0xf]  ;;  %3810 = vmatpush.bf16.msrb.mxu2 %v6685_v56  ;;  %v7529_v45 = vld [vmem:[%s11529_s1 + $0xa64] sm:$0xf0] }
 0x14d   : > { %3683 = vmatmul.bf16.vlgmr.msra.gmra.mxu2 %v9077_v19  ;;  %3754 = vmatmul.bf16.gmra.mxu0 %v9079_v30  ;;  %v9102_v49 = vpop.f32.mrf.mxu1  ;;  %v6829_v44 = vor.u32 %v7529_v45, %v6828_v8  ;;  %v5372_v8 = vld [vmem:[%s7767_s12 + $0x1c0] sm:$0xf] }
 0x14e   : > { %v3494_v22 = vadd.f32 %v8997_v32, %v3461_v48  ;;  %v7531_v48 = vld [vmem:[%s11529_s1 + $0xa74] sm:$0xf0]  ;;  %v7168_v45 = vld [vmem:[%s7767_s12 + $0x21c] sm:$0xf0] }
 0x14f   : > { %v6837_v15 = vor.u32 %v7531_v48, %v6836_v10 }
 0x150   : > { %3716 = vmatmul.bf16.vlgmr.msra.gmra.mxu3 %v9083_v38  ;;  %v9114_v32 = vadd.f32 %v9009_v25, %v3494_v22  ;;  %v3430_v17 = vpop.f32.mrf.mxu2  ;;  %3787 = vmatmul.bf16.gmra.mxu1 %v9096_v41  ;;  %v6676_v22 = vld [vmem:[%s11529_s1 + $0x930] sm:$0xf] }
 0x151   : > { %v3431_v31 = vadd.f32 %v3430_v17, %v8780_v53  ;;  %3873 = vmatpush.bf16.msrb.mxu0 %v6837_v15  ;;  %v7491_v53 = vld [vmem:[%s11529_s1 + $0x934] sm:$0xf0]  ;;  %v7131_v17 = vld [vmem:[%s7767_s12 + $0xfc] sm:$0xf] }
 0x152   : > { %v9124_v25 = vpop.f32.mrf.mxu0  ;;  %v6677_v10 = vor.u32 %v7491_v53, %v6676_v22  ;;  %v7143_v15 = vld [vmem:[%s7767_s12 + $0x154] sm:$0xf0]  ;;  %v5270_v53 = vld [vmem:[%s7767_s12 + $0x158] sm:$0xf0] }
 0x153   : > { %v3463_v29 = vpop.f32.mrf.mxu3  ;;  %v9169_v19 = vor.u32 %v7131_v17, %v5270_v53  ;;  %v6668_v17 = vld [vmem:[%s11529_s1 + $0x920] sm:$0xf] }
 0x154   : > { %v3464_v56 = vadd.f32 %v3463_v29, %v3431_v31  ;;  %3811 = vmatpush.bf16.msrb.mxu2 %v6677_v10  ;;  %v6821_v29 = vor.u32 %v7527_v13, %v6820_v37  ;;  %v9163_v13 = vor.u32 %v7143_v15, %v5268_v21 }
 0x155   : > { %v9144_v31 = vpop.f32.mrf.mxu1  ;;  %3874 = vmatpush.bf16.msrb.mxu0 %v6829_v44  ;;  %v6812_v44 = vld [vmem:[%s11529_s1 + $0xa40] sm:$0xf]  ;;  %11661 = vst [vmem:[#allocation53_spill] sm:$0xff] %v9169_v19 }
 0x156   : > { %v3497_v48 = vadd.f32 %v9025_v43, %v3464_v56  ;;  %v6740_v43 = vld [vmem:[%s11529_s1 + $0x9b0] sm:$0xf]  ;;  %v7507_v56 = vld [vmem:[%s11529_s1 + $0x9b4] sm:$0xf0]  ;;  %11659 = vst [vmem:[#allocation51_spill] sm:$0xff] %v9163_v13 }
 0x157   : > { %v6741_v38 = vor.u32 %v7507_v56, %v6740_v43  ;;  %v7156_v43 = vld [vmem:[%s7767_s12 + $0x1c4] sm:$0xf] }
 0x158   : > { %v9147_v22 = vadd.f32 %v9043_v40, %v3497_v48  ;;  %v3432_v41 = vpop.f32.mrf.mxu2  ;;  %v7525_v40 = vld [vmem:[%s11529_s1 + $0xa44] sm:$0xf0]  ;;  %v9165_v48 = vor.u32 %v7168_v45, %v5372_v8  ;;  %v5374_v56 = vld [vmem:[%s7767_s12 + $0x220] sm:$0xf0] }
 0x159   : > { %v3433_v10 = vadd.f32 %v3432_v41, %v8827_v14  ;;  %3875 = vmatpush.bf16.msrb.mxu0 %v6821_v29  ;;  %3844 = vmatpush.bf16.msrb.mxu3 %v6741_v38  ;;  %v6813_v34 = vor.u32 %v7525_v40, %v6812_v44  ;;  %v7523_v14 = vld [vmem:[%s11529_s1 + $0xa34] sm:$0xf0]  ;;  %v9182_v21 = vor.u32 %v7156_v43, %v5374_v56  ;;  %v7489_v8 = vld [vmem:[%s11529_s1 + $0x924] sm:$0xf0]  ;;  %v6796_v29 = vld [vmem:[%s11529_s1 + $0xa20] sm:$0xf] }
 0x15a   : > { %11660 = vst [vmem:[#allocation52_spill] sm:$0xff] %v9165_v48  ;;  %v9167_v30 = vpop.f32.mrf.mxu0  ;;  %v6805_v15 = vor.u32 %v7523_v14, %v6804_v16  ;;  %v7521_v16 = vld [vmem:[%s11529_s1 + $0xa24] sm:$0xf0]  ;;  %v6788_v43 = vld [vmem:[%s11529_s1 + $0xa10] sm:$0xf] }
 0x15b   : > { %v3465_v37 = vpop.f32.mrf.mxu3  ;;  %11662 = vst [vmem:[#allocation54_spill] sm:$0xff] %v9182_v21  ;;  %v6797_v44 = vor.u32 %v7521_v16, %v6796_v29  ;;  %v7519_v56 = vld [vmem:[%s11529_s1 + $0xa14] sm:$0xf0]  ;;  %v7155_v16 = vld [vmem:[%s7767_s12 + $0x1bc] sm:$0xf] }
 0x15c   : > { %v3466_v20 = vadd.f32 %v3465_v37, %v3433_v10  ;;  %v6732_v10 = vld [vmem:[%s11529_s1 + $0x9a0] sm:$0xf] }
 0x15d   : > { %3688 = vmatmul.bf16.gmra.mxu2 %v9163_v13  ;;  %3759 = vmatmul.bf16.gmra.mxu0 %v9165_v48  ;;  %v9185_v38 = vpop.f32.mrf.mxu1  ;;  %v7202_v13 = vld [vmem:[%s11529_s1 + $0x34] sm:$0xf] }
 0x15e   : > { %v3499_v41 = vadd.f32 %v9050_v42, %v3466_v20  ;;  %3876 = vmatpush.bf16.msrb.mxu0 %v6813_v34  ;;  %v6669_v20 = vor.u32 %v7489_v8, %v6668_v17  ;;  %v5468_v17 = vld [vmem:[%s7767_s12 + $0x280] sm:$0xf] }
 0x15f   : > { %v7192_v8 = vld [vmem:[%s7767_s12 + $0x2dc] sm:$0xf0] }
 0x160   : > { %3721 = vmatmul.bf16.gmra.mxu3 %v9169_v19  ;;  %v9194_v45 = vadd.f32 %v9069_v11, %v3499_v41  ;;  %v3435_v42 = vpop.f32.mrf.mxu2  ;;  %3792 = vmatmul.bf16.gmra.mxu1 %v9182_v21  ;;  %v5364_v41 = vld [vmem:[%s7767_s12 + $0x1b8] sm:$0xf] }
 0x161   : > { %v3436_v34 = vadd.f32 %v3435_v42, %v8855_v46  ;;  %3812 = vmatpush.bf16.msrb.mxu2 %v6669_v20  ;;  %v7505_v46 = vld [vmem:[%s11529_s1 + $0x9a4] sm:$0xf0]  ;;  %v6789_v42 = vor.u32 %v7519_v56, %v6788_v43 }
 0x162   : > { %v3508_v11 = vpop.f32.mrf.mxu0  ;;  %3877 = vmatpush.bf16.msrb.mxu0 %v6805_v15  ;;  %v6733_v37 = vor.u32 %v7505_v46, %v6732_v10  ;;  %v7167_v15 = vld [vmem:[%s7767_s12 + $0x214] sm:$0xf0]  ;;  %v9238_v46 = vor.u32 %v7192_v8, %v5468_v17  ;;  %v6724_v17 = vld [vmem:[%s11529_s1 + $0x990] sm:$0xf] }
 0x163   : > { %v3468_v53 = vpop.f32.mrf.mxu3  ;;  %v7517_v11 = vld [vmem:[%s11529_s1 + $0xa04] sm:$0xf0]  ;;  %v9236_v10 = vor.u32 %v7167_v15, %v5364_v41  ;;  %v7487_v41 = vld [vmem:[%s11529_s1 + $0x914] sm:$0xf0] }
 0x164   : > { %v3469_v40 = vadd.f32 %v3468_v53, %v3436_v34  ;;  %3845 = vmatpush.bf16.msrb.mxu3 %v6733_v37  ;;  %v5366_v34 = vld [vmem:[%s7767_s12 + $0x218] sm:$0xf0]  ;;  %11664 = vst [vmem:[#allocation56_spill] sm:$0xff] %v9238_v46  ;;  %v7547_v37 = vld [vmem:[%s11529_s1 + $0xaf4] sm:$0xf0] }
 0x165   : > { %v3541_v20 = vpop.f32.mrf.mxu1  ;;  %11663 = vst [vmem:[#allocation55_spill] sm:$0xff] %v9236_v10  ;;  %v9245_v56 = vor.u32 %v7155_v16, %v5366_v34 }
 0x166   : > { %v3502_v14 = vadd.f32 %v9081_v55, %v3469_v40  ;;  %3878 = vmatpush.bf16.msrb.mxu0 %v6797_v44  ;;  %v6780_v55 = vld [vmem:[%s11529_s1 + $0xa00] sm:$0xf]  ;;  %v6900_v44 = vld [vmem:[%s11529_s1 + $0xaf0] sm:$0xf]  ;;  %v5470_v20 = vld [vmem:[%s7767_s12 + $0x2e0] sm:$0xf0] }
 0x167   : > { %11665 = vst [vmem:[#allocation57_spill] sm:$0xff] %v9245_v56  ;;  %v6901_v21 = vor.u32 %v7547_v37, %v6900_v44  ;;  %v6781_v15 = vor.u32 %v7517_v11, %v6780_v55  ;;  %v6892_v55 = vld [vmem:[%s11529_s1 + $0xae0] sm:$0xf] }
 0x168   : > { %v9222_v29 = vadd.f32 %v9102_v49, %v3502_v14  ;;  %v3437_v53 = vpop.f32.mrf.mxu2  ;;  %v7180_v14 = vld [vmem:[%s7767_s12 + $0x284] sm:$0xf] }
 0x169   : > { %v3438_v40 = vadd.f32 %v3437_v53, %v8909_v54  ;;  %v6660_v54 = vld [vmem:[%s11529_s1 + $0x910] sm:$0xf]  ;;  %3906 = vmatpush.bf16.msrb.mxu1 %v6901_v21  ;;  %v9264_v34 = vor.u32 %v7180_v14, %v5470_v20  ;;  %v7545_v21 = vld [vmem:[%s11529_s1 + $0xae4] sm:$0xf0] }
 0x16a   : > { %v9243_v43 = vpop.f32.mrf.mxu0  ;;  %3879 = vmatpush.bf16.msrb.mxu0 %v6789_v42  ;;  %v6661_v8 = vor.u32 %v7487_v41, %v6660_v54  ;;  %v7503_v42 = vld [vmem:[%s11529_s1 + $0x994] sm:$0xf0]  ;;  %v6893_v44 = vor.u32 %v7545_v21, %v6892_v55  ;;  %v335_v54 = vld [vmem:[%s7767_s12 + $0x340] sm:$0xff] }
 0x16b   : > { %v3470_v49 = vpop.f32.mrf.mxu3  ;;  %11666 = vst [vmem:[#allocation58_spill] sm:$0xff] %v9264_v34  ;;  %v6725_v53 = vor.u32 %v7503_v42, %v6724_v17  ;;  %v7485_v17 = vld [vmem:[%s11529_s1 + $0x904] sm:$0xf0]  ;;  %v1045_v21 = vunpack.c.l.b16 %v335_v54 }
 0x16c   : > { %v3471_v19 = vadd.f32 %v3470_v49, %v3438_v40  ;;  %3813 = vmatpush.bf16.msrb.mxu2 %v6661_v8  ;;  %v6884_v40 = vld [vmem:[%s11529_s1 + $0xad0] sm:$0xf]  ;;  %v7543_v49 = vld [vmem:[%s11529_s1 + $0xad4] sm:$0xf0]  ;;  %v7501_v42 = vld [vmem:[%s11529_s1 + $0x984] sm:$0xf0] }
 0x16d   : > { %3693 = vmatmul.bf16.gmra.mxu2 %v9236_v10  ;;  %3764 = vmatmul.bf16.gmra.mxu0 %v9238_v46  ;;  %v9273_v11 = vpop.f32.mrf.mxu1  ;;  %v6885_v20 = vor.u32 %v7543_v49, %v6884_v40  ;;  %v5460_v40 = vld [vmem:[%s7767_s12 + $0x278] sm:$0xf] }
 0x16e   : > { %v3504_v16 = vadd.f32 %v9124_v25, %v3471_v19  ;;  %3880 = vmatpush.bf16.msrb.mxu0 %v6781_v15  ;;  %3846 = vmatpush.bf16.msrb.mxu3 %v6725_v53  ;;  %v6652_v15 = vld [vmem:[%s11529_s1 + $0x900] sm:$0xf]  ;;  %v7541_v53 = vld [vmem:[%s11529_s1 + $0xac4] sm:$0xf0]  ;;  %v7191_v49 = vld [vmem:[%s7767_s12 + $0x2d4] sm:$0xf0] }
 0x16f   : > { %3907 = vmatpush.bf16.msrb.mxu1 %v6893_v44  ;;  %v6653_v8 = vor.u32 %v7485_v17, %v6652_v15  ;;  %v5462_v15 = vld [vmem:[%s7767_s12 + $0x2d8] sm:$0xf0] }
 0x170   : > { %3726 = vmatmul.bf16.gmra.mxu3 %v9245_v56  ;;  %v9276_v19 = vadd.f32 %v9144_v31, %v3504_v16  ;;  %v3440_v25 = vpop.f32.mrf.mxu2  ;;  %3797 = vmatmul.bf16.gmra.mxu1 %v9264_v34  ;;  %v6876_v16 = vld [vmem:[%s11529_s1 + $0xac0] sm:$0xf]  ;;  %v5198_v34 = vld [vmem:[%s7767_s12 + $0xb0] sm:$0xf0] }
 0x171   : > { %v3441_v37 = vadd.f32 %v3440_v25, %v8946_v3  ;;  %v6716_v3 = vld [vmem:[%s11529_s1 + $0x980] sm:$0xf]  ;;  %v6877_v25 = vor.u32 %v7541_v53, %v6876_v16  ;;  %3814 = vmatpush.bf16.msrb.mxu2 %v6653_v8  ;;  %v9325_v8 = vpack.c.b16 %v1045_v21, %v1045_v21 }
 0x172   : > { %v9286_v31 = vpop.f32.mrf.mxu0  ;;  %v6717_v44 = vor.u32 %v7501_v42, %v6716_v3  ;;  %v9323_v42 = vor.u32 %v7191_v49, %v5460_v40  ;;  %v6964_v40 = vld [vmem:[%s11529_s1 + $0xb70] sm:$0xf]  ;;  %v7563_v49 = vld [vmem:[%s11529_s1 + $0xb74] sm:$0xf0] }
 0x173   : > { %v3473_v14 = vpop.f32.mrf.mxu3  ;;  %3908 = vmatpush.bf16.msrb.mxu1 %v6885_v20  ;;  %v7179_v20 = vld [vmem:[%s7767_s12 + $0x27c] sm:$0xf]  ;;  %11668 = vst [vmem:[#allocation60_spill] sm:$0xff] %v9325_v8 }
 0x174   : > { %v3474_v41 = vadd.f32 %v3473_v14, %v3441_v37  ;;  %3847 = vmatpush.bf16.msrb.mxu3 %v6717_v44  ;;  %11667 = vst [vmem:[#allocation59_spill] sm:$0xff] %v9323_v42 }
 0x175   : > { %v9310_v37 = vpop.f32.mrf.mxu1 }
 0x176   : > { %v3507_v55 = vadd.f32 %v9167_v30, %v3474_v41  ;;  %v6868_v30 = vld [vmem:[%s11529_s1 + $0xab0] sm:$0xf]  ;;  %v7539_v41 = vld [vmem:[%s11529_s1 + $0xab4] sm:$0xf0] }
 0x177   : > { %3909 = vmatpush.bf16.msrb.mxu1 %v6877_v25  ;;  %v6869_v16 = vor.u32 %v7539_v41, %v6868_v30  ;;  %v6860_v25 = vld [vmem:[%s11529_s1 + $0xaa0] sm:$0xf]  ;;  %v7579_v30 = vld [vmem:[%s11529_s1 + $0xbf4] sm:$0xf0] }
 0x178   : > { %v9313_v14 = vadd.f32 %v9185_v38, %v3507_v55  ;;  %v3442_v17 = vpop.f32.mrf.mxu2  ;;  %v1046_v38 = vunpack.c.h.b16 %v335_v54  ;;  %v9329_v55 = vor.u32 %v7179_v20, %v5462_v15  ;;  %v7537_v54 = vld [vmem:[%s11529_s1 + $0xaa4] sm:$0xf0]  ;;  %v6965_v15 = vor.u32 %v7563_v49, %v6964_v40 }
 0x179   : > { %v6861_v20 = vor.u32 %v7537_v54, %v6860_v25  ;;  %v7028_v17 = vld [vmem:[%s11529_s1 + $0xbf0] sm:$0xf] }
 0x17a   : > { %v9327_v53 = vpop.f32.mrf.mxu0  ;;  %11669 = vst [vmem:[#allocation61_spill] sm:$0xff] %v9329_v55  ;;  %v9333_v44 = vpack.c.b16 %v1046_v38, %v1046_v38  ;;  %v6852_v38 = vld [vmem:[%s11529_s1 + $0xa90] sm:$0xf]  ;;  %3939 = vmatpush.bf16.msra.mxu2 %v6965_v15 }
 0x17b   : > { %v3475_v3 = vpop.f32.mrf.mxu3  ;;  %3910 = vmatpush.bf16.msrb.mxu1 %v6869_v16  ;;  %v7535_v16 = vld [vmem:[%s11529_s1 + $0xa94] sm:$0xf0] }
 0x17c   : > { %11670 = vst [vmem:[#allocation62_spill] sm:$0xff] %v9333_v44  ;;  %v7029_v3 = vor.u32 %v7579_v30, %v7028_v17  ;;  %v6853_v40 = vor.u32 %v7535_v16, %v6852_v38  ;;  %v6844_v30 = vld [vmem:[%s11529_s1 + $0xa80] sm:$0xf]  ;;  %v5196_v38 = vld [vmem:[%s7767_s12 + $0x50] sm:$0xf] }
 0x17d   : > { %3698 = vmatmul.bf16.gmra.mxu2 %v9323_v42  ;;  %3769 = vmatmul.bf16.gmra.mxu0 %v9325_v8  ;;  %v9342_v21 = vpop.f32.mrf.mxu1  ;;  %v7122_v16 = vld [vmem:[%s7767_s12 + $0xac] sm:$0xf0]  ;;  %v7110_v42 = vld [vmem:[%s7767_s12 + $0x54] sm:$0xf] }
 0x17e   : > { %3972 = vmatpush.bf16.msra.mxu3 %v7029_v3  ;;  %v9390_v8 = vor.u32 %v7122_v16, %v5196_v38  ;;  %v9407_v38 = vor.u32 %v7110_v42, %v5198_v34 }
 0x17f   : > { %3911 = vmatpush.bf16.msrb.mxu1 %v6861_v20  ;;  %v334_v20 = vld [vmem:[%s7767_s12 + $0x338] sm:$0xff] }
 0x180   : > { %3731 = vmatmul.bf16.gmra.mxu3 %v9329_v55  ;;  %v3552_v41 = vpop.f32.mrf.mxu2  ;;  %3802 = vmatmul.bf16.gmra.mxu1 %v9333_v44  ;;  %v1043_v55 = vunpack.c.l.b16 %v334_v20  ;;  %v1044_v15 = vunpack.c.h.b16 %v334_v20  ;;  %11672 = vst [vmem:[#allocation64_spill] sm:$0xff] %v9390_v8 }
 0x181   : > { %v3553_v25 = vadd.f32 %v3552_v41, %v9012_v47  ;;  %v7533_v47 = vld [vmem:[%s11529_s1 + $0xa84] sm:$0xf0]  ;;  %11674 = vst [vmem:[#allocation66_spill] sm:$0xff] %v9407_v38 }
 0x182   : > { %v9364_v49 = vpop.f32.mrf.mxu0  ;;  %v6845_v44 = vor.u32 %v7533_v47, %v6844_v30  ;;  %v9388_v47 = vpack.c.b16 %v1043_v55, %v1043_v55 }
 0x183   : > { %v3585_v54 = vpop.f32.mrf.mxu3  ;;  %3912 = vmatpush.bf16.msrb.mxu1 %v6853_v40 }
 0x184   : > { %v3586_v17 = vadd.f32 %v3585_v54, %v3553_v25  ;;  %v6956_v54 = vld [vmem:[%s11529_s1 + $0xb60] sm:$0xf]  ;;  %11671 = vst [vmem:[#allocation63_spill] sm:$0xff] %v9388_v47 }
 0x185   : > { %v9376_v3 = vpop.f32.mrf.mxu1 }
 0x186   : > { %v3619_v41 = vadd.f32 %v9243_v43, %v3586_v17  ;;  %v7561_v43 = vld [vmem:[%s11529_s1 + $0xb64] sm:$0xf0] }
 0x187   : > { %3913 = vmatpush.bf16.msrb.mxu1 %v6845_v44  ;;  %v6957_v20 = vor.u32 %v7561_v43, %v6956_v54  ;;  %v7020_v44 = vld [vmem:[%s11529_s1 + $0xbe0] sm:$0xf] }
 0x188   : > { %v9379_v25 = vadd.f32 %v9273_v11, %v3619_v41  ;;  %v3554_v40 = vpop.f32.mrf.mxu2  ;;  %v9394_v41 = vpack.c.b16 %v1044_v15, %v1044_v15 }
 0x189   : > { %v3555_v17 = vadd.f32 %v3554_v40, %v9046_v58  ;;  %3940 = vmatpush.bf16.msra.mxu2 %v6957_v20  ;;  %v7577_v58 = vld [vmem:[%s11529_s1 + $0xbe4] sm:$0xf0] }
 0x18a   : > { %v9392_v11 = vpop.f32.mrf.mxu0  ;;  %11673 = vst [vmem:[#allocation65_spill] sm:$0xff] %v9394_v41  ;;  %v7021_v55 = vor.u32 %v7577_v58, %v7020_v44  ;;  %v5188_v44 = vld [vmem:[%s7767_s12 + $0x48] sm:$0xf] }
 0x18b   : > { %v3587_v30 = vpop.f32.mrf.mxu3 }
 0x18c   : > { %v3588_v56 = vadd.f32 %v3587_v30, %v3555_v17  ;;  %3973 = vmatpush.bf16.msra.mxu3 %v7021_v55  ;;  %v7575_v17 = vld [vmem:[%s11529_s1 + $0xbd4] sm:$0xf0]  ;;  %v7121_v55 = vld [vmem:[%s7767_s12 + $0xa4] sm:$0xf0] }
 0x18d   : > { %3703 = vmatmul.bf16.gmra.mxu2 %v9388_v47  ;;  %3881 = vmatmul.bf16.vlgmr.msrb.gmra.mxu0 %v9390_v8  ;;  %v9410_v16 = vpop.f32.mrf.mxu1  ;;  %v7134_v47 = vld [vmem:[%s7767_s12 + $0x114] sm:$0xf] }
 0x18e   : > { %v3621_v15 = vadd.f32 %v9286_v31, %v3588_v56  ;;  %v6948_v31 = vld [vmem:[%s11529_s1 + $0xb50] sm:$0xf] }
 0x190   : > { %3736 = vmatmul.bf16.gmra.mxu3 %v9394_v41  ;;  %v9413_v54 = vadd.f32 %v9310_v37, %v3621_v15  ;;  %v3557_v43 = vpop.f32.mrf.mxu2  ;;  %3914 = vmatmul.bf16.vlgmr.msrb.gmra.mxu1 %v9407_v38  ;;  %v7559_v37 = vld [vmem:[%s11529_s1 + $0xb54] sm:$0xf0]  ;;  %v5292_v15 = vld [vmem:[%s7767_s12 + $0x110] sm:$0xf] }
 0x191   : > { %v3558_v40 = vadd.f32 %v3557_v43, %v9072_v18  ;;  %v7012_v18 = vld [vmem:[%s11529_s1 + $0xbd0] sm:$0xf]  ;;  %v6949_v42 = vor.u32 %v7559_v37, %v6948_v31  ;;  %v7109_v31 = vld [vmem:[%s7767_s12 + $0x4c] sm:$0xf] }
 0x192   : > { %v9417_v56 = vpop.f32.mrf.mxu0  ;;  %v7013_v58 = vor.u32 %v7575_v17, %v7012_v18  ;;  %v7146_v43 = vld [vmem:[%s7767_s12 + $0x16c] sm:$0xf0]  ;;  %v5190_v37 = vld [vmem:[%s7767_s12 + $0xa8] sm:$0xf0] }
 0x193   : > { %v3590_v20 = vpop.f32.mrf.mxu3  ;;  %3941 = vmatpush.bf16.msra.mxu2 %v6949_v42  ;;  %v9446_v18 = vor.u32 %v7146_v43, %v5292_v15  ;;  %v9450_v8 = vor.u32 %v7109_v31, %v5190_v37  ;;  %v5294_v42 = vld [vmem:[%s7767_s12 + $0x170] sm:$0xf0]  ;;  %v7573_v15 = vld [vmem:[%s11529_s1 + $0xbc4] sm:$0xf0]  ;;  %v7208_v37 = vld [vmem:[%s11529_s1 + $0x64] sm:$0xf] }
 0x194   : > { %v3591_v34 = vadd.f32 %v3590_v20, %v3558_v40  ;;  %3974 = vmatpush.bf16.msra.mxu3 %v7013_v58 }
 0x195   : > { %v9436_v40 = vpop.f32.mrf.mxu1  ;;  %11676 = vst [vmem:[#allocation68_spill] sm:$0xff] %v9446_v18 }
 0x196   : > { %v3624_v30 = vadd.f32 %v9327_v53, %v3591_v34  ;;  %v9444_v34 = vor.u32 %v7121_v55, %v5188_v44  ;;  %11677 = vst [vmem:[#allocation69_spill] sm:$0xff] %v9450_v8  ;;  %v9463_v44 = vor.u32 %v7134_v47, %v5294_v42  ;;  %v7004_v55 = vld [vmem:[%s11529_s1 + $0xbc0] sm:$0xf] }
 0x197   : > { %v7005_v47 = vor.u32 %v7573_v15, %v7004_v55  ;;  %v7206_v55 = vld [vmem:[%s11529_s1 + $0x54] sm:$0xf]  ;;  %v5542_v15 = vld [vmem:[%s11529_s1 + $0x58] sm:$0xf0] }
 0x198   : > { %v9439_v20 = vadd.f32 %v9342_v21, %v3624_v30  ;;  %v3559_v38 = vpop.f32.mrf.mxu2  ;;  %11675 = vst [vmem:[#allocation67_spill] sm:$0xff] %v9444_v34  ;;  %v6940_v21 = vld [vmem:[%s11529_s1 + $0xb40] sm:$0xf] }
 0x199   : > { %v3560_v41 = vadd.f32 %v3559_v38, %v9114_v32  ;;  %v7557_v32 = vld [vmem:[%s11529_s1 + $0xb44] sm:$0xf0]  ;;  %11678 = vst [vmem:[#allocation70_spill] sm:$0xff] %v9463_v44  ;;  %3975 = vmatpush.bf16.msra.mxu3 %v7005_v47 }
 0x19a   : > { %v9448_v17 = vpop.f32.mrf.mxu0  ;;  %v6941_v38 = vor.u32 %v7557_v32, %v6940_v21  ;;  %v5284_v47 = vld [vmem:[%s7767_s12 + $0x108] sm:$0xf] }
 0x19b   : > { %v3592_v53 = vpop.f32.mrf.mxu3 }
 0x19c   : > { %v3593_v46 = vadd.f32 %v3592_v53, %v3560_v41  ;;  %v7210_v41 = vld [vmem:[%s11529_s1 + $0x74] sm:$0xf]  ;;  %3942 = vmatpush.bf16.msra.mxu2 %v6941_v38  ;;  %v5550_v53 = vld [vmem:[%s11529_s1 + $0x68] sm:$0xf0] }
 0x19d   : > { %3815 = vmatmul.bf16.vlgmr.msrb.gmra.mxu2 %v9444_v34  ;;  %3886 = vmatmul.bf16.gmra.mxu0 %v9446_v18  ;;  %v9469_v58 = vpop.f32.mrf.mxu1  ;;  %v5553_v32 = vor.u32 %v7208_v37, %v5550_v53  ;;  %v5388_v37 = vld [vmem:[%s7767_s12 + $0x1d0] sm:$0xf] }
 0x19e   : > { %v3626_v30 = vadd.f32 %v9364_v49, %v3593_v46  ;;  %v5558_v46 = vld [vmem:[%s11529_s1 + $0x78] sm:$0xf0]  ;;  %v7170_v53 = vld [vmem:[%s7767_s12 + $0x22c] sm:$0xf0] }
 0x19f   : > { %v5561_v43 = vor.u32 %v7210_v41, %v5558_v46 }
 0x1a0   : > { %3848 = vmatmul.bf16.vlgmr.msrb.gmra.mxu3 %v9450_v8  ;;  %v9481_v49 = vadd.f32 %v9376_v3, %v3626_v30  ;;  %v3562_v31 = vpop.f32.mrf.mxu2  ;;  %3919 = vmatmul.bf16.gmra.mxu1 %v9463_v44  ;;  %v6932_v30 = vld [vmem:[%s11529_s1 + $0xb30] sm:$0xf] }
 0x1a1   : > { %v3563_v42 = vadd.f32 %v3562_v31, %v9147_v22  ;;  %4005 = vmatpush.bf16.msra.mxu0 %v5561_v43  ;;  %v7555_v22 = vld [vmem:[%s11529_s1 + $0xb34] sm:$0xf0]  ;;  %v7145_v43 = vld [vmem:[%s7767_s12 + $0x164] sm:$0xf0]  ;;  %v7133_v31 = vld [vmem:[%s7767_s12 + $0x10c] sm:$0xf] }
 0x1a2   : > { %v9491_v3 = vpop.f32.mrf.mxu0  ;;  %v6933_v41 = vor.u32 %v7555_v22, %v6932_v30  ;;  %v5286_v22 = vld [vmem:[%s7767_s12 + $0x168] sm:$0xf0] }
 0x1a3   : > { %v3595_v21 = vpop.f32.mrf.mxu3  ;;  %v9536_v34 = vor.u32 %v7133_v31, %v5286_v22  ;;  %v6924_v31 = vld [vmem:[%s11529_s1 + $0xb20] sm:$0xf] }
 0x1a4   : > { %v3596_v38 = vadd.f32 %v3595_v21, %v3563_v42  ;;  %3943 = vmatpush.bf16.msra.mxu2 %v6933_v41  ;;  %v5545_v21 = vor.u32 %v7206_v55, %v5542_v15  ;;  %v9530_v15 = vor.u32 %v7145_v43, %v5284_v47 }
 0x1a5   : > { %v9511_v42 = vpop.f32.mrf.mxu1  ;;  %4006 = vmatpush.bf16.msra.mxu0 %v5553_v32  ;;  %v7204_v32 = vld [vmem:[%s11529_s1 + $0x44] sm:$0xf]  ;;  %11679 = vst [vmem:[#allocation71_spill] sm:$0xff] %v9536_v34 }
 0x1a6   : > { %v3629_v46 = vadd.f32 %v9392_v11, %v3596_v38  ;;  %v6996_v11 = vld [vmem:[%s11529_s1 + $0xbb0] sm:$0xf]  ;;  %v7571_v38 = vld [vmem:[%s11529_s1 + $0xbb4] sm:$0xf0] }
 0x1a7   : > { %v6997_v8 = vor.u32 %v7571_v38, %v6996_v11  ;;  %v7158_v11 = vld [vmem:[%s7767_s12 + $0x1d4] sm:$0xf] }
 0x1a8   : > { %v9514_v30 = vadd.f32 %v9410_v16, %v3629_v46  ;;  %v3564_v44 = vpop.f32.mrf.mxu2  ;;  %v5534_v16 = vld [vmem:[%s11529_s1 + $0x48] sm:$0xf0]  ;;  %v9532_v46 = vor.u32 %v7170_v53, %v5388_v37  ;;  %v5390_v38 = vld [vmem:[%s7767_s12 + $0x230] sm:$0xf0]  ;;  %v7553_v37 = vld [vmem:[%s11529_s1 + $0xb24] sm:$0xf0] }
 0x1a9   : > { %v3565_v41 = vadd.f32 %v3564_v44, %v9194_v45  ;;  %4007 = vmatpush.bf16.msra.mxu0 %v5545_v21  ;;  %3976 = vmatpush.bf16.msra.mxu3 %v6997_v8  ;;  %v5537_v10 = vor.u32 %v7204_v32, %v5534_v16  ;;  %v5526_v45 = vld [vmem:[%s11529_s1 + $0x38] sm:$0xf0]  ;;  %v9549_v47 = vor.u32 %v7158_v11, %v5390_v38  ;;  %v7200_v21 = vld [vmem:[%s11529_s1 + $0x24] sm:$0xf]  ;;  %v7198_v11 = vld [vmem:[%s11529_s1 + $0x14] sm:$0xf] }
 0x1aa   : > { %v9534_v18 = vpop.f32.mrf.mxu0  ;;  %v5529_v43 = vor.u32 %v7202_v13, %v5526_v45  ;;  %v5518_v13 = vld [vmem:[%s11529_s1 + $0x28] sm:$0xf0]  ;;  %v5510_v38 = vld [vmem:[%s11529_s1 + $0x18] sm:$0xf0] }
 0x1ab   : > { %v3597_v55 = vpop.f32.mrf.mxu3  ;;  %11680 = vst [vmem:[#allocation72_spill] sm:$0xff] %v9549_v47  ;;  %v5521_v32 = vor.u32 %v7200_v21, %v5518_v13  ;;  %v7157_v13 = vld [vmem:[%s7767_s12 + $0x1cc] sm:$0xf] }
 0x1ac   : > { %v3598_v48 = vadd.f32 %v3597_v55, %v3565_v41  ;;  %v6988_v41 = vld [vmem:[%s11529_s1 + $0xba0] sm:$0xf] }
 0x1ad   : > { %3820 = vmatmul.bf16.gmra.mxu2 %v9530_v15  ;;  %3891 = vmatmul.bf16.gmra.mxu0 %v9532_v46  ;;  %v9552_v8 = vpop.f32.mrf.mxu1 }
 0x1ae   : > { %v3631_v44 = vadd.f32 %v9417_v56, %v3598_v48  ;;  %4008 = vmatpush.bf16.msra.mxu0 %v5537_v10  ;;  %v6925_v48 = vor.u32 %v7553_v37, %v6924_v31  ;;  %v5484_v31 = vld [vmem:[%s7767_s12 + $0x290] sm:$0xf] }
 0x1af   : > { %v7194_v37 = vld [vmem:[%s7767_s12 + $0x2ec] sm:$0xf0] }
 0x1b0   : > { %3853 = vmatmul.bf16.gmra.mxu3 %v9536_v34  ;;  %v9561_v53 = vadd.f32 %v9436_v40, %v3631_v44  ;;  %v3567_v56 = vpop.f32.mrf.mxu2  ;;  %3924 = vmatmul.bf16.gmra.mxu1 %v9549_v47  ;;  %v5380_v44 = vld [vmem:[%s7767_s12 + $0x1c8] sm:$0xf] }
 0x1b1   : > { %v3568_v10 = vadd.f32 %v3567_v56, %v9222_v29  ;;  %3944 = vmatpush.bf16.msra.mxu2 %v6925_v48  ;;  %v7569_v29 = vld [vmem:[%s11529_s1 + $0xba4] sm:$0xf0]  ;;  %v5513_v56 = vor.u32 %v7198_v11, %v5510_v38  ;;  %v5486_v11 = vld [vmem:[%s7767_s12 + $0x2f0] sm:$0xf0]  ;;  %v5622_v38 = vld [vmem:[%s11529_s1 + $0xf8] sm:$0xf0] }
 0x1b2   : > { %v3640_v40 = vpop.f32.mrf.mxu0  ;;  %4009 = vmatpush.bf16.msra.mxu0 %v5529_v43  ;;  %v6989_v55 = vor.u32 %v7569_v29, %v6988_v41  ;;  %v7169_v43 = vld [vmem:[%s7767_s12 + $0x224] sm:$0xf0]  ;;  %v9605_v29 = vor.u32 %v7194_v37, %v5484_v31  ;;  %v6980_v31 = vld [vmem:[%s11529_s1 + $0xb90] sm:$0xf] }
 0x1b3   : > { %v3600_v22 = vpop.f32.mrf.mxu3  ;;  %v5502_v40 = vld [vmem:[%s11529_s1 + $0x8] sm:$0xf0] }
 0x1b4   : > { %v3601_v16 = vadd.f32 %v3600_v22, %v3568_v10  ;;  %3977 = vmatpush.bf16.msra.mxu3 %v6989_v55  ;;  %v5382_v10 = vld [vmem:[%s7767_s12 + $0x228] sm:$0xf0]  ;;  %v7182_v55 = vld [vmem:[%s7767_s12 + $0x294] sm:$0xf] }
 0x1b5   : > { %v3673_v48 = vpop.f32.mrf.mxu1  ;;  %v9625_v37 = vor.u32 %v7182_v55, %v5486_v11  ;;  %v7222_v55 = vld [vmem:[%s11529_s1 + $0xd4] sm:$0xf] }
 0x1b6   : > { %v3634_v45 = vadd.f32 %v9448_v17, %v3601_v16  ;;  %4010 = vmatpush.bf16.msra.mxu0 %v5521_v32  ;;  %v7196_v17 = vld [vmem:[%s11529_s1 + $0x4] sm:$0xf]  ;;  %v7226_v16 = vld [vmem:[%s11529_s1 + $0xf4] sm:$0xf]  ;;  %v9614_v48 = vor.u32 %v7157_v13, %v5382_v10 }
 0x1b7   : > { %v5625_v47 = vor.u32 %v7226_v16, %v5622_v38  ;;  %v7224_v10 = vld [vmem:[%s11529_s1 + $0xe4] sm:$0xf] }
 0x1b8   : > { %v9589_v21 = vadd.f32 %v9469_v58, %v3634_v45  ;;  %v3569_v22 = vpop.f32.mrf.mxu2  ;;  %v9603_v58 = vor.u32 %v7169_v43, %v5380_v44  ;;  %v7551_v44 = vld [vmem:[%s11529_s1 + $0xb14] sm:$0xf0]  ;;  %v5505_v43 = vor.u32 %v7196_v17, %v5502_v40 }
 0x1b9   : > { %v3570_v32 = vadd.f32 %v3569_v22, %v9276_v19  ;;  %v6916_v19 = vld [vmem:[%s11529_s1 + $0xb10] sm:$0xf]  ;;  %4038 = vmatpush.bf16.msra.mxu1 %v5625_v47  ;;  %v5614_v22 = vld [vmem:[%s11529_s1 + $0xe8] sm:$0xf0] }
 0x1ba   : > { %v9612_v45 = vpop.f32.mrf.mxu0  ;;  %4011 = vmatpush.bf16.msra.mxu0 %v5513_v56  ;;  %v6917_v13 = vor.u32 %v7551_v44, %v6916_v19  ;;  %v7567_v56 = vld [vmem:[%s11529_s1 + $0xb94] sm:$0xf0]  ;;  %v5617_v47 = vor.u32 %v7224_v10, %v5614_v22  ;;  %v337_v19 = vld [vmem:[%s7767_s12 + $0x350] sm:$0xff]  ;;  %v7220_v10 = vld [vmem:[%s11529_s1 + $0xc4] sm:$0xf] }
 0x1bb   : > { %v3602_v41 = vpop.f32.mrf.mxu3  ;;  %v6981_v40 = vor.u32 %v7567_v56, %v6980_v31  ;;  %v7549_v31 = vld [vmem:[%s11529_s1 + $0xb04] sm:$0xf0]  ;;  %v5598_v22 = vld [vmem:[%s11529_s1 + $0xc8] sm:$0xf0] }
 0x1bc   : > { %v3603_v34 = vadd.f32 %v3602_v41, %v3570_v32  ;;  %3945 = vmatpush.bf16.msra.mxu2 %v6917_v13  ;;  %v7565_v56 = vld [vmem:[%s11529_s1 + $0xb84] sm:$0xf0] }
 0x1bd   : > { %3825 = vmatmul.bf16.gmra.mxu2 %v9603_v58  ;;  %3896 = vmatmul.bf16.gmra.mxu0 %v9605_v29  ;;  %v9640_v16 = vpop.f32.mrf.mxu1 }
 0x1be   : > { %v3636_v17 = vadd.f32 %v9491_v3, %v3603_v34  ;;  %4012 = vmatpush.bf16.msra.mxu0 %v5505_v43  ;;  %3978 = vmatpush.bf16.msra.mxu3 %v6981_v40  ;;  %v5606_v34 = vld [vmem:[%s11529_s1 + $0xd8] sm:$0xf0]  ;;  %v6908_v43 = vld [vmem:[%s11529_s1 + $0xb00] sm:$0xf]  ;;  %v1049_v40 = vunpack.c.l.b16 %v337_v19 }
 0x1bf   : > { %4039 = vmatpush.bf16.msra.mxu1 %v5617_v47  ;;  %v5609_v38 = vor.u32 %v7222_v55, %v5606_v34  ;;  %v6909_v13 = vor.u32 %v7549_v31, %v6908_v43  ;;  %v5476_v55 = vld [vmem:[%s7767_s12 + $0x288] sm:$0xf]  ;;  %v5478_v43 = vld [vmem:[%s7767_s12 + $0x2e8] sm:$0xf0] }
 0x1c0   : > { %3858 = vmatmul.bf16.gmra.mxu3 %v9614_v48  ;;  %v9643_v32 = vadd.f32 %v9511_v42, %v3636_v17  ;;  %v3572_v41 = vpop.f32.mrf.mxu2  ;;  %3929 = vmatmul.bf16.gmra.mxu1 %v9625_v37  ;;  %v7193_v34 = vld [vmem:[%s7767_s12 + $0x2e4] sm:$0xf0] }
 0x1c1   : > { %v3573_v3 = vadd.f32 %v3572_v41, %v9313_v14  ;;  %v6972_v14 = vld [vmem:[%s11529_s1 + $0xb80] sm:$0xf]  ;;  %v5601_v41 = vor.u32 %v7220_v10, %v5598_v22  ;;  %3946 = vmatpush.bf16.msra.mxu2 %v6909_v13  ;;  %v9692_v13 = vpack.c.b16 %v1049_v40, %v1049_v40 }
 0x1c2   : > { %v9653_v42 = vpop.f32.mrf.mxu0  ;;  %v6973_v47 = vor.u32 %v7565_v56, %v6972_v14  ;;  %v9690_v56 = vor.u32 %v7193_v34, %v5476_v55  ;;  %v7242_v34 = vld [vmem:[%s11529_s1 + $0x174] sm:$0xf] }
 0x1c3   : > { %v3605_v11 = vpop.f32.mrf.mxu3  ;;  %4040 = vmatpush.bf16.msra.mxu1 %v5609_v38  ;;  %v7181_v38 = vld [vmem:[%s7767_s12 + $0x28c] sm:$0xf]  ;;  %11681 = vst [vmem:[#allocation73_spill] sm:$0xff] %v9692_v13 }
 0x1c4   : > { %v3606_v44 = vadd.f32 %v3605_v11, %v3573_v3  ;;  %3979 = vmatpush.bf16.msra.mxu3 %v6973_v47  ;;  %v7216_v47 = vld [vmem:[%s11529_s1 + $0xa4] sm:$0xf] }
 0x1c5   : > { %v9677_v3 = vpop.f32.mrf.mxu1 }
 0x1c6   : > { %v3639_v17 = vadd.f32 %v9534_v18, %v3606_v44  ;;  %v7218_v18 = vld [vmem:[%s11529_s1 + $0xb4] sm:$0xf]  ;;  %v5590_v44 = vld [vmem:[%s11529_s1 + $0xb8] sm:$0xf0] }
 0x1c7   : > { %4041 = vmatpush.bf16.msra.mxu1 %v5601_v41  ;;  %v5593_v10 = vor.u32 %v7218_v18, %v5590_v44  ;;  %v5582_v41 = vld [vmem:[%s11529_s1 + $0xa8] sm:$0xf0]  ;;  %v5750_v18 = vld [vmem:[%s11529_s1 + $0x1f8] sm:$0xf0] }
 0x1c8   : > { %v9680_v11 = vadd.f32 %v9552_v8, %v3639_v17  ;;  %v3574_v31 = vpop.f32.mrf.mxu2  ;;  %v1050_v8 = vunpack.c.h.b16 %v337_v19  ;;  %v9696_v17 = vor.u32 %v7181_v38, %v5478_v43  ;;  %v5585_v19 = vor.u32 %v7216_v47, %v5582_v41  ;;  %v5686_v38 = vld [vmem:[%s11529_s1 + $0x178] sm:$0xf0] }
 0x1c9   : > { %v5689_v43 = vor.u32 %v7242_v34, %v5686_v38  ;;  %v7258_v31 = vld [vmem:[%s11529_s1 + $0x1f4] sm:$0xf] }
 0x1ca   : > { %v9694_v22 = vpop.f32.mrf.mxu0  ;;  %11682 = vst [vmem:[#allocation74_spill] sm:$0xff] %v9696_v17  ;;  %v9706_v40 = vpack.c.b16 %v1050_v8, %v1050_v8  ;;  %v7214_v8 = vld [vmem:[%s11529_s1 + $0x94] sm:$0xf] }
 0x1cb   : > { %v3607_v14 = vpop.f32.mrf.mxu3  ;;  %4042 = vmatpush.bf16.msra.mxu1 %v5593_v10  ;;  %v5574_v10 = vld [vmem:[%s11529_s1 + $0x98] sm:$0xf0]  ;;  %4071 = vmatpush.bf16.msrb.mxu2 %v5689_v43 }
 0x1cc   : > { %11683 = vst [vmem:[#allocation75_spill] sm:$0xff] %v9706_v40  ;;  %v5753_v14 = vor.u32 %v7258_v31, %v5750_v18  ;;  %v5577_v34 = vor.u32 %v7214_v8, %v5574_v10  ;;  %v7212_v31 = vld [vmem:[%s11529_s1 + $0x84] sm:$0xf]  ;;  %v5566_v18 = vld [vmem:[%s11529_s1 + $0x88] sm:$0xf0] }
 0x1cd   : > { %3830 = vmatmul.bf16.gmra.mxu2 %v9690_v56  ;;  %3901 = vmatmul.bf16.gmra.mxu0 %v9692_v13  ;;  %v9709_v55 = vpop.f32.mrf.mxu1 }
 0x1ce   : > { %4104 = vmatpush.bf16.msrb.mxu3 %v5753_v14  ;;  %v7240_v14 = vld [vmem:[%s11529_s1 + $0x164] sm:$0xf] }
 0x1cf   : > { %4043 = vmatpush.bf16.msra.mxu1 %v5585_v19 }
 0x1d0   : > { %3863 = vmatmul.bf16.gmra.mxu3 %v9696_v17  ;;  %v3684_v44 = vpop.f32.mrf.mxu2  ;;  %3934 = vmatmul.bf16.gmra.mxu1 %v9706_v40  ;;  %v336_v17 = vld [vmem:[%s7767_s12 + $0x348] sm:$0xff]  ;;  %v5569_v40 = vor.u32 %v7212_v31, %v5566_v18 }
 0x1d1   : > { %v3685_v47 = vadd.f32 %v3684_v44, %v9379_v25  ;;  %v1047_v44 = vunpack.c.l.b16 %v336_v17  ;;  %v1048_v43 = vunpack.c.h.b16 %v336_v17 }
 0x1d2   : > { %v9731_v38 = vpop.f32.mrf.mxu0 }
 0x1d3   : > { %v3717_v41 = vpop.f32.mrf.mxu3  ;;  %4044 = vmatpush.bf16.msra.mxu1 %v5577_v34  ;;  %v9753_v17 = vpack.c.b16 %v1047_v44, %v1047_v44 }
 0x1d4   : > { %v3718_v19 = vadd.f32 %v3717_v41, %v3685_v47  ;;  %v5678_v47 = vld [vmem:[%s11529_s1 + $0x168] sm:$0xf0] }
 0x1d5   : > { %v9741_v8 = vpop.f32.mrf.mxu1  ;;  %v5681_v34 = vor.u32 %v7240_v14, %v5678_v47  ;;  %11684 = vst [vmem:[#allocation76_spill] sm:$0xff] %v9753_v17 }
 0x1d6   : > { %v3751_v25 = vadd.f32 %v9612_v45, %v3718_v19 }
 0x1d7   : > { %4045 = vmatpush.bf16.msra.mxu1 %v5569_v40  ;;  %4072 = vmatpush.bf16.msrb.mxu2 %v5681_v34  ;;  %v5742_v40 = vld [vmem:[%s11529_s1 + $0x1e8] sm:$0xf0] }
 0x1d8   : > { %v9744_v10 = vadd.f32 %v9640_v16, %v3751_v25  ;;  %v3686_v41 = vpop.f32.mrf.mxu2  ;;  %v9757_v16 = vpack.c.b16 %v1048_v43, %v1048_v43  ;;  %v7256_v25 = vld [vmem:[%s11529_s1 + $0x1e4] sm:$0xf] }
 0x1d9   : > { %v3687_v45 = vadd.f32 %v3686_v41, %v9413_v54  ;;  %v5745_v14 = vor.u32 %v7256_v25, %v5742_v40  ;;  %v5204_v40 = vld [vmem:[%s7767_s12 + $0x58] sm:$0xf] }
 0x1da   : > { %v9755_v31 = vpop.f32.mrf.mxu0  ;;  %11685 = vst [vmem:[#allocation77_spill] sm:$0xff] %v9757_v16 }
 0x1db   : > { %v3719_v19 = vpop.f32.mrf.mxu3  ;;  %4105 = vmatpush.bf16.msrb.mxu3 %v5745_v14  ;;  %v7123_v14 = vld [vmem:[%s7767_s12 + $0xb4] sm:$0xf0] }
 0x1dc   : > { %v3720_v18 = vadd.f32 %v3719_v19, %v3687_v45  ;;  %v7238_v45 = vld [vmem:[%s11529_s1 + $0x154] sm:$0xf] }
 0x1dd   : > { %3835 = vmatmul.bf16.gmra.mxu2 %v9753_v17  ;;  %4013 = vmatmul.bf16.vlgmr.msra.gmra.mxu0 %v7814_v4  ;;  %v9769_v44 = vpop.f32.mrf.mxu1  ;;  %v9801_v17 = vor.u32 %v7123_v14, %v5204_v40 }
 0x1de   : > { %v3753_v54 = vadd.f32 %v9653_v42, %v3720_v18 }
 0x1e0   : > { %3868 = vmatmul.bf16.gmra.mxu3 %v9757_v16  ;;  %v9772_v43 = vadd.f32 %v9677_v3, %v3753_v54  ;;  %v3689_v47 = vpop.f32.mrf.mxu2  ;;  %4046 = vmatmul.bf16.vlgmr.msra.gmra.mxu1 %v7857_v24  ;;  %v5670_v3 = vld [vmem:[%s11529_s1 + $0x158] sm:$0xf0] }
 0x1e1   : > { %v3690_v41 = vadd.f32 %v3689_v47, %v9439_v20  ;;  %v7254_v20 = vld [vmem:[%s11529_s1 + $0x1d4] sm:$0xf]  ;;  %v5673_v19 = vor.u32 %v7238_v45, %v5670_v3  ;;  %v5734_v24 = vld [vmem:[%s11529_s1 + $0x1d8] sm:$0xf0] }
 0x1e2   : > { %v9776_v4 = vpop.f32.mrf.mxu0  ;;  %v5737_v25 = vor.u32 %v7254_v20, %v5734_v24  ;;  %v7236_v20 = vld [vmem:[%s11529_s1 + $0x144] sm:$0xf]  ;;  %v5814_v24 = vld [vmem:[%s11529_s1 + $0x278] sm:$0xf0] }
 0x1e3   : > { %v3722_v34 = vpop.f32.mrf.mxu3  ;;  %4073 = vmatpush.bf16.msrb.mxu2 %v5673_v19 }
 0x1e4   : > { %v3723_v42 = vadd.f32 %v3722_v34, %v3690_v41  ;;  %v7111_v41 = vld [vmem:[%s7767_s12 + $0x5c] sm:$0xf]  ;;  %4106 = vmatpush.bf16.msrb.mxu3 %v5737_v25  ;;  %v7252_v25 = vld [vmem:[%s11529_s1 + $0x1c4] sm:$0xf] }
 0x1e5   : > { %v9793_v54 = vpop.f32.mrf.mxu1  ;;  %v5206_v34 = vld [vmem:[%s7767_s12 + $0xb8] sm:$0xf0] }
 0x1e6   : > { %v3756_v18 = vadd.f32 %v9694_v22, %v3723_v42  ;;  %v9805_v22 = vor.u32 %v7111_v41, %v5206_v34  ;;  %v7272_v34 = vld [vmem:[%s11529_s1 + $0x264] sm:$0xf] }
 0x1e8   : > { %v9796_v47 = vadd.f32 %v9709_v55, %v3756_v18  ;;  %v3691_v16 = vpop.f32.mrf.mxu2  ;;  %v5662_v55 = vld [vmem:[%s11529_s1 + $0x148] sm:$0xf0] }
 0x1e9   : > { %v3692_v45 = vadd.f32 %v3691_v16, %v9481_v49  ;;  %v5665_v19 = vor.u32 %v7236_v20, %v5662_v55  ;;  %v7274_v16 = vld [vmem:[%s11529_s1 + $0x274] sm:$0xf] }
 0x1ea   : > { %v9803_v13 = vpop.f32.mrf.mxu0 }
 0x1eb   : > { %v3724_v3 = vpop.f32.mrf.mxu3  ;;  %4074 = vmatpush.bf16.msrb.mxu2 %v5665_v19  ;;  %v7234_v19 = vld [vmem:[%s11529_s1 + $0x134] sm:$0xf] }
 0x1ec   : > { %v3725_v42 = vadd.f32 %v3724_v3, %v3692_v45  ;;  %v5806_v45 = vld [vmem:[%s11529_s1 + $0x268] sm:$0xf0] }
 0x1ed   : > { %3947 = vmatmul.bf16.vlgmr.msra.gmra.mxu2 %v9801_v17  ;;  %4018 = vmatmul.bf16.gmra.mxu0 %v7930_v0  ;;  %v9823_v18 = vpop.f32.mrf.mxu1  ;;  %v5726_v0 = vld [vmem:[%s11529_s1 + $0x1c8] sm:$0xf0] }
 0x1ee   : > { %v3758_v49 = vadd.f32 %v9731_v38, %v3725_v42  ;;  %v5817_v38 = vor.u32 %v7274_v16, %v5814_v24  ;;  %v5729_v14 = vor.u32 %v7252_v25, %v5726_v0  ;;  %v5798_v16 = vld [vmem:[%s11529_s1 + $0x258] sm:$0xf0]  ;;  %v5300_v0 = vld [vmem:[%s7767_s12 + $0x118] sm:$0xf] }
 0x1f0   : > { %3980 = vmatmul.bf16.vlgmr.msra.gmra.mxu3 %v9805_v22  ;;  %v9832_v40 = vadd.f32 %v9741_v8, %v3758_v49  ;;  %v3694_v41 = vpop.f32.mrf.mxu2  ;;  %4137 = vmatpush.bf16.msrb.mxu0 %v5817_v38  ;;  %v5809_v8 = vor.u32 %v7272_v34, %v5806_v45  ;;  %v5654_v49 = vld [vmem:[%s11529_s1 + $0x138] sm:$0xf0]  ;;  %v7147_v38 = vld [vmem:[%s7767_s12 + $0x174] sm:$0xf0] }
 0x1f1   : > { %v3695_v3 = vadd.f32 %v3694_v41, %v9514_v30  ;;  %4051 = vmatmul.bf16.gmra.mxu1 %v7973_v23  ;;  %4107 = vmatpush.bf16.msrb.mxu3 %v5729_v14  ;;  %v5657_v30 = vor.u32 %v7234_v19, %v5654_v49  ;;  %v7270_v23 = vld [vmem:[%s11529_s1 + $0x254] sm:$0xf]  ;;  %v7135_v14 = vld [vmem:[%s7767_s12 + $0x11c] sm:$0xf] }
 0x1f2   : > { %v9842_v20 = vpop.f32.mrf.mxu0  ;;  %v5801_v25 = vor.u32 %v7270_v23, %v5798_v16  ;;  %v5302_v45 = vld [vmem:[%s7767_s12 + $0x178] sm:$0xf0] }
 0x1f3   : > { %v3727_v42 = vpop.f32.mrf.mxu3  ;;  %4075 = vmatpush.bf16.msrb.mxu2 %v5657_v30  ;;  %v9879_v30 = vor.u32 %v7147_v38, %v5300_v0 }
 0x1f4   : > { %v3728_v55 = vadd.f32 %v3727_v42, %v3695_v3  ;;  %4138 = vmatpush.bf16.msrb.mxu0 %v5809_v8  ;;  %v7250_v3 = vld [vmem:[%s11529_s1 + $0x1b4] sm:$0xf]  ;;  %v5718_v42 = vld [vmem:[%s11529_s1 + $0x1b8] sm:$0xf0] }
 0x1f5   : > { %v9860_v41 = vpop.f32.mrf.mxu1  ;;  %v5721_v8 = vor.u32 %v7250_v3, %v5718_v42  ;;  %v7266_v3 = vld [vmem:[%s11529_s1 + $0x234] sm:$0xf]  ;;  %v5782_v42 = vld [vmem:[%s11529_s1 + $0x238] sm:$0xf0] }
 0x1f6   : > { %v3761_v24 = vadd.f32 %v9755_v31, %v3728_v55  ;;  %v7268_v55 = vld [vmem:[%s11529_s1 + $0x244] sm:$0xf]  ;;  %v5785_v0 = vor.u32 %v7266_v3, %v5782_v42  ;;  %v5710_v3 = vld [vmem:[%s11529_s1 + $0x1a8] sm:$0xf0] }
 0x1f7   : > { %4108 = vmatpush.bf16.msrb.mxu3 %v5721_v8 }
 0x1f8   : > { %v9863_v34 = vadd.f32 %v9769_v44, %v3761_v24  ;;  %v3696_v31 = vpop.f32.mrf.mxu2  ;;  %4139 = vmatpush.bf16.msrb.mxu0 %v5801_v25  ;;  %v5790_v44 = vld [vmem:[%s11529_s1 + $0x248] sm:$0xf0]  ;;  %v9883_v24 = vor.u32 %v7135_v14, %v5302_v45  ;;  %v7232_v14 = vld [vmem:[%s11529_s1 + $0x124] sm:$0xf] }
 0x1f9   : > { %v3697_v19 = vadd.f32 %v3696_v31, %v9561_v53  ;;  %v5793_v23 = vor.u32 %v7268_v55, %v5790_v44  ;;  %v5646_v45 = vld [vmem:[%s11529_s1 + $0x128] sm:$0xf0] }
 0x1fa   : > { %v9881_v16 = vpop.f32.mrf.mxu0  ;;  %v5649_v8 = vor.u32 %v7232_v14, %v5646_v45  ;;  %v5774_v55 = vld [vmem:[%s11529_s1 + $0x228] sm:$0xf0]  ;;  %v5396_v14 = vld [vmem:[%s7767_s12 + $0x1d8] sm:$0xf] }
 0x1fb   : > { %v3729_v49 = vpop.f32.mrf.mxu3  ;;  %v7171_v45 = vld [vmem:[%s7767_s12 + $0x234] sm:$0xf0] }
 0x1fc   : > { %v3730_v25 = vadd.f32 %v3729_v49, %v3697_v19  ;;  %4140 = vmatpush.bf16.msrb.mxu0 %v5793_v23  ;;  %4076 = vmatpush.bf16.msrb.mxu2 %v5649_v8 }
 0x1fd   : > { %3952 = vmatmul.bf16.gmra.mxu2 %v9879_v30  ;;  %4023 = vmatmul.bf16.gmra.mxu0 %v7816_v5  ;;  %v9895_v38 = vpop.f32.mrf.mxu1 }
 0x1fe   : > { %v3763_v53 = vadd.f32 %v9776_v4, %v3730_v25  ;;  %v7264_v4 = vld [vmem:[%s11529_s1 + $0x224] sm:$0xf] }
 0x1ff   : > { %v7248_v25 = vld [vmem:[%s11529_s1 + $0x1a4] sm:$0xf] }
 0x200   : > { %3985 = vmatmul.bf16.gmra.mxu3 %v9883_v24  ;;  %v9904_v31 = vadd.f32 %v9793_v54, %v3763_v53  ;;  %v3699_v5 = vpop.f32.mrf.mxu2  ;;  %4141 = vmatpush.bf16.msrb.mxu0 %v5785_v0  ;;  %v5777_v54 = vor.u32 %v7264_v4, %v5774_v55  ;;  %v5713_v42 = vor.u32 %v7248_v25, %v5710_v3  ;;  %v7159_v4 = vld [vmem:[%s7767_s12 + $0x1dc] sm:$0xf] }
 0x201   : > { %v3700_v44 = vadd.f32 %v3699_v5, %v9589_v21  ;;  %4056 = vmatmul.bf16.gmra.mxu1 %v7827_v9  ;;  %v7262_v9 = vld [vmem:[%s11529_s1 + $0x214] sm:$0xf]  ;;  %v5766_v21 = vld [vmem:[%s11529_s1 + $0x218] sm:$0xf0] }
 0x202   : > { %v3772_v49 = vpop.f32.mrf.mxu0  ;;  %v5769_v0 = vor.u32 %v7262_v9, %v5766_v21  ;;  %4109 = vmatpush.bf16.msrb.mxu3 %v5713_v42  ;;  %v5398_v55 = vld [vmem:[%s7767_s12 + $0x238] sm:$0xf0] }
 0x203   : > { %v3732_v19 = vpop.f32.mrf.mxu3  ;;  %v5878_v3 = vld [vmem:[%s11529_s1 + $0x2f8] sm:$0xf0]  ;;  %v9951_v9 = vor.u32 %v7159_v4, %v5398_v55  ;;  %v7288_v4 = vld [vmem:[%s11529_s1 + $0x2e4] sm:$0xf]  ;;  %v5870_v55 = vld [vmem:[%s11529_s1 + $0x2e8] sm:$0xf0] }
 0x204   : > { %v3733_v23 = vadd.f32 %v3732_v19, %v3700_v44  ;;  %4142 = vmatpush.bf16.msrb.mxu0 %v5777_v54  ;;  %v7260_v19 = vld [vmem:[%s11529_s1 + $0x204] sm:$0xf]  ;;  %v7290_v54 = vld [vmem:[%s11529_s1 + $0x2f4] sm:$0xf] }
 0x205   : > { %v3805_v8 = vpop.f32.mrf.mxu1  ;;  %v5881_v21 = vor.u32 %v7290_v54, %v5878_v3 }
 0x206   : > { %v3766_v53 = vadd.f32 %v9803_v13, %v3733_v23  ;;  %v5758_v13 = vld [vmem:[%s11529_s1 + $0x208] sm:$0xf0]  ;;  %v9944_v23 = vor.u32 %v7171_v45, %v5396_v14  ;;  %v7246_v14 = vld [vmem:[%s11529_s1 + $0x194] sm:$0xf]  ;;  %v5702_v8 = vld [vmem:[%s11529_s1 + $0x198] sm:$0xf0] }
 0x207   : > { %v5761_v25 = vor.u32 %v7260_v19, %v5758_v13  ;;  %4170 = vmatpush.bf16.msrb.mxu1 %v5881_v21  ;;  %v5705_v19 = vor.u32 %v7246_v14, %v5702_v8  ;;  %v5873_v13 = vor.u32 %v7288_v4, %v5870_v55  ;;  %v5694_v14 = vld [vmem:[%s11529_s1 + $0x188] sm:$0xf0] }
 0x208   : > { %v9930_v5 = vadd.f32 %v9823_v18, %v3766_v53  ;;  %v3701_v44 = vpop.f32.mrf.mxu2  ;;  %4143 = vmatpush.bf16.msrb.mxu0 %v5769_v0  ;;  %v7230_v0 = vld [vmem:[%s11529_s1 + $0x114] sm:$0xf]  ;;  %v5854_v8 = vld [vmem:[%s11529_s1 + $0x2c8] sm:$0xf0] }
 0x209   : > { %v3702_v49 = vadd.f32 %v3701_v44, %v9643_v32  ;;  %v5638_v32 = vld [vmem:[%s11529_s1 + $0x118] sm:$0xf0]  ;;  %4110 = vmatpush.bf16.msrb.mxu3 %v5705_v19  ;;  %v5492_v19 = vld [vmem:[%s7767_s12 + $0x298] sm:$0xf] }
 0x20a   : > { %v9949_v42 = vpop.f32.mrf.mxu0  ;;  %v5641_v45 = vor.u32 %v7230_v0, %v5638_v32  ;;  %v7228_v0 = vld [vmem:[%s11529_s1 + $0x104] sm:$0xf]  ;;  %v5630_v32 = vld [vmem:[%s11529_s1 + $0x108] sm:$0xf0] }
 0x20b   : > { %v3734_v18 = vpop.f32.mrf.mxu3  ;;  %4171 = vmatpush.bf16.msrb.mxu1 %v5873_v13  ;;  %v7195_v13 = vld [vmem:[%s7767_s12 + $0x2f4] sm:$0xf0] }
 0x20c   : > { %v3735_v53 = vadd.f32 %v3734_v18, %v3702_v49  ;;  %4144 = vmatpush.bf16.msrb.mxu0 %v5761_v25  ;;  %4077 = vmatpush.bf16.msrb.mxu2 %v5641_v45  ;;  %v7286_v25 = vld [vmem:[%s11529_s1 + $0x2d4] sm:$0xf]  ;;  %v7284_v45 = vld [vmem:[%s11529_s1 + $0x2c4] sm:$0xf] }
 0x20d   : > { %3957 = vmatmul.bf16.gmra.mxu2 %v9944_v23  ;;  %4028 = vmatmul.bf16.gmra.mxu0 %v7932_v1  ;;  %v9975_v54 = vpop.f32.mrf.mxu1  ;;  %v5862_v1 = vld [vmem:[%s11529_s1 + $0x2d8] sm:$0xf0] }
 0x20e   : > { %v3768_v44 = vadd.f32 %v9842_v20, %v3735_v53 }
 0x210   : > { %3990 = vmatmul.bf16.gmra.mxu3 %v9951_v9  ;;  %v9978_v49 = vadd.f32 %v9860_v41, %v3768_v44  ;;  %v3704_v18 = vpop.f32.mrf.mxu2  ;;  %v5865_v41 = vor.u32 %v7286_v25, %v5862_v1  ;;  %v5857_v44 = vor.u32 %v7284_v45, %v5854_v8  ;;  %v7183_v1 = vld [vmem:[%s7767_s12 + $0x29c] sm:$0xf] }
 0x211   : > { %v3705_v20 = vadd.f32 %v3704_v18, %v9680_v11  ;;  %4061 = vmatmul.bf16.gmra.mxu1 %v7943_v7  ;;  %v7244_v11 = vld [vmem:[%s11529_s1 + $0x184] sm:$0xf]  ;;  %v5633_v7 = vor.u32 %v7228_v0, %v5630_v32  ;;  %v10024_v0 = vor.u32 %v7195_v13, %v5492_v19  ;;  %v7322_v19 = vld [vmem:[%s11529_s1 + $0x3f4] sm:$0xf] }
 0x212   : > { %v9988_v21 = vpop.f32.mrf.mxu0  ;;  %4172 = vmatpush.bf16.msrb.mxu1 %v5865_v41  ;;  %v5697_v55 = vor.u32 %v7244_v11, %v5694_v14  ;;  %v7282_v41 = vld [vmem:[%s11529_s1 + $0x2b4] sm:$0xf]  ;;  %v5838_v14 = vld [vmem:[%s11529_s1 + $0x2a8] sm:$0xf0] }
 0x213   : > { %v3737_v3 = vpop.f32.mrf.mxu3  ;;  %4078 = vmatpush.bf16.msrb.mxu2 %v5633_v7  ;;  %v7280_v7 = vld [vmem:[%s11529_s1 + $0x2a4] sm:$0xf] }
 0x214   : > { %v3738_v53 = vadd.f32 %v3737_v3, %v3705_v20  ;;  %v5494_v20 = vld [vmem:[%s7767_s12 + $0x2f8] sm:$0xf0]  ;;  %4111 = vmatpush.bf16.msrb.mxu3 %v5697_v55  ;;  %v5841_v45 = vor.u32 %v7280_v7, %v5838_v14 }
 0x215   : > { %v10011_v18 = vpop.f32.mrf.mxu1  ;;  %v5942_v55 = vld [vmem:[%s11529_s1 + $0x378] sm:$0xf0] }
 0x216   : > { %v3771_v4 = vadd.f32 %v9881_v16, %v3738_v53  ;;  %4173 = vmatpush.bf16.msrb.mxu1 %v5857_v44  ;;  %v5846_v16 = vld [vmem:[%s11529_s1 + $0x2b8] sm:$0xf0] }
 0x217   : > { %v5849_v32 = vor.u32 %v7282_v41, %v5846_v16  ;;  %v338_v7 = vld [vmem:[%s7767_s12 + $0x358] sm:$0xff] }
 0x218   : > { %v10014_v25 = vadd.f32 %v9895_v38, %v3771_v4  ;;  %v3706_v3 = vpop.f32.mrf.mxu2  ;;  %v10028_v38 = vor.u32 %v7183_v1, %v5494_v20  ;;  %v7306_v4 = vld [vmem:[%s11529_s1 + $0x374] sm:$0xf] }
 0x219   : > { %v5945_v44 = vor.u32 %v7306_v4, %v5942_v55  ;;  %v7278_v20 = vld [vmem:[%s11529_s1 + $0x294] sm:$0xf]  ;;  %v5830_v3 = vld [vmem:[%s11529_s1 + $0x298] sm:$0xf0]  ;;  %v5822_v4 = vld [vmem:[%s11529_s1 + $0x288] sm:$0xf0]  ;;  %v1051_v55 = vunpack.c.l.b16 %v338_v7 }
 0x21a   : > { %v10026_v11 = vpop.f32.mrf.mxu0  ;;  %4174 = vmatpush.bf16.msrb.mxu1 %v5849_v32 }
 0x21b   : > { %v3739_v53 = vpop.f32.mrf.mxu3  ;;  %4203 = vmatpush.bf16.msra.mxu2 %v5945_v44  ;;  %v1052_v44 = vunpack.c.h.b16 %v338_v7 }
 0x21c   : > { %v5833_v53 = vor.u32 %v7278_v20, %v5830_v3 }
 0x21d   : > { %3962 = vmatmul.bf16.gmra.mxu2 %v10024_v0  ;;  %4033 = vmatmul.bf16.gmra.mxu0 %v8034_v59  ;;  %v10039_v8 = vpop.f32.mrf.mxu1  ;;  %v6006_v59 = vld [vmem:[%s11529_s1 + $0x3f8] sm:$0xf0] }
 0x21e   : > { %4175 = vmatpush.bf16.msrb.mxu1 %v5841_v45  ;;  %v6009_v1 = vor.u32 %v7322_v19, %v6006_v59  ;;  %v7276_v45 = vld [vmem:[%s11529_s1 + $0x284] sm:$0xf] }
 0x220   : > { %3995 = vmatmul.bf16.gmra.mxu3 %v10028_v38  ;;  %v3816_v13 = vpop.f32.mrf.mxu2 }
 0x221   : > { %v3817_v41 = vadd.f32 %v3816_v13, %v9744_v10  ;;  %4066 = vmatmul.bf16.gmra.mxu1 %v8038_v61  ;;  %4236 = vmatpush.bf16.msra.mxu3 %v6009_v1  ;;  %v5825_v61 = vor.u32 %v7276_v45, %v5822_v4  ;;  %v7304_v13 = vld [vmem:[%s11529_s1 + $0x364] sm:$0xf]  ;;  %v5934_v1 = vld [vmem:[%s11529_s1 + $0x368] sm:$0xf0] }
 0x222   : > { %v10061_v32 = vpop.f32.mrf.mxu0  ;;  %4176 = vmatpush.bf16.msrb.mxu1 %v5833_v53  ;;  %v5937_v3 = vor.u32 %v7304_v13, %v5934_v1  ;;  %v5998_v45 = vld [vmem:[%s11529_s1 + $0x3e8] sm:$0xf0] }
 0x223   : > { %v3849_v16 = vpop.f32.mrf.mxu3 }
 0x224   : > { %v3850_v14 = vadd.f32 %v3849_v16, %v3817_v41  ;;  %v10081_v16 = vpack.c.b16 %v1051_v55, %v1051_v55  ;;  %4204 = vmatpush.bf16.msra.mxu2 %v5937_v3 }
 0x225   : > { %v3922_v19 = vpop.f32.mrf.mxu1 }
 0x226   : > { %v3883_v10 = vadd.f32 %v9949_v42, %v3850_v14  ;;  %4177 = vmatpush.bf16.msrb.mxu1 %v5825_v61  ;;  %v7320_v14 = vld [vmem:[%s11529_s1 + $0x3e4] sm:$0xf] }
 0x227   : > { %v6001_v4 = vor.u32 %v7320_v14, %v5998_v45 }
 0x228   : > { %v10072_v59 = vadd.f32 %v9975_v54, %v3883_v10  ;;  %v3818_v20 = vpop.f32.mrf.mxu2  ;;  %v10085_v54 = vpack.c.b16 %v1052_v44, %v1052_v44 }
 0x229   : > { %v3819_v42 = vadd.f32 %v3818_v20, %v9772_v43  ;;  %4237 = vmatpush.bf16.msra.mxu3 %v6001_v4 }
 0x22a   : > { %v10083_v53 = vpop.f32.mrf.mxu0 }
 0x22b   : > { %v3851_v41 = vpop.f32.mrf.mxu3 }
 0x22c   : > { %v3852_v7 = vadd.f32 %v3851_v41, %v3819_v42 }
 0x22d   : > { %3967 = vmatmul.bf16.gmra.mxu2 %v10081_v16  ;;  %4145 = vmatmul.bf16.vlgmr.msrb.gmra.mxu0 %v8036_v60  ;;  %v3925_v10 = vpop.f32.mrf.mxu1  ;;  %v7302_v60 = vld [vmem:[%s11529_s1 + $0x354] sm:$0xf] }
 0x22e   : > { %v3885_v43 = vadd.f32 %v9988_v21, %v3852_v7  ;;  %v5926_v21 = vld [vmem:[%s11529_s1 + $0x358] sm:$0xf0] }
 0x22f   : > { %v5929_v3 = vor.u32 %v7302_v60, %v5926_v21 }
 0x230   : > { %4000 = vmatmul.bf16.gmra.mxu3 %v10085_v54  ;;  %v10098_v55 = vadd.f32 %v10011_v18, %v3885_v43  ;;  %v3821_v61 = vpop.f32.mrf.mxu2  ;;  %v7318_v18 = vld [vmem:[%s11529_s1 + $0x3d4] sm:$0xf] }
 0x231   : > { %v3822_v44 = vadd.f32 %v3821_v61, %v9796_v47  ;;  %4178 = vmatmul.bf16.vlgmr.msrb.gmra.mxu1 %v8044_v6  ;;  %v5990_v6 = vld [vmem:[%s11529_s1 + $0x3d8] sm:$0xf0]  ;;  %4205 = vmatpush.bf16.msra.mxu2 %v5929_v3  ;;  %v5982_v3 = vld [vmem:[%s11529_s1 + $0x3c8] sm:$0xf0] }
 0x232   : > { %v10102_v1 = vpop.f32.mrf.mxu0  ;;  %v5993_v42 = vor.u32 %v7318_v18, %v5990_v6  ;;  %v7316_v18 = vld [vmem:[%s11529_s1 + $0x3c4] sm:$0xf] }
 0x233   : > { %v3854_v13 = vpop.f32.mrf.mxu3 }
 0x234   : > { %v3855_v20 = vadd.f32 %v3854_v13, %v3822_v44  ;;  %4238 = vmatpush.bf16.msra.mxu3 %v5993_v42  ;;  %v7300_v44 = vld [vmem:[%s11529_s1 + $0x344] sm:$0xf] }
 0x235   : > { %v10117_v41 = vpop.f32.mrf.mxu1 }
 0x236   : > { %v3888_v47 = vadd.f32 %v10026_v11, %v3855_v20  ;;  %v5918_v11 = vld [vmem:[%s11529_s1 + $0x348] sm:$0xf0] }
 0x237   : > { %v5921_v13 = vor.u32 %v7300_v44, %v5918_v11 }
 0x238   : > { %v10120_v7 = vadd.f32 %v10039_v8, %v3888_v47  ;;  %v3823_v14 = vpop.f32.mrf.mxu2  ;;  %v7338_v8 = vld [vmem:[%s11529_s1 + $0x474] sm:$0xf] }
 0x239   : > { %v3824_v45 = vadd.f32 %v3823_v14, %v9832_v40  ;;  %v6070_v40 = vld [vmem:[%s11529_s1 + $0x478] sm:$0xf0]  ;;  %4206 = vmatpush.bf16.msra.mxu2 %v5921_v13 }
 0x23a   : > { %v10123_v43 = vpop.f32.mrf.mxu0  ;;  %v6073_v60 = vor.u32 %v7338_v8, %v6070_v40 }
 0x23b   : > { %v3856_v4 = vpop.f32.mrf.mxu3 }
 0x23c   : > { %v3857_v61 = vadd.f32 %v3856_v4, %v3824_v45  ;;  %4269 = vmatpush.bf16.msra.mxu0 %v6073_v60  ;;  %v7298_v4 = vld [vmem:[%s11529_s1 + $0x334] sm:$0xf]  ;;  %v5974_v60 = vld [vmem:[%s11529_s1 + $0x3b8] sm:$0xf0] }
 0x23d   : > { %4079 = vmatmul.bf16.vlgmr.msrb.gmra.mxu2 %v8072_v26  ;;  %4150 = vmatmul.bf16.gmra.mxu0 %v8074_v27  ;;  %v10141_v21 = vpop.f32.mrf.mxu1  ;;  %v5985_v26 = vor.u32 %v7316_v18, %v5982_v3 }
 0x23e   : > { %v3890_v20 = vadd.f32 %v10061_v32, %v3857_v61  ;;  %v6062_v32 = vld [vmem:[%s11529_s1 + $0x468] sm:$0xf0]  ;;  %v5910_v61 = vld [vmem:[%s11529_s1 + $0x338] sm:$0xf0] }
 0x23f   : > { %4239 = vmatpush.bf16.msra.mxu3 %v5985_v26  ;;  %v5913_v44 = vor.u32 %v7298_v4, %v5910_v61  ;;  %v7296_v61 = vld [vmem:[%s11529_s1 + $0x324] sm:$0xf] }
 0x240   : > { %4112 = vmatmul.bf16.vlgmr.msrb.gmra.mxu3 %v8076_v28  ;;  %v10149_v6 = vadd.f32 %v3922_v19, %v3890_v20  ;;  %v3826_v27 = vpop.f32.mrf.mxu2  ;;  %v7336_v28 = vld [vmem:[%s11529_s1 + $0x464] sm:$0xf]  ;;  %v7314_v20 = vld [vmem:[%s11529_s1 + $0x3b4] sm:$0xf] }
 0x241   : > { %v3827_v47 = vadd.f32 %v3826_v27, %v9863_v34  ;;  %4183 = vmatmul.bf16.gmra.mxu1 %v8088_v33  ;;  %v6065_v14 = vor.u32 %v7336_v28, %v6062_v32  ;;  %v7334_v34 = vld [vmem:[%s11529_s1 + $0x454] sm:$0xf]  ;;  %v6054_v33 = vld [vmem:[%s11529_s1 + $0x458] sm:$0xf0]  ;;  %4207 = vmatpush.bf16.msra.mxu2 %v5913_v44  ;;  %v5977_v3 = vor.u32 %v7314_v20, %v5974_v60  ;;  %v5902_v44 = vld [vmem:[%s11529_s1 + $0x328] sm:$0xf0] }
 0x242   : > { %v10159_v19 = vpop.f32.mrf.mxu0  ;;  %v6057_v13 = vor.u32 %v7334_v34, %v6054_v33  ;;  %v7326_v60 = vld [vmem:[%s11529_s1 + $0x414] sm:$0xf] }
 0x243   : > { %v3859_v42 = vpop.f32.mrf.mxu3  ;;  %4270 = vmatpush.bf16.msra.mxu0 %v6065_v14  ;;  %4240 = vmatpush.bf16.msra.mxu3 %v5977_v3  ;;  %v6038_v14 = vld [vmem:[%s11529_s1 + $0x438] sm:$0xf0] }
 0x244   : > { %v3860_v45 = vadd.f32 %v3859_v42, %v3827_v47  ;;  %v7330_v42 = vld [vmem:[%s11529_s1 + $0x434] sm:$0xf] }
 0x245   : > { %v10174_v8 = vpop.f32.mrf.mxu1 }
 0x246   : > { %v3893_v11 = vadd.f32 %v10083_v53, %v3860_v45  ;;  %v7332_v53 = vld [vmem:[%s11529_s1 + $0x444] sm:$0xf]  ;;  %v6041_v45 = vor.u32 %v7330_v42, %v6038_v14  ;;  %v6014_v14 = vld [vmem:[%s11529_s1 + $0x408] sm:$0xf0] }
 0x247   : > { %4271 = vmatpush.bf16.msra.mxu0 %v6057_v13  ;;  %v7324_v42 = vld [vmem:[%s11529_s1 + $0x404] sm:$0xf] }
 0x248   : > { %v10176_v40 = vadd.f32 %v3925_v10, %v3893_v11  ;;  %v3828_v18 = vpop.f32.mrf.mxu2  ;;  %v6046_v10 = vld [vmem:[%s11529_s1 + $0x448] sm:$0xf0] }
 0x249   : > { %v3829_v26 = vadd.f32 %v3828_v18, %v9904_v31  ;;  %v6049_v28 = vor.u32 %v7332_v53, %v6046_v10  ;;  %v6022_v18 = vld [vmem:[%s11529_s1 + $0x418] sm:$0xf0] }
 0x24a   : > { %v10191_v32 = vpop.f32.mrf.mxu0  ;;  %v6025_v53 = vor.u32 %v7326_v60, %v6022_v18  ;;  %v7294_v18 = vld [vmem:[%s11529_s1 + $0x314] sm:$0xf] }
 0x24b   : > { %v3861_v27 = vpop.f32.mrf.mxu3  ;;  %4272 = vmatpush.bf16.msra.mxu0 %v6049_v28  ;;  %v7622_v28 = vld [vmem:[%s11530_s2] sm:$0x3] }
 0x24c   : > { %v3862_v47 = vadd.f32 %v3861_v27, %v3829_v26 }
 0x24d   : > { %4084 = vmatmul.bf16.gmra.mxu2 %v8134_v62  ;;  %4155 = vmatmul.bf16.gmra.mxu0 %v8136_v63  ;;  %v10203_v4 = vpop.f32.mrf.mxu1  ;;  %v5905_v62 = vor.u32 %v7296_v61, %v5902_v44  ;;  %v6017_v61 = vor.u32 %v7324_v42, %v6014_v14  ;;  %v6134_v44 = vld [vmem:[%s11529_s1 + $0x4f8] sm:$0xf0]  ;;  %v7348_v14 = vld [vmem:[%s11529_s1 + $0x4c4] sm:$0xf] }
 0x24e   : > { %v3895_v31 = vadd.f32 %v10102_v1, %v3862_v47  ;;  %v6030_v1 = vld [vmem:[%s11529_s1 + $0x428] sm:$0xf0]  ;;  %v10241_v47 = vperm.slane %v7622_v28, 1 }
 0x24f   : > { %4273 = vmatpush.bf16.msra.mxu0 %v6041_v45  ;;  %4208 = vmatpush.bf16.msra.mxu2 %v5905_v62 }
 0x250   : > { %4117 = vmatmul.bf16.gmra.mxu3 %v8138_v2  ;;  %v10212_v34 = vadd.f32 %v10117_v41, %v3895_v31  ;;  %v3831_v63 = vpop.f32.mrf.mxu2  ;;  %v7328_v2 = vld [vmem:[%s11529_s1 + $0x424] sm:$0xf] }
 0x251   : > { %v3832_v33 = vadd.f32 %v3831_v63, %v9930_v5  ;;  %4188 = vmatmul.bf16.gmra.mxu1 %v8150_v12  ;;  %v6033_v13 = vor.u32 %v7328_v2, %v6030_v1  ;;  %v7312_v5 = vld [vmem:[%s11529_s1 + $0x3a4] sm:$0xf]  ;;  %v5966_v12 = vld [vmem:[%s11529_s1 + $0x3a8] sm:$0xf0] }
 0x252   : > { %v3904_v41 = vpop.f32.mrf.mxu0  ;;  %v5969_v26 = vor.u32 %v7312_v5, %v5966_v12  ;;  %v6118_v5 = vld [vmem:[%s11529_s1 + $0x4d8] sm:$0xf0] }
 0x253   : > { %v3864_v11 = vpop.f32.mrf.mxu3  ;;  %4274 = vmatpush.bf16.msra.mxu0 %v6033_v13 }
 0x254   : > { %v3865_v20 = vadd.f32 %v3864_v11, %v3832_v33  ;;  %4241 = vmatpush.bf16.msra.mxu3 %v5969_v26  ;;  %v7352_v33 = vld [vmem:[%s11529_s1 + $0x4e4] sm:$0xf] }
 0x255   : > { %v3937_v10 = vpop.f32.mrf.mxu1 }
 0x256   : > { %v3898_v3 = vadd.f32 %v10123_v43, %v3865_v20 }
 0x257   : > { %4275 = vmatpush.bf16.msra.mxu0 %v6025_v53 }
 0x258   : > { %v10236_v27 = vadd.f32 %v10141_v21, %v3898_v3  ;;  %v3833_v43 = vpop.f32.mrf.mxu2  ;;  %v7354_v21 = vld [vmem:[%s11529_s1 + $0x4f4] sm:$0xf] }
 0x259   : > { %v3834_v31 = vadd.f32 %v3833_v43, %v9978_v49  ;;  %v6137_v63 = vor.u32 %v7354_v21, %v6134_v44  ;;  %v6126_v49 = vld [vmem:[%s11529_s1 + $0x4e8] sm:$0xf0]  ;;  %v7350_v3 = vld [vmem:[%s11529_s1 + $0x4d4] sm:$0xf] }
 0x25a   : > { %v4014_v62 = vpop.f32.mrf.mxu0  ;;  %v6129_v13 = vor.u32 %v7352_v33, %v6126_v49  ;;  %v6121_v26 = vor.u32 %v7350_v3, %v6118_v5  ;;  %v7346_v49 = vld [vmem:[%s11529_s1 + $0x4b4] sm:$0xf]  ;;  %v6198_v3 = vld [vmem:[%s11529_s1 + $0x578] sm:$0xf0] }
 0x25b   : > { %v3866_v45 = vpop.f32.mrf.mxu3  ;;  %v4015_v1 = vadd.f32 %v4014_v62, %v10241_v47  ;;  %4276 = vmatpush.bf16.msra.mxu0 %v6017_v61  ;;  %4302 = vmatpush.bf16.msra.mxu1 %v6137_v63  ;;  %v5950_v63 = vld [vmem:[%s11529_s1 + $0x388] sm:$0xf0]  ;;  %v7386_v5 = vld [vmem:[%s11529_s1 + $0x5f4] sm:$0xf] }
 0x25c   : > { %v3867_v2 = vadd.f32 %v3866_v45, %v3834_v31  ;;  %v5886_v31 = vld [vmem:[%s11529_s1 + $0x308] sm:$0xf0]  ;;  %v7308_v45 = vld [vmem:[%s11529_s1 + $0x384] sm:$0xf] }
 0x25d   : > { %4089 = vmatmul.bf16.gmra.mxu2 %v8208_v50  ;;  %4160 = vmatmul.bf16.gmra.mxu0 %v8210_v51  ;;  %v4047_v41 = vpop.f32.mrf.mxu1  ;;  %v5894_v50 = vld [vmem:[%s11529_s1 + $0x318] sm:$0xf0]  ;;  %v7310_v51 = vld [vmem:[%s11529_s1 + $0x394] sm:$0xf] }
 0x25e   : > { %v3900_v11 = vadd.f32 %v10159_v19, %v3867_v2  ;;  %v10270_v60 = vadd.f32 %v4047_v41, %v4015_v1  ;;  %v5953_v1 = vor.u32 %v7308_v45, %v5950_v63  ;;  %v6078_v45 = vld [vmem:[%s11529_s1 + $0x488] sm:$0xf0] }
 0x25f   : > { %4303 = vmatpush.bf16.msra.mxu1 %v6129_v13 }
 0x260   : > { %4122 = vmatmul.bf16.gmra.mxu3 %v8212_v52  ;;  %v10268_v20 = vadd.f32 %v10174_v8, %v3900_v11  ;;  %v3836_v19 = vpop.f32.mrf.mxu2  ;;  %v5897_v52 = vor.u32 %v7294_v18, %v5894_v50  ;;  %v5958_v8 = vld [vmem:[%s11529_s1 + $0x398] sm:$0xf0]  ;;  %v7344_v50 = vld [vmem:[%s11529_s1 + $0x4a4] sm:$0xf] }
 0x261   : > { %v3837_v12 = vadd.f32 %v3836_v19, %v10014_v25  ;;  %4193 = vmatmul.bf16.gmra.mxu1 %v8224_v57  ;;  %v5961_v10 = vor.u32 %v7310_v51, %v5958_v8  ;;  %v6110_v25 = vld [vmem:[%s11529_s1 + $0x4c8] sm:$0xf0]  ;;  %v7292_v57 = vld [vmem:[%s11529_s1 + $0x304] sm:$0xf]  ;;  %v6102_v11 = vld [vmem:[%s11529_s1 + $0x4b8] sm:$0xf0] }
 0x262   : > { %v4016_v28 = vpop.f32.mrf.mxu0  ;;  %4209 = vmatpush.bf16.msra.mxu2 %v5897_v52  ;;  %v6113_v61 = vor.u32 %v7348_v14, %v6110_v25  ;;  %v5889_v62 = vor.u32 %v7292_v57, %v5886_v31  ;;  %v6105_v41 = vor.u32 %v7346_v49, %v6102_v11  ;;  %v6094_v51 = vld [vmem:[%s11529_s1 + $0x4a8] sm:$0xf0]  ;;  %v7370_v8 = vld [vmem:[%s11529_s1 + $0x574] sm:$0xf]  ;;  %v7340_v31 = vld [vmem:[%s11529_s1 + $0x484] sm:$0xf] }
 0x263   : > { %v3869_v53 = vpop.f32.mrf.mxu3  ;;  %v4017_v42 = vadd.f32 %v4016_v28, %v10241_v47  ;;  %4242 = vmatpush.bf16.msra.mxu3 %v5961_v10  ;;  %4304 = vmatpush.bf16.msra.mxu1 %v6121_v26  ;;  %v6097_v19 = vor.u32 %v7344_v50, %v6094_v51  ;;  %v7342_v10 = vld [vmem:[%s11529_s1 + $0x494] sm:$0xf]  ;;  %v6086_v26 = vld [vmem:[%s11529_s1 + $0x498] sm:$0xf0]  ;;  %v11687_v51 = vld [vmem:[#allocation3_spill] sm:$0xff] }
 0x264   : > { %v3870_v43 = vadd.f32 %v3869_v53, %v3837_v12  ;;  %v6089_v14 = vor.u32 %v7342_v10, %v6086_v26  ;;  %v11690_v26 = vld [vmem:[#allocation6_spill] sm:$0xff] }
 0x265   : > { %v4049_v44 = vpop.f32.mrf.mxu1 }
 0x266   : > { %v3903_v21 = vadd.f32 %v10191_v32, %v3870_v43  ;;  %v10315_v2 = vadd.f32 %v4049_v44, %v4017_v42  ;;  %4210 = vmatpush.bf16.msra.mxu2 %v5889_v62  ;;  %v11686_v42 = vld [vmem:[#allocation2_spill] sm:$0xff]  ;;  %v6190_v44 = vld [vmem:[%s11529_s1 + $0x568] sm:$0xf0] }
 0x267   : > { %4305 = vmatpush.bf16.msra.mxu1 %v6113_v61  ;;  %4243 = vmatpush.bf16.msra.mxu3 %v5953_v1  ;;  %v7368_v61 = vld [vmem:[%s11529_s1 + $0x564] sm:$0xf] }
 0x268   : > { %v10313_v32 = vadd.f32 %v10203_v4, %v3903_v21  ;;  %v3838_v33 = vpop.f32.mrf.mxu2  ;;  %v6193_v63 = vor.u32 %v7368_v61, %v6190_v44 }
 0x26a   : > { %v4019_v18 = vpop.f32.mrf.mxu0 }
 0x26b   : > { %v3871_v13 = vpop.f32.mrf.mxu3  ;;  %v4020_v4 = vadd.f32 %v4019_v18, %v10241_v47  ;;  %4306 = vmatpush.bf16.msra.mxu1 %v6105_v41 }
 0x26d   : > { %4094 = vmatmul.bf16.gmra.mxu2 %v8263_v35  ;;  %4165 = vmatmul.bf16.gmra.mxu0 %v8265_v36  ;;  %v6201_v35 = vor.u32 %v7370_v8, %v6198_v3  ;;  %v6262_v36 = vld [vmem:[%s11529_s1 + $0x5f8] sm:$0xf0]  ;;  %v6254_v8 = vld [vmem:[%s11529_s1 + $0x5e8] sm:$0xf0] }
 0x26e   : > { %v4052_v52 = vpop.f32.mrf.mxu1  ;;  %v6265_v53 = vor.u32 %v7386_v5, %v6262_v36 }
 0x26f   : > { %v10342_v12 = vadd.f32 %v4052_v52, %v4020_v4  ;;  %4307 = vmatpush.bf16.msra.mxu1 %v6097_v19  ;;  %4335 = vmatpush.bf16.msrb.mxu2 %v6201_v35  ;;  %v11688_v19 = vld [vmem:[#allocation4_spill] sm:$0xff]  ;;  %v7384_v52 = vld [vmem:[%s11529_s1 + $0x5e4] sm:$0xf] }
 0x270   : > { %4127 = vmatmul.bf16.gmra.mxu3 %v8267_v39  ;;  %v3948_v39 = vpop.f32.mrf.mxu2  ;;  %v6257_v5 = vor.u32 %v7384_v52, %v6254_v8  ;;  %v11693_v52 = vld [vmem:[#allocation9_spill] sm:$0xff] }
 0x271   : > { %v3949_v28 = vadd.f32 %v3948_v39, %v10072_v59  ;;  %4198 = vmatmul.bf16.gmra.mxu1 %v11686_v42  ;;  %4368 = vmatpush.bf16.msrb.mxu3 %v6265_v53  ;;  %v6081_v59 = vor.u32 %v7340_v31, %v6078_v45  ;;  %v6246_v31 = vld [vmem:[%s11529_s1 + $0x5d8] sm:$0xf0] }
 0x272   : > { %v4021_v25 = vpop.f32.mrf.mxu0 }
 0x273   : > { %v3981_v43 = vpop.f32.mrf.mxu3  ;;  %v4022_v57 = vadd.f32 %v4021_v25, %v10241_v47  ;;  %4308 = vmatpush.bf16.msra.mxu1 %v6089_v14  ;;  %4336 = vmatpush.bf16.msrb.mxu2 %v6193_v63  ;;  %v7366_v14 = vld [vmem:[%s11529_s1 + $0x554] sm:$0xf]  ;;  %v6182_v25 = vld [vmem:[%s11529_s1 + $0x558] sm:$0xf0] }
 0x274   : > { %v3982_v21 = vadd.f32 %v3981_v43, %v3949_v28 }
 0x275   : > { %4369 = vmatpush.bf16.msrb.mxu3 %v6257_v5  ;;  %v6238_v5 = vld [vmem:[%s11529_s1 + $0x5c8] sm:$0xf0] }
 0x276   : > { %v4054_v62 = vpop.f32.mrf.mxu1  ;;  %v4797_v4 = vmax.f32 %v3982_v21, 0.0 }
 0x277   : > { %v10368_v1 = vadd.f32 %v4054_v62, %v4022_v57  ;;  %4309 = vmatpush.bf16.msra.mxu1 %v6081_v59  ;;  %v6185_v57 = vor.u32 %v7366_v14, %v6182_v25  ;;  %v11694_v25 = vld [vmem:[#allocation10_spill] sm:$0xff] }
 0x278   : > { %v3950_v33 = vpop.f32.mrf.mxu2 }
 0x279   : > { %v3951_v49 = vadd.f32 %v3950_v33, %v10098_v55  ;;  %v11689_v55 = vld [vmem:[#allocation5_spill] sm:$0xff]  ;;  %4337 = vmatpush.bf16.msrb.mxu2 %v6185_v57 }
 0x27a   : > { %v4024_v13 = vpop.f32.mrf.mxu0 }
 0x27b   : > { %v3983_v11 = vpop.f32.mrf.mxu3  ;;  %v4025_v18 = vadd.f32 %v4024_v13, %v10241_v47  ;;  %v6326_v13 = vld [vmem:[%s11529_s1 + $0x678] sm:$0xf0] }
 0x27c   : > { %v3984_v41 = vadd.f32 %v3983_v11, %v3951_v49  ;;  %v7402_v11 = vld [vmem:[%s11529_s1 + $0x674] sm:$0xf] }
 0x27d   : > { %4099 = vmatmul.bf16.gmra.mxu2 %v11687_v51  ;;  %4277 = vmatmul.bf16.vlgmr.msra.gmra.mxu0 %v11688_v19  ;;  %v6174_v51 = vld [vmem:[%s11529_s1 + $0x548] sm:$0xf0]  ;;  %v6329_v19 = vor.u32 %v7402_v11, %v6326_v13 }
 0x27e   : > { %v4799_v50 = vmax.f32 %v3984_v41, 0.0  ;;  %v4057_v3 = vpop.f32.mrf.mxu1 }
 0x27f   : > { %v10383_v36 = vadd.f32 %v4057_v3, %v4025_v18  ;;  %v7380_v3 = vld [vmem:[%s11529_s1 + $0x5c4] sm:$0xf]  ;;  %4401 = vmatpush.bf16.msrb.mxu0 %v6329_v19 }
 0x280   : > { %4132 = vmatmul.bf16.gmra.mxu3 %v11689_v55  ;;  %v10381_v35 = vpack.c.bf16 %v4799_v50, %v4797_v4  ;;  %v3953_v39 = vpop.f32.mrf.mxu2  ;;  %v11691_v4 = vld [vmem:[#allocation7_spill] sm:$0xff]  ;;  %v11692_v50 = vld [vmem:[#allocation8_spill] sm:$0xff] }
 0x281   : > { %v3954_v53 = vadd.f32 %v3953_v39, %v10120_v7  ;;  %4310 = vmatmul.bf16.vlgmr.msra.gmra.mxu1 %v11690_v26  ;;  %v7382_v7 = vld [vmem:[%s11529_s1 + $0x5d4] sm:$0xf] }
 0x282   : > { %v4026_v28 = vpop.f32.mrf.mxu0  ;;  %v6249_v59 = vor.u32 %v7382_v7, %v6246_v31 }
 0x283   : > { %v3986_v10 = vpop.f32.mrf.mxu3  ;;  %v4027_v42 = vadd.f32 %v4026_v28, %v10241_v47  ;;  %v7400_v28 = vld [vmem:[%s11529_s1 + $0x664] sm:$0xf] }
 0x284   : > { %v3987_v43 = vadd.f32 %v3986_v10, %v3954_v53  ;;  %4370 = vmatpush.bf16.msrb.mxu3 %v6249_v59  ;;  %v6241_v53 = vor.u32 %v7380_v3, %v6238_v5  ;;  %v7398_v59 = vld [vmem:[%s11529_s1 + $0x654] sm:$0xf]  ;;  %v6294_v5 = vld [vmem:[%s11529_s1 + $0x638] sm:$0xf0] }
 0x285   : > { %v7394_v3 = vld [vmem:[%s11529_s1 + $0x634] sm:$0xf] }
 0x286   : > { %v4059_v21 = vpop.f32.mrf.mxu1  ;;  %v4801_v41 = vmax.f32 %v3987_v43, 0.0  ;;  %v6318_v43 = vld [vmem:[%s11529_s1 + $0x668] sm:$0xf0] }
 0x287   : > { %v10400_v45 = vadd.f32 %v4059_v21, %v4027_v42  ;;  %v6321_v21 = vor.u32 %v7400_v28, %v6318_v43  ;;  %v11696_v28 = vld [vmem:[#allocation12_spill] sm:$0xff]  ;;  %v6297_v43 = vor.u32 %v7394_v3, %v6294_v5 }
 0x288   : > { %v3955_v61 = vpop.f32.mrf.mxu2  ;;  %4371 = vmatpush.bf16.msrb.mxu3 %v6241_v53 }
 0x289   : > { %v3956_v44 = vadd.f32 %v3955_v61, %v10149_v6  ;;  %v7364_v6 = vld [vmem:[%s11529_s1 + $0x544] sm:$0xf]  ;;  %4402 = vmatpush.bf16.msrb.mxu0 %v6321_v21  ;;  %v6310_v61 = vld [vmem:[%s11529_s1 + $0x658] sm:$0xf0] }
 0x28a   : > { %v4029_v63 = vpop.f32.mrf.mxu0  ;;  %v6177_v55 = vor.u32 %v7364_v6, %v6174_v51 }
 0x28b   : > { %v3988_v62 = vpop.f32.mrf.mxu3  ;;  %v4030_v49 = vadd.f32 %v4029_v63, %v10241_v47  ;;  %v7362_v63 = vld [vmem:[%s11529_s1 + $0x534] sm:$0xf] }
 0x28c   : > { %v3989_v33 = vadd.f32 %v3988_v62, %v3956_v44  ;;  %4338 = vmatpush.bf16.msrb.mxu2 %v6177_v55  ;;  %v6313_v44 = vor.u32 %v7398_v59, %v6310_v61  ;;  %v7392_v59 = vld [vmem:[%s11529_s1 + $0x624] sm:$0xf]  ;;  %v6286_v61 = vld [vmem:[%s11529_s1 + $0x628] sm:$0xf0] }
 0x28d   : > { %4211 = vmatmul.bf16.vlgmr.msra.gmra.mxu2 %v11691_v4  ;;  %4282 = vmatmul.bf16.gmra.mxu0 %v11692_v50  ;;  %v6302_v4 = vld [vmem:[%s11529_s1 + $0x648] sm:$0xf0] }
 0x28e   : > { %v4803_v18 = vmax.f32 %v3989_v33, 0.0  ;;  %v4062_v8 = vpop.f32.mrf.mxu1  ;;  %v6166_v33 = vld [vmem:[%s11529_s1 + $0x538] sm:$0xf0]  ;;  %4403 = vmatpush.bf16.msrb.mxu0 %v6313_v44 }
 0x28f   : > { %v10425_v39 = vadd.f32 %v4062_v8, %v4030_v49  ;;  %v7378_v49 = vld [vmem:[%s11529_s1 + $0x5b4] sm:$0xf]  ;;  %v6169_v13 = vor.u32 %v7362_v63, %v6166_v33  ;;  %v11698_v63 = vld [vmem:[#allocation14_spill] sm:$0xff]  ;;  %v6289_v33 = vor.u32 %v7392_v59, %v6286_v61  ;;  %v11699_v61 = vld [vmem:[#allocation15_spill] sm:$0xff] }
 0x290   : > { %4244 = vmatmul.bf16.vlgmr.msra.gmra.mxu3 %v11693_v52  ;;  %v10427_v10 = vpack.c.bf16 %v4803_v18, %v4801_v41  ;;  %v3958_v26 = vpop.f32.mrf.mxu2  ;;  %v6230_v41 = vld [vmem:[%s11529_s1 + $0x5b8] sm:$0xf0]  ;;  %v7396_v18 = vld [vmem:[%s11529_s1 + $0x644] sm:$0xf] }
 0x291   : > { %v3959_v42 = vadd.f32 %v3958_v26, %v10176_v40  ;;  %4315 = vmatmul.bf16.gmra.mxu1 %v11694_v25  ;;  %v6233_v51 = vor.u32 %v7378_v49, %v6230_v41  ;;  %v6305_v19 = vor.u32 %v7396_v18, %v6302_v4  ;;  %4339 = vmatpush.bf16.msrb.mxu2 %v6169_v13  ;;  %v11695_v26 = vld [vmem:[#allocation11_spill] sm:$0xff]  ;;  %v7376_v13 = vld [vmem:[%s11529_s1 + $0x5a4] sm:$0xf]  ;;  %v6278_v4 = vld [vmem:[%s11529_s1 + $0x618] sm:$0xf0] }
 0x292   : > { %v4031_v57 = vpop.f32.mrf.mxu0  ;;  %v6158_v25 = vld [vmem:[%s11529_s1 + $0x528] sm:$0xf0] }
 0x293   : > { %v3991_v14 = vpop.f32.mrf.mxu3  ;;  %v4032_v31 = vadd.f32 %v4031_v57, %v10241_v47  ;;  %4372 = vmatpush.bf16.msrb.mxu3 %v6233_v51  ;;  %4404 = vmatpush.bf16.msrb.mxu0 %v6305_v19  ;;  %v6222_v41 = vld [vmem:[%s11529_s1 + $0x5a8] sm:$0xf0]  ;;  %v7388_v19 = vld [vmem:[%s11529_s1 + $0x604] sm:$0xf] }
 0x294   : > { %v3992_v7 = vadd.f32 %v3991_v14, %v3959_v42  ;;  %v11697_v42 = vld [vmem:[#allocation13_spill] sm:$0xff]  ;;  %v7360_v14 = vld [vmem:[%s11529_s1 + $0x524] sm:$0xf]  ;;  %v6225_v18 = vor.u32 %v7376_v13, %v6222_v41 }
 0x295   : > { %v6161_v57 = vor.u32 %v7360_v14, %v6158_v25  ;;  %v6214_v14 = vld [vmem:[%s11529_s1 + $0x598] sm:$0xf0]  ;;  %v7416_v25 = vld [vmem:[%s11529_s1 + $0x6e4] sm:$0xf] }
 0x296   : > { %v4064_v40 = vpop.f32.mrf.mxu1  ;;  %v4805_v53 = vmax.f32 %v3992_v7, 0.0 }
 0x297   : > { %v10444_v62 = vadd.f32 %v4064_v40, %v4032_v31  ;;  %4405 = vmatpush.bf16.msrb.mxu0 %v6297_v43  ;;  %4340 = vmatpush.bf16.msrb.mxu2 %v6161_v57  ;;  %v7358_v43 = vld [vmem:[%s11529_s1 + $0x514] sm:$0xf]  ;;  %v6382_v57 = vld [vmem:[%s11529_s1 + $0x6e8] sm:$0xf0] }
 0x298   : > { %v3960_v11 = vpop.f32.mrf.mxu2  ;;  %4373 = vmatpush.bf16.msrb.mxu3 %v6225_v18  ;;  %v6374_v18 = vld [vmem:[%s11529_s1 + $0x6d8] sm:$0xf0] }
 0x299   : > { %v3961_v50 = vadd.f32 %v3960_v11, %v10212_v34 }
 0x29a   : > { %v4034_v52 = vpop.f32.mrf.mxu0 }
 0x29b   : > { %v3993_v6 = vpop.f32.mrf.mxu3  ;;  %v4035_v55 = vadd.f32 %v4034_v52, %v10241_v47  ;;  %4406 = vmatpush.bf16.msrb.mxu0 %v6289_v33  ;;  %v6270_v52 = vld [vmem:[%s11529_s1 + $0x608] sm:$0xf0]  ;;  %v11701_v33 = vld [vmem:[#allocation17_spill] sm:$0xff] }
 0x29c   : > { %v3994_v8 = vadd.f32 %v3993_v6, %v3961_v50  ;;  %v6273_v5 = vor.u32 %v7388_v19, %v6270_v52  ;;  %v7356_v52 = vld [vmem:[%s11529_s1 + $0x504] sm:$0xf] }
 0x29d   : > { %4216 = vmatmul.bf16.gmra.mxu2 %v11695_v26  ;;  %4287 = vmatmul.bf16.gmra.mxu0 %v11696_v28 }
 0x29e   : > { %v4807_v34 = vmax.f32 %v3994_v8, 0.0  ;;  %v4067_v47 = vpop.f32.mrf.mxu1  ;;  %v7418_v8 = vld [vmem:[%s11529_s1 + $0x6f4] sm:$0xf] }
 0x29f   : > { %v10481_v21 = vadd.f32 %v4067_v47, %v4035_v55 }
 0x2a0   : > { %4249 = vmatmul.bf16.gmra.mxu3 %v11697_v42  ;;  %v10483_v7 = vpack.c.bf16 %v4807_v34, %v4805_v53  ;;  %v3963_v31 = vpop.f32.mrf.mxu2  ;;  %v6390_v53 = vld [vmem:[%s11529_s1 + $0x6f8] sm:$0xf0] }
 0x2a1   : > { %v3964_v44 = vadd.f32 %v3963_v31, %v10236_v27  ;;  %4320 = vmatmul.bf16.gmra.mxu1 %v11698_v63  ;;  %v7390_v27 = vld [vmem:[%s11529_s1 + $0x614] sm:$0xf]  ;;  %v6393_v26 = vor.u32 %v7418_v8, %v6390_v53  ;;  %v6150_v42 = vld [vmem:[%s11529_s1 + $0x518] sm:$0xf0]  ;;  %v6385_v63 = vor.u32 %v7416_v25, %v6382_v57  ;;  %v6142_v8 = vld [vmem:[%s11529_s1 + $0x508] sm:$0xf0] }
 0x2a2   : > { %v4036_v49 = vpop.f32.mrf.mxu0  ;;  %v6281_v50 = vor.u32 %v7390_v27, %v6278_v4  ;;  %v6153_v47 = vor.u32 %v7358_v43, %v6150_v42  ;;  %v6366_v53 = vld [vmem:[%s11529_s1 + $0x6c8] sm:$0xf0] }
 0x2a3   : > { %v3996_v40 = vpop.f32.mrf.mxu3  ;;  %4434 = vmatpush.bf16.msrb.mxu1 %v6393_v26 }
 0x2a4   : > { %v3997_v11 = vadd.f32 %v3996_v40, %v3964_v44  ;;  %4407 = vmatpush.bf16.msrb.mxu0 %v6281_v50  ;;  %v11700_v44 = vld [vmem:[#allocation16_spill] sm:$0xff]  ;;  %4341 = vmatpush.bf16.msrb.mxu2 %v6153_v47  ;;  %v11702_v50 = vld [vmem:[#allocation18_spill] sm:$0xff]  ;;  %v6358_v47 = vld [vmem:[%s11529_s1 + $0x6b8] sm:$0xf0] }
 0x2a6   : > { %v4069_v6 = vpop.f32.mrf.mxu1  ;;  %v4809_v31 = vmax.f32 %v3997_v11, 0.0  ;;  %v7414_v11 = vld [vmem:[%s11529_s1 + $0x6d4] sm:$0xf] }
 0x2a7   : > { %4435 = vmatpush.bf16.msrb.mxu1 %v6385_v63  ;;  %v6377_v6 = vor.u32 %v7414_v11, %v6374_v18  ;;  %v11705_v63 = vld [vmem:[#allocation21_spill] sm:$0xff] }
 0x2a8   : > { %v3965_v51 = vpop.f32.mrf.mxu2  ;;  %4408 = vmatpush.bf16.msrb.mxu0 %v6273_v5  ;;  %v7412_v5 = vld [vmem:[%s11529_s1 + $0x6c4] sm:$0xf]  ;;  %v6454_v11 = vld [vmem:[%s11529_s1 + $0x778] sm:$0xf0] }
 0x2a9   : > { %v3966_v55 = vadd.f32 %v3965_v51, %v10268_v20  ;;  %v7374_v20 = vld [vmem:[%s11529_s1 + $0x594] sm:$0xf] }
 0x2aa   : > { %v10518_v34 = vpop.f32.mrf.mxu0  ;;  %v6217_v40 = vor.u32 %v7374_v20, %v6214_v14  ;;  %v7410_v20 = vld [vmem:[%s11529_s1 + $0x6b4] sm:$0xf] }
 0x2ab   : > { %v3998_v3 = vpop.f32.mrf.mxu3  ;;  %4436 = vmatpush.bf16.msrb.mxu1 %v6377_v6  ;;  %v6361_v25 = vor.u32 %v7410_v20, %v6358_v47 }
 0x2ac   : > { %v3999_v28 = vadd.f32 %v3998_v3, %v3966_v55  ;;  %4374 = vmatpush.bf16.msrb.mxu3 %v6217_v40  ;;  %v6145_v55 = vor.u32 %v7356_v52, %v6142_v8  ;;  %v6206_v3 = vld [vmem:[%s11529_s1 + $0x588] sm:$0xf0]  ;;  %v7406_v52 = vld [vmem:[%s11529_s1 + $0x694] sm:$0xf]  ;;  %v6342_v8 = vld [vmem:[%s11529_s1 + $0x698] sm:$0xf0] }
 0x2ad   : > { %4221 = vmatmul.bf16.gmra.mxu2 %v11699_v61  ;;  %4292 = vmatmul.bf16.gmra.mxu0 %v11700_v44  ;;  %v11703_v61 = vld [vmem:[#allocation19_spill] sm:$0xff]  ;;  %v11704_v44 = vld [vmem:[#allocation20_spill] sm:$0xff] }
 0x2ae   : > { %v4811_v59 = vmax.f32 %v3999_v28, 0.0  ;;  %v10541_v49 = vpop.f32.mrf.mxu1  ;;  %v6369_v28 = vor.u32 %v7412_v5, %v6366_v53  ;;  %4342 = vmatpush.bf16.msrb.mxu2 %v6145_v55  ;;  %v6345_v5 = vor.u32 %v7406_v52, %v6342_v8 }
 0x2b0   : > { %4254 = vmatmul.bf16.gmra.mxu3 %v11701_v33  ;;  %v10543_v13 = vpack.c.bf16 %v4811_v59, %v4809_v31  ;;  %v3968_v41 = vpop.f32.mrf.mxu2  ;;  %4437 = vmatpush.bf16.msrb.mxu1 %v6369_v28  ;;  %v7408_v31 = vld [vmem:[%s11529_s1 + $0x6a4] sm:$0xf]  ;;  %v6350_v59 = vld [vmem:[%s11529_s1 + $0x6a8] sm:$0xf0] }
 0x2b1   : > { %v3969_v27 = vadd.f32 %v3968_v41, %v10313_v32  ;;  %4325 = vmatmul.bf16.gmra.mxu1 %v11702_v50  ;;  %v7372_v32 = vld [vmem:[%s11529_s1 + $0x584] sm:$0xf]  ;;  %v6353_v40 = vor.u32 %v7408_v31, %v6350_v59  ;;  %v7434_v41 = vld [vmem:[%s11529_s1 + $0x774] sm:$0xf]  ;;  %v6446_v31 = vld [vmem:[%s11529_s1 + $0x768] sm:$0xf0] }
 0x2b2   : > { %v10553_v51 = vpop.f32.mrf.mxu0  ;;  %v6209_v26 = vor.u32 %v7372_v32, %v6206_v3  ;;  %v6457_v18 = vor.u32 %v7434_v41, %v6454_v11  ;;  %v11706_v3 = vld [vmem:[#allocation22_spill] sm:$0xff]  ;;  %v6510_v41 = vld [vmem:[%s11529_s1 + $0x7e8] sm:$0xf0] }
 0x2b3   : > { %v4001_v4 = vpop.f32.mrf.mxu3  ;;  %v7404_v28 = vld [vmem:[%s11529_s1 + $0x684] sm:$0xf] }
 0x2b4   : > { %v10555_v19 = vadd.f32 %v4001_v4, %v3969_v27  ;;  %4375 = vmatpush.bf16.msrb.mxu3 %v6209_v26  ;;  %4438 = vmatpush.bf16.msrb.mxu1 %v6361_v25  ;;  %v7450_v27 = vld [vmem:[%s11529_s1 + $0x7f4] sm:$0xf]  ;;  %v6518_v4 = vld [vmem:[%s11529_s1 + $0x7f8] sm:$0xf0]  ;;  %v7432_v25 = vld [vmem:[%s11529_s1 + $0x764] sm:$0xf] }
 0x2b5   : > { %v6521_v6 = vor.u32 %v7450_v27, %v6518_v4  ;;  %4467 = vmatpush.bf16.msra.mxu2 %v6457_v18  ;;  %v11707_v18 = vld [vmem:[#allocation23_spill] sm:$0xff]  ;;  %v11708_v27 = vld [vmem:[#allocation24_spill] sm:$0xff]  ;;  %v11709_v4 = vld [vmem:[#allocation25_spill] sm:$0xff] }
 0x2b6   : > { %v4181_v43 = vpop.f32.mrf.mxu1 }
 0x2b8   : > { %v3970_v42 = vpop.f32.mrf.mxu2  ;;  %4439 = vmatpush.bf16.msrb.mxu1 %v6353_v40  ;;  %4500 = vmatpush.bf16.msra.mxu3 %v6521_v6 }
 0x2b9   : > { %v6334_v42 = vld [vmem:[%s11529_s1 + $0x688] sm:$0xf0] }
 0x2ba   : > { %v10581_v57 = vpop.f32.mrf.mxu0 }
 0x2bb   : > { %v4003_v14 = vpop.f32.mrf.mxu3 }
 0x2bc   : > { %4440 = vmatpush.bf16.msrb.mxu1 %v6345_v5 }
 0x2bd   : > { %4226 = vmatmul.bf16.gmra.mxu2 %v11703_v61  ;;  %4297 = vmatmul.bf16.gmra.mxu0 %v11704_v44  ;;  %v6449_v61 = vor.u32 %v7432_v25, %v6446_v31 }
 0x2be   : > { %v4184_v33 = vpop.f32.mrf.mxu1 }
 0x2bf   : > { %4468 = vmatpush.bf16.msra.mxu2 %v6449_v61 }
 0x2c0   : > { %4259 = vmatmul.bf16.gmra.mxu3 %v11705_v63  ;;  %v4080_v50 = vpop.f32.mrf.mxu2 }
 0x2c1   : > { %v4081_v32 = vadd.f32 %v4080_v50, %v10270_v60  ;;  %4330 = vmatmul.bf16.gmra.mxu1 %v11706_v3  ;;  %v6337_v60 = vor.u32 %v7404_v28, %v6334_v42 }
 0x2c2   : > { %v4153_v53 = vpop.f32.mrf.mxu0 }
 0x2c3   : > { %v4113_v55 = vpop.f32.mrf.mxu3  ;;  %4441 = vmatpush.bf16.msrb.mxu1 %v6337_v60 }
 0x2c4   : > { %v4114_v26 = vadd.f32 %v4113_v55, %v4081_v32  ;;  %v11710_v55 = vld [vmem:[#allocation26_spill] sm:$0xff] }
 0x2c6   : > { %v4147_v20 = vadd.f32 %v10518_v34, %v4114_v26  ;;  %v4186_v47 = vpop.f32.mrf.mxu1  ;;  %v7430_v26 = vld [vmem:[%s11529_s1 + $0x754] sm:$0xf] }
 0x2c8   : > { %v10620_v14 = vadd.f32 %v10541_v49, %v4147_v20  ;;  %v4082_v59 = vpop.f32.mrf.mxu2  ;;  %v7448_v49 = vld [vmem:[%s11529_s1 + $0x7e4] sm:$0xf] }
 0x2c9   : > { %v4083_v44 = vadd.f32 %v4082_v59, %v10315_v2  ;;  %v6513_v11 = vor.u32 %v7448_v49, %v6510_v41  ;;  %v11711_v41 = vld [vmem:[#allocation27_spill] sm:$0xff] }
 0x2ca   : > { %v10629_v34 = vpop.f32.mrf.mxu0 }
 0x2cb   : > { %v4115_v40 = vpop.f32.mrf.mxu3  ;;  %4501 = vmatpush.bf16.msra.mxu3 %v6513_v11  ;;  %v11712_v11 = vld [vmem:[#allocation28_spill] sm:$0xff] }
 0x2cc   : > { %v4116_v63 = vadd.f32 %v4115_v40, %v4083_v44 }
 0x2cd   : > { %4231 = vmatmul.bf16.gmra.mxu2 %v11707_v18  ;;  %4409 = vmatmul.bf16.vlgmr.msrb.gmra.mxu0 %v11708_v27 }
 0x2ce   : > { %v4149_v2 = vadd.f32 %v10553_v51, %v4116_v63  ;;  %v4189_v50 = vpop.f32.mrf.mxu1  ;;  %v6438_v51 = vld [vmem:[%s11529_s1 + $0x758] sm:$0xf0]  ;;  %v7428_v63 = vld [vmem:[%s11529_s1 + $0x744] sm:$0xf] }
 0x2cf   : > { %v6441_v28 = vor.u32 %v7430_v26, %v6438_v51  ;;  %v6574_v26 = vld [vmem:[%s11529_s1 + $0x868] sm:$0xf0] }
 0x2d0   : > { %4264 = vmatmul.bf16.gmra.mxu3 %v11709_v4  ;;  %v10641_v6 = vadd.f32 %v4181_v43, %v4149_v2  ;;  %v4085_v52 = vpop.f32.mrf.mxu2  ;;  %v7446_v43 = vld [vmem:[%s11529_s1 + $0x7d4] sm:$0xf]  ;;  %v11713_v2 = vld [vmem:[#allocation29_spill] sm:$0xff] }
 0x2d1   : > { %v4086_v8 = vadd.f32 %v4085_v52, %v10342_v12  ;;  %4442 = vmatmul.bf16.vlgmr.msrb.gmra.mxu1 %v11710_v55  ;;  %v6502_v12 = vld [vmem:[%s11529_s1 + $0x7d8] sm:$0xf0]  ;;  %4469 = vmatpush.bf16.msra.mxu2 %v6441_v28  ;;  %v7444_v52 = vld [vmem:[%s11529_s1 + $0x7c4] sm:$0xf] }
 0x2d2   : > { %v10645_v3 = vpop.f32.mrf.mxu0  ;;  %v6505_v20 = vor.u32 %v7446_v43, %v6502_v12  ;;  %v11714_v28 = vld [vmem:[#allocation30_spill] sm:$0xff] }
 0x2d3   : > { %v4118_v32 = vpop.f32.mrf.mxu3 }
 0x2d4   : > { %v4119_v5 = vadd.f32 %v4118_v32, %v4086_v8  ;;  %4502 = vmatpush.bf16.msra.mxu3 %v6505_v20  ;;  %v6494_v8 = vld [vmem:[%s11529_s1 + $0x7c8] sm:$0xf0]  ;;  %v7426_v20 = vld [vmem:[%s11529_s1 + $0x734] sm:$0xf] }
 0x2d5   : > { %v6497_v55 = vor.u32 %v7444_v52, %v6494_v8 }
 0x2d6   : > { %v4152_v42 = vadd.f32 %v10581_v57, %v4119_v5  ;;  %v10660_v60 = vpop.f32.mrf.mxu1  ;;  %v6430_v57 = vld [vmem:[%s11529_s1 + $0x748] sm:$0xf0] }
 0x2d7   : > { %v6433_v49 = vor.u32 %v7428_v63, %v6430_v57 }
 0x2d8   : > { %v10662_v25 = vadd.f32 %v4184_v33, %v4152_v42  ;;  %v4087_v31 = vpop.f32.mrf.mxu2  ;;  %v7466_v33 = vld [vmem:[%s11529_s1 + $0x874] sm:$0xf]  ;;  %4503 = vmatpush.bf16.msra.mxu3 %v6497_v55 }
 0x2d9   : > { %v4088_v59 = vadd.f32 %v4087_v31, %v10368_v1  ;;  %v6582_v1 = vld [vmem:[%s11529_s1 + $0x878] sm:$0xf0]  ;;  %4470 = vmatpush.bf16.msra.mxu2 %v6433_v49  ;;  %v7458_v55 = vld [vmem:[%s11529_s1 + $0x834] sm:$0xf] }
 0x2da   : > { %v10665_v44 = vpop.f32.mrf.mxu0  ;;  %v6585_v27 = vor.u32 %v7466_v33, %v6582_v1  ;;  %v6422_v31 = vld [vmem:[%s11529_s1 + $0x738] sm:$0xf0]  ;;  %v7442_v33 = vld [vmem:[%s11529_s1 + $0x7b4] sm:$0xf] }
 0x2db   : > { %v4120_v61 = vpop.f32.mrf.mxu3  ;;  %v6486_v1 = vld [vmem:[%s11529_s1 + $0x7b8] sm:$0xf0] }
 0x2dc   : > { %v4121_v40 = vadd.f32 %v4120_v61, %v4088_v59  ;;  %4533 = vmatpush.bf16.msra.mxu0 %v6585_v27  ;;  %v6425_v59 = vor.u32 %v7426_v20, %v6422_v31  ;;  %v6566_v61 = vld [vmem:[%s11529_s1 + $0x858] sm:$0xf0] }
 0x2dd   : > { %4343 = vmatmul.bf16.vlgmr.msrb.gmra.mxu2 %v11711_v41  ;;  %4414 = vmatmul.bf16.gmra.mxu0 %v11712_v11  ;;  %v6489_v11 = vor.u32 %v7442_v33, %v6486_v1 }
 0x2de   : > { %v4154_v18 = vadd.f32 %v4153_v53, %v4121_v40  ;;  %v10682_v4 = vpop.f32.mrf.mxu1  ;;  %v7464_v53 = vld [vmem:[%s11529_s1 + $0x864] sm:$0xf]  ;;  %4471 = vmatpush.bf16.msra.mxu2 %v6425_v59 }
 0x2df   : > { %v6577_v12 = vor.u32 %v7464_v53, %v6574_v26  ;;  %4504 = vmatpush.bf16.msra.mxu3 %v6489_v11  ;;  %v11715_v53 = vld [vmem:[#allocation31_spill] sm:$0xff]  ;;  %v11716_v26 = vld [vmem:[#allocation32_spill] sm:$0xff] }
 0x2e0   : > { %4376 = vmatmul.bf16.vlgmr.msrb.gmra.mxu3 %v11713_v2  ;;  %v10690_v32 = vadd.f32 %v4186_v47, %v4154_v18  ;;  %v4090_v5 = vpop.f32.mrf.mxu2  ;;  %v6478_v11 = vld [vmem:[%s11529_s1 + $0x7a8] sm:$0xf0] }
 0x2e1   : > { %v4091_v51 = vadd.f32 %v4090_v5, %v10383_v36  ;;  %4447 = vmatmul.bf16.gmra.mxu1 %v11714_v28  ;;  %4534 = vmatpush.bf16.msra.mxu0 %v6577_v12  ;;  %v7462_v36 = vld [vmem:[%s11529_s1 + $0x854] sm:$0xf]  ;;  %v6550_v5 = vld [vmem:[%s11529_s1 + $0x838] sm:$0xf0]  ;;  %v7424_v12 = vld [vmem:[%s11529_s1 + $0x724] sm:$0xf] }
 0x2e2   : > { %v10700_v47 = vpop.f32.mrf.mxu0  ;;  %v6569_v63 = vor.u32 %v7462_v36, %v6566_v61  ;;  %v6542_v36 = vld [vmem:[%s11529_s1 + $0x828] sm:$0xf0] }
 0x2e3   : > { %v4123_v43 = vpop.f32.mrf.mxu3 }
 0x2e4   : > { %v4124_v42 = vadd.f32 %v4123_v43, %v4091_v51  ;;  %v6553_v51 = vor.u32 %v7458_v55, %v6550_v5  ;;  %v11717_v43 = vld [vmem:[#allocation33_spill] sm:$0xff]  ;;  %v7452_v5 = vld [vmem:[%s11529_s1 + $0x804] sm:$0xf] }
 0x2e5   : > { %4535 = vmatpush.bf16.msra.mxu0 %v6569_v63  ;;  %v11718_v63 = vld [vmem:[#allocation34_spill] sm:$0xff] }
 0x2e6   : > { %v4157_v40 = vadd.f32 %v10629_v34, %v4124_v42  ;;  %v10715_v57 = vpop.f32.mrf.mxu1  ;;  %v7460_v34 = vld [vmem:[%s11529_s1 + $0x844] sm:$0xf]  ;;  %v6414_v42 = vld [vmem:[%s11529_s1 + $0x728] sm:$0xf0] }
 0x2e7   : > { %v6417_v31 = vor.u32 %v7424_v12, %v6414_v42 }
 0x2e8   : > { %v10717_v49 = vadd.f32 %v4189_v50, %v4157_v40  ;;  %v4092_v41 = vpop.f32.mrf.mxu2  ;;  %v6558_v50 = vld [vmem:[%s11529_s1 + $0x848] sm:$0xf0] }
 0x2e9   : > { %v4093_v18 = vadd.f32 %v4092_v41, %v10400_v45  ;;  %v6561_v2 = vor.u32 %v7460_v34, %v6558_v50  ;;  %4472 = vmatpush.bf16.msra.mxu2 %v6417_v31  ;;  %v7440_v41 = vld [vmem:[%s11529_s1 + $0x7a4] sm:$0xf]  ;;  %v6534_v50 = vld [vmem:[%s11529_s1 + $0x818] sm:$0xf0]  ;;  %v7422_v31 = vld [vmem:[%s11529_s1 + $0x714] sm:$0xf] }
 0x2ea   : > { %v10732_v52 = vpop.f32.mrf.mxu0  ;;  %v6481_v34 = vor.u32 %v7440_v41, %v6478_v11  ;;  %v11721_v11 = vld [vmem:[#allocation37_spill] sm:$0xff] }
 0x2eb   : > { %v4125_v27 = vpop.f32.mrf.mxu3  ;;  %4536 = vmatpush.bf16.msra.mxu0 %v6561_v2 }
 0x2ec   : > { %v4126_v8 = vadd.f32 %v4125_v27, %v4093_v18  ;;  %4505 = vmatpush.bf16.msra.mxu3 %v6481_v34 }
 0x2ed   : > { %4348 = vmatmul.bf16.gmra.mxu2 %v11715_v53  ;;  %4419 = vmatmul.bf16.gmra.mxu0 %v11716_v26  ;;  %v6526_v53 = vld [vmem:[%s11529_s1 + $0x808] sm:$0xf0] }
 0x2ee   : > { %v4159_v45 = vadd.f32 %v10645_v3, %v4126_v8  ;;  %v10744_v28 = vpop.f32.mrf.mxu1  ;;  %v7456_v3 = vld [vmem:[%s11529_s1 + $0x824] sm:$0xf] }
 0x2ef   : > { %4537 = vmatpush.bf16.msra.mxu0 %v6553_v51  ;;  %v6545_v33 = vor.u32 %v7456_v3, %v6542_v36  ;;  %v6529_v51 = vor.u32 %v7452_v5, %v6526_v53  ;;  %v6470_v36 = vld [vmem:[%s11529_s1 + $0x798] sm:$0xf0] }
 0x2f0   : > { %4381 = vmatmul.bf16.gmra.mxu3 %v11717_v43  ;;  %v10753_v20 = vadd.f32 %v10660_v60, %v4159_v45  ;;  %v4095_v59 = vpop.f32.mrf.mxu2 }
 0x2f1   : > { %v4096_v61 = vadd.f32 %v4095_v59, %v10425_v39  ;;  %4452 = vmatmul.bf16.gmra.mxu1 %v11718_v63  ;;  %v7454_v39 = vld [vmem:[%s11529_s1 + $0x814] sm:$0xf]  ;;  %v6406_v59 = vld [vmem:[%s11529_s1 + $0x718] sm:$0xf0]  ;;  %v11719_v63 = vld [vmem:[#allocation35_spill] sm:$0xff] }
 0x2f2   : > { %v4168_v60 = vpop.f32.mrf.mxu0  ;;  %v6537_v27 = vor.u32 %v7454_v39, %v6534_v50  ;;  %v6409_v3 = vor.u32 %v7422_v31, %v6406_v59 }
 0x2f3   : > { %v4128_v40 = vpop.f32.mrf.mxu3  ;;  %4538 = vmatpush.bf16.msra.mxu0 %v6545_v33  ;;  %v11720_v33 = vld [vmem:[#allocation36_spill] sm:$0xff] }
 0x2f4   : > { %v4129_v1 = vadd.f32 %v4128_v40, %v4096_v61  ;;  %v7480_v61 = vld [vmem:[%s11529_s1 + $0x8e4] sm:$0xf]  ;;  %v6638_v40 = vld [vmem:[%s11529_s1 + $0x8e8] sm:$0xf0]  ;;  %4473 = vmatpush.bf16.msra.mxu2 %v6409_v3 }
 0x2f5   : > { %v6641_v41 = vor.u32 %v7480_v61, %v6638_v40  ;;  %v7474_v61 = vld [vmem:[%s11529_s1 + $0x8b4] sm:$0xf]  ;;  %v6614_v40 = vld [vmem:[%s11529_s1 + $0x8b8] sm:$0xf0] }
 0x2f6   : > { %v4162_v18 = vadd.f32 %v10665_v44, %v4129_v1  ;;  %v4201_v2 = vpop.f32.mrf.mxu1  ;;  %v7482_v44 = vld [vmem:[%s11529_s1 + $0x8f4] sm:$0xf] }
 0x2f7   : > { %4539 = vmatpush.bf16.msra.mxu0 %v6537_v27 }
 0x2f8   : > { %v10777_v8 = vadd.f32 %v10682_v4, %v4162_v18  ;;  %v4097_v55 = vpop.f32.mrf.mxu2  ;;  %v6646_v4 = vld [vmem:[%s11529_s1 + $0x8f8] sm:$0xf0]  ;;  %v7478_v18 = vld [vmem:[%s11529_s1 + $0x8d4] sm:$0xf] }
 0x2f9   : > { %v4098_v26 = vadd.f32 %v4097_v55, %v10444_v62  ;;  %v6649_v12 = vor.u32 %v7482_v44, %v6646_v4  ;;  %v7438_v62 = vld [vmem:[%s11529_s1 + $0x794] sm:$0xf]  ;;  %v11722_v55 = vld [vmem:[#allocation38_spill] sm:$0xff] }
 0x2fa   : > { %v10792_v43 = vpop.f32.mrf.mxu0  ;;  %v6473_v1 = vor.u32 %v7438_v62, %v6470_v36  ;;  %v7420_v44 = vld [vmem:[%s11529_s1 + $0x704] sm:$0xf] }
 0x2fb   : > { %v4130_v45 = vpop.f32.mrf.mxu3  ;;  %4540 = vmatpush.bf16.msra.mxu0 %v6529_v51  ;;  %4566 = vmatpush.bf16.msra.mxu1 %v6649_v12  ;;  %v6462_v51 = vld [vmem:[%s11529_s1 + $0x788] sm:$0xf0]  ;;  %v7476_v4 = vld [vmem:[%s11529_s1 + $0x8c4] sm:$0xf] }
 0x2fc   : > { %v4131_v42 = vadd.f32 %v4130_v45, %v4098_v26  ;;  %4506 = vmatpush.bf16.msra.mxu3 %v6473_v1  ;;  %v6398_v26 = vld [vmem:[%s11529_s1 + $0x708] sm:$0xf0]  ;;  %v7436_v45 = vld [vmem:[%s11529_s1 + $0x784] sm:$0xf] }
 0x2fd   : > { %4353 = vmatmul.bf16.gmra.mxu2 %v11719_v63  ;;  %4424 = vmatmul.bf16.gmra.mxu0 %v11720_v33  ;;  %v6622_v12 = vld [vmem:[%s11529_s1 + $0x8c8] sm:$0xf0]  ;;  %v6465_v31 = vor.u32 %v7436_v45, %v6462_v51  ;;  %v6598_v45 = vld [vmem:[%s11529_s1 + $0x898] sm:$0xf0] }
 0x2fe   : > { %v4164_v60 = vadd.f32 %v10700_v47, %v4131_v42  ;;  %v10816_v34 = vpop.f32.mrf.mxu1  ;;  %v6630_v47 = vld [vmem:[%s11529_s1 + $0x8d8] sm:$0xf0]  ;;  %v6625_v59 = vor.u32 %v7476_v4, %v6622_v12  ;;  %v11723_v1 = vld [vmem:[#allocation39_spill] sm:$0xff]  ;;  %v11726_v4 = vld [vmem:[#allocation42_spill] sm:$0xff] }
 0x2ff   : > { %4567 = vmatpush.bf16.msra.mxu1 %v6641_v41  ;;  %v6633_v5 = vor.u32 %v7478_v18, %v6630_v47  ;;  %v11724_v41 = vld [vmem:[#allocation40_spill] sm:$0xff] }
 0x300   : > { %4386 = vmatmul.bf16.gmra.mxu3 %v11721_v11  ;;  %v10819_v39 = vadd.f32 %v10715_v57, %v4164_v60  ;;  %v4100_v50 = vpop.f32.mrf.mxu2  ;;  %v6606_v60 = vld [vmem:[%s11529_s1 + $0x8a8] sm:$0xf0]  ;;  %v7498_v47 = vld [vmem:[%s11529_s1 + $0x974] sm:$0xf] }
 0x301   : > { %v4101_v27 = vadd.f32 %v4100_v50, %v10481_v21  ;;  %4457 = vmatmul.bf16.gmra.mxu1 %v11722_v55  ;;  %v6401_v21 = vor.u32 %v7420_v44, %v6398_v26  ;;  %4507 = vmatpush.bf16.msra.mxu3 %v6465_v31  ;;  %v11725_v50 = vld [vmem:[#allocation41_spill] sm:$0xff]  ;;  %v7514_v55 = vld [vmem:[%s11529_s1 + $0x9f4] sm:$0xf] }
 0x302   : > { %v10829_v53 = vpop.f32.mrf.mxu0  ;;  %v7470_v26 = vld [vmem:[%s11529_s1 + $0x894] sm:$0xf] }
 0x303   : > { %v4133_v2 = vpop.f32.mrf.mxu3  ;;  %4568 = vmatpush.bf16.msra.mxu1 %v6633_v5  ;;  %4474 = vmatpush.bf16.msra.mxu2 %v6401_v21  ;;  %v6774_v5 = vld [vmem:[%s11529_s1 + $0x9f8] sm:$0xf0]  ;;  %v6601_v12 = vor.u32 %v7470_v26, %v6598_v45 }
 0x304   : > { %v4134_v57 = vadd.f32 %v4133_v2, %v4101_v27  ;;  %v6710_v27 = vld [vmem:[%s11529_s1 + $0x978] sm:$0xf0]  ;;  %v6777_v44 = vor.u32 %v7514_v55, %v6774_v5  ;;  %v11728_v55 = vld [vmem:[#allocation44_spill] sm:$0xff] }
 0x305   : > { %v6713_v2 = vor.u32 %v7498_v47, %v6710_v27  ;;  %v6766_v47 = vld [vmem:[%s11529_s1 + $0x9e8] sm:$0xf0]  ;;  %v11729_v5 = vld [vmem:[#allocation45_spill] sm:$0xff] }
 0x306   : > { %v4167_v42 = vadd.f32 %v10732_v52, %v4134_v57  ;;  %v4313_v62 = vpop.f32.mrf.mxu1  ;;  %v6617_v52 = vor.u32 %v7474_v61, %v6614_v40  ;;  %4632 = vmatpush.bf16.msrb.mxu3 %v6777_v44 }
 0x307   : > { %4569 = vmatpush.bf16.msra.mxu1 %v6625_v59  ;;  %4599 = vmatpush.bf16.msrb.mxu2 %v6713_v2  ;;  %v7468_v59 = vld [vmem:[%s11529_s1 + $0x884] sm:$0xf]  ;;  %v11727_v2 = vld [vmem:[#allocation43_spill] sm:$0xff] }
 0x308   : > { %v10851_v3 = vadd.f32 %v10744_v28, %v4167_v42  ;;  %v4102_v36 = vpop.f32.mrf.mxu2  ;;  %v7472_v28 = vld [vmem:[%s11529_s1 + $0x8a4] sm:$0xf] }
 0x309   : > { %v6609_v11 = vor.u32 %v7472_v28, %v6606_v60  ;;  %v6590_v36 = vld [vmem:[%s11529_s1 + $0x888] sm:$0xf0] }
 0x30a   : > { %v10859_v33 = vpop.f32.mrf.mxu0  ;;  %v6702_v28 = vld [vmem:[%s11529_s1 + $0x968] sm:$0xf0] }
 0x30b   : > { %v4135_v63 = vpop.f32.mrf.mxu3  ;;  %4570 = vmatpush.bf16.msra.mxu1 %v6617_v52  ;;  %v7496_v52 = vld [vmem:[%s11529_s1 + $0x964] sm:$0xf] }
 0x30d   : > { %4358 = vmatmul.bf16.gmra.mxu2 %v11723_v1  ;;  %4429 = vmatmul.bf16.gmra.mxu0 %v11724_v41  ;;  %v6705_v1 = vor.u32 %v7496_v52, %v6702_v28 }
 0x30e   : > { %v4316_v18 = vpop.f32.mrf.mxu1 }
 0x30f   : > { %4571 = vmatpush.bf16.msra.mxu1 %v6609_v11  ;;  %4600 = vmatpush.bf16.msrb.mxu2 %v6705_v1 }
 0x310   : > { %4391 = vmatmul.bf16.gmra.mxu3 %v11725_v50  ;;  %v4212_v57 = vpop.f32.mrf.mxu2 }
 0x311   : > { %v4213_v21 = vadd.f32 %v4212_v57, %v10620_v14  ;;  %4462 = vmatmul.bf16.gmra.mxu1 %v11726_v4  ;;  %v6593_v14 = vor.u32 %v7468_v59, %v6590_v36 }
 0x312   : > { %v4285_v42 = vpop.f32.mrf.mxu0 }
 0x313   : > { %v4245_v51 = vpop.f32.mrf.mxu3  ;;  %4572 = vmatpush.bf16.msra.mxu1 %v6601_v12 }
 0x314   : > { %v4246_v31 = vadd.f32 %v4245_v51, %v4213_v21  ;;  %v11730_v51 = vld [vmem:[#allocation46_spill] sm:$0xff] }
 0x316   : > { %v4279_v61 = vadd.f32 %v10792_v43, %v4246_v31  ;;  %v4318_v40 = vpop.f32.mrf.mxu1  ;;  %v7494_v31 = vld [vmem:[%s11529_s1 + $0x954] sm:$0xf] }
 0x317   : > { %4573 = vmatpush.bf16.msra.mxu1 %v6593_v14 }
 0x318   : > { %v10898_v63 = vadd.f32 %v10816_v34, %v4279_v61  ;;  %v4214_v60 = vpop.f32.mrf.mxu2  ;;  %v7512_v34 = vld [vmem:[%s11529_s1 + $0x9e4] sm:$0xf] }
 0x319   : > { %v4215_v41 = vadd.f32 %v4214_v60, %v10641_v6  ;;  %v6769_v27 = vor.u32 %v7512_v34, %v6766_v47  ;;  %v11731_v47 = vld [vmem:[#allocation47_spill] sm:$0xff] }
 0x31a   : > { %v10907_v43 = vpop.f32.mrf.mxu0 }
 0x31b   : > { %v4247_v11 = vpop.f32.mrf.mxu3  ;;  %4633 = vmatpush.bf16.msrb.mxu3 %v6769_v27  ;;  %v11732_v27 = vld [vmem:[#allocation48_spill] sm:$0xff] }
 0x31c   : > { %v4248_v50 = vadd.f32 %v4247_v11, %v4215_v41 }
 0x31d   : > { %4363 = vmatmul.bf16.gmra.mxu2 %v11727_v2  ;;  %4541 = vmatmul.bf16.vlgmr.msra.gmra.mxu0 %v11728_v55 }
 0x31e   : > { %v4281_v6 = vadd.f32 %v10829_v53, %v4248_v50  ;;  %v4321_v57 = vpop.f32.mrf.mxu1  ;;  %v6694_v53 = vld [vmem:[%s11529_s1 + $0x958] sm:$0xf0]  ;;  %v7492_v50 = vld [vmem:[%s11529_s1 + $0x944] sm:$0xf] }
 0x31f   : > { %v6697_v59 = vor.u32 %v7494_v31, %v6694_v53  ;;  %v6830_v31 = vld [vmem:[%s11529_s1 + $0xa68] sm:$0xf0] }
 0x320   : > { %4396 = vmatmul.bf16.gmra.mxu3 %v11729_v5  ;;  %v10919_v44 = vadd.f32 %v4313_v62, %v4281_v6  ;;  %v4217_v26 = vpop.f32.mrf.mxu2  ;;  %v7510_v62 = vld [vmem:[%s11529_s1 + $0x9d4] sm:$0xf]  ;;  %v11733_v6 = vld [vmem:[#allocation49_spill] sm:$0xff] }
 0x321   : > { %v4218_v45 = vadd.f32 %v4217_v26, %v10662_v25  ;;  %4574 = vmatmul.bf16.vlgmr.msra.gmra.mxu1 %v11730_v51  ;;  %v6758_v25 = vld [vmem:[%s11529_s1 + $0x9d8] sm:$0xf0]  ;;  %4601 = vmatpush.bf16.msrb.mxu2 %v6697_v59  ;;  %v7508_v26 = vld [vmem:[%s11529_s1 + $0x9c4] sm:$0xf] }
 0x322   : > { %v10923_v4 = vpop.f32.mrf.mxu0  ;;  %v6761_v61 = vor.u32 %v7510_v62, %v6758_v25  ;;  %v11734_v59 = vld [vmem:[#allocation50_spill] sm:$0xff] }
 0x323   : > { %v4250_v21 = vpop.f32.mrf.mxu3 }
 0x324   : > { %v4251_v12 = vadd.f32 %v4250_v21, %v4218_v45  ;;  %4634 = vmatpush.bf16.msrb.mxu3 %v6761_v61  ;;  %v6750_v45 = vld [vmem:[%s11529_s1 + $0x9c8] sm:$0xf0]  ;;  %v7490_v61 = vld [vmem:[%s11529_s1 + $0x934] sm:$0xf] }
 0x325   : > { %v6753_v51 = vor.u32 %v7508_v26, %v6750_v45 }
 0x326   : > { %v4284_v36 = vadd.f32 %v10859_v33, %v4251_v12  ;;  %v10938_v14 = vpop.f32.mrf.mxu1  ;;  %v6686_v33 = vld [vmem:[%s11529_s1 + $0x948] sm:$0xf0] }
 0x327   : > { %v6689_v34 = vor.u32 %v7492_v50, %v6686_v33 }
 0x328   : > { %v10940_v52 = vadd.f32 %v4316_v18, %v4284_v36  ;;  %v4219_v28 = vpop.f32.mrf.mxu2  ;;  %v7530_v18 = vld [vmem:[%s11529_s1 + $0xa74] sm:$0xf]  ;;  %4635 = vmatpush.bf16.msrb.mxu3 %v6753_v51 }
 0x329   : > { %v4220_v60 = vadd.f32 %v4219_v28, %v10690_v32  ;;  %v6838_v32 = vld [vmem:[%s11529_s1 + $0xa78] sm:$0xf0]  ;;  %4602 = vmatpush.bf16.msrb.mxu2 %v6689_v34  ;;  %v7522_v51 = vld [vmem:[%s11529_s1 + $0xa34] sm:$0xf] }
 0x32a   : > { %v10943_v41 = vpop.f32.mrf.mxu0  ;;  %v6841_v55 = vor.u32 %v7530_v18, %v6838_v32  ;;  %v6678_v28 = vld [vmem:[%s11529_s1 + $0x938] sm:$0xf0]  ;;  %v7506_v18 = vld [vmem:[%s11529_s1 + $0x9b4] sm:$0xf] }
 0x32b   : > { %v4252_v1 = vpop.f32.mrf.mxu3  ;;  %v6742_v32 = vld [vmem:[%s11529_s1 + $0x9b8] sm:$0xf0] }
 0x32c   : > { %v4253_v11 = vadd.f32 %v4252_v1, %v4220_v60  ;;  %4665 = vmatpush.bf16.msrb.mxu0 %v6841_v55  ;;  %v6681_v60 = vor.u32 %v7490_v61, %v6678_v28  ;;  %v6822_v1 = vld [vmem:[%s11529_s1 + $0xa58] sm:$0xf0] }
 0x32d   : > { %4475 = vmatmul.bf16.vlgmr.msra.gmra.mxu2 %v11731_v47  ;;  %4546 = vmatmul.bf16.gmra.mxu0 %v11732_v27  ;;  %v6745_v27 = vor.u32 %v7506_v18, %v6742_v32 }
 0x32e   : > { %v4286_v2 = vadd.f32 %v4285_v42, %v4253_v11  ;;  %v10960_v5 = vpop.f32.mrf.mxu1  ;;  %v7528_v42 = vld [vmem:[%s11529_s1 + $0xa64] sm:$0xf]  ;;  %4603 = vmatpush.bf16.msrb.mxu2 %v6681_v60 }
 0x32f   : > { %v6833_v25 = vor.u32 %v7528_v42, %v6830_v31  ;;  %4636 = vmatpush.bf16.msrb.mxu3 %v6745_v27  ;;  %v11735_v42 = vld [vmem:[#allocation51_spill] sm:$0xff]  ;;  %v11736_v31 = vld [vmem:[#allocation52_spill] sm:$0xff] }
 0x330   : > { %4508 = vmatmul.bf16.vlgmr.msra.gmra.mxu3 %v11733_v6  ;;  %v10968_v21 = vadd.f32 %v4318_v40, %v4286_v2  ;;  %v4222_v12 = vpop.f32.mrf.mxu2  ;;  %v6734_v27 = vld [vmem:[%s11529_s1 + $0x9a8] sm:$0xf0] }
 0x331   : > { %v4223_v53 = vadd.f32 %v4222_v12, %v10717_v49  ;;  %4579 = vmatmul.bf16.gmra.mxu1 %v11734_v59  ;;  %4666 = vmatpush.bf16.msrb.mxu0 %v6833_v25  ;;  %v7526_v49 = vld [vmem:[%s11529_s1 + $0xa54] sm:$0xf]  ;;  %v6806_v12 = vld [vmem:[%s11529_s1 + $0xa38] sm:$0xf0]  ;;  %v7488_v25 = vld [vmem:[%s11529_s1 + $0x924] sm:$0xf] }
 0x332   : > { %v10978_v40 = vpop.f32.mrf.mxu0  ;;  %v6825_v50 = vor.u32 %v7526_v49, %v6822_v1  ;;  %v6798_v49 = vld [vmem:[%s11529_s1 + $0xa28] sm:$0xf0] }
 0x333   : > { %v4255_v62 = vpop.f32.mrf.mxu3 }
 0x334   : > { %v4256_v36 = vadd.f32 %v4255_v62, %v4223_v53  ;;  %v6809_v53 = vor.u32 %v7522_v51, %v6806_v12  ;;  %v11737_v62 = vld [vmem:[#allocation53_spill] sm:$0xff]  ;;  %v7516_v12 = vld [vmem:[%s11529_s1 + $0xa04] sm:$0xf] }
 0x335   : > { %4667 = vmatpush.bf16.msrb.mxu0 %v6825_v50  ;;  %v11738_v50 = vld [vmem:[#allocation54_spill] sm:$0xff] }
 0x336   : > { %v4289_v11 = vadd.f32 %v10907_v43, %v4256_v36  ;;  %v10993_v33 = vpop.f32.mrf.mxu1  ;;  %v7524_v43 = vld [vmem:[%s11529_s1 + $0xa44] sm:$0xf]  ;;  %v6670_v36 = vld [vmem:[%s11529_s1 + $0x928] sm:$0xf0] }
 0x337   : > { %v6673_v28 = vor.u32 %v7488_v25, %v6670_v36 }
 0x338   : > { %v10995_v34 = vadd.f32 %v4321_v57, %v4289_v11  ;;  %v4224_v47 = vpop.f32.mrf.mxu2  ;;  %v6814_v57 = vld [vmem:[%s11529_s1 + $0xa48] sm:$0xf0] }
 0x339   : > { %v4225_v2 = vadd.f32 %v4224_v47, %v10753_v20  ;;  %v6817_v6 = vor.u32 %v7524_v43, %v6814_v57  ;;  %4604 = vmatpush.bf16.msrb.mxu2 %v6673_v28  ;;  %v7504_v47 = vld [vmem:[%s11529_s1 + $0x9a4] sm:$0xf]  ;;  %v6790_v57 = vld [vmem:[%s11529_s1 + $0xa18] sm:$0xf0]  ;;  %v7486_v28 = vld [vmem:[%s11529_s1 + $0x914] sm:$0xf] }
 0x33a   : > { %v11010_v26 = vpop.f32.mrf.mxu0  ;;  %v6737_v43 = vor.u32 %v7504_v47, %v6734_v27  ;;  %v11741_v27 = vld [vmem:[#allocation57_spill] sm:$0xff] }
 0x33b   : > { %v4257_v55 = vpop.f32.mrf.mxu3  ;;  %4668 = vmatpush.bf16.msrb.mxu0 %v6817_v6 }
 0x33c   : > { %v4258_v45 = vadd.f32 %v4257_v55, %v4225_v2  ;;  %4637 = vmatpush.bf16.msrb.mxu3 %v6737_v43 }
 0x33d   : > { %4480 = vmatmul.bf16.gmra.mxu2 %v11735_v42  ;;  %4551 = vmatmul.bf16.gmra.mxu0 %v11736_v31  ;;  %v6782_v42 = vld [vmem:[%s11529_s1 + $0xa08] sm:$0xf0] }
 0x33e   : > { %v4291_v20 = vadd.f32 %v10923_v4, %v4258_v45  ;;  %v11022_v59 = vpop.f32.mrf.mxu1  ;;  %v7520_v4 = vld [vmem:[%s11529_s1 + $0xa24] sm:$0xf] }
 0x33f   : > { %4669 = vmatpush.bf16.msrb.mxu0 %v6809_v53  ;;  %v6801_v18 = vor.u32 %v7520_v4, %v6798_v49  ;;  %v6785_v53 = vor.u32 %v7516_v12, %v6782_v42  ;;  %v6726_v49 = vld [vmem:[%s11529_s1 + $0x998] sm:$0xf0] }
 0x340   : > { %4513 = vmatmul.bf16.gmra.mxu3 %v11737_v62  ;;  %v11031_v61 = vadd.f32 %v10938_v14, %v4291_v20  ;;  %v4227_v60 = vpop.f32.mrf.mxu2 }
 0x341   : > { %v4228_v1 = vadd.f32 %v4227_v60, %v10777_v8  ;;  %4584 = vmatmul.bf16.gmra.mxu1 %v11738_v50  ;;  %v7518_v8 = vld [vmem:[%s11529_s1 + $0xa14] sm:$0xf]  ;;  %v6662_v60 = vld [vmem:[%s11529_s1 + $0x918] sm:$0xf0]  ;;  %v11739_v50 = vld [vmem:[#allocation55_spill] sm:$0xff] }
 0x342   : > { %v4300_v14 = vpop.f32.mrf.mxu0  ;;  %v6793_v55 = vor.u32 %v7518_v8, %v6790_v57  ;;  %v6665_v4 = vor.u32 %v7486_v28, %v6662_v60 }
 0x343   : > { %v4260_v11 = vpop.f32.mrf.mxu3  ;;  %4670 = vmatpush.bf16.msrb.mxu0 %v6801_v18  ;;  %v11740_v18 = vld [vmem:[#allocation56_spill] sm:$0xff] }
 0x344   : > { %v4261_v32 = vadd.f32 %v4260_v11, %v4228_v1  ;;  %v7544_v1 = vld [vmem:[%s11529_s1 + $0xae4] sm:$0xf]  ;;  %v6894_v11 = vld [vmem:[%s11529_s1 + $0xae8] sm:$0xf0]  ;;  %4605 = vmatpush.bf16.msrb.mxu2 %v6665_v4 }
 0x345   : > { %v6897_v47 = vor.u32 %v7544_v1, %v6894_v11  ;;  %v7538_v1 = vld [vmem:[%s11529_s1 + $0xab4] sm:$0xf]  ;;  %v6870_v11 = vld [vmem:[%s11529_s1 + $0xab8] sm:$0xf0] }
 0x346   : > { %v4294_v2 = vadd.f32 %v10943_v41, %v4261_v32  ;;  %v4333_v6 = vpop.f32.mrf.mxu1  ;;  %v7546_v41 = vld [vmem:[%s11529_s1 + $0xaf4] sm:$0xf] }
 0x347   : > { %4671 = vmatpush.bf16.msrb.mxu0 %v6793_v55 }
 0x348   : > { %v11055_v45 = vadd.f32 %v10960_v5, %v4294_v2  ;;  %v4229_v51 = vpop.f32.mrf.mxu2  ;;  %v6902_v5 = vld [vmem:[%s11529_s1 + $0xaf8] sm:$0xf0]  ;;  %v7542_v2 = vld [vmem:[%s11529_s1 + $0xad4] sm:$0xf] }
 0x349   : > { %v4230_v31 = vadd.f32 %v4229_v51, %v10819_v39  ;;  %v6905_v25 = vor.u32 %v7546_v41, %v6902_v5  ;;  %v7502_v39 = vld [vmem:[%s11529_s1 + $0x994] sm:$0xf]  ;;  %v11742_v51 = vld [vmem:[#allocation58_spill] sm:$0xff] }
 0x34a   : > { %v11070_v62 = vpop.f32.mrf.mxu0  ;;  %v6729_v32 = vor.u32 %v7502_v39, %v6726_v49  ;;  %v7484_v41 = vld [vmem:[%s11529_s1 + $0x904] sm:$0xf] }
 0x34b   : > { %v4262_v20 = vpop.f32.mrf.mxu3  ;;  %4672 = vmatpush.bf16.msrb.mxu0 %v6785_v53  ;;  %4698 = vmatpush.bf16.msrb.mxu1 %v6905_v25  ;;  %v6718_v53 = vld [vmem:[%s11529_s1 + $0x988] sm:$0xf0]  ;;  %v7540_v5 = vld [vmem:[%s11529_s1 + $0xac4] sm:$0xf] }
 0x34c   : > { %v4263_v36 = vadd.f32 %v4262_v20, %v4230_v31  ;;  %4638 = vmatpush.bf16.msrb.mxu3 %v6729_v32  ;;  %v6654_v31 = vld [vmem:[%s11529_s1 + $0x908] sm:$0xf0]  ;;  %v7500_v20 = vld [vmem:[%s11529_s1 + $0x984] sm:$0xf] }
 0x34d   : > { %4485 = vmatmul.bf16.gmra.mxu2 %v11739_v50  ;;  %4556 = vmatmul.bf16.gmra.mxu0 %v11740_v18  ;;  %v6878_v25 = vld [vmem:[%s11529_s1 + $0xac8] sm:$0xf0]  ;;  %v6721_v28 = vor.u32 %v7500_v20, %v6718_v53  ;;  %v6854_v20 = vld [vmem:[%s11529_s1 + $0xa98] sm:$0xf0] }
 0x34e   : > { %v4296_v14 = vadd.f32 %v10978_v40, %v4263_v36  ;;  %v11094_v43 = vpop.f32.mrf.mxu1  ;;  %v6886_v40 = vld [vmem:[%s11529_s1 + $0xad8] sm:$0xf0]  ;;  %v6881_v60 = vor.u32 %v7540_v5, %v6878_v25  ;;  %v11743_v32 = vld [vmem:[#allocation59_spill] sm:$0xff]  ;;  %v11746_v5 = vld [vmem:[#allocation62_spill] sm:$0xff] }
 0x34f   : > { %4699 = vmatpush.bf16.msrb.mxu1 %v6897_v47  ;;  %v6889_v12 = vor.u32 %v7542_v2, %v6886_v40  ;;  %v11744_v47 = vld [vmem:[#allocation60_spill] sm:$0xff] }
 0x350   : > { %4518 = vmatmul.bf16.gmra.mxu3 %v11741_v27  ;;  %v11097_v8 = vadd.f32 %v10993_v33, %v4296_v14  ;;  %v4232_v57 = vpop.f32.mrf.mxu2  ;;  %v6862_v14 = vld [vmem:[%s11529_s1 + $0xaa8] sm:$0xf0]  ;;  %v7562_v40 = vld [vmem:[%s11529_s1 + $0xb74] sm:$0xf] }
 0x351   : > { %v4233_v55 = vadd.f32 %v4232_v57, %v10851_v3  ;;  %4589 = vmatmul.bf16.gmra.mxu1 %v11742_v51  ;;  %v6657_v3 = vor.u32 %v7484_v41, %v6654_v31  ;;  %4639 = vmatpush.bf16.msrb.mxu3 %v6721_v28  ;;  %v11745_v57 = vld [vmem:[#allocation61_spill] sm:$0xff]  ;;  %v7578_v51 = vld [vmem:[%s11529_s1 + $0xbf4] sm:$0xf] }
 0x352   : > { %v11107_v42 = vpop.f32.mrf.mxu0  ;;  %v7534_v31 = vld [vmem:[%s11529_s1 + $0xa94] sm:$0xf] }
 0x353   : > { %v4265_v6 = vpop.f32.mrf.mxu3  ;;  %4700 = vmatpush.bf16.msrb.mxu1 %v6889_v12  ;;  %4606 = vmatpush.bf16.msrb.mxu2 %v6657_v3  ;;  %v7030_v12 = vld [vmem:[%s11529_s1 + $0xbf8] sm:$0xf0]  ;;  %v6857_v25 = vor.u32 %v7534_v31, %v6854_v20 }
 0x354   : > { %v4266_v33 = vadd.f32 %v4265_v6, %v4233_v55  ;;  %v6966_v55 = vld [vmem:[%s11529_s1 + $0xb78] sm:$0xf0]  ;;  %v7033_v41 = vor.u32 %v7578_v51, %v7030_v12  ;;  %v11748_v51 = vld [vmem:[#allocation64_spill] sm:$0xff] }
 0x355   : > { %v6969_v6 = vor.u32 %v7562_v40, %v6966_v55  ;;  %v7022_v40 = vld [vmem:[%s11529_s1 + $0xbe8] sm:$0xf0] }
 0x356   : > { %v4299_v36 = vadd.f32 %v11010_v26, %v4266_v33  ;;  %v4445_v39 = vpop.f32.mrf.mxu1  ;;  %v6873_v26 = vor.u32 %v7538_v1, %v6870_v11  ;;  %4764 = vmatpush.bf16.msra.mxu3 %v7033_v41 }
 0x357   : > { %4701 = vmatpush.bf16.msrb.mxu1 %v6881_v60  ;;  %4731 = vmatpush.bf16.msra.mxu2 %v6969_v6  ;;  %v7532_v60 = vld [vmem:[%s11529_s1 + $0xa84] sm:$0xf]  ;;  %v11747_v6 = vld [vmem:[#allocation63_spill] sm:$0xff] }
 0x358   : > { %v11129_v4 = vadd.f32 %v11022_v59, %v4299_v36  ;;  %v4234_v49 = vpop.f32.mrf.mxu2  ;;  %v7536_v59 = vld [vmem:[%s11529_s1 + $0xaa4] sm:$0xf] }
 0x359   : > { %v6865_v27 = vor.u32 %v7536_v59, %v6862_v14  ;;  %v6846_v49 = vld [vmem:[%s11529_s1 + $0xa88] sm:$0xf0] }
 0x35a   : > { %v11137_v18 = vpop.f32.mrf.mxu0  ;;  %v6958_v59 = vld [vmem:[%s11529_s1 + $0xb68] sm:$0xf0] }
 0x35b   : > { %v4267_v50 = vpop.f32.mrf.mxu3  ;;  %4702 = vmatpush.bf16.msrb.mxu1 %v6873_v26  ;;  %v7560_v26 = vld [vmem:[%s11529_s1 + $0xb64] sm:$0xf] }
 0x35d   : > { %4490 = vmatmul.bf16.gmra.mxu2 %v11743_v32  ;;  %4561 = vmatmul.bf16.gmra.mxu0 %v11744_v47  ;;  %v6961_v32 = vor.u32 %v7560_v26, %v6958_v59 }
 0x35e   : > { %v4448_v2 = vpop.f32.mrf.mxu1 }
 0x35f   : > { %4703 = vmatpush.bf16.msrb.mxu1 %v6865_v27  ;;  %4732 = vmatpush.bf16.msra.mxu2 %v6961_v32 }
 0x360   : > { %4523 = vmatmul.bf16.gmra.mxu3 %v11745_v57  ;;  %v4344_v33 = vpop.f32.mrf.mxu2 }
 0x361   : > { %v4345_v3 = vadd.f32 %v4344_v33, %v10898_v63  ;;  %4594 = vmatmul.bf16.gmra.mxu1 %v11746_v5  ;;  %v6849_v63 = vor.u32 %v7532_v60, %v6846_v49 }
 0x362   : > { %v4417_v36 = vpop.f32.mrf.mxu0 }
 0x363   : > { %v4377_v53 = vpop.f32.mrf.mxu3  ;;  %4704 = vmatpush.bf16.msrb.mxu1 %v6857_v25 }
 0x364   : > { %v4378_v28 = vadd.f32 %v4377_v53, %v4345_v3  ;;  %v11750_v53 = vld [vmem:[#allocation66_spill] sm:$0xff] }
 0x366   : > { %v4411_v1 = vadd.f32 %v11070_v62, %v4378_v28  ;;  %v4450_v11 = vpop.f32.mrf.mxu1  ;;  %v7558_v28 = vld [vmem:[%s11529_s1 + $0xb54] sm:$0xf] }
 0x367   : > { %4705 = vmatpush.bf16.msrb.mxu1 %v6849_v63 }
 0x368   : > { %v11176_v50 = vadd.f32 %v11094_v43, %v4411_v1  ;;  %v4346_v14 = vpop.f32.mrf.mxu2  ;;  %v7576_v43 = vld [vmem:[%s11529_s1 + $0xbe4] sm:$0xf] }
 0x369   : > { %v4347_v47 = vadd.f32 %v4346_v14, %v10919_v44  ;;  %v7025_v55 = vor.u32 %v7576_v43, %v7022_v40  ;;  %v11749_v44 = vld [vmem:[#allocation65_spill] sm:$0xff]  ;;  %v11751_v40 = vld [vmem:[#allocation67_spill] sm:$0xff] }
 0x36a   : > { %v4420_v62 = vpop.f32.mrf.mxu0 }
 0x36b   : > { %v4379_v27 = vpop.f32.mrf.mxu3  ;;  %4765 = vmatpush.bf16.msra.mxu3 %v7025_v55 }
 0x36c   : > { %v4380_v57 = vadd.f32 %v4379_v27, %v4347_v47 }
 0x36d   : > { %4495 = vmatmul.bf16.gmra.mxu2 %v11747_v6  ;;  %4673 = vmatmul.bf16.vlgmr.msrb.gmra.mxu0 %v11748_v51  ;;  %v11753_v6 = vld [vmem:[#allocation69_spill] sm:$0xff] }
 0x36e   : > { %v4413_v12 = vadd.f32 %v11107_v42, %v4380_v57  ;;  %v4453_v33 = vpop.f32.mrf.mxu1  ;;  %v6950_v42 = vld [vmem:[%s11529_s1 + $0xb58] sm:$0xf0]  ;;  %v7556_v57 = vld [vmem:[%s11529_s1 + $0xb44] sm:$0xf] }
 0x36f   : > { %v6953_v60 = vor.u32 %v7558_v28, %v6950_v42  ;;  %v7586_v28 = vld [vmem:[%s11531_s3 + $0x30] sm:$0xff] }
 0x370   : > { %4528 = vmatmul.bf16.gmra.mxu3 %v11749_v44  ;;  %v11195_v41 = vadd.f32 %v4445_v39, %v4413_v12  ;;  %v4349_v31 = vpop.f32.mrf.mxu2  ;;  %v7574_v39 = vld [vmem:[%s11529_s1 + $0xbd4] sm:$0xf]  ;;  %v7572_v12 = vld [vmem:[%s11529_s1 + $0xbc4] sm:$0xf]  ;;  %v7006_v44 = vld [vmem:[%s11529_s1 + $0xbc8] sm:$0xf0] }
 0x371   : > { %v4350_v20 = vadd.f32 %v4349_v31, %v10940_v52  ;;  %4706 = vmatmul.bf16.vlgmr.msrb.gmra.mxu1 %v11750_v53  ;;  %v7014_v52 = vld [vmem:[%s11529_s1 + $0xbd8] sm:$0xf0]  ;;  %4733 = vmatpush.bf16.msra.mxu2 %v6953_v60 }
 0x372   : > { %v11199_v5 = vpop.f32.mrf.mxu0  ;;  %v7017_v1 = vor.u32 %v7574_v39, %v7014_v52 }
 0x373   : > { %v4382_v3 = vpop.f32.mrf.mxu3 }
 0x374   : > { %v4383_v25 = vadd.f32 %v4382_v3, %v4350_v20  ;;  %4766 = vmatpush.bf16.msra.mxu3 %v7017_v1 }
 0x376   : > { %v4416_v49 = vadd.f32 %v11137_v18, %v4383_v25  ;;  %v4455_v63 = vpop.f32.mrf.mxu1  ;;  %v6942_v18 = vld [vmem:[%s11529_s1 + $0xb48] sm:$0xf0]  ;;  %v11754_v25 = vld [vmem:[#allocation70_spill] sm:$0xff] }
 0x377   : > { %v6945_v43 = vor.u32 %v7556_v57, %v6942_v18 }
 0x378   : > { %v11214_v26 = vadd.f32 %v4448_v2, %v4416_v49  ;;  %v4351_v59 = vpop.f32.mrf.mxu2  ;;  %v11752_v2 = vld [vmem:[#allocation68_spill] sm:$0xff]  ;;  %v7585_v49 = vld [vmem:[%s11531_s3 + $0x28] sm:$0xff] }
 0x379   : > { %v4352_v14 = vadd.f32 %v4351_v59, %v10968_v21  ;;  %v7587_v21 = vld [vmem:[%s11531_s3 + $0x38] sm:$0xff]  ;;  %4734 = vmatpush.bf16.msra.mxu2 %v6945_v43  ;;  %v7584_v43 = vld [vmem:[%s11531_s3 + $0x20] sm:$0xff] }
 0x37a   : > { %v11217_v47 = vpop.f32.mrf.mxu0  ;;  %4957 = vmatpush.bf16.msra.mxu0 %v7587_v21 }
 0x37b   : > { %v4384_v32 = vpop.f32.mrf.mxu3 }
 0x37c   : > { %v4385_v27 = vadd.f32 %v4384_v32, %v4352_v14  ;;  %v7570_v14 = vld [vmem:[%s11529_s1 + $0xbb4] sm:$0xf]  ;;  %v6998_v32 = vld [vmem:[%s11529_s1 + $0xbb8] sm:$0xf0] }
 0x37d   : > { %4607 = vmatmul.bf16.vlgmr.msrb.gmra.mxu2 %v11751_v40  ;;  %4678 = vmatmul.bf16.gmra.mxu0 %v11752_v2 }
 0x37e   : > { %v4418_v55 = vadd.f32 %v4417_v36, %v4385_v27  ;;  %v11231_v51 = vpop.f32.mrf.mxu1  ;;  %v7009_v36 = vor.u32 %v7572_v12, %v7006_v44  ;;  %4958 = vmatpush.bf16.msra.mxu0 %v7586_v28  ;;  %v6926_v12 = vld [vmem:[%s11529_s1 + $0xb28] sm:$0xf0] }
 0x37f   : > { %v6990_v28 = vld [vmem:[%s11529_s1 + $0xba8] sm:$0xf0] }
 0x380   : > { %4640 = vmatmul.bf16.vlgmr.msrb.gmra.mxu3 %v11753_v6  ;;  %v11239_v31 = vadd.f32 %v4450_v11, %v4418_v55  ;;  %v4354_v20 = vpop.f32.mrf.mxu2  ;;  %v7554_v11 = vld [vmem:[%s11529_s1 + $0xb34] sm:$0xf]  ;;  %v11755_v55 = vld [vmem:[#allocation71_spill] sm:$0xff]  ;;  %v7552_v6 = vld [vmem:[%s11529_s1 + $0xb24] sm:$0xf] }
 0x381   : > { %v4355_v3 = vadd.f32 %v4354_v20, %v10995_v34  ;;  %4711 = vmatmul.bf16.gmra.mxu1 %v11754_v25  ;;  %4767 = vmatpush.bf16.msra.mxu3 %v7009_v36  ;;  %v6934_v34 = vld [vmem:[%s11529_s1 + $0xb38] sm:$0xf0]  ;;  %v11756_v20 = vld [vmem:[#allocation72_spill] sm:$0xff] }
 0x382   : > { %v11246_v42 = vpop.f32.mrf.mxu0  ;;  %v6937_v60 = vor.u32 %v7554_v11, %v6934_v34  ;;  %4959 = vmatpush.bf16.msra.mxu0 %v7585_v49  ;;  %v7581_v11 = vld [vmem:[%s11531_s3 + $0x8] sm:$0xff] }
 0x383   : > { %v4387_v53 = vpop.f32.mrf.mxu3 }
 0x384   : > { %v4388_v39 = vadd.f32 %v4387_v53, %v4355_v3  ;;  %4735 = vmatpush.bf16.msra.mxu2 %v6937_v60  ;;  %v7582_v3 = vld [vmem:[%s11531_s3 + $0x10] sm:$0xff] }
 0x386   : > { %v4421_v52 = vadd.f32 %v4420_v62, %v4388_v39  ;;  %v11257_v1 = vpop.f32.mrf.mxu1  ;;  %v7001_v62 = vor.u32 %v7570_v14, %v6998_v32  ;;  %4960 = vmatpush.bf16.msra.mxu0 %v7584_v43  ;;  %v7580_v32 = vld [vmem:[%s11531_s3] sm:$0xff] }
 0x388   : > { %v11259_v59 = vadd.f32 %v4453_v33, %v4421_v52  ;;  %v4356_v27 = vpop.f32.mrf.mxu2  ;;  %4768 = vmatpush.bf16.msra.mxu3 %v7001_v62  ;;  %v7550_v62 = vld [vmem:[%s11529_s1 + $0xb14] sm:$0xf] }
 0x389   : > { %v4357_v57 = vadd.f32 %v4356_v27, %v11031_v61  ;;  %v7583_v61 = vld [vmem:[%s11531_s3 + $0x18] sm:$0xff] }
 0x38a   : > { %v11271_v33 = vpop.f32.mrf.mxu0  ;;  %4961 = vmatpush.bf16.msra.mxu0 %v7583_v61 }
 0x38b   : > { %v4389_v18 = vpop.f32.mrf.mxu3 }
 0x38c   : > { %v4390_v40 = vadd.f32 %v4389_v18, %v4357_v57  ;;  %v6982_v18 = vld [vmem:[%s11529_s1 + $0xb98] sm:$0xf0] }
 0x38d   : > { %4612 = vmatmul.bf16.gmra.mxu2 %v9530_v15  ;;  %4683 = vmatmul.bf16.gmra.mxu0 %v9532_v46  ;;  %v6929_v46 = vor.u32 %v7552_v6, %v6926_v12 }
 0x38e   : > { %v4423_v2 = vadd.f32 %v11199_v5, %v4390_v40  ;;  %v4463_v21 = vpop.f32.mrf.mxu1  ;;  %4962 = vmatpush.bf16.msra.mxu0 %v7582_v3 }
 0x38f   : > { %4736 = vmatpush.bf16.msra.mxu2 %v6929_v46 }
 0x390   : > { %4645 = vmatmul.bf16.gmra.mxu3 %v11755_v55  ;;  %v11286_v15 = vadd.f32 %v4455_v63, %v4423_v2  ;;  %v4359_v5 = vpop.f32.mrf.mxu2  ;;  %v7568_v63 = vld [vmem:[%s11529_s1 + $0xba4] sm:$0xf] }
 0x391   : > { %v4360_v44 = vadd.f32 %v4359_v5, %v11055_v45  ;;  %4716 = vmatmul.bf16.gmra.mxu1 %v11756_v20  ;;  %v6993_v45 = vor.u32 %v7568_v63, %v6990_v28  ;;  %v11758_v63 = vld [vmem:[#allocation74_spill] sm:$0xff] }
 0x392   : > { %v4432_v53 = vpop.f32.mrf.mxu0  ;;  %4963 = vmatpush.bf16.msra.mxu0 %v7581_v11  ;;  %v11759_v11 = vld [vmem:[#allocation75_spill] sm:$0xff] }
 0x393   : > { %v4392_v36 = vpop.f32.mrf.mxu3  ;;  %4769 = vmatpush.bf16.msra.mxu3 %v6993_v45 }
 0x394   : > { %v4393_v25 = vadd.f32 %v4392_v36, %v4360_v44 }
 0x396   : > { %v4426_v39 = vadd.f32 %v11217_v47, %v4393_v25  ;;  %v4465_v34 = vpop.f32.mrf.mxu1  ;;  %4964 = vmatpush.bf16.msra.mxu0 %v7580_v32  ;;  %v11757_v25 = vld [vmem:[#allocation73_spill] sm:$0xff] }
 0x398   : > { %v11304_v60 = vadd.f32 %v11231_v51, %v4426_v39  ;;  %v4361_v52 = vpop.f32.mrf.mxu2  ;;  %v6918_v51 = vld [vmem:[%s11529_s1 + $0xb18] sm:$0xf0] }
 0x399   : > { %v4362_v49 = vadd.f32 %v4361_v52, %v11097_v8  ;;  %v7566_v8 = vld [vmem:[%s11529_s1 + $0xb94] sm:$0xf]  ;;  %v6921_v57 = vor.u32 %v7550_v62, %v6918_v51 }
 0x39a   : > { %v4542_v27 = vpop.f32.mrf.mxu0  ;;  %v6985_v40 = vor.u32 %v7566_v8, %v6982_v18  ;;  %v11760_v8 = vld [vmem:[#allocation76_spill] sm:$0xff] }
 0x39b   : > { %v4394_v14 = vpop.f32.mrf.mxu3  ;;  %4737 = vmatpush.bf16.msra.mxu2 %v6921_v57  ;;  %v11761_v57 = vld [vmem:[#allocation77_spill] sm:$0xff] }
 0x39c   : > { %v4395_v47 = vadd.f32 %v4394_v14, %v4362_v49  ;;  %4770 = vmatpush.bf16.msra.mxu3 %v6985_v40 }
 0x39d   : > { %4617 = vmatmul.bf16.gmra.mxu2 %v9603_v58  ;;  %4688 = vmatmul.bf16.gmra.mxu0 %v9605_v29  ;;  %v7548_v58 = vld [vmem:[%s11529_s1 + $0xb04] sm:$0xf]  ;;  %v6910_v29 = vld [vmem:[%s11529_s1 + $0xb08] sm:$0xf0] }
 0x39e   : > { %v11325_v43 = vadd.f32 %v11246_v42, %v4395_v47  ;;  %v4575_v2 = vpop.f32.mrf.mxu1  ;;  %v6913_v42 = vor.u32 %v7548_v58, %v6910_v29 }
 0x3a0   : > { %4650 = vmatmul.bf16.gmra.mxu3 %v9614_v48  ;;  %v4364_v61 = vpop.f32.mrf.mxu2  ;;  %v7564_v48 = vld [vmem:[%s11529_s1 + $0xb84] sm:$0xf]  ;;  %4738 = vmatpush.bf16.msra.mxu2 %v6913_v42 }
 0x3a1   : > { %v4365_v55 = vadd.f32 %v4364_v61, %v11129_v4  ;;  %4721 = vmatmul.bf16.gmra.mxu1 %v9625_v37  ;;  %v6974_v4 = vld [vmem:[%s11529_s1 + $0xb88] sm:$0xf0] }
 0x3a2   : > { %v4544_v12 = vpop.f32.mrf.mxu0  ;;  %v6977_v5 = vor.u32 %v7564_v48, %v6974_v4 }
 0x3a3   : > { %v4397_v6 = vpop.f32.mrf.mxu3 }
 0x3a4   : > { %v4398_v46 = vadd.f32 %v4397_v6, %v4365_v55  ;;  %4771 = vmatpush.bf16.msra.mxu3 %v6977_v5 }
 0x3a6   : > { %v4431_v37 = vadd.f32 %v11271_v33, %v4398_v46  ;;  %v11343_v44 = vpop.f32.mrf.mxu1 }
 0x3a8   : > { %v11345_v36 = vadd.f32 %v4463_v21, %v4431_v37  ;;  %v4366_v20 = vpop.f32.mrf.mxu2 }
 0x3aa   : > { %v4547_v53 = vpop.f32.mrf.mxu0 }
 0x3ab   : > { %v4399_v3 = vpop.f32.mrf.mxu3 }
 0x3ad   : > { %4622 = vmatmul.bf16.gmra.mxu2 %v9690_v56  ;;  %4693 = vmatmul.bf16.gmra.mxu0 %v11757_v25 }
 0x3ae   : > { %v4580_v28 = vpop.f32.mrf.mxu1 }
 0x3b0   : > { %4655 = vmatmul.bf16.gmra.mxu3 %v11758_v63  ;;  %v4476_v45 = vpop.f32.mrf.mxu2 }
 0x3b1   : > { %v4477_v33 = vadd.f32 %v4476_v45, %v11176_v50  ;;  %4726 = vmatmul.bf16.gmra.mxu1 %v11759_v11 }
 0x3b2   : > { %v4549_v34 = vpop.f32.mrf.mxu0 }
 0x3b3   : > { %v4509_v39 = vpop.f32.mrf.mxu3 }
 0x3b4   : > { %v4510_v21 = vadd.f32 %v4509_v39, %v4477_v33 }
 0x3b6   : > { %v4543_v52 = vadd.f32 %v4542_v27, %v4510_v21  ;;  %v11352_v49 = vpop.f32.mrf.mxu1 }
 0x3b8   : > { %v11354_v14 = vadd.f32 %v4575_v2, %v4543_v52  ;;  %v4478_v32 = vpop.f32.mrf.mxu2 }
 0x3b9   : > { %v4479_v56 = vadd.f32 %v4478_v32, %v11195_v41  ;;  %v4461_v32 = vadd.f32 %v11257_v1, %v11325_v43 }
 0x3ba   : > { %v4552_v62 = vpop.f32.mrf.mxu0 }
 0x3bb   : > { %v4511_v47 = vpop.f32.mrf.mxu3 }
 0x3bc   : > { %v4512_v51 = vadd.f32 %v4511_v47, %v4479_v56 }
 0x3bd   : > { %4627 = vmatmul.bf16.gmra.mxu2 %v11760_v8  ;;  %4965 = vmatmul.bf16.vlgmr.msra.gmra.mxu0 %v10381_v35 }
 0x3be   : > { %v11359_v50 = vadd.f32 %v4544_v12, %v4512_v51  ;;  %v4585_v18 = vpop.f32.mrf.mxu1 }
 0x3c0   : > { %4660 = vmatmul.bf16.gmra.mxu3 %v11761_v57  ;;  %v4481_v27 = vpop.f32.mrf.mxu2 }
 0x3c1   : > { %v4482_v40 = vadd.f32 %v4481_v27, %v11214_v26 }
 0x3c2   : > { %v4554_v61 = vpop.f32.mrf.mxu0 }
 0x3c3   : > { %v4514_v2 = vpop.f32.mrf.mxu3 }
 0x3c4   : > { %v4515_v55 = vadd.f32 %v4514_v2, %v4482_v40  ;;  %v7595_v40 = vld [vmem:[%s11531_s3 + $0x78] sm:$0xff] }
 0x3c5   : > { %4990 = vmatpush.bf16.msra.mxu1 %v7595_v40 }
 0x3c6   : > { %v4548_v6 = vadd.f32 %v4547_v53, %v4515_v55  ;;  %v11363_v41 = vpop.f32.mrf.mxu1 }
 0x3c8   : > { %v11365_v46 = vadd.f32 %v4580_v28, %v4548_v6  ;;  %v4483_v58 = vpop.f32.mrf.mxu2 }
 0x3c9   : > { %v4484_v29 = vadd.f32 %v4483_v58, %v11239_v31 }
 0x3ca   : > { %v4557_v12 = vpop.f32.mrf.mxu0 }
 0x3cb   : > { %v4516_v35 = vpop.f32.mrf.mxu3 }
 0x3cc   : > { %v4517_v48 = vadd.f32 %v4516_v35, %v4484_v29 }
 0x3cd   : > { %4739 = vmatmul.bf16.vlgmr.msra.gmra.mxu2 %v9801_v17  ;;  %4970 = vmatmul.bf16.gmra.mxu0 %v10427_v10 }
 0x3ce   : > { %v11370_v42 = vadd.f32 %v4549_v34, %v4517_v48  ;;  %v4590_v26 = vpop.f32.mrf.mxu1 }
 0x3d0   : > { %4772 = vmatmul.bf16.vlgmr.msra.gmra.mxu3 %v9805_v22  ;;  %v4486_v4 = vpop.f32.mrf.mxu2 }
 0x3d1   : > { %v4487_v37 = vadd.f32 %v4486_v4, %v11259_v59  ;;  %v7593_v4 = vld [vmem:[%s11531_s3 + $0x68] sm:$0xff] }
 0x3d2   : > { %v4559_v20 = vpop.f32.mrf.mxu0 }
 0x3d3   : > { %v4519_v5 = vpop.f32.mrf.mxu3 }
 0x3d4   : > { %v4520_v3 = vadd.f32 %v4519_v5, %v4487_v37 }
 0x3d6   : > { %v4553_v53 = vadd.f32 %v4552_v62, %v4520_v3  ;;  %v4592_v31 = vpop.f32.mrf.mxu1 }
 0x3d8   : > { %v11374_v25 = vadd.f32 %v4585_v18, %v4553_v53  ;;  %v4488_v63 = vpop.f32.mrf.mxu2 }
 0x3d9   : > { %v4489_v17 = vadd.f32 %v4488_v63, %v11286_v15 }
 0x3da   : > { %v4562_v10 = vpop.f32.mrf.mxu0 }
 0x3db   : > { %v4521_v28 = vpop.f32.mrf.mxu3 }
 0x3dc   : > { %v4522_v45 = vadd.f32 %v4521_v28, %v4489_v17 }
 0x3dd   : > { %4744 = vmatmul.bf16.gmra.mxu2 %v9879_v30  ;;  %4975 = vmatmul.bf16.gmra.mxu0 %v10483_v7 }
 0x3de   : > { %v11379_v22 = vadd.f32 %v4554_v61, %v4522_v45  ;;  %v4595_v59 = vpop.f32.mrf.mxu1 }
 0x3e0   : > { %4777 = vmatmul.bf16.gmra.mxu3 %v9883_v24  ;;  %v4491_v33 = vpop.f32.mrf.mxu2 }
 0x3e1   : > { %v4492_v39 = vadd.f32 %v4491_v33, %v11304_v60 }
 0x3e2   : > { %v4564_v34 = vpop.f32.mrf.mxu0 }
 0x3e3   : > { %v4524_v11 = vpop.f32.mrf.mxu3 }
 0x3e4   : > { %v4525_v21 = vadd.f32 %v4524_v11, %v4492_v39 }
 0x3e6   : > { %v4558_v52 = vadd.f32 %v4557_v12, %v4525_v21  ;;  %v4597_v15 = vpop.f32.mrf.mxu1 }
 0x3e8   : > { %v11385_v56 = vadd.f32 %v4590_v26, %v4558_v52  ;;  %v4493_v30 = vpop.f32.mrf.mxu2 }
 0x3e9   : > { %v4494_v7 = vadd.f32 %v4493_v30, %v4461_v32 }
 0x3ea   : > { %v4674_v62 = vpop.f32.mrf.mxu0 }
 0x3eb   : > { %v4526_v47 = vpop.f32.mrf.mxu3 }
 0x3ec   : > { %v4527_v51 = vadd.f32 %v4526_v47, %v4494_v7 }
 0x3ed   : > { %4749 = vmatmul.bf16.gmra.mxu2 %v9944_v23  ;;  %4980 = vmatmul.bf16.gmra.mxu0 %v10543_v13  ;;  %v4813_v13 = vmax.f32 %v10555_v19, 0.0 }
 0x3ee   : > { %v4560_v24 = vadd.f32 %v4559_v20, %v4527_v51  ;;  %v4707_v60 = vpop.f32.mrf.mxu1 }
 0x3ef   : > { %v4823_v58 = vpack.c.bf16 %v4813_v13, %v4813_v13  ;;  %v7589_v13 = vld [vmem:[%s11531_s3 + $0x48] sm:$0xff] }
 0x3f0   : > { %4782 = vmatmul.bf16.gmra.mxu3 %v9951_v9  ;;  %v11390_v8 = vadd.f32 %v4592_v31, %v4560_v24  ;;  %v4496_v57 = vpop.f32.mrf.mxu2 }
 0x3f1   : > { %v4497_v1 = vadd.f32 %v4496_v57, %v11345_v36  ;;  %v7594_v36 = vld [vmem:[%s11531_s3 + $0x70] sm:$0xff] }
 0x3f2   : > { %v4676_v18 = vpop.f32.mrf.mxu0  ;;  %4991 = vmatpush.bf16.msra.mxu1 %v7594_v36 }
 0x3f3   : > { %v4529_v43 = vpop.f32.mrf.mxu3 }
 0x3f4   : > { %v4530_v27 = vadd.f32 %v4529_v43, %v4497_v1  ;;  %v4588_v43 = vadd.f32 %v11363_v41, %v11379_v22 }
 0x3f6   : > { %v4563_v2 = vadd.f32 %v4562_v10, %v4530_v27  ;;  %v4709_v23 = vpop.f32.mrf.mxu1  ;;  %4992 = vmatpush.bf16.msra.mxu1 %v7593_v4  ;;  %v7592_v10 = vld [vmem:[%s11531_s3 + $0x60] sm:$0xff] }
 0x3f8   : > { %v11397_v61 = vadd.f32 %v4595_v59, %v4563_v2  ;;  %v4498_v9 = vpop.f32.mrf.mxu2 }
 0x3fa   : > { %v4679_v6 = vpop.f32.mrf.mxu0  ;;  %4993 = vmatpush.bf16.msra.mxu1 %v7592_v10 }
 0x3fb   : > { %v4531_v55 = vpop.f32.mrf.mxu3 }
 0x3fd   : > { %4754 = vmatmul.bf16.gmra.mxu2 %v10024_v0  ;;  %4985 = vmatmul.bf16.gmra.mxu0 %v4823_v58  ;;  %v4578_v0 = vadd.f32 %v11343_v44, %v11359_v50 }
 0x3fe   : > { %v4712_v29 = vpop.f32.mrf.mxu1 }
 0x400   : > { %4787 = vmatmul.bf16.gmra.mxu3 %v10028_v38  ;;  %v4608_v35 = vpop.f32.mrf.mxu2 }
 0x401   : > { %v4609_v19 = vadd.f32 %v4608_v35, %v11354_v14 }
 0x402   : > { %v4681_v48 = vpop.f32.mrf.mxu0 }
 0x403   : > { %v4641_v12 = vpop.f32.mrf.mxu3 }
 0x404   : > { %v4642_v26 = vadd.f32 %v4641_v12, %v4609_v19  ;;  %v7588_v19 = vld [vmem:[%s11531_s3 + $0x40] sm:$0xff] }
 0x406   : > { %v4675_v37 = vadd.f32 %v4674_v62, %v4642_v26  ;;  %v4714_v5 = vpop.f32.mrf.mxu1 }
 0x408   : > { %v11410_v20 = vadd.f32 %v4707_v60, %v4675_v37  ;;  %v4610_v38 = vpop.f32.mrf.mxu2  ;;  %v7590_v60 = vld [vmem:[%s11531_s3 + $0x50] sm:$0xff] }
 0x409   : > { %v4611_v3 = vadd.f32 %v4610_v38, %v4578_v0 }
 0x40a   : > { %v4684_v31 = vpop.f32.mrf.mxu0 }
 0x40b   : > { %v4643_v53 = vpop.f32.mrf.mxu3 }
 0x40c   : > { %v4644_v14 = vadd.f32 %v4643_v53, %v4611_v3 }
 0x40d   : > { %4759 = vmatmul.bf16.gmra.mxu2 %v10081_v16  ;;  %v4583_v16 = vadd.f32 %v11352_v49, %v11370_v42 }
 0x40e   : > { %v4677_v63 = vadd.f32 %v4676_v18, %v4644_v14  ;;  %v4717_v17 = vpop.f32.mrf.mxu1 }
 0x410   : > { %4792 = vmatmul.bf16.gmra.mxu3 %v10085_v54  ;;  %v11414_v28 = vadd.f32 %v4709_v23, %v4677_v63  ;;  %v4613_v44 = vpop.f32.mrf.mxu2 }
 0x411   : > { %v4614_v50 = vadd.f32 %v4613_v44, %v11365_v46  ;;  %v7591_v46 = vld [vmem:[%s11531_s3 + $0x58] sm:$0xff] }
 0x412   : > { %v4686_v59 = vpop.f32.mrf.mxu0  ;;  %4994 = vmatpush.bf16.msra.mxu1 %v7591_v46 }
 0x413   : > { %v4646_v45 = vpop.f32.mrf.mxu3 }
 0x414   : > { %v4647_v33 = vadd.f32 %v4646_v45, %v4614_v50 }
 0x416   : > { %v4680_v39 = vadd.f32 %v4679_v6, %v4647_v33  ;;  %v4719_v11 = vpop.f32.mrf.mxu1  ;;  %4995 = vmatpush.bf16.msra.mxu1 %v7590_v60 }
 0x418   : > { %v11422_v54 = vadd.f32 %v4712_v29, %v4680_v39  ;;  %v4615_v34 = vpop.f32.mrf.mxu2 }
 0x419   : > { %v4616_v21 = vadd.f32 %v4615_v34, %v4583_v16 }
 0x41a   : > { %v4689_v15 = vpop.f32.mrf.mxu0  ;;  %4996 = vmatpush.bf16.msra.mxu1 %v7589_v13 }
 0x41b   : > { %v4648_v52 = vpop.f32.mrf.mxu3 }
 0x41c   : > { %v4649_v32 = vadd.f32 %v4648_v52, %v4616_v21 }
 0x41e   : > { %v4682_v30 = vadd.f32 %v4681_v48, %v4649_v32  ;;  %v4722_v7 = vpop.f32.mrf.mxu1  ;;  %4997 = vmatpush.bf16.msra.mxu1 %v7588_v19 }
 0x420   : > { %v11427_v47 = vadd.f32 %v4714_v5, %v4682_v30  ;;  %v4618_v62 = vpop.f32.mrf.mxu2 }
 0x421   : > { %v4619_v51 = vadd.f32 %v4618_v62, %v11374_v25 }
 0x422   : > { %v4691_v42 = vpop.f32.mrf.mxu0 }
 0x423   : > { %v4651_v49 = vpop.f32.mrf.mxu3 }
 0x424   : > { %v4652_v24 = vadd.f32 %v4651_v49, %v4619_v51 }
 0x426   : > { %v4685_v57 = vadd.f32 %v4684_v31, %v4652_v24  ;;  %v4724_v1 = vpop.f32.mrf.mxu1 }
 0x428   : > { %v11435_v18 = vadd.f32 %v4717_v17, %v4685_v57  ;;  %v4620_v27 = vpop.f32.mrf.mxu2 }
 0x429   : > { %v4621_v40 = vadd.f32 %v4620_v27, %v4588_v43 }
 0x42a   : > { %v4694_v23 = vpop.f32.mrf.mxu0 }
 0x42b   : > { %v4653_v2 = vpop.f32.mrf.mxu3 }
 0x42c   : > { %v4654_v25 = vadd.f32 %v4653_v2, %v4621_v40 }
 0x42e   : > { %v4687_v9 = vadd.f32 %v4686_v59, %v4654_v25  ;;  %v4727_v55 = vpop.f32.mrf.mxu1 }
 0x430   : > { %v11440_v6 = vadd.f32 %v4719_v11, %v4687_v9  ;;  %v4623_v58 = vpop.f32.mrf.mxu2 }
 0x431   : > { %v4624_v36 = vadd.f32 %v4623_v58, %v11385_v56 }
 0x432   : > { %v4696_v22 = vpop.f32.mrf.mxu0 }
 0x433   : > { %v4656_v41 = vpop.f32.mrf.mxu3 }
 0x434   : > { %v4657_v29 = vadd.f32 %v4656_v41, %v4624_v36 }
 0x436   : > { %v4690_v35 = vadd.f32 %v4689_v15, %v4657_v29  ;;  %v4729_v12 = vpop.f32.mrf.mxu1 }
 0x438   : > { %v11446_v48 = vadd.f32 %v4722_v7, %v4690_v35  ;;  %v4625_v26 = vpop.f32.mrf.mxu2 }
 0x439   : > { %v4626_v4 = vadd.f32 %v4625_v26, %v11390_v8 }
 0x43a   : > { %v11449_v5 = vpop.f32.mrf.mxu0 }
 0x43b   : > { %v4658_v37 = vpop.f32.mrf.mxu3 }
 0x43c   : > { %v4659_v0 = vadd.f32 %v4658_v37, %v4626_v4 }
 0x43e   : > { %v4692_v56 = vadd.f32 %v4691_v42, %v4659_v0 }
 0x440   : > { %v4725_v38 = vadd.f32 %v4724_v1, %v4692_v56  ;;  %v4628_v3 = vpop.f32.mrf.mxu2 }
 0x441   : > { %v4629_v53 = vadd.f32 %v4628_v3, %v11397_v61 }
 0x442   : > { %v11452_v14 = vpop.f32.mrf.mxu0 }
 0x443   : > { %v4661_v31 = vpop.f32.mrf.mxu3 }
 0x444   : > { %v4662_v63 = vadd.f32 %v4661_v31, %v4629_v53 }
 0x446   : > { %v4695_v17 = vadd.f32 %v4694_v23, %v4662_v63 }
 0x448   : > { %v11454_v10 = vadd.f32 %v4727_v55, %v4695_v17  ;;  %v4630_v44 = vpop.f32.mrf.mxu2 }
 0x44a   : > { %v11456_v45 = vpop.f32.mrf.mxu0 }
 0x44b   : > { %v4663_v50 = vpop.f32.mrf.mxu3 }
 0x450   : > { %v4740_v8 = vpop.f32.mrf.mxu2 }
 0x451   : > { %v4741_v39 = vadd.f32 %v4740_v8, %v11410_v20 }
 0x452   : > { %v11458_v33 = vpop.f32.mrf.mxu0 }
 0x453   : > { %v4773_v59 = vpop.f32.mrf.mxu3 }
 0x454   : > { %v4774_v16 = vadd.f32 %v4773_v59, %v4741_v39 }
 0x456   : > { %v4798_v15 = vmax.f32 %v4774_v16, 0.0 }
 0x458   : > { %v4742_v11 = vpop.f32.mrf.mxu2 }
 0x459   : > { %v4743_v61 = vadd.f32 %v4742_v11, %v11414_v28 }
 0x45a   : > { %v11462_v21 = vpop.f32.mrf.mxu0 }
 0x45b   : > { %v4775_v34 = vpop.f32.mrf.mxu3 }
 0x45c   : > { %v4776_v52 = vadd.f32 %v4775_v34, %v4743_v61 }
 0x45e   : > { %v4800_v32 = vmax.f32 %v4776_v52, 0.0 }
 0x460   : > { %v4816_v46 = vpack.c.bf16 %v4800_v32, %v4798_v15  ;;  %v4745_v30 = vpop.f32.mrf.mxu2 }
 0x461   : > { %v4746_v51 = vadd.f32 %v4745_v30, %v11422_v54  ;;  %v11476_v54 = vld [vmem:[%s11532_s4] ss:$0 sm:$0xff] }
 0x462   : > { %4998 = vmatmul.bf16.vlgmr.msra.gmra.mxu1 %v4816_v46  ;;  %v11464_v62 = vpop.f32.mrf.mxu0  ;;  %v4969_v61 = vadd.f32 %v11476_v54, %v11452_v14  ;;  %v4972_v32 = vadd.f32 %v11476_v54, %v11456_v45  ;;  %v4974_v14 = vadd.f32 %v11476_v54, %v11458_v33  ;;  %v4977_v45 = vadd.f32 %v11476_v54, %v11462_v21 }
 0x463   : > { %v4778_v7 = vpop.f32.mrf.mxu3  ;;  %v4979_v33 = vadd.f32 %v11476_v54, %v11464_v62 }
 0x464   : > { %v4779_v20 = vadd.f32 %v4778_v7, %v4746_v51 }
 0x466   : > { %v4802_v57 = vmax.f32 %v4779_v20, 0.0 }
 0x468   : > { %v4747_v49 = vpop.f32.mrf.mxu2 }
 0x469   : > { %v4748_v42 = vadd.f32 %v4747_v49, %v11427_v47 }
 0x46a   : > { %v11468_v28 = vpop.f32.mrf.mxu0 }
 0x46b   : > { %v4780_v24 = vpop.f32.mrf.mxu3  ;;  %v4982_v21 = vadd.f32 %v11476_v54, %v11468_v28 }
 0x46c   : > { %v4781_v60 = vadd.f32 %v4780_v24, %v4748_v42 }
 0x46e   : > { %v4804_v1 = vmax.f32 %v4781_v60, 0.0 }
 0x470   : > { %v4818_v43 = vpack.c.bf16 %v4804_v1, %v4802_v57  ;;  %v4750_v27 = vpop.f32.mrf.mxu2 }
 0x471   : > { %v4751_v23 = vadd.f32 %v4750_v27, %v11435_v18 }
 0x472   : > { %5003 = vmatmul.bf16.gmra.mxu1 %v4818_v43  ;;  %v11470_v2 = vpop.f32.mrf.mxu0 }
 0x473   : > { %v4783_v40 = vpop.f32.mrf.mxu3  ;;  %v4984_v62 = vadd.f32 %v11476_v54, %v11470_v2 }
 0x474   : > { %v4784_v47 = vadd.f32 %v4783_v40, %v4751_v23 }
 0x476   : > { %v4806_v41 = vmax.f32 %v4784_v47, 0.0 }
 0x478   : > { %v4752_v25 = vpop.f32.mrf.mxu2 }
 0x479   : > { %v4753_v13 = vadd.f32 %v4752_v25, %v11440_v6 }
 0x47a   : > { %v4986_v55 = vpop.f32.mrf.mxu0 }
 0x47b   : > { %v4785_v9 = vpop.f32.mrf.mxu3  ;;  %v11480_v36 = vadd.f32 %v11476_v54, %v4986_v55 }
 0x47c   : > { %v4786_v58 = vadd.f32 %v4785_v9, %v4753_v13 }
 0x47e   : > { %v4808_v22 = vmax.f32 %v4786_v58, 0.0 }
 0x480   : > { %v4820_v29 = vpack.c.bf16 %v4808_v22, %v4806_v41  ;;  %v4755_v35 = vpop.f32.mrf.mxu2 }
 0x481   : > { %v4756_v12 = vadd.f32 %v4755_v35, %v11446_v48  ;;  %v4967_v48 = vadd.f32 %v11476_v54, %v11449_v5 }
 0x482   : > { %5008 = vmatmul.bf16.gmra.mxu1 %v4820_v29  ;;  %v4988_v19 = vpop.f32.mrf.mxu0 }
 0x483   : > { %v4788_v18 = vpop.f32.mrf.mxu3 }
 0x484   : > { %v4789_v4 = vadd.f32 %v4788_v18, %v4756_v12 }
 0x486   : > { %v4810_v56 = vmax.f32 %v4789_v4, 0.0 }
 0x488   : > { %v4757_v26 = vpop.f32.mrf.mxu2 }
 0x489   : > { %v4758_v37 = vadd.f32 %v4757_v26, %v4725_v38 }
 0x48b   : > { %v4790_v0 = vpop.f32.mrf.mxu3 }
 0x48c   : > { %v4791_v6 = vadd.f32 %v4790_v0, %v4758_v37 }
 0x48e   : > { %v4812_v3 = vmax.f32 %v4791_v6, 0.0 }
 0x490   : > { %v4822_v53 = vpack.c.bf16 %v4812_v3, %v4810_v56  ;;  %v4760_v31 = vpop.f32.mrf.mxu2 }
 0x491   : > { %v4761_v17 = vadd.f32 %v4760_v31, %v11454_v10 }
 0x492   : > { %5013 = vmatmul.bf16.gmra.mxu1 %v4822_v53 }
 0x493   : > { %v4793_v63 = vpop.f32.mrf.mxu3 }
 0x494   : > { %v4794_v44 = vadd.f32 %v4793_v63, %v4761_v17 }
 0x496   : > { %v4814_v59 = vmax.f32 %v4794_v44, 0.0 }
 0x498   : > { %v4762_v50 = vpop.f32.mrf.mxu2  ;;  %v4824_v39 = vpack.c.bf16 %v4814_v59, %v4814_v59 }
 0x49b   : > { %v4795_v8 = vpop.f32.mrf.mxu3 }
 0x4a2   : > { %5018 = vmatmul.bf16.gmra.mxu1 %v4824_v39 }
 0x4df   : > { %v4999_v38 = vpop.f32.mrf.mxu1 }
 0x4e0   : > { %v5000_v11 = vadd.f32 %v4999_v38, %v4967_v48 }
 0x4e2   : > { %v5023_v16 = vmax.f32 %v5000_v11, 0.0 }
 0x4e4   : > { %v5032_v10 = vpack.c.bf16 %v5023_v16, %v5023_v16 }
 0x4e6   : > { %5042 = vst.msk [vmem:[%s11490_s7] sm:$0xf] %vm5041_vm0, %v5032_v10 }
 0x4e7   : > { %v5001_v5 = vpop.f32.mrf.mxu1 }
 0x4e8   : > { %v5002_v34 = vadd.f32 %v5001_v5, %v4969_v61 }
 0x4ea   : > { %v5024_v52 = vmax.f32 %v5002_v34, 0.0 }
 0x4ec   : > { %v5033_v15 = vpack.c.bf16 %v5024_v52, %v5024_v52 }
 0x4ee   : > { %5043 = vst.msk [vmem:[%s11490_s7 + $0x4] sm:$0xf] %vm5041_vm0, %v5033_v15 }
 0x4ef   : > { %v5004_v46 = vpop.f32.mrf.mxu1 }
 0x4f0   : > { %v5005_v30 = vadd.f32 %v5004_v46, %v4972_v32 }
 0x4f2   : > { %v5025_v7 = vmax.f32 %v5005_v30, 0.0 }
 0x4f4   : > { %v5034_v51 = vpack.c.bf16 %v5025_v7, %v5025_v7 }
 0x4f6   : > { %5044 = vst.msk [vmem:[%s11490_s7 + $0x8] sm:$0xf] %vm5041_vm0, %v5034_v51 }
 0x4f7   : > { %v5006_v49 = vpop.f32.mrf.mxu1 }
 0x4f8   : > { %v5007_v20 = vadd.f32 %v5006_v49, %v4974_v14 }
 0x4fa   : > { %v5026_v42 = vmax.f32 %v5007_v20, 0.0 }
 0x4fc   : > { %v5035_v24 = vpack.c.bf16 %v5026_v42, %v5026_v42 }
 0x4fe   : > { %5045 = vst.msk [vmem:[%s11490_s7 + $0xc] sm:$0xf] %vm5041_vm0, %v5035_v24 }
 0x4ff   : > { %v5009_v60 = vpop.f32.mrf.mxu1 }
 0x500   : > { %v5010_v57 = vadd.f32 %v5009_v60, %v4977_v45 }
 0x502   : > { %v5027_v1 = vmax.f32 %v5010_v57, 0.0 }
 0x504   : > { %v5036_v43 = vpack.c.bf16 %v5027_v1, %v5027_v1 }
 0x506   : > { %5046 = vst.msk [vmem:[%s11490_s7 + $0x10] sm:$0xf] %vm5041_vm0, %v5036_v43 }
 0x507   : > { %v5011_v27 = vpop.f32.mrf.mxu1 }
 0x508   : > { %v5012_v40 = vadd.f32 %v5011_v27, %v4979_v33 }
 0x50a   : > { %v5028_v23 = vmax.f32 %v5012_v40, 0.0 }
 0x50c   : > { %v5037_v25 = vpack.c.bf16 %v5028_v23, %v5028_v23 }
 0x50e   : > { %5047 = vst.msk [vmem:[%s11490_s7 + $0x14] sm:$0xf] %vm5041_vm0, %v5037_v25 }
 0x50f   : > { %v5014_v47 = vpop.f32.mrf.mxu1 }
 0x510   : > { %v5015_v13 = vadd.f32 %v5014_v47, %v4982_v21 }
 0x512   : > { %v5029_v9 = vmax.f32 %v5015_v13, 0.0 }
 0x514   : > { %v5038_v55 = vpack.c.bf16 %v5029_v9, %v5029_v9 }
 0x516   : > { %5048 = vst.msk [vmem:[%s11490_s7 + $0x18] sm:$0xf] %vm5041_vm0, %v5038_v55 }
 0x517   : > { %v5016_v58 = vpop.f32.mrf.mxu1 }
 0x518   : > { %v5017_v41 = vadd.f32 %v5016_v58, %v4984_v62 }
 0x51a   : > { %v5030_v22 = vmax.f32 %v5017_v41, 0.0 }
 0x51c   : > { %v5039_v29 = vpack.c.bf16 %v5030_v22, %v5030_v22 }
 0x51e   : > { %5049 = vst.msk [vmem:[%s11490_s7 + $0x1c] sm:$0xf] %vm5041_vm0, %v5039_v29 }
 0x51f   : > { %v5019_v35 = vpop.f32.mrf.mxu1 }
 0x520   : > { %v5020_v28 = vadd.f32 %v5019_v35, %v11480_v36 }
 0x522   : > { %v5031_v18 = vmax.f32 %v5020_v28, 0.0 }
 0x524   : > { %v5040_v19 = vpack.c.bf16 %v5031_v18, %v5031_v18 }
 0x526   : > { %5050 = vst.msk [vmem:[%s11490_s7 + $0x20] sm:$0xf] %vm5041_vm0, %v5040_v19 }
 0x527   : > { %v5021_v12 = vpop.f32.mrf.mxu1 }
 0x528 PF: > { %s15_s18 = sadd.s32 1, %s7629_s18  }
 0x529   : > { %p12_p4 = scmp.ge.s32.totalorder %s15_s18, 4  }
 0x52b   :  { %14 = sbr.rel (!%p12_p4) target bundleno = 1 (0x1), region = 70 }

// kernel: dqn_forward_pallas.3
= control target key start
LH: loop header
LB: loop body
LE: loop exit
PB: predicated region body
PF: predicated region fallthrough
CT: control target
= control target key end

     0   :  { %vm818_vm0 = vcmask 261120   ;;  %vm2375_vm1 = vcmask 523264   ;;  %vm2406_vm2 = vcmask 48128   ;;  %s4836_s1 = inlined_call_operand.vmem [shape: bf16[800,32], index: 1, kind: input, shape index: {}]   ;;  %s4837_s2 = inlined_call_operand.vmem [shape: f32[1,32], index: 2, kind: input, shape index: {}]   ;;  %s4838_s0 = inlined_call_operand.vmem [shape: bf16[144,800], index: 0, kind: input, shape index: {}]   ;;  %s4839_s3 = inlined_call_operand.vmem [shape: bf16[18,32,192], index: 3, kind: input, shape index: {}]   ;;  %s4840_s5 = inlined_call_operand.vmem [shape: bf16[192,6], index: 5, kind: input, shape index: {}]   ;;  %s4841_s4 = inlined_call_operand.vmem [shape: f32[1,192], index: 4, kind: input, shape index: {}]   ;;  %s4842_s6 = inlined_call_operand.vmem [shape: f32[1,6], index: 6, kind: input, shape index: {}]   ;;  %s4843_s7 = inlined_call_operand.vmem [shape: f32[8,6], index: 7, kind: output, shape index: {}]  }
   0x1   :  { %v3384_v0 = vld [vmem:[%s4836_s1 + $0x38] sm:$0xff]  ;;  %v3383_v4 = vld [vmem:[%s4836_s1 + $0x30] sm:$0xff]  ;;  %v3382_v8 = vld [vmem:[%s4836_s1 + $0x28] sm:$0xff] }
   0x2   :  { %v3392_v1 = vld [vmem:[%s4836_s1 + $0x78] sm:$0xff]  ;;  %846 = vmatpush.bf16.msra.mxu0 %v3384_v0  ;;  %v3391_v5 = vld [vmem:[%s4836_s1 + $0x70] sm:$0xff]  ;;  %v3390_v9 = vld [vmem:[%s4836_s1 + $0x68] sm:$0xff] }
   0x3   :  { %v3400_v2 = vld [vmem:[%s4836_s1 + $0xb8] sm:$0xff]  ;;  %900 = vmatpush.bf16.msra.mxu1 %v3392_v1  ;;  %v3399_v6 = vld [vmem:[%s4836_s1 + $0xb0] sm:$0xff]  ;;  %v3398_v10 = vld [vmem:[%s4836_s1 + $0xa8] sm:$0xff] }
   0x4   :  { %v3408_v3 = vld [vmem:[%s4836_s1 + $0xf8] sm:$0xff]  ;;  %954 = vmatpush.bf16.msra.mxu2 %v3400_v2  ;;  %v3407_v7 = vld [vmem:[%s4836_s1 + $0xf0] sm:$0xff]  ;;  %v3406_v11 = vld [vmem:[%s4836_s1 + $0xe8] sm:$0xff] }
   0x5   :  { %1008 = vmatpush.bf16.msra.mxu3 %v3408_v3  ;;  %v3381_v12 = vld [vmem:[%s4836_s1 + $0x20] sm:$0xff]  ;;  %v3380_v16 = vld [vmem:[%s4836_s1 + $0x18] sm:$0xff]  ;;  %v3379_v20 = vld [vmem:[%s4836_s1 + $0x10] sm:$0xff] }
   0x6   :  { %847 = vmatpush.bf16.msra.mxu0 %v3383_v4  ;;  %v3389_v13 = vld [vmem:[%s4836_s1 + $0x60] sm:$0xff]  ;;  %v3388_v17 = vld [vmem:[%s4836_s1 + $0x58] sm:$0xff]  ;;  %v3387_v21 = vld [vmem:[%s4836_s1 + $0x50] sm:$0xff] }
   0x7   :  { %901 = vmatpush.bf16.msra.mxu1 %v3391_v5  ;;  %v3397_v14 = vld [vmem:[%s4836_s1 + $0xa0] sm:$0xff]  ;;  %v3396_v18 = vld [vmem:[%s4836_s1 + $0x98] sm:$0xff]  ;;  %v3395_v22 = vld [vmem:[%s4836_s1 + $0x90] sm:$0xff] }
   0x8   :  { %955 = vmatpush.bf16.msra.mxu2 %v3399_v6  ;;  %v3405_v15 = vld [vmem:[%s4836_s1 + $0xe0] sm:$0xff]  ;;  %v3404_v19 = vld [vmem:[%s4836_s1 + $0xd8] sm:$0xff]  ;;  %v3403_v23 = vld [vmem:[%s4836_s1 + $0xd0] sm:$0xff] }
   0x9   :  { %1009 = vmatpush.bf16.msra.mxu3 %v3407_v7  ;;  %v3378_v24 = vld [vmem:[%s4836_s1 + $0x8] sm:$0xff]  ;;  %v3377_v28 = vld [vmem:[%s4836_s1] sm:$0xff]  ;;  %v3317_v33 = vld [vmem:[%s4838_s0 + $0x18] sm:$0xf0] }
   0xa   :  { %848 = vmatpush.bf16.msra.mxu0 %v3382_v8  ;;  %v3386_v25 = vld [vmem:[%s4836_s1 + $0x48] sm:$0xff]  ;;  %v3385_v29 = vld [vmem:[%s4836_s1 + $0x40] sm:$0xff]  ;;  %v3416_v41 = vld [vmem:[%s4836_s1 + $0x138] sm:$0xff] }
   0xb   :  { %902 = vmatpush.bf16.msra.mxu1 %v3390_v9  ;;  %v3394_v26 = vld [vmem:[%s4836_s1 + $0x88] sm:$0xff]  ;;  %v3393_v30 = vld [vmem:[%s4836_s1 + $0x80] sm:$0xff]  ;;  %v3424_v46 = vld [vmem:[%s4836_s1 + $0x178] sm:$0xff] }
   0xc   :  { %956 = vmatpush.bf16.msra.mxu2 %v3398_v10  ;;  %v3402_v27 = vld [vmem:[%s4836_s1 + $0xc8] sm:$0xff]  ;;  %v3401_v31 = vld [vmem:[%s4836_s1 + $0xc0] sm:$0xff]  ;;  %v3415_v47 = vld [vmem:[%s4836_s1 + $0x130] sm:$0xff] }
   0xd   :  { %1010 = vmatpush.bf16.msra.mxu3 %v3406_v11  ;;  %v2414_v32 = vld [vmem:[%s4838_s0] sm:$0xf]  ;;  %v3314_v34 = vld [vmem:[%s4838_s0 + $0x4] sm:$0xf]  ;;  %v2422_v36 = vld [vmem:[%s4838_s0 + $0x8] sm:$0xf] }
   0xe   :  { %849 = vmatpush.bf16.msra.mxu0 %v3381_v12  ;;  %v2416_v35 = vld [vmem:[%s4838_s0 + $0x1c] sm:$0xf0]  ;;  %v3318_v37 = vld [vmem:[%s4838_s0 + $0x20] sm:$0xf0]  ;;  %v3315_v38 = vld [vmem:[%s4838_s0 + $0xc] sm:$0xf]  ;;  %v2415_v42 = vor.u32 %v3317_v33, %v2414_v32 }
   0xf   :  { %903 = vmatpush.bf16.msra.mxu1 %v3389_v13  ;;  %v2424_v39 = vld [vmem:[%s4838_s0 + $0x24] sm:$0xf0]  ;;  %v2419_v43 = vor.u32 %v3314_v34, %v2416_v35  ;;  %v2423_v44 = vor.u32 %v3318_v37, %v2422_v36  ;;  %v3423_v48 = vld [vmem:[%s4836_s1 + $0x170] sm:$0xff]  ;;  %v2442_v51 = vld [vmem:[%s4838_s0 + $0x38] sm:$0xf] }
  0x10   :  { %957 = vmatpush.bf16.msra.mxu2 %v3397_v14  ;;  %v3426_v40 = vld [vmem:[%s4836_s1 + $0x188] sm:$0xff]  ;;  %v2427_v45 = vor.u32 %v3315_v38, %v2424_v39  ;;  %v3324_v52 = vld [vmem:[%s4838_s0 + $0x50] sm:$0xf0]  ;;  %v3321_v53 = vld [vmem:[%s4838_s0 + $0x3c] sm:$0xf] }
  0x11   :  { %1011 = vmatpush.bf16.msra.mxu3 %v3405_v15  ;;  %v3414_v49 = vld [vmem:[%s4836_s1 + $0x128] sm:$0xff]  ;;  %v2444_v54 = vld [vmem:[%s4838_s0 + $0x54] sm:$0xf0]  ;;  %v2450_v55 = vld [vmem:[%s4838_s0 + $0x40] sm:$0xf]  ;;  %v2443_v59 = vor.u32 %v3324_v52, %v2442_v51 }
  0x12   :  { %850 = vmatpush.bf16.msra.mxu0 %v3380_v16  ;;  %v3422_v50 = vld [vmem:[%s4836_s1 + $0x168] sm:$0xff]  ;;  %v3325_v56 = vld [vmem:[%s4838_s0 + $0x58] sm:$0xf0]  ;;  %v3322_v57 = vld [vmem:[%s4838_s0 + $0x44] sm:$0xf]  ;;  %v2447_v60 = vor.u32 %v3321_v53, %v2444_v54 }
  0x13   :  { %904 = vmatpush.bf16.msra.mxu1 %v3388_v17  ;;  %v2452_v58 = vld [vmem:[%s4838_s0 + $0x5c] sm:$0xf0]  ;;  %v2451_v61 = vor.u32 %v3325_v56, %v2450_v55  ;;  %v2470_v1 = vld [vmem:[%s4838_s0 + $0x70] sm:$0xf]  ;;  %v3331_v2 = vld [vmem:[%s4838_s0 + $0x88] sm:$0xf0] }
  0x14   :  { %958 = vmatpush.bf16.msra.mxu2 %v3396_v18  ;;  %v2455_v62 = vor.u32 %v3322_v57, %v2452_v58  ;;  %v3413_v63 = vld [vmem:[%s4836_s1 + $0x120] sm:$0xff]  ;;  %v3328_v3 = vld [vmem:[%s4838_s0 + $0x74] sm:$0xf]  ;;  %v2472_v4 = vld [vmem:[%s4838_s0 + $0x8c] sm:$0xf0]  ;;  %v2471_v9 = vor.u32 %v3331_v2, %v2470_v1 }
  0x15   :  { %1012 = vmatpush.bf16.msra.mxu3 %v3404_v19  ;;  %v3421_v0 = vld [vmem:[%s4836_s1 + $0x160] sm:$0xff]  ;;  %v2478_v5 = vld [vmem:[%s4838_s0 + $0x78] sm:$0xf]  ;;  %v3332_v6 = vld [vmem:[%s4838_s0 + $0x90] sm:$0xf0]  ;;  %v2475_v10 = vor.u32 %v3328_v3, %v2472_v4 }
  0x16   :  { %851 = vmatpush.bf16.msra.mxu0 %v3379_v20  ;;  %v3329_v7 = vld [vmem:[%s4838_s0 + $0x7c] sm:$0xf]  ;;  %v2480_v8 = vld [vmem:[%s4838_s0 + $0x94] sm:$0xf0]  ;;  %v2479_v11 = vor.u32 %v3332_v6, %v2478_v5  ;;  %v3425_v13 = vld [vmem:[%s4836_s1 + $0x180] sm:$0xff] }
  0x17   :  { %905 = vmatpush.bf16.msra.mxu1 %v3387_v21  ;;  %v2483_v12 = vor.u32 %v3329_v7, %v2480_v8  ;;  %v3412_v14 = vld [vmem:[%s4836_s1 + $0x118] sm:$0xff]  ;;  %v2498_v16 = vld [vmem:[%s4838_s0 + $0xa8] sm:$0xf]  ;;  %v3338_v17 = vld [vmem:[%s4838_s0 + $0xc0] sm:$0xf0] }
  0x18   :  { %959 = vmatpush.bf16.msra.mxu2 %v3395_v22  ;;  %v3420_v15 = vld [vmem:[%s4836_s1 + $0x158] sm:$0xff]  ;;  %v3335_v18 = vld [vmem:[%s4838_s0 + $0xac] sm:$0xf]  ;;  %v2500_v19 = vld [vmem:[%s4838_s0 + $0xc4] sm:$0xf0] }
  0x19   :  { %1013 = vmatpush.bf16.msra.mxu3 %v3403_v23  ;;  %v2506_v20 = vld [vmem:[%s4838_s0 + $0xb0] sm:$0xf]  ;;  %v3339_v21 = vld [vmem:[%s4838_s0 + $0xc8] sm:$0xf0]  ;;  %v3336_v22 = vld [vmem:[%s4838_s0 + $0xb4] sm:$0xf] }
  0x1a   :  { %852 = vmatpush.bf16.msra.mxu0 %v3378_v24  ;;  %v2508_v23 = vld [vmem:[%s4838_s0 + $0xcc] sm:$0xf0]  ;;  %v2499_v24 = vor.u32 %v3338_v17, %v2498_v16  ;;  %v3342_v32 = vld [vmem:[%s4838_s0 + $0xe4] sm:$0xf]  ;;  %v2528_v33 = vld [vmem:[%s4838_s0 + $0xfc] sm:$0xf0] }
  0x1b   :  { %906 = vmatpush.bf16.msra.mxu1 %v3386_v25  ;;  %v2503_v25 = vor.u32 %v3335_v18, %v2500_v19  ;;  %v2534_v34 = vld [vmem:[%s4838_s0 + $0xe8] sm:$0xf]  ;;  %v3346_v35 = vld [vmem:[%s4838_s0 + $0x100] sm:$0xf0]  ;;  %v3343_v36 = vld [vmem:[%s4838_s0 + $0xec] sm:$0xf]  ;;  %v2531_v39 = vor.u32 %v3342_v32, %v2528_v33 }
  0x1c   :  { %960 = vmatpush.bf16.msra.mxu2 %v3394_v26  ;;  %v2507_v26 = vor.u32 %v3339_v21, %v2506_v20  ;;  %v2536_v37 = vld [vmem:[%s4838_s0 + $0x104] sm:$0xf0]  ;;  %v2582_v56 = vld [vmem:[%s4838_s0 + $0x150] sm:$0xf]  ;;  %v3359_v57 = vld [vmem:[%s4838_s0 + $0x168] sm:$0xf0] }
  0x1d   :  { %1014 = vmatpush.bf16.msra.mxu3 %v3402_v27  ;;  %v2511_v27 = vor.u32 %v3336_v22, %v2508_v23  ;;  %v3418_v55 = vld [vmem:[%s4836_s1 + $0x148] sm:$0xff]  ;;  %v3356_v58 = vld [vmem:[%s4838_s0 + $0x154] sm:$0xf]  ;;  %v3409_v4 = vld [vmem:[%s4836_s1 + $0x100] sm:$0xff] }
  0x1e   :  { %853 = vmatpush.bf16.msra.mxu0 %v3377_v28  ;;  %v3411_v28 = vld [vmem:[%s4836_s1 + $0x110] sm:$0xff]  ;;  %v3417_v5 = vld [vmem:[%s4836_s1 + $0x140] sm:$0xff]  ;;  %v2610_v6 = vld [vmem:[%s4838_s0 + $0x188] sm:$0xf] }
  0x1f   :  { %907 = vmatpush.bf16.msra.mxu1 %v3385_v29  ;;  %v3419_v29 = vld [vmem:[%s4836_s1 + $0x150] sm:$0xff]  ;;  %v3366_v7 = vld [vmem:[%s4838_s0 + $0x1a0] sm:$0xf0]  ;;  %v3363_v8 = vld [vmem:[%s4838_s0 + $0x18c] sm:$0xf] }
  0x20   :  { %961 = vmatpush.bf16.msra.mxu2 %v3393_v30  ;;  %v2526_v30 = vld [vmem:[%s4838_s0 + $0xe0] sm:$0xf]  ;;  %v2887_v18 = vld [vmem:[%s4839_s3 + $0x30] sm:$0xf]  ;;  %v3434_v19 = vld [vmem:[%s4839_s3 + $0x34] sm:$0xf0] }
  0x21   :  { %1015 = vmatpush.bf16.msra.mxu3 %v3401_v31  ;;  %854 = vmatmul.bf16.vlgmr.msra.gmra.mxu0 %v2415_v42  ;;  %v3345_v31 = vld [vmem:[%s4838_s0 + $0xf8] sm:$0xf0]  ;;  %v3410_v42 = vld [vmem:[%s4836_s1 + $0x108] sm:$0xff]  ;;  %v2888_v20 = vor.u32 %v3434_v19, %v2887_v18  ;;  %v3905_v21 = vld [vmem:[%s4837_s2] ss:$0 sm:$0xff] }
  0x22   :  { %1062 = vmatpush.bf16.msrb.mxu0 %v3416_v41  ;;  %908 = vmatmul.bf16.vlgmr.msra.gmra.mxu1 %v2419_v43  ;;  %v2527_v38 = vor.u32 %v3345_v31, %v2526_v30  ;;  %v2539_v41 = vor.u32 %v3343_v36, %v2536_v37  ;;  %v2554_v43 = vld [vmem:[%s4838_s0 + $0x118] sm:$0xf]  ;;  %v2638_v22 = vld [vmem:[%s4838_s0 + $0x1c0] sm:$0xf]  ;;  %v3373_v23 = vld [vmem:[%s4838_s0 + $0x1d8] sm:$0xf0] }
  0x23   :  { %962 = vmatmul.bf16.vlgmr.msra.gmra.mxu2 %v2423_v44  ;;  %1116 = vmatpush.bf16.msrb.mxu1 %v3424_v46  ;;  %v3352_v44 = vld [vmem:[%s4838_s0 + $0x130] sm:$0xf0]  ;;  %v2556_v46 = vld [vmem:[%s4838_s0 + $0x134] sm:$0xf0]  ;;  %v2639_v30 = vor.u32 %v3373_v23, %v2638_v22  ;;  %v2486_v23 = vld [vmem:[%s4838_s0 + $0x80] sm:$0xf] }
  0x24   :  { %1176 = vmatpush.bf16.msrb.mxu2 %v3426_v40  ;;  %1016 = vmatmul.bf16.vlgmr.msra.gmra.mxu3 %v2427_v45  ;;  %v2535_v40 = vor.u32 %v3346_v35, %v2534_v34  ;;  %v3349_v45 = vld [vmem:[%s4838_s0 + $0x11c] sm:$0xf]  ;;  %v2555_v51 = vor.u32 %v3352_v44, %v2554_v43  ;;  %v2430_v44 = vld [vmem:[%s4838_s0 + $0x10] sm:$0xf] }
  0x25   :  { %v2559_v52 = vor.u32 %v3349_v45, %v2556_v46  ;;  %1298 = vmatpush.bf16.msrb.mxu3 %v2888_v20  ;;  %v3319_v45 = vld [vmem:[%s4838_s0 + $0x28] sm:$0xf0]  ;;  %v3316_v46 = vld [vmem:[%s4838_s0 + $0x14] sm:$0xf] }
  0x26   :  { %1063 = vmatpush.bf16.msrb.mxu0 %v3415_v47  ;;  %v2562_v47 = vld [vmem:[%s4838_s0 + $0x120] sm:$0xf] }
  0x27   :  { %1117 = vmatpush.bf16.msrb.mxu1 %v3423_v48  ;;  %v3353_v48 = vld [vmem:[%s4838_s0 + $0x138] sm:$0xf0] }
  0x28   :  { %1177 = vmatpush.bf16.msrb.mxu2 %v3425_v13  ;;  %v2563_v53 = vor.u32 %v3353_v48, %v2562_v47  ;;  %v2620_v13 = vld [vmem:[%s4838_s0 + $0x1ac] sm:$0xf0]  ;;  %v2438_v48 = vld [vmem:[%s4838_s0 + $0x18] sm:$0xf] }
  0x29   :  { %v2432_v47 = vld [vmem:[%s4838_s0 + $0x2c] sm:$0xf0] }
  0x2a   :  { %1064 = vmatpush.bf16.msrb.mxu0 %v3414_v49  ;;  %v3350_v49 = vld [vmem:[%s4838_s0 + $0x124] sm:$0xf] }
  0x2b   :  { %1118 = vmatpush.bf16.msrb.mxu1 %v3422_v50  ;;  %v2564_v50 = vld [vmem:[%s4838_s0 + $0x13c] sm:$0xf0] }
  0x2c   :  { %v2567_v54 = vor.u32 %v3350_v49, %v2564_v50  ;;  %v3320_v49 = vld [vmem:[%s4838_s0 + $0x30] sm:$0xf0] }
  0x2e   :  { %1065 = vmatpush.bf16.msrb.mxu0 %v3413_v63  ;;  %v2592_v63 = vld [vmem:[%s4838_s0 + $0x174] sm:$0xf0] }
  0x2f   :  { %1119 = vmatpush.bf16.msrb.mxu1 %v3421_v0  ;;  %v2583_v0 = vor.u32 %v3359_v57, %v2582_v56  ;;  %v2439_v56 = vor.u32 %v3320_v49, %v2438_v48  ;;  %v3340_v48 = vld [vmem:[%s4838_s0 + $0xd0] sm:$0xf0]  ;;  %v3337_v49 = vld [vmem:[%s4838_s0 + $0xbc] sm:$0xf] }
  0x31   :  { %859 = vmatmul.bf16.gmra.mxu0 %v2443_v59  ;;  %v2584_v59 = vld [vmem:[%s4838_s0 + $0x16c] sm:$0xf0] }
  0x32   :  { %913 = vmatmul.bf16.gmra.mxu1 %v2447_v60  ;;  %1066 = vmatpush.bf16.msrb.mxu0 %v3412_v14  ;;  %v2590_v60 = vld [vmem:[%s4838_s0 + $0x158] sm:$0xf]  ;;  %v2587_v1 = vor.u32 %v3356_v58, %v2584_v59  ;;  %v2611_v14 = vor.u32 %v3366_v7, %v2610_v6  ;;  %v3327_v6 = vld [vmem:[%s4838_s0 + $0x68] sm:$0xf0] }
  0x33   :  { %967 = vmatmul.bf16.gmra.mxu2 %v2451_v61  ;;  %1120 = vmatpush.bf16.msrb.mxu1 %v3420_v15  ;;  %v3360_v61 = vld [vmem:[%s4838_s0 + $0x170] sm:$0xf0] }
  0x34   :  { %1021 = vmatmul.bf16.gmra.mxu3 %v2455_v62  ;;  %v3357_v62 = vld [vmem:[%s4838_s0 + $0x15c] sm:$0xf]  ;;  %v2591_v2 = vor.u32 %v3360_v61, %v2590_v60 }
  0x35   :  { %v2595_v3 = vor.u32 %v3357_v62, %v2592_v63 }
  0x36   :  { %1067 = vmatpush.bf16.msrb.mxu0 %v3411_v28  ;;  %v3371_v28 = vld [vmem:[%s4838_s0 + $0x1cc] sm:$0xf] }
  0x37   :  { %1121 = vmatpush.bf16.msrb.mxu1 %v3419_v29  ;;  %v2648_v29 = vld [vmem:[%s4838_s0 + $0x1e4] sm:$0xf0] }
  0x38   :  { %v2651_v35 = vor.u32 %v3371_v28, %v2648_v29  ;;  %v3334_v28 = vld [vmem:[%s4838_s0 + $0xa0] sm:$0xf0] }
  0x3a   :  { %1068 = vmatpush.bf16.msrb.mxu0 %v3410_v42 }
  0x3b   :  { %1122 = vmatpush.bf16.msrb.mxu1 %v3418_v55 }
  0x3e   :  { %1069 = vmatpush.bf16.msrb.mxu0 %v3409_v4  ;;  %v2460_v4 = vld [vmem:[%s4838_s0 + $0x64] sm:$0xf0] }
  0x3f   :  { %1123 = vmatpush.bf16.msrb.mxu1 %v3417_v5  ;;  %v2466_v5 = vld [vmem:[%s4838_s0 + $0x50] sm:$0xf] }
  0x41   :  { %864 = vmatmul.bf16.gmra.mxu0 %v2471_v9  ;;  %v2612_v9 = vld [vmem:[%s4838_s0 + $0x1a4] sm:$0xf0] }
  0x42   :  { %918 = vmatmul.bf16.gmra.mxu1 %v2475_v10  ;;  %v2618_v10 = vld [vmem:[%s4838_s0 + $0x190] sm:$0xf]  ;;  %v2615_v15 = vor.u32 %v3363_v8, %v2612_v9 }
  0x43   :  { %972 = vmatmul.bf16.gmra.mxu2 %v2479_v11  ;;  %v3367_v11 = vld [vmem:[%s4838_s0 + $0x1a8] sm:$0xf0] }
  0x44   :  { %1026 = vmatmul.bf16.gmra.mxu3 %v2483_v12  ;;  %v3364_v12 = vld [vmem:[%s4838_s0 + $0x194] sm:$0xf]  ;;  %v2619_v16 = vor.u32 %v3367_v11, %v2618_v10 }
  0x45   :  { %v2623_v17 = vor.u32 %v3364_v12, %v2620_v13  ;;  %v2467_v13 = vor.u32 %v3327_v6, %v2466_v5 }
  0x51   :  { %869 = vmatmul.bf16.gmra.mxu0 %v2499_v24  ;;  %v3370_v24 = vld [vmem:[%s4838_s0 + $0x1c4] sm:$0xf] }
  0x52   :  { %923 = vmatmul.bf16.gmra.mxu1 %v2503_v25  ;;  %v2640_v25 = vld [vmem:[%s4838_s0 + $0x1dc] sm:$0xf0] }
  0x53   :  { %977 = vmatmul.bf16.gmra.mxu2 %v2507_v26  ;;  %v2646_v26 = vld [vmem:[%s4838_s0 + $0x1c8] sm:$0xf]  ;;  %v2643_v31 = vor.u32 %v3370_v24, %v2640_v25  ;;  %v3333_v24 = vld [vmem:[%s4838_s0 + $0x98] sm:$0xf0]  ;;  %v3330_v25 = vld [vmem:[%s4838_s0 + $0x84] sm:$0xf] }
  0x54   :  { %1031 = vmatmul.bf16.gmra.mxu3 %v2511_v27  ;;  %v3374_v27 = vld [vmem:[%s4838_s0 + $0x1e0] sm:$0xf0] }
  0x55   :  { %v2647_v34 = vor.u32 %v3374_v27, %v2646_v26  ;;  %v2488_v26 = vld [vmem:[%s4838_s0 + $0x9c] sm:$0xf0]  ;;  %v2494_v27 = vld [vmem:[%s4838_s0 + $0x88] sm:$0xf] }
  0x61   :  { %874 = vmatmul.bf16.gmra.mxu0 %v2527_v38 }
  0x62   :  { %928 = vmatmul.bf16.gmra.mxu1 %v2531_v39 }
  0x63   :  { %982 = vmatmul.bf16.gmra.mxu2 %v2535_v40 }
  0x64   :  { %1036 = vmatmul.bf16.gmra.mxu3 %v2539_v41 }
  0x71   :  { %879 = vmatmul.bf16.gmra.mxu0 %v2555_v51  ;;  %v2431_v51 = vor.u32 %v3319_v45, %v2430_v44  ;;  %v2514_v45 = vld [vmem:[%s4838_s0 + $0xb8] sm:$0xf] }
  0x72   :  { %933 = vmatmul.bf16.gmra.mxu1 %v2559_v52  ;;  %v2435_v52 = vor.u32 %v3316_v46, %v2432_v47  ;;  %v2879_v46 = vld [vmem:[%s4839_s3 + $0x20] sm:$0xf]  ;;  %v3432_v47 = vld [vmem:[%s4839_s3 + $0x24] sm:$0xf0] }
  0x73   :  { %987 = vmatmul.bf16.gmra.mxu2 %v2563_v53 }
  0x74   :  { %1041 = vmatmul.bf16.gmra.mxu3 %v2567_v54 }
  0x81   :  { %884 = vmatmul.bf16.gmra.mxu0 %v2583_v0 }
  0x82   :  { %938 = vmatmul.bf16.gmra.mxu1 %v2587_v1  ;;  %v2458_v1 = vld [vmem:[%s4838_s0 + $0x48] sm:$0xf] }
  0x83   :  { %992 = vmatmul.bf16.gmra.mxu2 %v2591_v2  ;;  %v3326_v2 = vld [vmem:[%s4838_s0 + $0x60] sm:$0xf0] }
  0x84   :  { %1046 = vmatmul.bf16.gmra.mxu3 %v2595_v3  ;;  %v3323_v3 = vld [vmem:[%s4838_s0 + $0x4c] sm:$0xf]  ;;  %v2459_v8 = vor.u32 %v3326_v2, %v2458_v1 }
  0x85   :  { %v2463_v9 = vor.u32 %v3323_v3, %v2460_v4 }
  0x91   :  { %889 = vmatmul.bf16.gmra.mxu0 %v2611_v14 }
  0x92   :  { %943 = vmatmul.bf16.gmra.mxu1 %v2615_v15 }
  0x93   :  { %997 = vmatmul.bf16.gmra.mxu2 %v2619_v16 }
  0x94   :  { %1051 = vmatmul.bf16.gmra.mxu3 %v2623_v17 }
  0x9e   :  { %v855_v32 = vpop.f32.mrf.mxu0 }
  0x9f   :  { %v909_v33 = vpop.f32.mrf.mxu1  ;;  %v856_v36 = vadd.f32 %v3905_v21, %v855_v32 }
  0xa1   :  { %v910_v37 = vadd.f32 %v909_v33, %v856_v36  ;;  %894 = vmatmul.bf16.gmra.mxu0 %v2639_v30  ;;  %v2487_v30 = vor.u32 %v3333_v24, %v2486_v23 }
  0xa2   :  { %948 = vmatmul.bf16.gmra.mxu1 %v2643_v31  ;;  %v2491_v31 = vor.u32 %v3330_v25, %v2488_v26 }
  0xa3   :  { %1002 = vmatmul.bf16.gmra.mxu2 %v2647_v34 }
  0xa4   :  { %1056 = vmatmul.bf16.gmra.mxu3 %v2651_v35  ;;  %v2495_v35 = vor.u32 %v3334_v28, %v2494_v27 }
  0xa6   :  { %v963_v38 = vpop.f32.mrf.mxu2  ;;  %v857_v40 = vpop.f32.mrf.mxu0 }
  0xa7   :  { %v3932_v39 = vadd.f32 %v963_v38, %v910_v37  ;;  %v911_v41 = vpop.f32.mrf.mxu1  ;;  %v858_v42 = vadd.f32 %v3905_v21, %v857_v40 }
  0xa9   :  { %v912_v43 = vadd.f32 %v911_v41, %v858_v42 }
  0xae   :  { %v965_v50 = vpop.f32.mrf.mxu2  ;;  %v860_v54 = vpop.f32.mrf.mxu0 }
  0xaf   :  { %v3953_v53 = vadd.f32 %v965_v50, %v912_v43  ;;  %v914_v55 = vpop.f32.mrf.mxu1  ;;  %v861_v57 = vadd.f32 %v3905_v21, %v860_v54  ;;  %v2516_v50 = vld [vmem:[%s4838_s0 + $0xd4] sm:$0xf0]  ;;  %v3341_v54 = vld [vmem:[%s4838_s0 + $0xd8] sm:$0xf0] }
  0xb1   :  { %v915_v58 = vadd.f32 %v914_v55, %v861_v57  ;;  %1070 = vmatmul.bf16.vlgmr.msrb.gmra.mxu0 %v2431_v51  ;;  %v2880_v51 = vor.u32 %v3432_v47, %v2879_v46  ;;  %v2519_v57 = vor.u32 %v3337_v49, %v2516_v50 }
  0xb2   :  { %1124 = vmatmul.bf16.vlgmr.msrb.gmra.mxu1 %v2435_v52  ;;  %v2522_v52 = vld [vmem:[%s4838_s0 + $0xc0] sm:$0xf] }
  0xb3   :  { %2864 = vmatmul.msk.bf16.vlgmr.msrb.gmra.mxu2 %vm818_vm0, %v2439_v56  ;;  %1299 = vmatpush.bf16.msrb.mxu3 %v2880_v51  ;;  %v2515_v56 = vor.u32 %v3340_v48, %v2514_v45 }
  0xb6   :  { %v968_v59 = vpop.f32.mrf.mxu2  ;;  %v862_v61 = vpop.f32.mrf.mxu0 }
  0xb7   :  { %v3957_v60 = vadd.f32 %v968_v59, %v915_v58  ;;  %v916_v62 = vpop.f32.mrf.mxu1  ;;  %v863_v63 = vadd.f32 %v3905_v21, %v862_v61 }
  0xb9   :  { %v917_v0 = vadd.f32 %v916_v62, %v863_v63  ;;  %v2523_v62 = vor.u32 %v3341_v54, %v2522_v52  ;;  %v4094_v54 = vpop.f32.mrf.mxu3 }
  0xbe   :  { %v970_v7 = vpop.f32.mrf.mxu2  ;;  %v865_v11 = vpop.f32.mrf.mxu0 }
  0xbf   :  { %v3978_v10 = vadd.f32 %v970_v7, %v917_v0  ;;  %v919_v12 = vpop.f32.mrf.mxu1  ;;  %v866_v14 = vadd.f32 %v3905_v21, %v865_v11  ;;  %v2542_v7 = vld [vmem:[%s4838_s0 + $0xf0] sm:$0xf] }
  0xc0   :  { %v2544_v11 = vld [vmem:[%s4838_s0 + $0x10c] sm:$0xf0] }
  0xc1   :  { %v920_v15 = vadd.f32 %v919_v12, %v866_v14  ;;  %1075 = vmatmul.bf16.gmra.mxu0 %v2459_v8  ;;  %v3347_v8 = vld [vmem:[%s4838_s0 + $0x108] sm:$0xf0]  ;;  %v2550_v12 = vld [vmem:[%s4838_s0 + $0xf8] sm:$0xf] }
  0xc2   :  { %1129 = vmatmul.bf16.gmra.mxu1 %v2463_v9  ;;  %v3344_v9 = vld [vmem:[%s4838_s0 + $0xf4] sm:$0xf] }
  0xc3   :  { %2865 = vmatmul.msk.bf16.gmra.mxu2 %vm818_vm0, %v2467_v13  ;;  %v3348_v13 = vld [vmem:[%s4838_s0 + $0x110] sm:$0xf0] }
  0xc6   :  { %v973_v16 = vpop.f32.mrf.mxu2  ;;  %v867_v18 = vpop.f32.mrf.mxu0 }
  0xc7   :  { %v3982_v17 = vadd.f32 %v973_v16, %v920_v15  ;;  %v921_v19 = vpop.f32.mrf.mxu1  ;;  %v868_v20 = vadd.f32 %v3905_v21, %v867_v18  ;;  %v2543_v15 = vor.u32 %v3347_v8, %v2542_v7  ;;  %v2547_v16 = vor.u32 %v3344_v9, %v2544_v11  ;;  %v4118_v8 = vpop.f32.mrf.mxu3 }
  0xc9   :  { %v922_v22 = vadd.f32 %v921_v19, %v868_v20 }
  0xce   :  { %v975_v29 = vpop.f32.mrf.mxu2  ;;  %v870_v33 = vpop.f32.mrf.mxu0 }
  0xcf   :  { %v4003_v32 = vadd.f32 %v975_v29, %v922_v22  ;;  %v924_v34 = vpop.f32.mrf.mxu1  ;;  %v871_v36 = vadd.f32 %v3905_v21, %v870_v33  ;;  %v2551_v22 = vor.u32 %v3348_v13, %v2550_v12  ;;  %v3354_v33 = vld [vmem:[%s4838_s0 + $0x140] sm:$0xf0] }
  0xd1   :  { %v925_v37 = vadd.f32 %v924_v34, %v871_v36  ;;  %1080 = vmatmul.bf16.gmra.mxu0 %v2487_v30  ;;  %v3351_v34 = vld [vmem:[%s4838_s0 + $0x12c] sm:$0xf]  ;;  %v2578_v36 = vld [vmem:[%s4838_s0 + $0x130] sm:$0xf] }
  0xd2   :  { %1134 = vmatmul.bf16.gmra.mxu1 %v2491_v31  ;;  %v2570_v31 = vld [vmem:[%s4838_s0 + $0x128] sm:$0xf] }
  0xd3   :  { %2866 = vmatmul.msk.bf16.gmra.mxu2 %vm818_vm0, %v2495_v35  ;;  %v2572_v35 = vld [vmem:[%s4838_s0 + $0x144] sm:$0xf0] }
  0xd6   :  { %v978_v38 = vpop.f32.mrf.mxu2  ;;  %v872_v41 = vpop.f32.mrf.mxu0 }
  0xd7   :  { %v4007_v40 = vadd.f32 %v978_v38, %v925_v37  ;;  %v926_v42 = vpop.f32.mrf.mxu1  ;;  %v873_v43 = vadd.f32 %v3905_v21, %v872_v41  ;;  %v3355_v37 = vld [vmem:[%s4838_s0 + $0x148] sm:$0xf0]  ;;  %v2571_v41 = vor.u32 %v3354_v33, %v2570_v31 }
  0xd8   :  { %v2579_v46 = vor.u32 %v3355_v37, %v2578_v36 }
  0xd9   :  { %v927_v44 = vadd.f32 %v926_v42, %v873_v43  ;;  %v2575_v42 = vor.u32 %v3351_v34, %v2572_v35 }
  0xde   :  { %v980_v55 = vpop.f32.mrf.mxu2  ;;  %v875_v59 = vpop.f32.mrf.mxu0 }
  0xdf   :  { %v4034_v58 = vadd.f32 %v980_v55, %v927_v44  ;;  %v929_v61 = vpop.f32.mrf.mxu1  ;;  %v876_v63 = vadd.f32 %v3905_v21, %v875_v59  ;;  %v2598_v55 = vld [vmem:[%s4838_s0 + $0x160] sm:$0xf] }
  0xe0   :  { %v2600_v59 = vld [vmem:[%s4838_s0 + $0x17c] sm:$0xf0] }
  0xe1   :  { %v930_v0 = vadd.f32 %v929_v61, %v876_v63  ;;  %1085 = vmatmul.bf16.gmra.mxu0 %v2515_v56  ;;  %v3361_v56 = vld [vmem:[%s4838_s0 + $0x178] sm:$0xf0]  ;;  %v2606_v61 = vld [vmem:[%s4838_s0 + $0x168] sm:$0xf] }
  0xe2   :  { %1139 = vmatmul.bf16.gmra.mxu1 %v2519_v57  ;;  %v3358_v57 = vld [vmem:[%s4838_s0 + $0x164] sm:$0xf] }
  0xe3   :  { %2867 = vmatmul.msk.bf16.gmra.mxu2 %vm818_vm0, %v2523_v62  ;;  %v3362_v62 = vld [vmem:[%s4838_s0 + $0x180] sm:$0xf0] }
  0xe6   :  { %v983_v1 = vpop.f32.mrf.mxu2  ;;  %v877_v3 = vpop.f32.mrf.mxu0 }
  0xe7   :  { %v4038_v2 = vadd.f32 %v983_v1, %v930_v0  ;;  %v931_v4 = vpop.f32.mrf.mxu1  ;;  %v878_v5 = vadd.f32 %v3905_v21, %v877_v3  ;;  %v2599_v0 = vor.u32 %v3361_v56, %v2598_v55  ;;  %v2603_v1 = vor.u32 %v3358_v57, %v2600_v59  ;;  %v2654_v59 = vld [vmem:[%s4838_s0 + $0x1d0] sm:$0xf] }
  0xe9   :  { %v932_v6 = vadd.f32 %v931_v4, %v878_v5  ;;  %v2607_v5 = vor.u32 %v3362_v62, %v2606_v61  ;;  %v3375_v61 = vld [vmem:[%s4838_s0 + $0x1e8] sm:$0xf0]  ;;  %v3372_v62 = vld [vmem:[%s4838_s0 + $0x1d4] sm:$0xf] }
  0xee   :  { %v985_v14 = vpop.f32.mrf.mxu2  ;;  %v880_v19 = vpop.f32.mrf.mxu0 }
  0xef   :  { %v4059_v18 = vadd.f32 %v985_v14, %v932_v6  ;;  %v934_v20 = vpop.f32.mrf.mxu1  ;;  %v881_v23 = vadd.f32 %v3905_v21, %v880_v19  ;;  %v2626_v14 = vld [vmem:[%s4838_s0 + $0x198] sm:$0xf] }
  0xf0   :  { %v2628_v19 = vld [vmem:[%s4838_s0 + $0x1b4] sm:$0xf0] }
  0xf1   :  { %v935_v24 = vadd.f32 %v934_v20, %v881_v23  ;;  %1090 = vmatmul.bf16.gmra.mxu0 %v2543_v15  ;;  %v3368_v15 = vld [vmem:[%s4838_s0 + $0x1b0] sm:$0xf0]  ;;  %v2993_v20 = vld [vmem:[%s4839_s3 + $0xb0] sm:$0xf] }
  0xf2   :  { %1144 = vmatmul.bf16.gmra.mxu1 %v2547_v16  ;;  %v3365_v16 = vld [vmem:[%s4838_s0 + $0x19c] sm:$0xf]  ;;  %v3449_v23 = vld [vmem:[%s4839_s3 + $0xb4] sm:$0xf]  ;;  %v2627_v33 = vor.u32 %v3368_v15, %v2626_v14 }
  0xf3   :  { %2868 = vmatmul.msk.bf16.gmra.mxu2 %vm818_vm0, %v2551_v22  ;;  %v3450_v22 = vld [vmem:[%s4839_s3 + $0xb4] sm:$0xf0]  ;;  %v2631_v34 = vor.u32 %v3365_v16, %v2628_v19 }
  0xf6   :  { %v988_v25 = vpop.f32.mrf.mxu2  ;;  %v882_v27 = vpop.f32.mrf.mxu0 }
  0xf7   :  { %v4063_v26 = vadd.f32 %v988_v25, %v935_v24  ;;  %v936_v28 = vpop.f32.mrf.mxu1  ;;  %v883_v29 = vadd.f32 %v3905_v21, %v882_v27  ;;  %v2634_v24 = vld [vmem:[%s4838_s0 + $0x1a0] sm:$0xf]  ;;  %v3369_v25 = vld [vmem:[%s4838_s0 + $0x1b8] sm:$0xf0]  ;;  %v2994_v27 = vor.u32 %v3450_v22, %v2993_v20 }
  0xf8   :  { %v2635_v37 = vor.u32 %v3369_v25, %v2634_v24 }
  0xf9   :  { %v937_v30 = vadd.f32 %v936_v28, %v883_v29  ;;  %v2995_v28 = vld [vmem:[%s4839_s3 + $0xb8] sm:$0xf0]  ;;  %1569 = vmatpush.bf16.msra.mxu1 %v2994_v27  ;;  %v3443_v27 = vld [vmem:[%s4839_s3 + $0x84] sm:$0xf] }
  0xfa   :  { %v2998_v29 = vor.u32 %v3449_v23, %v2995_v28  ;;  %v1020_v23 = vadd.f32 %v4118_v8, %v3953_v53  ;;  %v2965_v28 = vld [vmem:[%s4839_s3 + $0x88] sm:$0xf0]  ;;  %v2905_v53 = vld [vmem:[%s4839_s3 + $0x10] sm:$0xf]  ;;  %v3430_v8 = vld [vmem:[%s4839_s3 + $0x14] sm:$0xf0] }
  0xfc   :  { %1582 = vmatpush.bf16.msra.mxu2 %v2998_v29  ;;  %v2968_v29 = vor.u32 %v3443_v27, %v2965_v28  ;;  %v3037_v27 = vld [vmem:[%s4839_s3 + $0xf0] sm:$0xf]  ;;  %v3458_v28 = vld [vmem:[%s4839_s3 + $0xf4] sm:$0xf0] }
  0xfe   :  { %v990_v38 = vpop.f32.mrf.mxu2  ;;  %v885_v44 = vpop.f32.mrf.mxu0 }
  0xff   :  { %v4084_v43 = vadd.f32 %v990_v38, %v937_v30  ;;  %v939_v45 = vpop.f32.mrf.mxu1  ;;  %v886_v47 = vadd.f32 %v3905_v21, %v885_v44  ;;  %v4156_v30 = vpop.f32.mrf.mxu3  ;;  %v2973_v44 = vld [vmem:[%s4839_s3 + $0x98] sm:$0xf0] }
 0x101   :  { %v940_v48 = vadd.f32 %v939_v45, %v886_v47  ;;  %1095 = vmatmul.bf16.gmra.mxu0 %v2571_v41 }
 0x102   :  { %1149 = vmatmul.bf16.gmra.mxu1 %v2575_v42  ;;  %v3445_v42 = vld [vmem:[%s4839_s3 + $0x94] sm:$0xf] }
 0x103   :  { %2869 = vmatmul.msk.bf16.gmra.mxu2 %vm818_vm0, %v2579_v46  ;;  %v2976_v45 = vor.u32 %v3445_v42, %v2973_v44  ;;  %v3433_v46 = vld [vmem:[%s4839_s3 + $0x34] sm:$0xf]  ;;  %v2985_v42 = vld [vmem:[%s4839_s3 + $0xa0] sm:$0xf]  ;;  %v3448_v44 = vld [vmem:[%s4839_s3 + $0xa4] sm:$0xf0] }
 0x105   :  { %1526 = vmatpush.bf16.msra.mxu0 %v2976_v45  ;;  %v3447_v45 = vld [vmem:[%s4839_s3 + $0xa4] sm:$0xf] }
 0x106   :  { %v993_v49 = vpop.f32.mrf.mxu2  ;;  %v4090_v51 = vpop.f32.mrf.mxu0 }
 0x107   :  { %v4088_v50 = vadd.f32 %v993_v49, %v940_v48  ;;  %v4092_v52 = vpop.f32.mrf.mxu1  ;;  %v4180_v57 = vpop.f32.mrf.mxu3 }
 0x109   :  { %1527 = vmatpush.bf16.msra.mxu0 %v2968_v29  ;;  %v3457_v29 = vld [vmem:[%s4839_s3 + $0xf4] sm:$0xf] }
 0x10e   :  { %v4114_v63 = vpop.f32.mrf.mxu2  ;;  %v890_v3 = vpop.f32.mrf.mxu0 }
 0x10f   :  { %v944_v4 = vpop.f32.mrf.mxu1  ;;  %v891_v6 = vadd.f32 %v3905_v21, %v890_v3  ;;  %v2881_v3 = vld [vmem:[%s4839_s3 + $0x28] sm:$0xf0]  ;;  %v1027_v20 = vpop.f32.mrf.mxu3 }
 0x111   :  { %v945_v7 = vadd.f32 %v944_v4, %v891_v6  ;;  %1100 = vmatmul.bf16.gmra.mxu0 %v2599_v0  ;;  %v2656_v0 = vld [vmem:[%s4838_s0 + $0x1ec] sm:$0xf0]  ;;  %v2662_v4 = vld [vmem:[%s4838_s0 + $0x1d8] sm:$0xf] }
 0x112   :  { %1154 = vmatmul.bf16.gmra.mxu1 %v2603_v1  ;;  %v3431_v1 = vld [vmem:[%s4839_s3 + $0x24] sm:$0xf]  ;;  %v2659_v14 = vor.u32 %v3372_v62, %v2656_v0  ;;  %v2897_v62 = vld [vmem:[%s4839_s3] sm:$0xf]  ;;  %v3428_v0 = vld [vmem:[%s4839_s3 + $0x4] sm:$0xf0] }
 0x113   :  { %2870 = vmatmul.msk.bf16.gmra.mxu2 %vm818_vm0, %v2607_v5  ;;  %v3376_v5 = vld [vmem:[%s4838_s0 + $0x1f0] sm:$0xf0]  ;;  %v2884_v6 = vor.u32 %v3431_v1, %v2881_v3  ;;  %v3017_v3 = vld [vmem:[%s4839_s3 + $0xd8] sm:$0xf0] }
 0x114   :  { %v2663_v19 = vor.u32 %v3376_v5, %v2662_v4  ;;  %v3453_v1 = vld [vmem:[%s4839_s3 + $0xd4] sm:$0xf] }
 0x115   :  { %v3020_v4 = vor.u32 %v3453_v1, %v3017_v3  ;;  %v3427_v3 = vld [vmem:[%s4839_s3 + $0x4] sm:$0xf] }
 0x116   :  { %v998_v9 = vpop.f32.mrf.mxu2  ;;  %v4122_v12 = vpop.f32.mrf.mxu0 }
 0x117   :  { %v4120_v11 = vadd.f32 %v998_v9, %v945_v7  ;;  %v4124_v13 = vpop.f32.mrf.mxu1  ;;  %v2655_v9 = vor.u32 %v3375_v61, %v2654_v59  ;;  %v2906_v59 = vor.u32 %v3430_v8, %v2905_v53  ;;  %1638 = vmatpush.bf16.msrb.mxu0 %v3020_v4  ;;  %v1028_v8 = vadd.f32 %v1027_v20, %v3982_v17  ;;  %v3456_v17 = vld [vmem:[%s4839_s3 + $0xe4] sm:$0xf0]  ;;  %v3455_v20 = vld [vmem:[%s4839_s3 + $0xe4] sm:$0xf]  ;;  %v2899_v4 = vld [vmem:[%s4839_s3 + $0x8] sm:$0xf0] }
 0x11e   :  { %v4158_v31 = vpop.f32.mrf.mxu2  ;;  %v895_v35 = vpop.f32.mrf.mxu0 }
 0x11f   :  { %v949_v36 = vpop.f32.mrf.mxu1  ;;  %v896_v38 = vadd.f32 %v3905_v21, %v895_v35  ;;  %v2889_v21 = vld [vmem:[%s4839_s3 + $0x38] sm:$0xf0] }
 0x120   :  { %v2892_v48 = vor.u32 %v3433_v46, %v2889_v21  ;;  %v2986_v46 = vor.u32 %v3448_v44, %v2985_v42  ;;  %v2987_v21 = vld [vmem:[%s4839_s3 + $0xa8] sm:$0xf0]  ;;  %v3429_v44 = vld [vmem:[%s4839_s3 + $0x14] sm:$0xf] }
 0x121   :  { %v950_v41 = vadd.f32 %v949_v36, %v896_v38  ;;  %1105 = vmatmul.bf16.gmra.mxu0 %v2627_v33 }
 0x122   :  { %1159 = vmatmul.bf16.gmra.mxu1 %v2631_v34  ;;  %1311 = vmatpush.bf16.msra.mxu3 %v2892_v48  ;;  %v4223_v34 = vpop.f32.mrf.mxu3  ;;  %v2990_v48 = vor.u32 %v3447_v45, %v2987_v21  ;;  %v2907_v45 = vld [vmem:[%s4839_s3 + $0x18] sm:$0xf0]  ;;  %v3029_v21 = vld [vmem:[%s4839_s3 + $0xe0] sm:$0xf] }
 0x123   :  { %2871 = vmatmul.msk.bf16.gmra.mxu2 %vm818_vm0, %v2635_v37  ;;  %1570 = vmatpush.bf16.msra.mxu1 %v2986_v46 }
 0x124   :  { %1583 = vmatpush.bf16.msra.mxu2 %v2990_v48  ;;  %v3030_v48 = vor.u32 %v3456_v17, %v3029_v21 }
 0x126   :  { %v1003_v47 = vpop.f32.mrf.mxu2  ;;  %v4176_v55 = vpop.f32.mrf.mxu0  ;;  %1312 = vmatpush.bf16.msra.mxu3 %v2884_v6 }
 0x127   :  { %v4174_v49 = vadd.f32 %v1003_v47, %v950_v41  ;;  %v4178_v56 = vpop.f32.mrf.mxu1 }
 0x12a   :  { %v4260_v5 = vpop.f32.mrf.mxu3 }
 0x12b   :  { %v1033_v21 = vadd.f32 %v4260_v5, %v4007_v40  ;;  %v3465_v40 = vld [vmem:[%s4839_s3 + $0x134] sm:$0xf]  ;;  %v3083_v5 = vld [vmem:[%s4839_s3 + $0x138] sm:$0xf0] }
 0x12e   :  { %v4206_v7 = vpop.f32.mrf.mxu2  ;;  %v4208_v15 = vpop.f32.mrf.mxu0 }
 0x12f   :  { %v4210_v16 = vpop.f32.mrf.mxu1 }
 0x131   :  { %1110 = vmatmul.bf16.gmra.mxu0 %v2655_v9  ;;  %v2898_v9 = vor.u32 %v3428_v0, %v2897_v62  ;;  %v1018_v62 = vadd.f32 %v4094_v54, %v3932_v39  ;;  %v2910_v0 = vor.u32 %v3429_v44, %v2907_v45  ;;  %v2902_v39 = vor.u32 %v3427_v3, %v2899_v4 }
 0x132   :  { %1164 = vmatmul.bf16.gmra.mxu1 %v2659_v14  ;;  %v4295_v46 = vpop.f32.mrf.mxu3  ;;  %v1030_v54 = vadd.f32 %v4223_v34, %v4003_v32 }
 0x133   :  { %2872 = vmatmul.msk.bf16.gmra.mxu2 %vm818_vm0, %v2663_v19 }
 0x136   :  { %v4213_v22 = vpop.f32.mrf.mxu2  ;;  %v1073_v24 = vpop.f32.mrf.mxu0 }
 0x137   :  { %v1127_v25 = vpop.f32.mrf.mxu1  ;;  %v1074_v33 = vadd.f32 %v1073_v24, %v1020_v23  ;;  %v3451_v23 = vld [vmem:[%s4839_s3 + $0xc4] sm:$0xf]  ;;  %v3009_v24 = vld [vmem:[%s4839_s3 + $0xc8] sm:$0xf0] }
 0x139   :  { %v1128_v35 = vadd.f32 %v1127_v25, %v1074_v33  ;;  %v3012_v25 = vor.u32 %v3451_v23, %v3009_v24  ;;  %v3038_v33 = vor.u32 %v3458_v28, %v3037_v27 }
 0x13b   :  { %1639 = vmatpush.bf16.msrb.mxu0 %v3012_v25  ;;  %1681 = vmatpush.bf16.msrb.mxu1 %v3038_v33 }
 0x13e   :  { %v1181_v36 = vpop.f32.mrf.mxu2  ;;  %v4231_v38 = vpop.f32.mrf.mxu0 }
 0x13f   :  { %v1182_v37 = vadd.f32 %v1181_v36, %v1128_v35  ;;  %v4233_v41 = vpop.f32.mrf.mxu1  ;;  %v3039_v35 = vld [vmem:[%s4839_s3 + $0xf8] sm:$0xf0]  ;;  %1682 = vmatpush.bf16.msrb.mxu1 %v3030_v48  ;;  %v2927_v48 = vld [vmem:[%s4839_s3 + $0x50] sm:$0xf] }
 0x140   :  { %v3042_v53 = vor.u32 %v3457_v29, %v3039_v35  ;;  %v3461_v29 = vld [vmem:[%s4839_s3 + $0x114] sm:$0xf] }
 0x141   :  { %v1225_v47 = vmax.f32 %v1182_v37, 0.0 }
 0x142   :  { %1694 = vmatpush.bf16.msrb.mxu2 %v3042_v53  ;;  %v4328_v53 = vpop.f32.mrf.mxu3 }
 0x143   :  { %v1243_v61 = vpack.c.bf16 %v1225_v47, %v1225_v47 }
 0x145   :  { %2893 = vmatmul.msk.bf16.vlgmr.msrb.gmra.mxu3 %vm818_vm0, %v1243_v61 }
 0x146   :  { %v4262_v6 = vpop.f32.mrf.mxu2  ;;  %1347 = vmatpush.bf16.msrb.mxu3 %v2906_v59  ;;  %v4264_v14 = vpop.f32.mrf.mxu0  ;;  %v3031_v59 = vld [vmem:[%s4839_s3 + $0xe8] sm:$0xf0] }
 0x147   :  { %v4266_v19 = vpop.f32.mrf.mxu1  ;;  %v3034_v1 = vor.u32 %v3455_v20, %v3031_v59  ;;  %v3438_v59 = vld [vmem:[%s4839_s3 + $0x54] sm:$0xf0] }
 0x148   :  { %v2928_v4 = vor.u32 %v3438_v59, %v2927_v48  ;;  %v3097_v48 = vld [vmem:[%s4839_s3 + $0x148] sm:$0xf0] }
 0x149   :  { %1695 = vmatpush.bf16.msrb.mxu2 %v3034_v1 }
 0x14a   :  { %1348 = vmatpush.bf16.msrb.mxu3 %v2898_v9  ;;  %v1072_v9 = vadd.f32 %v4208_v15, %v1018_v62  ;;  %v3061_v15 = vld [vmem:[%s4839_s3 + $0x118] sm:$0xf0]  ;;  %v3081_v62 = vld [vmem:[%s4839_s3 + $0x130] sm:$0xf] }
 0x14b   :  { %v3064_v32 = vor.u32 %v3461_v29, %v3061_v15  ;;  %v3464_v29 = vld [vmem:[%s4839_s3 + $0x124] sm:$0xf0]  ;;  %v3463_v15 = vld [vmem:[%s4839_s3 + $0x124] sm:$0xf] }
 0x14c   :  { %v1126_v33 = vadd.f32 %v4210_v16, %v1072_v9 }
 0x14e   :  { %v4286_v36 = vpop.f32.mrf.mxu2  ;;  %v1081_v37 = vpop.f32.mrf.mxu0 }
 0x14f   :  { %v1135_v42 = vpop.f32.mrf.mxu1  ;;  %v1082_v47 = vadd.f32 %v1081_v37, %v1028_v8  ;;  %v1180_v8 = vadd.f32 %v4213_v22, %v1126_v33  ;;  %v3459_v37 = vld [vmem:[%s4839_s3 + $0x104] sm:$0xf]  ;;  %v3075_v33 = vld [vmem:[%s4839_s3 + $0x128] sm:$0xf0] }
 0x151   :  { %v1136_v23 = vadd.f32 %v1135_v42, %v1082_v47  ;;  %v3053_v42 = vld [vmem:[%s4839_s3 + $0x108] sm:$0xf0]  ;;  %v1224_v16 = vmax.f32 %v1180_v8, 0.0 }
 0x152   :  { %v3056_v22 = vor.u32 %v3459_v37, %v3053_v42 }
 0x153   :  { %v4361_v9 = vpack.c.bf16 %v1224_v16, %v1224_v16 }
 0x155   :  { %2894 = vmatmul.msk.bf16.vlgmr.msra.gmra.mxu3 %vm818_vm0, %v1243_v61 }
 0x156   :  { %v1189_v24 = vpop.f32.mrf.mxu2  ;;  %1360 = vmatpush.bf16.msra.mxu3 %v2910_v0  ;;  %v1083_v27 = vpop.f32.mrf.mxu0  ;;  %v3466_v0 = vld [vmem:[%s4839_s3 + $0x134] sm:$0xf0] }
 0x157   :  { %v1190_v25 = vadd.f32 %v1189_v24, %v1136_v23  ;;  %v1137_v28 = vpop.f32.mrf.mxu1  ;;  %v1084_v35 = vadd.f32 %v1083_v27, %v1030_v54  ;;  %v2919_v24 = vld [vmem:[%s4839_s3 + $0x40] sm:$0xf]  ;;  %v3082_v54 = vor.u32 %v3466_v0, %v3081_v62 }
 0x158   :  { %v3073_v27 = vld [vmem:[%s4839_s3 + $0x120] sm:$0xf] }
 0x159   :  { %v1228_v61 = vmax.f32 %v1190_v25, 0.0  ;;  %v1138_v44 = vadd.f32 %v1137_v28, %v1084_v35  ;;  %v3086_v25 = vor.u32 %v3465_v40, %v3083_v5  ;;  %v4372_v28 = vpop.f32.mrf.mxu3  ;;  %v1035_v35 = vadd.f32 %v4295_v46, %v4034_v58  ;;  %v3105_v58 = vld [vmem:[%s4839_s3 + $0x158] sm:$0xf0] }
 0x15a   :  { %1361 = vmatpush.bf16.msra.mxu3 %v2902_v39  ;;  %v3436_v39 = vld [vmem:[%s4839_s3 + $0x44] sm:$0xf0]  ;;  %v3074_v16 = vor.u32 %v3464_v29, %v3073_v27  ;;  %v1038_v5 = vadd.f32 %v4328_v53, %v4038_v2  ;;  %v3473_v2 = vld [vmem:[%s4839_s3 + $0x174] sm:$0xf]  ;;  %v3127_v53 = vld [vmem:[%s4839_s3 + $0x178] sm:$0xf0]  ;;  %v1023_v29 = vadd.f32 %v4156_v30, %v3957_v60 }
 0x15b   :  { %v4331_v34 = vpack.c.bf16 %v1228_v61, %v1228_v61  ;;  %v3472_v60 = vld [vmem:[%s4839_s3 + $0x164] sm:$0xf0]  ;;  %v3471_v30 = vld [vmem:[%s4839_s3 + $0x164] sm:$0xf] }
 0x15d   :  { %2978 = vmatmul.msk.bf16.vlgmr.msra.gmra.mxu0 %vm818_vm0, %v4331_v34 }
 0x15e   :  { %v1191_v45 = vpop.f32.mrf.mxu2  ;;  %1750 = vmatpush.bf16.msra.mxu0 %v3064_v32  ;;  %v1086_v20 = vpop.f32.mrf.mxu0  ;;  %v2920_v32 = vor.u32 %v3436_v39, %v2919_v24  ;;  %v2929_v24 = vld [vmem:[%s4839_s3 + $0x58] sm:$0xf0]  ;;  %v3125_v39 = vld [vmem:[%s4839_s3 + $0x170] sm:$0xf] }
 0x15f   :  { %v1192_v17 = vadd.f32 %v1191_v45, %v1138_v44  ;;  %v1140_v47 = vpop.f32.mrf.mxu1  ;;  %v1087_v3 = vadd.f32 %v1086_v20, %v1033_v21  ;;  %v3078_v45 = vor.u32 %v3463_v15, %v3075_v33 }
 0x161   :  { %v1229_v1 = vmax.f32 %v1192_v17, 0.0  ;;  %v1141_v61 = vadd.f32 %v1140_v47, %v1087_v3  ;;  %v3467_v47 = vld [vmem:[%s4839_s3 + $0x144] sm:$0xf]  ;;  %v4405_v62 = vpop.f32.mrf.mxu3 }
 0x162   :  { %1751 = vmatpush.bf16.msra.mxu0 %v3056_v22  ;;  %v3469_v22 = vld [vmem:[%s4839_s3 + $0x154] sm:$0xf]  ;;  %v3100_v40 = vor.u32 %v3467_v47, %v3097_v48 }
 0x163   :  { %v1247_v23 = vpack.c.bf16 %v1229_v1, %v1229_v1  ;;  %v3108_v17 = vor.u32 %v3469_v22, %v3105_v58 }
 0x165   :  { %2911 = vmatmul.msk.bf16.vlgmr.msrb.gmra.mxu3 %vm818_vm0, %v4361_v9  ;;  %2999 = vmatmul.msk.bf16.vlgmr.msra.gmra.mxu1 %vm818_vm0, %v1247_v23 }
 0x166   :  { %3000 = vmatmul.msk.bf16.vlgmr.msra.gmra.mxu2 %vm818_vm0, %v1247_v23  ;;  %v1194_v8 = vpop.f32.mrf.mxu2  ;;  %1401 = vmatpush.bf16.msrb.mxu3 %v2928_v4  ;;  %v1088_v42 = vpop.f32.mrf.mxu0  ;;  %v3437_v23 = vld [vmem:[%s4839_s3 + $0x54] sm:$0xf] }
 0x167   :  { %v1195_v37 = vadd.f32 %v1194_v8, %v1141_v61  ;;  %v1142_v44 = vpop.f32.mrf.mxu1  ;;  %1793 = vmatpush.bf16.msra.mxu1 %v3082_v54  ;;  %1806 = vmatpush.bf16.msra.mxu2 %v3086_v25  ;;  %v1089_v21 = vadd.f32 %v1088_v42, %v1035_v35  ;;  %v3474_v54 = vld [vmem:[%s4839_s3 + $0x174] sm:$0xf0]  ;;  %v2932_v15 = vor.u32 %v3437_v23, %v2929_v24  ;;  %v3435_v61 = vld [vmem:[%s4839_s3 + $0x44] sm:$0xf]  ;;  %v2921_v35 = vld [vmem:[%s4839_s3 + $0x48] sm:$0xf0] }
 0x168   :  { %v3126_v8 = vor.u32 %v3474_v54, %v3125_v39  ;;  %v1077_v42 = vadd.f32 %v4231_v38, %v1023_v29  ;;  %v1040_v38 = vadd.f32 %v4372_v28, %v4059_v18  ;;  %v2924_v22 = vor.u32 %v3435_v61, %v2921_v35  ;;  %v3149_v18 = vld [vmem:[%s4839_s3 + $0x198] sm:$0xf0]  ;;  %v3169_v29 = vld [vmem:[%s4839_s3 + $0x1b0] sm:$0xf] }
 0x169   :  { %v1230_v46 = vmax.f32 %v1195_v37, 0.0  ;;  %v1143_v59 = vadd.f32 %v1142_v44, %v1089_v21  ;;  %v3117_v37 = vld [vmem:[%s4839_s3 + $0x160] sm:$0xf]  ;;  %v3119_v44 = vld [vmem:[%s4839_s3 + $0x168] sm:$0xf0]  ;;  %v1044_v28 = vpop.f32.mrf.mxu3  ;;  %v1043_v39 = vadd.f32 %v4405_v62, %v4063_v26 }
 0x16a   :  { %1402 = vmatpush.bf16.msrb.mxu3 %v2920_v32  ;;  %v3130_v32 = vor.u32 %v3473_v2, %v3127_v53  ;;  %v3122_v47 = vor.u32 %v3471_v30, %v3119_v44  ;;  %v1131_v48 = vadd.f32 %v4233_v41, %v1077_v42  ;;  %v3481_v26 = vld [vmem:[%s4839_s3 + $0x1b4] sm:$0xf]  ;;  %v3171_v62 = vld [vmem:[%s4839_s3 + $0x1b8] sm:$0xf0]  ;;  %v2941_v42 = vld [vmem:[%s4839_s3 + $0x60] sm:$0xf] }
 0x16b   :  { %v4395_v20 = vpack.c.bf16 %v1230_v46, %v1230_v46  ;;  %1794 = vmatpush.bf16.msra.mxu1 %v3074_v16  ;;  %1807 = vmatpush.bf16.msra.mxu2 %v3078_v45  ;;  %v3174_v44 = vor.u32 %v3481_v26, %v3171_v62  ;;  %v3213_v26 = vld [vmem:[%s4839_s3 + $0x1f0] sm:$0xf] }
 0x16d   :  { %3022 = vmatmul.msk.bf16.vlgmr.msrb.gmra.mxu0 %vm818_vm0, %v4395_v20 }
 0x16e   :  { %v1196_v0 = vpop.f32.mrf.mxu2  ;;  %1862 = vmatpush.bf16.msrb.mxu0 %v3108_v17  ;;  %v1091_v3 = vpop.f32.mrf.mxu0  ;;  %v3118_v17 = vor.u32 %v3472_v60, %v3117_v37  ;;  %v3440_v60 = vld [vmem:[%s4839_s3 + $0x64] sm:$0xf0] }
 0x16f   :  { %v1197_v1 = vadd.f32 %v1196_v0, %v1143_v59  ;;  %v1145_v4 = vpop.f32.mrf.mxu1  ;;  %v1092_v27 = vadd.f32 %v1091_v3, %v1038_v5  ;;  %v3475_v3 = vld [vmem:[%s4839_s3 + $0x184] sm:$0xf] }
 0x171   :  { %v1231_v25 = vmax.f32 %v1197_v1, 0.0  ;;  %v1146_v16 = vadd.f32 %v1145_v4, %v1092_v27  ;;  %v3141_v4 = vld [vmem:[%s4839_s3 + $0x188] sm:$0xf0]  ;;  %v3442_v27 = vld [vmem:[%s4839_s3 + $0x74] sm:$0xf0]  ;;  %v1047_v35 = vpop.f32.mrf.mxu3 }
 0x172   :  { %1863 = vmatpush.bf16.msrb.mxu0 %v3100_v40  ;;  %v1185_v40 = vadd.f32 %v4262_v6, %v1131_v48  ;;  %v3144_v24 = vor.u32 %v3475_v3, %v3141_v4  ;;  %v3483_v4 = vld [vmem:[%s4839_s3 + $0x1c4] sm:$0xf] }
 0x173   :  { %v1249_v33 = vpack.c.bf16 %v1231_v25, %v1231_v25  ;;  %v2949_v25 = vld [vmem:[%s4839_s3 + $0x70] sm:$0xf] }
 0x174   :  { %v1226_v41 = vmax.f32 %v1185_v40, 0.0 }
 0x175   :  { %2912 = vmatmul.msk.bf16.vlgmr.msra.gmra.mxu3 %vm818_vm0, %v4361_v9  ;;  %3043 = vmatmul.msk.bf16.vlgmr.msrb.gmra.mxu1 %vm818_vm0, %v1249_v33  ;;  %v3477_v9 = vld [vmem:[%s4839_s3 + $0x194] sm:$0xf] }
 0x176   :  { %3044 = vmatmul.msk.bf16.vlgmr.msrb.gmra.mxu2 %vm818_vm0, %v1249_v33  ;;  %v1199_v45 = vpop.f32.mrf.mxu2  ;;  %1414 = vmatpush.bf16.msra.mxu3 %v2932_v15  ;;  %v1093_v46 = vpop.f32.mrf.mxu0  ;;  %v3152_v5 = vor.u32 %v3477_v9, %v3149_v18  ;;  %v3482_v15 = vld [vmem:[%s4839_s3 + $0x1b4] sm:$0xf0] }
 0x177   :  { %v1200_v58 = vadd.f32 %v1199_v45, %v1146_v16  ;;  %v1147_v21 = vpop.f32.mrf.mxu1  ;;  %1905 = vmatpush.bf16.msrb.mxu1 %v3126_v8  ;;  %1918 = vmatpush.bf16.msrb.mxu2 %v3130_v32  ;;  %v1094_v0 = vadd.f32 %v1093_v46, %v1040_v38  ;;  %v2950_v8 = vor.u32 %v3442_v27, %v2949_v25  ;;  %v3161_v16 = vld [vmem:[%s4839_s3 + $0x1a0] sm:$0xf]  ;;  %v3480_v38 = vld [vmem:[%s4839_s3 + $0x1a4] sm:$0xf0]  ;;  %v3479_v45 = vld [vmem:[%s4839_s3 + $0x1a4] sm:$0xf] }
 0x178   :  { %v4492_v32 = vpack.c.bf16 %v1226_v41, %v1226_v41  ;;  %v3170_v30 = vor.u32 %v3482_v15, %v3169_v29  ;;  %v1045_v46 = vadd.f32 %v1044_v28, %v4084_v43  ;;  %v3162_v48 = vor.u32 %v3480_v38, %v3161_v16  ;;  %v3193_v43 = vld [vmem:[%s4839_s3 + $0x1d8] sm:$0xf0]  ;;  %v4534_v41 = vld [vmem:[%s4837_s2] ss:$0 sm:$0xff]  ;;  %v3441_v15 = vld [vmem:[%s4839_s3 + $0x74] sm:$0xf] }
 0x179   :  { %v1232_v59 = vmax.f32 %v1200_v58, 0.0  ;;  %v1148_v23 = vadd.f32 %v1147_v21, %v1094_v0  ;;  %v3485_v0 = vld [vmem:[%s4839_s3 + $0x1d4] sm:$0xf] }
 0x17a   :  { %1415 = vmatpush.bf16.msra.mxu3 %v2924_v22  ;;  %v3163_v22 = vld [vmem:[%s4839_s3 + $0x1a8] sm:$0xf0] }
 0x17b   :  { %v4462_v1 = vpack.c.bf16 %v1232_v59, %v1232_v59  ;;  %1906 = vmatpush.bf16.msrb.mxu1 %v3118_v17  ;;  %1919 = vmatpush.bf16.msrb.mxu2 %v3122_v47  ;;  %v2942_v17 = vor.u32 %v3440_v60, %v2941_v42  ;;  %v3166_v59 = vor.u32 %v3479_v45, %v3163_v22  ;;  %v3205_v45 = vld [vmem:[%s4839_s3 + $0x1e0] sm:$0xf]  ;;  %v3207_v22 = vld [vmem:[%s4839_s3 + $0x1e8] sm:$0xf0] }
 0x17d   :  { %3066 = vmatmul.msk.bf16.vlgmr.msra.gmra.mxu0 %vm818_vm0, %v4462_v1 }
 0x17e   :  { %v1201_v6 = vpop.f32.mrf.mxu2  ;;  %1974 = vmatpush.bf16.msra.mxu0 %v3152_v5  ;;  %v1096_v2 = vpop.f32.mrf.mxu0  ;;  %v3196_v5 = vor.u32 %v3485_v0, %v3193_v43  ;;  %v3237_v0 = vld [vmem:[%s4839_s3 + $0x218] sm:$0xf0] }
 0x17f   :  { %v1202_v54 = vadd.f32 %v1201_v6, %v1148_v23  ;;  %v1150_v53 = vpop.f32.mrf.mxu1  ;;  %v1097_v61 = vadd.f32 %v1096_v2, %v1043_v39  ;;  %v3185_v23 = vld [vmem:[%s4839_s3 + $0x1c8] sm:$0xf0]  ;;  %v888_v6 = vadd.f32 %v4534_v41, %v4090_v51  ;;  %v2951_v51 = vld [vmem:[%s4839_s3 + $0x78] sm:$0xf0] }
 0x180   :  { %v3188_v2 = vor.u32 %v3483_v4, %v3185_v23 }
 0x181   :  { %v1233_v33 = vmax.f32 %v1202_v54, 0.0  ;;  %v1151_v58 = vadd.f32 %v1150_v53, %v1097_v61  ;;  %v1048_v53 = vadd.f32 %v1047_v35, %v4088_v50  ;;  %v942_v62 = vadd.f32 %v4092_v52, %v888_v6  ;;  %v3490_v50 = vld [vmem:[%s4839_s3 + $0x1f4] sm:$0xf0]  ;;  %v3215_v61 = vld [vmem:[%s4839_s3 + $0x1f8] sm:$0xf0] }
 0x182   :  { %1975 = vmatpush.bf16.msra.mxu0 %v3144_v24  ;;  %v1049_v24 = vpop.f32.mrf.mxu3  ;;  %v2954_v52 = vor.u32 %v3441_v15, %v2951_v51  ;;  %v3214_v16 = vor.u32 %v3490_v50, %v3213_v26  ;;  %v3491_v6 = vld [vmem:[%s4839_s3 + $0x204] sm:$0xf]  ;;  %v2971_v15 = vld [vmem:[%s4839_s3 + $0x90] sm:$0xf]  ;;  %v3497_v50 = vld [vmem:[%s4839_s3 + $0x234] sm:$0xf] }
 0x183   :  { %v1251_v37 = vpack.c.bf16 %v1233_v33, %v1233_v33  ;;  %v3489_v33 = vld [vmem:[%s4839_s3 + $0x1f4] sm:$0xf]  ;;  %v996_v42 = vadd.f32 %v4114_v63, %v942_v62  ;;  %v3488_v63 = vld [vmem:[%s4839_s3 + $0x1e4] sm:$0xf0]  ;;  %v3257_v51 = vld [vmem:[%s4839_s3 + $0x230] sm:$0xf] }
 0x184   :  { %v3218_v38 = vor.u32 %v3489_v33, %v3215_v61  ;;  %v3259_v33 = vld [vmem:[%s4839_s3 + $0x238] sm:$0xf0] }
 0x185   :  { %2933 = vmatmul.msk.bf16.vlgmr.msrb.gmra.mxu3 %vm818_vm0, %v4492_v32  ;;  %3087 = vmatmul.msk.bf16.vlgmr.msra.gmra.mxu1 %vm818_vm0, %v1251_v37 }
 0x186   :  { %3088 = vmatmul.msk.bf16.vlgmr.msra.gmra.mxu2 %vm818_vm0, %v1251_v37  ;;  %v1204_v21 = vpop.f32.mrf.mxu2  ;;  %1457 = vmatpush.bf16.msrb.mxu3 %v2950_v8  ;;  %v1098_v9 = vpop.f32.mrf.mxu0  ;;  %v1025_v37 = vadd.f32 %v4180_v57, %v3978_v10  ;;  %v3487_v57 = vld [vmem:[%s4839_s3 + $0x1e4] sm:$0xf] }
 0x187   :  { %v1205_v47 = vadd.f32 %v1204_v21, %v1151_v58  ;;  %v1152_v18 = vpop.f32.mrf.mxu1  ;;  %2017 = vmatpush.bf16.msra.mxu1 %v3170_v30  ;;  %2030 = vmatpush.bf16.msra.mxu2 %v3174_v44  ;;  %v1099_v40 = vadd.f32 %v1098_v9, %v1045_v46  ;;  %v3439_v30 = vld [vmem:[%s4839_s3 + $0x64] sm:$0xf]  ;;  %v2943_v44 = vld [vmem:[%s4839_s3 + $0x68] sm:$0xf0]  ;;  %v1050_v46 = vadd.f32 %v1049_v24, %v996_v42 }
 0x188   :  { %v1079_v10 = vadd.f32 %v4264_v14, %v1025_v37  ;;  %v3229_v24 = vld [vmem:[%s4839_s3 + $0x208] sm:$0xf0] }
 0x189   :  { %v1234_v28 = vmax.f32 %v1205_v47, 0.0  ;;  %v1153_v39 = vadd.f32 %v1152_v18, %v1099_v40 }
 0x18a   :  { %1458 = vmatpush.bf16.msrb.mxu3 %v2942_v17  ;;  %v1052_v14 = vpop.f32.mrf.mxu3  ;;  %v2946_v17 = vor.u32 %v3439_v30, %v2943_v44  ;;  %v1133_v43 = vadd.f32 %v4266_v19, %v1079_v10  ;;  %v893_v19 = vadd.f32 %v4534_v41, %v4122_v12  ;;  %v3446_v12 = vld [vmem:[%s4839_s3 + $0x94] sm:$0xf0]  ;;  %v3262_v44 = vor.u32 %v3497_v50, %v3259_v33  ;;  %v3059_v33 = vld [vmem:[%s4839_s3 + $0x110] sm:$0xf] }
 0x18b   :  { %v4523_v3 = vpack.c.bf16 %v1234_v28, %v1234_v28  ;;  %2018 = vmatpush.bf16.msra.mxu1 %v3162_v48  ;;  %2031 = vmatpush.bf16.msra.mxu2 %v3166_v59  ;;  %v3206_v48 = vor.u32 %v3488_v63, %v3205_v45  ;;  %v3210_v59 = vor.u32 %v3487_v57, %v3207_v22  ;;  %v3251_v45 = vld [vmem:[%s4839_s3 + $0x228] sm:$0xf0] }
 0x18c   :  { %v947_v26 = vadd.f32 %v4124_v13, %v893_v19  ;;  %v2972_v37 = vor.u32 %v3446_v12, %v2971_v15 }
 0x18d   :  { %3110 = vmatmul.msk.bf16.vlgmr.msrb.gmra.mxu0 %vm818_vm0, %v4523_v3 }
 0x18e   :  { %v1206_v54 = vpop.f32.mrf.mxu2  ;;  %2086 = vmatpush.bf16.msrb.mxu0 %v3196_v5  ;;  %v1101_v27 = vpop.f32.mrf.mxu0  ;;  %v1187_v5 = vadd.f32 %v4286_v36, %v1133_v43 }
 0x18f   :  { %v1207_v25 = vadd.f32 %v1206_v54, %v1153_v39  ;;  %v1155_v29 = vpop.f32.mrf.mxu1  ;;  %v1102_v8 = vadd.f32 %v1101_v27, %v1048_v53  ;;  %v1053_v53 = vadd.f32 %v1052_v14, %v4120_v11  ;;  %v3498_v11 = vld [vmem:[%s4839_s3 + $0x234] sm:$0xf0] }
 0x190   :  { %v1227_v36 = vmax.f32 %v1187_v5, 0.0  ;;  %v3258_v30 = vor.u32 %v3498_v11, %v3257_v51  ;;  %v3015_v5 = vld [vmem:[%s4839_s3 + $0xd0] sm:$0xf] }
 0x191   :  { %v1235_v35 = vmax.f32 %v1207_v25, 0.0  ;;  %v1156_v58 = vadd.f32 %v1155_v29, %v1102_v8  ;;  %v1001_v8 = vadd.f32 %v4158_v31, %v947_v26  ;;  %v3496_v31 = vld [vmem:[%s4839_s3 + $0x224] sm:$0xf0] }
 0x192   :  { %2087 = vmatpush.bf16.msrb.mxu0 %v3188_v2  ;;  %v3232_v2 = vor.u32 %v3491_v6, %v3229_v24  ;;  %v1054_v62 = vpop.f32.mrf.mxu3  ;;  %v1245_v13 = vpack.c.bf16 %v1227_v36, %v1227_v36 }
 0x193   :  { %v1253_v60 = vpack.c.bf16 %v1235_v35, %v1235_v35  ;;  %v1055_v63 = vadd.f32 %v1054_v62, %v1001_v8 }
 0x195   :  { %2934 = vmatmul.msk.bf16.vlgmr.msra.gmra.mxu3 %vm818_vm0, %v4492_v32  ;;  %3131 = vmatmul.msk.bf16.vlgmr.msrb.gmra.mxu1 %vm818_vm0, %v1253_v60  ;;  %v3493_v32 = vld [vmem:[%s4839_s3 + $0x214] sm:$0xf] }
 0x196   :  { %3132 = vmatmul.msk.bf16.vlgmr.msrb.gmra.mxu2 %vm818_vm0, %v1253_v60  ;;  %v1209_v21 = vpop.f32.mrf.mxu2  ;;  %1470 = vmatpush.bf16.msra.mxu3 %v2954_v52  ;;  %v1103_v9 = vpop.f32.mrf.mxu0  ;;  %v3240_v4 = vor.u32 %v3493_v32, %v3237_v0  ;;  %v2963_v52 = vld [vmem:[%s4839_s3 + $0x80] sm:$0xf]  ;;  %v3444_v60 = vld [vmem:[%s4839_s3 + $0x84] sm:$0xf0] }
 0x197   :  { %v1210_v47 = vadd.f32 %v1209_v21, %v1156_v58  ;;  %v1157_v18 = vpop.f32.mrf.mxu1  ;;  %2129 = vmatpush.bf16.msrb.mxu1 %v3214_v16  ;;  %2142 = vmatpush.bf16.msrb.mxu2 %v3218_v38  ;;  %v1104_v40 = vadd.f32 %v1103_v9, %v1050_v46  ;;  %v3249_v16 = vld [vmem:[%s4839_s3 + $0x220] sm:$0xf]  ;;  %v3495_v38 = vld [vmem:[%s4839_s3 + $0x224] sm:$0xf]  ;;  %v2964_v22 = vor.u32 %v3444_v60, %v2963_v52 }
 0x198   :  { %v3250_v21 = vor.u32 %v3496_v31, %v3249_v16 }
 0x199   :  { %v1236_v28 = vmax.f32 %v1210_v47, 0.0  ;;  %v1158_v39 = vadd.f32 %v1157_v18, %v1104_v40 }
 0x19a   :  { %1471 = vmatpush.bf16.msra.mxu3 %v2946_v17  ;;  %v3254_v17 = vor.u32 %v3495_v38, %v3251_v45  ;;  %v1057_v18 = vpop.f32.mrf.mxu3  ;;  %v3468_v38 = vld [vmem:[%s4839_s3 + $0x144] sm:$0xf0] }
 0x19b   :  { %v4594_v23 = vpack.c.bf16 %v1236_v28, %v1236_v28  ;;  %2130 = vmatpush.bf16.msrb.mxu1 %v3206_v48  ;;  %2143 = vmatpush.bf16.msrb.mxu2 %v3210_v59  ;;  %v898_v59 = vadd.f32 %v4534_v41, %v4176_v55  ;;  %v1058_v43 = vadd.f32 %v1057_v18, %v4174_v49  ;;  %v3007_v49 = vld [vmem:[%s4839_s3 + $0xc0] sm:$0xf] }
 0x19d   :  { %3154 = vmatmul.msk.bf16.vlgmr.msra.gmra.mxu0 %vm818_vm0, %v4594_v23  ;;  %v952_v55 = vadd.f32 %v4178_v56, %v898_v59 }
 0x19e   :  { %v1211_v54 = vpop.f32.mrf.mxu2  ;;  %2198 = vmatpush.bf16.msra.mxu0 %v3240_v4  ;;  %v1106_v27 = vpop.f32.mrf.mxu0  ;;  %v3454_v4 = vld [vmem:[%s4839_s3 + $0xd4] sm:$0xf0] }
 0x19f   :  { %v1212_v25 = vadd.f32 %v1211_v54, %v1158_v39  ;;  %v1160_v29 = vpop.f32.mrf.mxu1  ;;  %v1107_v35 = vadd.f32 %v1106_v27, %v1053_v53  ;;  %v3016_v19 = vor.u32 %v3454_v4, %v3015_v5  ;;  %v1006_v39 = vadd.f32 %v4206_v7, %v952_v55  ;;  %v3452_v54 = vld [vmem:[%s4839_s3 + $0xc4] sm:$0xf0]  ;;  %v3183_v55 = vld [vmem:[%s4839_s3 + $0x1c0] sm:$0xf] }
 0x1a0   :  { %v3008_v7 = vor.u32 %v3452_v54, %v3007_v49  ;;  %v3235_v54 = vld [vmem:[%s4839_s3 + $0x210] sm:$0xf] }
 0x1a1   :  { %v1237_v61 = vmax.f32 %v1212_v25, 0.0  ;;  %v1161_v10 = vadd.f32 %v1160_v29, %v1107_v35 }
 0x1a2   :  { %2199 = vmatpush.bf16.msra.mxu0 %v3232_v2  ;;  %v1059_v2 = vpop.f32.mrf.mxu3 }
 0x1a3   :  { %v1255_v42 = vpack.c.bf16 %v1237_v61, %v1237_v61  ;;  %v1060_v25 = vadd.f32 %v1059_v2, %v1006_v39  ;;  %v3462_v61 = vld [vmem:[%s4839_s3 + $0x114] sm:$0xf0] }
 0x1a4   :  { %v3060_v8 = vor.u32 %v3462_v61, %v3059_v33  ;;  %v3494_v2 = vld [vmem:[%s4839_s3 + $0x214] sm:$0xf0] }
 0x1a5   :  { %2955 = vmatmul.msk.bf16.vlgmr.msrb.gmra.mxu3 %vm818_vm0, %v1245_v13  ;;  %3175 = vmatmul.msk.bf16.vlgmr.msra.gmra.mxu1 %vm818_vm0, %v1255_v42 }
 0x1a6   :  { %3176 = vmatmul.msk.bf16.vlgmr.msra.gmra.mxu2 %vm818_vm0, %v1255_v42  ;;  %v1214_v57 = vpop.f32.mrf.mxu2  ;;  %1513 = vmatpush.bf16.msrb.mxu3 %v2972_v37  ;;  %v1108_v46 = vpop.f32.mrf.mxu0  ;;  %v3460_v42 = vld [vmem:[%s4839_s3 + $0x104] sm:$0xf0] }
 0x1a7   :  { %v1215_v58 = vadd.f32 %v1214_v57, %v1161_v10  ;;  %v1162_v14 = vpop.f32.mrf.mxu1  ;;  %2241 = vmatpush.bf16.msra.mxu1 %v3258_v30  ;;  %2254 = vmatpush.bf16.msra.mxu2 %v3262_v44  ;;  %v1109_v9 = vadd.f32 %v1108_v46, %v1055_v63  ;;  %v3103_v30 = vld [vmem:[%s4839_s3 + $0x150] sm:$0xf]  ;;  %v3470_v44 = vld [vmem:[%s4839_s3 + $0x154] sm:$0xf0] }
 0x1a8   :  { %v3104_v31 = vor.u32 %v3470_v44, %v3103_v30  ;;  %v3147_v57 = vld [vmem:[%s4839_s3 + $0x190] sm:$0xf] }
 0x1a9   :  { %v1238_v47 = vmax.f32 %v1215_v58, 0.0  ;;  %v1163_v32 = vadd.f32 %v1162_v14, %v1109_v9 }
 0x1aa   :  { %1514 = vmatpush.bf16.msrb.mxu3 %v2964_v22  ;;  %v3478_v22 = vld [vmem:[%s4839_s3 + $0x194] sm:$0xf0] }
 0x1ab   :  { %v4648_v48 = vpack.c.bf16 %v1238_v47, %v1238_v47  ;;  %2242 = vmatpush.bf16.msra.mxu1 %v3250_v21  ;;  %2255 = vmatpush.bf16.msra.mxu2 %v3254_v17  ;;  %v3139_v21 = vld [vmem:[%s4839_s3 + $0x180] sm:$0xf]  ;;  %v3476_v17 = vld [vmem:[%s4839_s3 + $0x184] sm:$0xf0] }
 0x1ac   :  { %v3140_v47 = vor.u32 %v3476_v17, %v3139_v21  ;;  %v3508_v21 = vld [vmem:[%s4840_s5 + $0x48] sm:$0xff] }
 0x1ad   :  { %3198 = vmatmul.msk.bf16.vlgmr.msrb.gmra.mxu0 %vm818_vm0, %v4648_v48 }
 0x1ae   :  { %v1216_v0 = vpop.f32.mrf.mxu2  ;;  %v1111_v40 = vpop.f32.mrf.mxu0 }
 0x1af   :  { %v1217_v28 = vadd.f32 %v1216_v0, %v1163_v32  ;;  %v1165_v6 = vpop.f32.mrf.mxu1  ;;  %v1112_v24 = vadd.f32 %v1111_v40, %v1058_v43  ;;  %v3191_v43 = vld [vmem:[%s4839_s3 + $0x1d0] sm:$0xf] }
 0x1b1   :  { %v1239_v41 = vmax.f32 %v1217_v28, 0.0  ;;  %v1166_v53 = vadd.f32 %v1165_v6, %v1112_v24  ;;  %v3486_v28 = vld [vmem:[%s4839_s3 + $0x1d4] sm:$0xf0] }
 0x1b2   :  { %v3192_v6 = vor.u32 %v3486_v28, %v3191_v43 }
 0x1b3   :  { %v1257_v36 = vpack.c.bf16 %v1239_v41, %v1239_v41  ;;  %v3484_v41 = vld [vmem:[%s4839_s3 + $0x1c4] sm:$0xf0] }
 0x1b4   :  { %v3184_v24 = vor.u32 %v3484_v41, %v3183_v55 }
 0x1b5   :  { %2956 = vmatmul.msk.bf16.vlgmr.msra.gmra.mxu3 %vm818_vm0, %v1245_v13  ;;  %3219 = vmatmul.msk.bf16.vlgmr.msrb.gmra.mxu1 %vm818_vm0, %v1257_v36  ;;  %v3051_v13 = vld [vmem:[%s4839_s3 + $0x100] sm:$0xf] }
 0x1b6   :  { %3220 = vmatmul.msk.bf16.vlgmr.msrb.gmra.mxu2 %vm818_vm0, %v1257_v36  ;;  %v1219_v56 = vpop.f32.mrf.mxu2  ;;  %1625 = vmatpush.bf16.msra.mxu3 %v3016_v19  ;;  %v1113_v29 = vpop.f32.mrf.mxu0  ;;  %v3052_v52 = vor.u32 %v3460_v42, %v3051_v13 }
 0x1b7   :  { %v1220_v27 = vadd.f32 %v1219_v56, %v1166_v53  ;;  %v1114_v12 = vadd.f32 %v1113_v29, %v1060_v25  ;;  %v1167_v51 = vpop.f32.mrf.mxu1  ;;  %v3236_v25 = vor.u32 %v3494_v2, %v3235_v54  ;;  %v3492_v29 = vld [vmem:[%s4839_s3 + $0x204] sm:$0xf0] }
 0x1b9   :  { %v1240_v15 = vmax.f32 %v1220_v27, 0.0  ;;  %v1168_v62 = vadd.f32 %v1167_v51, %v1114_v12  ;;  %v3227_v27 = vld [vmem:[%s4839_s3 + $0x200] sm:$0xf] }
 0x1ba   :  { %1626 = vmatpush.bf16.msra.mxu3 %v3008_v7 }
 0x1bb   :  { %v4672_v26 = vpack.c.bf16 %v1240_v15, %v1240_v15  ;;  %v3228_v15 = vor.u32 %v3492_v29, %v3227_v27 }
 0x1bd   :  { %3242 = vmatmul.msk.bf16.vlgmr.msra.gmra.mxu0 %vm818_vm0, %v4672_v26 }
 0x1be   :  { %v1221_v11 = vpop.f32.mrf.mxu2 }
 0x1bf   :  { %v1222_v50 = vadd.f32 %v1221_v11, %v1168_v62 }
 0x1c1   :  { %v1241_v35 = vmax.f32 %v1222_v50, 0.0 }
 0x1c3   :  { %v1259_v37 = vpack.c.bf16 %v1241_v35, %v1241_v35 }
 0x1c5   :  { %2977 = vmatmul.msk.bf16.vlgmr.msrb.gmra.mxu3 %vm818_vm0, %v4331_v34  ;;  %3263 = vmatmul.msk.bf16.vlgmr.msra.gmra.mxu1 %vm818_vm0, %v1259_v37  ;;  %v3095_v34 = vld [vmem:[%s4839_s3 + $0x140] sm:$0xf] }
 0x1c6   :  { %3264 = vmatmul.msk.bf16.vlgmr.msra.gmra.mxu2 %vm818_vm0, %v1259_v37  ;;  %1737 = vmatpush.bf16.msrb.mxu3 %v3060_v8  ;;  %v3096_v45 = vor.u32 %v3468_v38, %v3095_v34 }
 0x1c8   :  { %v1301_v60 = vpop.f32.mrf.mxu3 }
 0x1ca   :  { %1738 = vmatpush.bf16.msrb.mxu3 %v3052_v52 }
 0x1d0   :  { %v1303_v16 = vpop.f32.mrf.mxu3 }
 0x1d5   :  { %3021 = vmatmul.msk.bf16.vlgmr.msra.gmra.mxu3 %vm818_vm0, %v4395_v20  ;;  %v3148_v20 = vor.u32 %v3478_v22, %v3147_v57 }
 0x1d6   :  { %1849 = vmatpush.bf16.msra.mxu3 %v3104_v31 }
 0x1d8   :  { %v4706_v10 = vpop.f32.mrf.mxu3 }
 0x1da   :  { %v4708_v63 = vpop.f32.mrf.mxu0  ;;  %1850 = vmatpush.bf16.msra.mxu3 %v3096_v45 }
 0x1e0   :  { %v1316_v58 = vpop.f32.mrf.mxu3 }
 0x1e1   :  { %v3509_v58 = vld [vmem:[%s4840_s5 + $0x50] sm:$0xff] }
 0x1e2   :  { %v1531_v46 = vpop.f32.mrf.mxu0  ;;  %v4716_v14 = vpop.f32.mrf.mxu1 }
 0x1e5   :  { %3065 = vmatmul.msk.bf16.vlgmr.msrb.gmra.mxu3 %vm818_vm0, %v4462_v1 }
 0x1e6   :  { %1961 = vmatpush.bf16.msrb.mxu3 %v3148_v20 }
 0x1e8   :  { %v1350_v9 = vpop.f32.mrf.mxu3 }
 0x1e9   :  { %v1351_v18 = vadd.f32 %v1350_v9, %v1301_v60  ;;  %v4726_v59 = vpop.f32.mrf.mxu2 }
 0x1ea   :  { %v1574_v32 = vpop.f32.mrf.mxu1  ;;  %v4728_v0 = vpop.f32.mrf.mxu0  ;;  %1962 = vmatpush.bf16.msrb.mxu3 %v3140_v47 }
 0x1eb   :  { %v3507_v32 = vld [vmem:[%s4840_s5 + $0x40] sm:$0xff] }
 0x1f0   :  { %v1352_v40 = vpop.f32.mrf.mxu3 }
 0x1f1   :  { %v1587_v1 = vpop.f32.mrf.mxu2 }
 0x1f2   :  { %v1643_v5 = vpop.f32.mrf.mxu0  ;;  %v4736_v4 = vpop.f32.mrf.mxu1 }
 0x1f5   :  { %3109 = vmatmul.msk.bf16.vlgmr.msra.gmra.mxu3 %vm818_vm0, %v4523_v3 }
 0x1f6   :  { %2073 = vmatpush.bf16.msra.mxu3 %v3192_v6 }
 0x1f8   :  { %v1363_v19 = vpop.f32.mrf.mxu3 }
 0x1f9   :  { %v4746_v39 = vpop.f32.mrf.mxu2 }
 0x1fa   :  { %v1686_v36 = vpop.f32.mrf.mxu1  ;;  %v4748_v49 = vpop.f32.mrf.mxu0  ;;  %2074 = vmatpush.bf16.msra.mxu3 %v3184_v24 }
 0x200   :  { %v1365_v53 = vpop.f32.mrf.mxu3 }
 0x201   :  { %v1699_v56 = vpop.f32.mrf.mxu2 }
 0x202   :  { %v1755_v3 = vpop.f32.mrf.mxu0  ;;  %v4756_v7 = vpop.f32.mrf.mxu1 }
 0x205   :  { %3153 = vmatmul.msk.bf16.vlgmr.msrb.gmra.mxu3 %vm818_vm0, %v4594_v23 }
 0x206   :  { %2185 = vmatpush.bf16.msrb.mxu3 %v3236_v25 }
 0x208   :  { %v1404_v12 = vpop.f32.mrf.mxu3 }
 0x209   :  { %v1421_v51 = vadd.f32 %v1404_v12, %v1351_v18  ;;  %v1809_v62 = vpop.f32.mrf.mxu2 }
 0x20a   :  { %v1798_v11 = vpop.f32.mrf.mxu1  ;;  %v1865_v50 = vpop.f32.mrf.mxu0  ;;  %2186 = vmatpush.bf16.msrb.mxu3 %v3228_v15 }
 0x210   :  { %v1406_v33 = vpop.f32.mrf.mxu3 }
 0x211   :  { %v1811_v61 = vpop.f32.mrf.mxu2 }
 0x212   :  { %v1867_v35 = vpop.f32.mrf.mxu0  ;;  %v4766_v8 = vpop.f32.mrf.mxu1 }
 0x215   :  { %3197 = vmatmul.msk.bf16.vlgmr.msra.gmra.mxu3 %vm818_vm0, %v4648_v48  ;;  %v3510_v48 = vld [vmem:[%s4840_s5 + $0x58] sm:$0xff] }
 0x216   :  { %2396 = vmatpush.bf16.msrb.mxu0 %v3510_v48  ;;  %v3500_v48 = vld [vmem:[%s4840_s5 + $0x8] sm:$0xff] }
 0x218   :  { %v1417_v37 = vpop.f32.mrf.mxu3 }
 0x219   :  { %v1921_v13 = vpop.f32.mrf.mxu2 }
 0x21a   :  { %v1910_v42 = vpop.f32.mrf.mxu1  ;;  %v1977_v23 = vpop.f32.mrf.mxu0  ;;  %2397 = vmatpush.bf16.msrb.mxu0 %v3509_v58 }
 0x21b   :  { %v3505_v42 = vld [vmem:[%s4840_s5 + $0x30] sm:$0xff] }
 0x21e   :  { %2398 = vmatpush.bf16.msrb.mxu0 %v3508_v21 }
 0x220   :  { %v1419_v52 = vpop.f32.mrf.mxu3 }
 0x221   :  { %v1923_v60 = vpop.f32.mrf.mxu2  ;;  %v3504_v52 = vld [vmem:[%s4840_s5 + $0x28] sm:$0xff] }
 0x222   :  { %v1979_v30 = vpop.f32.mrf.mxu0  ;;  %v4770_v44 = vpop.f32.mrf.mxu1  ;;  %2399 = vmatpush.bf16.msrb.mxu0 %v3507_v32  ;;  %v3503_v60 = vld [vmem:[%s4840_s5 + $0x20] sm:$0xff] }
 0x225   :  { %3241 = vmatmul.msk.bf16.vlgmr.msrb.gmra.mxu3 %vm818_vm0, %v4672_v26  ;;  %v1364_v26 = vadd.f32 %v1363_v19, %v4706_v10 }
 0x227   :  { %v1422_v17 = vadd.f32 %v1417_v37, %v1364_v26 }
 0x228   :  { %v1460_v16 = vpop.f32.mrf.mxu3 }
 0x229   :  { %v1477_v31 = vadd.f32 %v1460_v16, %v1421_v51  ;;  %v2033_v34 = vpop.f32.mrf.mxu2  ;;  %v3502_v16 = vld [vmem:[%s4840_s5 + $0x18] sm:$0xff] }
 0x22a   :  { %v2022_v38 = vpop.f32.mrf.mxu1  ;;  %v2089_v45 = vpop.f32.mrf.mxu0 }
 0x230   :  { %v1462_v57 = vpop.f32.mrf.mxu3 }
 0x231   :  { %v2035_v22 = vpop.f32.mrf.mxu2 }
 0x232   :  { %v2091_v46 = vpop.f32.mrf.mxu0  ;;  %v4780_v20 = vpop.f32.mrf.mxu1  ;;  %v3499_v22 = vld [vmem:[%s4840_s5] sm:$0xff] }
 0x238   :  { %v1473_v47 = vpop.f32.mrf.mxu3 }
 0x239   :  { %v1478_v9 = vadd.f32 %v1473_v47, %v1422_v17  ;;  %v2145_v18 = vpop.f32.mrf.mxu2 }
 0x23a   :  { %v2134_v43 = vpop.f32.mrf.mxu1  ;;  %v2201_v28 = vpop.f32.mrf.mxu0 }
 0x23b   :  { %v1534_v40 = vadd.f32 %v4708_v63, %v1478_v9 }
 0x23d   :  { %v1590_v10 = vadd.f32 %v4726_v59, %v1534_v40 }
 0x23f   :  { %v1646_v1 = vadd.f32 %v4728_v0, %v1590_v10  ;;  %v2263_v0 = vld [vmem:[%s4841_s4] sm:$0x3] }
 0x240   :  { %v1475_v5 = vpop.f32.mrf.mxu3  ;;  %v2266_v51 = vperm.slane %v2263_v0, 1  ;;  %v2265_v40 = vperm.slane %v2263_v0, 0 }
 0x241   :  { %v1702_v6 = vadd.f32 %v4746_v39, %v1646_v1  ;;  %v2147_v55 = vpop.f32.mrf.mxu2 }
 0x242   :  { %v2203_v41 = vpop.f32.mrf.mxu0  ;;  %v4793_v24 = vpop.f32.mrf.mxu1 }
 0x243   :  { %v1758_v19 = vadd.f32 %v4748_v49, %v1702_v6 }
 0x245   :  { %v1814_v36 = vadd.f32 %v1809_v62, %v1758_v19 }
 0x247   :  { %v1870_v54 = vadd.f32 %v1865_v50, %v1814_v36 }
 0x248   :  { %v1516_v2 = vpop.f32.mrf.mxu3 }
 0x249   :  { %v1926_v53 = vadd.f32 %v1921_v13, %v1870_v54  ;;  %v1533_v56 = vadd.f32 %v1516_v2, %v1477_v31  ;;  %v2257_v63 = vpop.f32.mrf.mxu2  ;;  %v3506_v13 = vld [vmem:[%s4840_s5 + $0x38] sm:$0xff]  ;;  %v3501_v31 = vld [vmem:[%s4840_s5 + $0x10] sm:$0xff] }
 0x24a   :  { %v2246_v3 = vpop.f32.mrf.mxu1  ;;  %2379 = vmatpush.bf16.msra.mxu3 %v3506_v13 }
 0x24b   :  { %v1982_v25 = vadd.f32 %v1977_v23, %v1926_v53  ;;  %v1589_v38 = vadd.f32 %v4716_v14, %v1533_v56 }
 0x24d   :  { %v2038_v59 = vadd.f32 %v2033_v34, %v1982_v25 }
 0x24e   :  { %2380 = vmatpush.bf16.msra.mxu3 %v3505_v42 }
 0x24f   :  { %v2094_v27 = vadd.f32 %v2089_v45, %v2038_v59 }
 0x250   :  { %v1518_v39 = vpop.f32.mrf.mxu3 }
 0x251   :  { %v2150_v29 = vadd.f32 %v2145_v18, %v2094_v27  ;;  %v2259_v15 = vpop.f32.mrf.mxu2 }
 0x252   :  { %2381 = vmatpush.bf16.msra.mxu3 %v3504_v52 }
 0x253   :  { %v2206_v12 = vadd.f32 %v2201_v28, %v2150_v29 }
 0x255   :  { %v2262_v49 = vadd.f32 %v2257_v63, %v2206_v12 }
 0x256   :  { %2382 = vmatpush.bf16.msra.mxu3 %v3503_v60 }
 0x257   :  { %v2270_v62 = vadd.f32 %v2266_v51, %v2262_v49 }
 0x258   :  { %v1628_v11 = vpop.f32.mrf.mxu3 }
 0x259   :  { %v2272_v50 = vmax.f32 %v2270_v62, 0.0  ;;  %v1645_v45 = vadd.f32 %v1628_v11, %v1589_v38 }
 0x25a   :  { %2383 = vmatpush.bf16.msra.mxu3 %v3502_v16 }
 0x25b   :  { %v2274_v33 = vpack.c.bf16 %v2272_v50, %v2272_v50  ;;  %v1701_v57 = vadd.f32 %v4736_v4, %v1645_v45 }
 0x25d   :  { %3313 = vmatmul.msk.bf16.vlgmr.msrb.gmra.mxu0 %vm2375_vm1, %v2274_v33 }
 0x25e   :  { %2384 = vmatpush.bf16.msra.mxu3 %v3501_v31 }
 0x260   :  { %v1630_v61 = vpop.f32.mrf.mxu3 }
 0x262   :  { %2385 = vmatpush.bf16.msra.mxu3 %v3500_v48 }
 0x266   :  { %2386 = vmatpush.bf16.msra.mxu3 %v3499_v22 }
 0x268   :  { %v1740_v35 = vpop.f32.mrf.mxu3 }
 0x269   :  { %v1757_v46 = vadd.f32 %v1740_v35, %v1701_v57 }
 0x26b   :  { %v1813_v26 = vadd.f32 %v4756_v7, %v1757_v46 }
 0x270   :  { %v1742_v37 = vpop.f32.mrf.mxu3 }
 0x278   :  { %v1852_v23 = vpop.f32.mrf.mxu3 }
 0x279   :  { %v1869_v21 = vadd.f32 %v1852_v23, %v1813_v26 }
 0x27b   :  { %v1925_v17 = vadd.f32 %v4766_v8, %v1869_v21  ;;  %v3512_v8 = vld [vmem:[%s4842_s6] ss:$0 sm:$0xff] }
 0x280   :  { %v1854_v30 = vpop.f32.mrf.mxu3 }
 0x288   :  { %v1964_v34 = vpop.f32.mrf.mxu3 }
 0x289   :  { %v1981_v47 = vadd.f32 %v1964_v34, %v1925_v17 }
 0x28b   :  { %v2037_v18 = vadd.f32 %v4770_v44, %v1981_v47 }
 0x290   :  { %v1966_v58 = vpop.f32.mrf.mxu3 }
 0x298   :  { %v2076_v14 = vpop.f32.mrf.mxu3 }
 0x299   :  { %v2093_v32 = vadd.f32 %v2076_v14, %v2037_v18 }
 0x29b   :  { %v2149_v4 = vadd.f32 %v4780_v20, %v2093_v32 }
 0x2a0   :  { %v2078_v9 = vpop.f32.mrf.mxu3 }
 0x2a8   :  { %v2188_v43 = vpop.f32.mrf.mxu3 }
 0x2a9   :  { %v2205_v28 = vadd.f32 %v2188_v43, %v2149_v4 }
 0x2ab   :  { %v2261_v10 = vadd.f32 %v4793_v24, %v2205_v28 }
 0x2ad   :  { %v2269_v1 = vadd.f32 %v2265_v40, %v2261_v10 }
 0x2af   :  { %v2271_v5 = vmax.f32 %v2269_v1, 0.0 }
 0x2b0   :  { %v2190_v6 = vpop.f32.mrf.mxu3 }
 0x2b1   :  { %v2273_v7 = vpack.c.bf16 %v2271_v5, %v2271_v5 }
 0x2b3   :  { %2387 = vmatmul.bf16.vlgmr.msra.gmra.mxu3 %v2273_v7 }
 0x2da   :  { %v2401_v55 = vpop.f32.mrf.mxu0 }
 0x2e2   :  { %v2403_v41 = vpop.f32.mrf.mxu0 }
 0x336   :  { %v2388_v44 = vpop.f32.mrf.mxu3 }
 0x337   :  { %v2389_v19 = vadd.f32 %v3512_v8, %v2388_v44 }
 0x339   :  { %v2402_v36 = vadd.f32 %v2401_v55, %v2389_v19 }
 0x33b   :  { %v2405_v20 = vmax.f32 %v2402_v36, 0.0 }
 0x33d   :  { %2407 = vst.msk [vmem:[%s4843_s7] sm:$0xff] %vm2406_vm2, %v2405_v20 }
 0x33e   :  { %v2390_v24 = vpop.f32.mrf.mxu3 }

</bundles_post_ra>
